<compile_context>
chip_gen: v6e
topology: v6e:2x2x1
jax: 0.10.0
libtpu: 0.0.40
codegen_flags: <defaults>
</compile_context>

<pallas_src>
import functools
import math

import jax
import jax.numpy as jnp
from jax.experimental import pallas as pl
from jax.experimental.pallas import tpu as pltpu


# ---------------------------------------------------------------------------
# Hardware / tiling helpers
# ---------------------------------------------------------------------------

@functools.lru_cache(maxsize=None)
def _tpu_vmem_capacity():
    try:
        info = pltpu.get_tpu_info()
        cap = int(getattr(info, "vmem_capacity_bytes", 0))
        if cap > 0:
            return cap
    except Exception:
        pass
    return 64 << 20  # conservative default (v7x per-TensorCore size)


def _vmem_limit():
    # Generation-aware scoped-VMEM limit: ~0.8x physical capacity
    # (~100 MiB on v5e/v6e's 128 MiB, ~51 MiB on v7x's 64 MiB per core).
    return int(0.8 * _tpu_vmem_capacity())


def _divisors_desc(n):
    return [d for d in range(n, 0, -1) if n % d == 0]


def _tile_candidates(n, quantum):
    # Divisors of n that are either the full extent or a multiple of `quantum`
    # (second-minor blocks want multiples of 8, lane blocks want multiples of 128).
    cands = [d for d in _divisors_desc(n) if d == n or d % quantum == 0]
    return cands or [n]


def _batch_candidates(B):
    cap = _tpu_vmem_capacity()
    multi_core = cap <= (64 << 20)  # v7x-class: two TensorCores share the chip
    if multi_core and B >= 2:
        # Split the batch so both cores get work; pick divisors (handles odd B by falling
        # back to the largest divisor <= ceil(B/2) instead of degenerating to bt=1 blocks).
        bt_cap = max(1, (B + 1) // 2)
    else:
        # Single TensorCore (v5e/v6e): a batch split is just a serial loop that shrinks
        # every matmul's M -- keep the whole batch in one grid step unless VMEM forces it.
        bt_cap = B
    return [d for d in _divisors_desc(B) if d <= bt_cap] or [1]


def _mha_tiles(B, Sq, Skv, D, nheads, act_bytes):
    budget = int(0.55 * _tpu_vmem_capacity())

    def resident(bt, tq):
        blocks = (2 * (2 * bt * tq * D + bt * Skv * D) * act_bytes  # xq + out + xkv (x2 buffers)
                  + 2 * 4 * D * D * 2                               # 4 QKVO weights bf16 (x2)
                  + 12 * D * 4)                                     # biases + LN params
        interm = (bt * (tq + 2 * Skv) * D * 4                       # q, k, v (f32)
                  + 2 * bt * nheads * tq * Skv * 4                  # scores + probs (f32)
                  + 3 * bt * tq * D * 4)                            # head outputs + LN temps
        return blocks + interm

    bt_cands = _batch_candidates(B)
    tq_cands = _tile_candidates(Sq, 8)
    for bt in bt_cands:
        for tq in tq_cands:
            if resident(bt, tq) <= budget:
                return bt, tq
    return bt_cands[-1], tq_cands[-1]


def _ffn_tiles(B, S, D, H, act_bytes):
    budget = int(0.55 * _tpu_vmem_capacity())

    def resident(bt, tH):
        blocks = (2 * 2 * bt * S * D * act_bytes    # x + out (x2 buffers)
                  + 2 * 2 * D * tH * 2              # w1 + w2 slabs bf16 (x2 buffers)
                  + (tH + 3 * D) * 4)               # b1 slab + b2 + LN params
        interm = (bt * S * tH * 6                   # hidden (f32 + bf16)
                  + 2 * bt * S * D * 4)             # acc scratch + LN temps
        return blocks + interm

    bt_cands = _batch_candidates(B)
    tH_cands = _tile_candidates(H, 128)             # big VMEM -> tH == H (one hidden step)
    for bt in bt_cands:
        for tH in tH_cands:
            if resident(bt, tH) <= budget:
                return bt, tH
    return bt_cands[-1], tH_cands[-1]


def _maybe_single_buffered(shape, index_map, want):
    # Grid-invariant blocks do not need Pallas' default double buffering; reclaim the VMEM
    # only when the block is big enough to matter (production-size weights).  The plain spec
    # is the zero-risk path used at small sizes.
    if want:
        try:
            return pl.BlockSpec(shape, index_map, pipeline_mode=pl.Buffered(1))
        except TypeError:  # BlockSpec without pipeline_mode support
            pass
    return pl.BlockSpec(shape, index_map)


# ---------------------------------------------------------------------------
# Head split / merge (single relayout per tensor instead of per-head slicing)
# ---------------------------------------------------------------------------

def _split_heads(x, bt, s, nheads, hd):
    # (bt*s, nheads*hd) -> (bt*nheads, s, hd)
    x4 = x.reshape(bt, s, nheads, hd)
    x4 = jnp.transpose(x4, (0, 2, 1, 3))
    return x4.reshape(bt * nheads, s, hd)


def _merge_heads(o, bt, s, nheads, hd):
    # (bt*nheads, s, hd) -> (bt*s, nheads*hd)
    o4 = o.reshape(bt, nheads, s, hd)
    o4 = jnp.transpose(o4, (0, 2, 1, 3))
    return o4.reshape(bt * s, nheads * hd)


_BATCHED_OK = None


def _batched_heads_supported():
    """Probe once whether the head-batched relayout path lowers (and computes correctly) on
    this backend.  If not, the kernels silently fall back to the per-head-slice path so the
    layer always runs."""
    global _BATCHED_OK
    if _BATCHED_OK is not None:
        return _BATCHED_OK
    b, s, nh, hd = 2, 8, 2, 8
    d = nh * hd

    def probe_kernel(x_ref, o_ref):
        xh = _split_heads(x_ref[...].reshape(b * s, d), b, s, nh, hd).astype(jnp.bfloat16)
        sc = jnp.einsum('gqd,gkd->gqk', xh, xh, preferred_element_type=jnp.float32)
        y = jnp.einsum('gqk,gkd->gqd', sc.astype(jnp.bfloat16), xh,
                       preferred_element_type=jnp.float32)
        o_ref[...] = _merge_heads(y, b, s, nh, hd).reshape(b, s, d)

    try:
        x = jax.random.normal(jax.random.PRNGKey(1), (b, s, d), jnp.float32)
        out = pl.pallas_call(
            probe_kernel,
            out_shape=jax.ShapeDtypeStruct((b, s, d), jnp.float32),
            grid=(1,),
            in_specs=[pl.BlockSpec((b, s, d), lambda i: (0, 0, 0))],
            out_specs=pl.BlockSpec((b, s, d), lambda i: (0, 0, 0)),
        )(x)
        x4 = x.reshape(b, s, nh, hd).transpose(0, 2, 1, 3).astype(jnp.bfloat16).astype(jnp.float32)
        sc = jnp.einsum('bhqd,bhkd->bhqk', x4, x4)
        ref = jnp.einsum('bhqk,bhkd->bhqd',
                         sc.astype(jnp.bfloat16).astype(jnp.float32), x4)
        ref = ref.transpose(0, 2, 1, 3).reshape(b, s, d)
        _BATCHED_OK = bool(jnp.allclose(out, ref, rtol=1e-1, atol=5e-1))
    except Exception:
        _BATCHED_OK = False
    return _BATCHED_OK


# ---------------------------------------------------------------------------
# Kernels
# ---------------------------------------------------------------------------

def mha_ln_kernel(xq_ref, xkv_ref, wq_ref, wk_ref, wv_ref, wo_ref,
                  bq_ref, bk_ref, bv_ref, bo_ref, g_ref, beta_ref,
                  out_ref, *, nheads, head_dim, batched_heads, eps=1e-5):
    """Fused MHA + residual-add + LayerNorm for a (bt, tq, D) query tile.

    xq_ref : (bt, tq, D)   query-side activations (also the residual)
    xkv_ref: (bt, Skv, D)  key/value-side activations (full key length per step)
    w*_ref : (D, D) bf16   projection weights (pre-transposed: y = x @ W); 1/sqrt(head_dim)
                           is already folded into wq/bq.
    b*_ref : (1, D) f32    projection biases;  g/beta: LayerNorm affine params
    """
    bt, tq, d = xq_ref.shape
    skv = xkv_ref.shape[1]

    xq = xq_ref[...]
    xkv = xkv_ref[...]

    # QKV projections: bf16 into the MXU, f32 accumulation.  Each tensor is cast exactly once.
    xq2 = xq.reshape(bt * tq, d).astype(jnp.bfloat16)
    xkv2 = xkv.reshape(bt * skv, d).astype(jnp.bfloat16)
    q = jnp.dot(xq2, wq_ref[...], preferred_element_type=jnp.float32) + bq_ref[...]
    k = jnp.dot(xkv2, wk_ref[...], preferred_element_type=jnp.float32) + bk_ref[...]
    v = jnp.dot(xkv2, wv_ref[...], preferred_element_type=jnp.float32) + bv_ref[...]

    if batched_heads:
        # Head-batched attention: one relayout per tensor, then a single pair of batched
        # matmuls over all (batch, head) pairs -- no per-head lane slicing / concat.
        qh = _split_heads(q, bt, tq, nheads, head_dim).astype(jnp.bfloat16)
        kh = _split_heads(k, bt, skv, nheads, head_dim).astype(jnp.bfloat16)
        vh = _split_heads(v, bt, skv, nheads, head_dim).astype(jnp.bfloat16)
        s = jnp.einsum('gqd,gkd->gqk', qh, kh,
                       preferred_element_type=jnp.float32)            # (bt*nh, tq, Skv)
        m = jnp.max(s, axis=-1, keepdims=True)
        p = jnp.exp(s - m)
        l = jnp.sum(p, axis=-1, keepdims=True)
        oh = jnp.einsum('gqk,gkd->gqd', p.astype(jnp.bfloat16), vh,
                        preferred_element_type=jnp.float32)            # (bt*nh, tq, hd)
        oh = oh * pl.reciprocal(l, approx=False)
        o = _merge_heads(oh, bt, tq, nheads, head_dim)                 # (bt*tq, D)
    else:
        # Fallback: per-head slice loop (used for tiny heads or when the 4-D head relayout
        # is not supported by the backend).
        q3 = q.reshape(bt, tq, d).astype(jnp.bfloat16)
        k3 = k.reshape(bt, skv, d).astype(jnp.bfloat16)
        v3 = v.reshape(bt, skv, d).astype(jnp.bfloat16)
        o_heads = []
        for h in range(nheads):
            lo = h * head_dim
            hi = lo + head_dim
            s = jnp.einsum('bqd,bkd->bqk', q3[:, :, lo:hi], k3[:, :, lo:hi],
                           preferred_element_type=jnp.float32)
            m = jnp.max(s, axis=-1, keepdims=True)
            p = jnp.exp(s - m)
            l = jnp.sum(p, axis=-1, keepdims=True)
            oh = jnp.einsum('bqk,bkd->bqd', p.astype(jnp.bfloat16), v3[:, :, lo:hi],
                            preferred_element_type=jnp.float32)
            o_heads.append(oh * pl.reciprocal(l, approx=False))
        o = jnp.concatenate(o_heads, axis=-1).reshape(bt * tq, d)

    # Single output projection with contraction K = D.
    attn = (jnp.dot(o.astype(jnp.bfloat16), wo_ref[...],
                    preferred_element_type=jnp.float32) + bo_ref[...])

    # Fused residual add + LayerNorm epilogue (f32 math, eps matches nn.LayerNorm).
    y = xq.reshape(bt * tq, d).astype(jnp.float32) + attn
    mu = jnp.mean(y, axis=-1, keepdims=True)
    var = jnp.mean((y - mu) ** 2, axis=-1, keepdims=True)
    y = (y - mu) * jax.lax.rsqrt(var + eps)
    y = y * g_ref[...] + beta_ref[...]
    out_ref[...] = y.reshape(bt, tq, d).astype(out_ref.dtype)


def ffn_ln_kernel(x_ref, w1_ref, b1_ref, w2_ref, b2_ref, g_ref, beta_ref,
                  out_ref, acc_ref, *, eps=1e-5):
    """Fused FFN (hidden dim tiled over grid axis 1) + residual-add + LayerNorm."""
    bt, s, d = x_ref.shape
    last = pl.num_programs(1) - 1

    @pl.when(pl.program_id(1) == 0)
    def _():
        acc_ref[...] = jnp.zeros_like(acc_ref)

    # Activations arrive in bf16 between launches, so this cast is a no-op on the hot path.
    x2 = x_ref[...].reshape(bt * s, d).astype(jnp.bfloat16)
    hdn = jnp.dot(x2, w1_ref[...], preferred_element_type=jnp.float32) + b1_ref[...]
    hdn = jnp.maximum(hdn, 0.0).astype(jnp.bfloat16)
    acc_ref[...] += jnp.dot(hdn, w2_ref[...], preferred_element_type=jnp.float32)

    @pl.when(pl.program_id(1) == last)
    def _():
        y = x_ref[...].reshape(bt * s, d).astype(jnp.float32) + acc_ref[...] + b2_ref[...]
        mu = jnp.mean(y, axis=-1, keepdims=True)
        var = jnp.mean((y - mu) ** 2, axis=-1, keepdims=True)
        y = (y - mu) * jax.lax.rsqrt(var + eps)
        y = y * g_ref[...] + beta_ref[...]
        out_ref[...] = y.reshape(bt, s, d).astype(out_ref.dtype)


# ---------------------------------------------------------------------------
# Wrappers (pallas_call plumbing)
# ---------------------------------------------------------------------------

def mha_ln(xq, xkv, attn_p, ln_p, *, nheads, out_dtype=None):
    B, Sq, D = xq.shape
    Skv = xkv.shape[1]
    assert D % nheads == 0, "hidden_dim must be divisible by nheads"
    head_dim = D // nheads
    out_dtype = xq.dtype if out_dtype is None else out_dtype
    act_bytes = max(jnp.dtype(xq.dtype).itemsize, jnp.dtype(xkv.dtype).itemsize,
                    jnp.dtype(out_dtype).itemsize)

    bt, tq = _mha_tiles(B, Sq, Skv, D, nheads, act_bytes)
    nb, nq = B // bt, Sq // tq

    # Head-batched path when head_dim is a sublane multiple and the relayout lowers here.
    batched = (head_dim % 8 == 0) and _batched_heads_supported()

    # Grid-invariant weights only need a single VMEM buffer once they are big enough to matter.
    want_sb = (4 * D * D * 2) > (2 << 20)
    xq_spec = pl.BlockSpec((bt, tq, D), lambda b, q: (b, q, 0))
    xkv_spec = pl.BlockSpec((bt, Skv, D), lambda b, q: (b, 0, 0))
    w_spec = _maybe_single_buffered((D, D), lambda b, q: (0, 0), want_sb)
    vec_spec = pl.BlockSpec((1, D), lambda b, q: (0, 0))

    flops = (2 * B * D * D * (Sq + 2 * Skv)      # QKV projections
             + 4 * B * Sq * Skv * D              # scores + PV (summed over heads)
             + 2 * B * Sq * D * D)               # output projection
    transcendentals = B * nheads * Sq * Skv
    bytes_accessed = ((2 * B * Sq * D + B * Skv * D) * act_bytes
                      + 4 * D * D * 2 + 8 * D * 4)

    # TODO(synk): flash-style KV tiling (online softmax) for very long key/value sequences;
    # the key length is kept whole per step here and only the query axis is tiled.
    kernel = functools.partial(mha_ln_kernel, nheads=nheads, head_dim=head_dim,
                               batched_heads=batched)
    return pl.pallas_call(
        kernel,
        out_shape=jax.ShapeDtypeStruct((B, Sq, D), out_dtype),
        grid=(nb, nq),
        in_specs=[xq_spec, xkv_spec,
                  w_spec, w_spec, w_spec, w_spec,
                  vec_spec, vec_spec, vec_spec, vec_spec, vec_spec, vec_spec],
        out_specs=pl.BlockSpec((bt, tq, D), lambda b, q: (b, q, 0)),
        compiler_params=pltpu.CompilerParams(
            dimension_semantics=("parallel", "parallel"),
            vmem_limit_bytes=_vmem_limit()),
        cost_estimate=pl.CostEstimate(flops=int(flops),
                                      transcendentals=int(transcendentals),
                                      bytes_accessed=int(bytes_accessed)),
    )(xq, xkv,
      attn_p["wq"], attn_p["wk"], attn_p["wv"], attn_p["wo"],
      attn_p["bq"], attn_p["bk"], attn_p["bv"], attn_p["bo"],
      ln_p["gamma"], ln_p["beta"])


def ffn_ln(x, ffn_p, ln_p, *, out_dtype=None):
    B, S, D = x.shape
    H = ffn_p["w1"].shape[1]
    out_dtype = x.dtype if out_dtype is None else out_dtype
    act_bytes = max(jnp.dtype(x.dtype).itemsize, jnp.dtype(out_dtype).itemsize)

    bt, tH = _ffn_tiles(B, S, D, H, act_bytes)
    nb, nh = B // bt, H // tH

    flops = 4 * B * S * D * H
    bytes_accessed = int(2 * B * S * D * act_bytes + 2 * D * H * 2 + (H + 5 * D) * 4)

    return pl.pallas_call(
        ffn_ln_kernel,
        out_shape=jax.ShapeDtypeStruct((B, S, D), out_dtype),
        grid=(nb, nh),
        in_specs=[pl.BlockSpec((bt, S, D), lambda b, h: (b, 0, 0)),
                  pl.BlockSpec((D, tH), lambda b, h: (0, h)),
                  pl.BlockSpec((1, tH), lambda b, h: (0, h)),
                  pl.BlockSpec((tH, D), lambda b, h: (h, 0)),
                  pl.BlockSpec((1, D), lambda b, h: (0, 0)),
                  pl.BlockSpec((1, D), lambda b, h: (0, 0)),
                  pl.BlockSpec((1, D), lambda b, h: (0, 0))],
        out_specs=pl.BlockSpec((bt, S, D), lambda b, h: (b, 0, 0)),
        scratch_shapes=[pltpu.VMEM((bt * S, D), jnp.float32)],
        compiler_params=pltpu.CompilerParams(
            dimension_semantics=("parallel", "arbitrary"),
            vmem_limit_bytes=_vmem_limit()),
        cost_estimate=pl.CostEstimate(flops=int(flops), transcendentals=0,
                                      bytes_accessed=bytes_accessed),
    )(x, ffn_p["w1"], ffn_p["b1"], ffn_p["w2"], ffn_p["b2"],
      ln_p["gamma"], ln_p["beta"])


# ---------------------------------------------------------------------------
# Parameter init (deterministic, synthetic — not a checkpoint load)
# ---------------------------------------------------------------------------

def init_params(key, hidden_dim, nheads=8):
    """Linear weights stored pre-transposed as (in, out) in bf16; biases / LN params in f32.
    The 1/sqrt(head_dim) attention scale is folded into wq/bq once here (a checkpoint importer
    should transpose PyTorch's (out, in) weights and fold the same scale)."""
    D = hidden_dim
    scale = 1.0 / math.sqrt(D // nheads)
    ks = iter(jax.random.split(key, 64))

    def w(shape, std=0.02):
        return jax.random.normal(next(ks), shape, jnp.float32) * std

    def mha_params():
        return dict(
            wq=(w((D, D)) * scale).astype(jnp.bfloat16), bq=w((1, D), 0.01) * scale,
            wk=w((D, D)).astype(jnp.bfloat16),           bk=w((1, D), 0.01),
            wv=w((D, D)).astype(jnp.bfloat16),           bv=w((1, D), 0.01),
            wo=w((D, D)).astype(jnp.bfloat16),           bo=w((1, D), 0.01),
        )

    def ln_params():
        return dict(gamma=jnp.ones((1, D), jnp.float32),
                    beta=jnp.zeros((1, D), jnp.float32))

    def ffn_params():
        return dict(w1=w((D, 4 * D)).astype(jnp.bfloat16), b1=w((1, 4 * D), 0.01),
                    w2=w((4 * D, D)).astype(jnp.bfloat16), b2=w((1, D), 0.01))

    return dict(
        self_a=mha_params(), self_b=mha_params(),
        cross_a2b=mha_params(), cross_b2a=mha_params(),
        norm_a1=ln_params(), norm_a2=ln_params(), norm_a3=ln_params(),
        norm_b1=ln_params(), norm_b2=ln_params(), norm_b3=ln_params(),
        ffn_a=ffn_params(), ffn_b=ffn_params(),
    )


# ---------------------------------------------------------------------------
# Full forward pass (matches CoAttentionLayer.forward, masks=None, eval mode)
# ---------------------------------------------------------------------------

def co_attention_forward(feat_a, feat_b, p, *, nheads=8):
    # Ordering intentionally matches the reference forward: cross_b2a consumes the already
    # cross-attended feat_a, exactly like the PyTorch module.
    # TODO(synk): key_padding_mask (mask_a/mask_b) and dropout are not implemented
    # (eval / masks=None path of the reference module).
    inter = jnp.bfloat16          # inter-launch activations in bf16 (halves HBM traffic)
    out_dt = feat_a.dtype         # final outputs keep the caller's dtype

    feat_a = mha_ln(feat_a, feat_a, p["self_a"], p["norm_a1"], nheads=nheads, out_dtype=inter)
    feat_b = mha_ln(feat_b, feat_b, p["self_b"], p["norm_b1"], nheads=nheads, out_dtype=inter)
    feat_a = mha_ln(feat_a, feat_b, p["cross_a2b"], p["norm_a2"], nheads=nheads, out_dtype=inter)
    feat_b = mha_ln(feat_b, feat_a, p["cross_b2a"], p["norm_b2"], nheads=nheads, out_dtype=inter)
    feat_a = ffn_ln(feat_a, p["ffn_a"], p["norm_a3"], out_dtype=out_dt)
    feat_b = ffn_ln(feat_b, p["ffn_b"], p["norm_b3"], out_dtype=out_dt)
    return feat_a, feat_b


if __name__ == "__main__":
    # Small shapes consistent with the module; D=64 with 8 heads gives head_dim=8 so the
    # head-batched attention path is exercised (with automatic fallback if unsupported).
    B, Sa, Sb, D, NH = 2, 8, 16, 64, 8

    key = jax.random.PRNGKey(0)
    k_a, k_b, k_p = jax.random.split(key, 3)
    feat_a = jax.random.normal(k_a, (B, Sa, D), jnp.float32)
    feat_b = jax.random.normal(k_b, (B, Sb, D), jnp.float32)
    params = init_params(k_p, D, NH)

    _batched_heads_supported()  # prime the one-time lowering probe outside of jit tracing

    fwd = jax.jit(functools.partial(co_attention_forward, nheads=NH))
    out_a, out_b = fwd(feat_a, feat_b, params)
    jax.block_until_ready((out_a, out_b))

    assert out_a.shape == (B, Sa, D) and out_b.shape == (B, Sb, D)
    assert out_a.dtype == feat_a.dtype and out_b.dtype == feat_b.dtype
    assert bool(jnp.all(jnp.isfinite(out_a))) and bool(jnp.all(jnp.isfinite(out_b)))
    print("KERNEL_OK")
</pallas_src>

<mosaic_0001>
module attributes {stable_mosaic.version = 11 : i64} {
  func.func @probe_kernel(%arg0: i32, %arg1: memref<2x8x16xf32, #tpu.memory_space<vmem>>, %arg2: memref<2x8x16xf32, #tpu.memory_space<vmem>>) attributes {dimension_semantics = [#tpu.dimension_semantics<arbitrary>], iteration_bounds = array<i64: 1>, scalar_prefetch = 0 : i64, scratch_operands = 0 : i64, tpu.core_type = #tpu.core_type<tc>, window_params = [{pipeline_mode = #tpu.pipeline_mode<synchronous>, transform_indices = @transform_0, window_bounds = array<i64: 2, 8, 16>}, {pipeline_mode = #tpu.pipeline_mode<synchronous>, transform_indices = @transform_1, window_bounds = array<i64: 2, 8, 16>}]} {
    %c0 = arith.constant 0 : index
    %c0_0 = arith.constant 0 : index
    %c0_1 = arith.constant 0 : index
    %0 = vector.load %arg1[%c0, %c0_0, %c0_1] : memref<2x8x16xf32, #tpu.memory_space<vmem>>, vector<2x8x16xf32>
    %1 = vector.shape_cast %0 : vector<2x8x16xf32> to vector<16x16xf32>
    %2 = vector.shape_cast %1 : vector<16x16xf32> to vector<2x8x2x8xf32>
    %3 = tpu.transpose %2, [0, 2, 1, 3] : vector<2x8x2x8xf32> -> vector<2x2x8x8xf32>
    %4 = vector.shape_cast %3 : vector<2x2x8x8xf32> to vector<4x8x8xf32>
    %5 = arith.truncf %4 : vector<4x8x8xf32> to vector<4x8x8xbf16>
    "tpu.trace_start"() <{level = 10 : i32, message = "gqd,gkd->gqk"}> : () -> ()
    %cst = arith.constant dense<0.000000e+00> : vector<4x8x8xf32>
    %6 = tpu.matmul %5, %5, %cst {dimension_numbers = #tpu.dot_dimension_numbers<[2], [2], [1], [1], [0, 0, 0, 1, 1, 1], [0], [0]>} : vector<4x8x8xbf16>, vector<4x8x8xbf16>, vector<4x8x8xf32> -> vector<4x8x8xf32>
    "tpu.trace_stop"() : () -> ()
    %7 = arith.truncf %6 : vector<4x8x8xf32> to vector<4x8x8xbf16>
    "tpu.trace_start"() <{level = 10 : i32, message = "gqk,gkd->gqd"}> : () -> ()
    %cst_2 = arith.constant dense<0.000000e+00> : vector<4x8x8xf32>
    %8 = tpu.matmul %7, %5, %cst_2 {dimension_numbers = #tpu.dot_dimension_numbers<[2], [1], [1], [2], [0, 0, 0, 1, 1, 2], [0], [0]>} : vector<4x8x8xbf16>, vector<4x8x8xbf16>, vector<4x8x8xf32> -> vector<4x8x8xf32>
    "tpu.trace_stop"() : () -> ()
    %9 = vector.shape_cast %8 : vector<4x8x8xf32> to vector<2x2x8x8xf32>
    %10 = tpu.transpose %9, [0, 2, 1, 3] : vector<2x2x8x8xf32> -> vector<2x8x2x8xf32>
    %11 = vector.shape_cast %10 : vector<2x8x2x8xf32> to vector<16x16xf32>
    %12 = vector.shape_cast %11 : vector<16x16xf32> to vector<2x8x16xf32>
    %c0_3 = arith.constant 0 : index
    %c0_4 = arith.constant 0 : index
    %c0_5 = arith.constant 0 : index
    %13 = vector.load %arg2[%c0_3, %c0_4, %c0_5] : memref<2x8x16xf32, #tpu.memory_space<vmem>>, vector<2x8x16xf32>
    tpu.vector_store %arg2[%c0_3, %c0_4, %c0_5], %12 {strides = array<i32>} : memref<2x8x16xf32, #tpu.memory_space<vmem>>, vector<2x8x16xf32>,
    return
  }
  func.func @transform_0(%arg0: i32) -> (i32, i32, i32) {
    %c0_i32 = arith.constant 0 : i32
    %c0_i32_0 = arith.constant 0 : i32
    %c0_i32_1 = arith.constant 0 : i32
    %c0_i32_2 = arith.constant 0 : i32
    return %c0_i32, %c0_i32_0, %c0_i32_1 : i32, i32, i32
  }
  func.func @transform_1(%arg0: i32) -> (i32, i32, i32) {
    %c0_i32 = arith.constant 0 : i32
    %c0_i32_0 = arith.constant 0 : i32
    %c0_i32_1 = arith.constant 0 : i32
    %c0_i32_2 = arith.constant 0 : i32
    return %c0_i32, %c0_i32_0, %c0_i32_1 : i32, i32, i32
  }
}

module attributes {stable_mosaic.version = 11 : i64} {
  func.func @mha_ln_kernel(%arg0: i32, %arg1: i32, %arg2: memref<1x8x64xbf16, #tpu.memory_space<vmem>>, %arg3: memref<1x16x64xbf16, #tpu.memory_space<vmem>>, %arg4: memref<64x64xbf16, #tpu.memory_space<vmem>>, %arg5: memref<64x64xbf16, #tpu.memory_space<vmem>>, %arg6: memref<64x64xbf16, #tpu.memory_space<vmem>>, %arg7: memref<64x64xbf16, #tpu.memory_space<vmem>>, %arg8: memref<1x64xf32, #tpu.memory_space<vmem>>, %arg9: memref<1x64xf32, #tpu.memory_space<vmem>>, %arg10: memref<1x64xf32, #tpu.memory_space<vmem>>, %arg11: memref<1x64xf32, #tpu.memory_space<vmem>>, %arg12: memref<1x64xf32, #tpu.memory_space<vmem>>, %arg13: memref<1x64xf32, #tpu.memory_space<vmem>>, %arg14: memref<1x8x64xbf16, #tpu.memory_space<vmem>>) attributes {dimension_semantics = [#tpu.dimension_semantics<parallel>, #tpu.dimension_semantics<parallel>], iteration_bounds = array<i64: 2, 1>, scalar_prefetch = 0 : i64, scratch_operands = 0 : i64, tpu.core_type = #tpu.core_type<tc>, window_params = [{transform_indices = @transform_0, window_bounds = array<i64: 1, 8, 64>}, {transform_indices = @transform_1, window_bounds = array<i64: 1, 16, 64>}, {pipeline_mode = #tpu.pipeline_mode<synchronous>, transform_indices = @transform_2, window_bounds = array<i64: 64, 64>}, {pipeline_mode = #tpu.pipeline_mode<synchronous>, transform_indices = @transform_3, window_bounds = array<i64: 64, 64>}, {pipeline_mode = #tpu.pipeline_mode<synchronous>, transform_indices = @transform_4, window_bounds = array<i64: 64, 64>}, {pipeline_mode = #tpu.pipeline_mode<synchronous>, transform_indices = @transform_5, window_bounds = array<i64: 64, 64>}, {pipeline_mode = #tpu.pipeline_mode<synchronous>, transform_indices = @transform_6, window_bounds = array<i64: 1, 64>}, {pipeline_mode = #tpu.pipeline_mode<synchronous>, transform_indices = @transform_7, window_bounds = array<i64: 1, 64>}, {pipeline_mode = #tpu.pipeline_mode<synchronous>, transform_indices = @transform_8, window_bounds = array<i64: 1, 64>}, {pipeline_mode = #tpu.pipeline_mode<synchronous>, transform_indices = @transform_9, window_bounds = array<i64: 1, 64>}, {pipeline_mode = #tpu.pipeline_mode<synchronous>, transform_indices = @transform_10, window_bounds = array<i64: 1, 64>}, {pipeline_mode = #tpu.pipeline_mode<synchronous>, transform_indices = @transform_11, window_bounds = array<i64: 1, 64>}, {transform_indices = @transform_12, window_bounds = array<i64: 1, 8, 64>}]} {
    %c0 = arith.constant 0 : index
    %c0_0 = arith.constant 0 : index
    %c0_1 = arith.constant 0 : index
    %0 = vector.load %arg2[%c0, %c0_0, %c0_1] : memref<1x8x64xbf16, #tpu.memory_space<vmem>>, vector<1x8x64xbf16>
    %c0_2 = arith.constant 0 : index
    %c0_3 = arith.constant 0 : index
    %c0_4 = arith.constant 0 : index
    %1 = vector.load %arg3[%c0_2, %c0_3, %c0_4] : memref<1x16x64xbf16, #tpu.memory_space<vmem>>, vector<1x16x64xbf16>
    %2 = vector.shape_cast %0 : vector<1x8x64xbf16> to vector<8x64xbf16>
    %3 = vector.shape_cast %1 : vector<1x16x64xbf16> to vector<16x64xbf16>
    %c0_5 = arith.constant 0 : index
    %c0_6 = arith.constant 0 : index
    %4 = vector.load %arg4[%c0_5, %c0_6] : memref<64x64xbf16, #tpu.memory_space<vmem>>, vector<64x64xbf16>
    %cst = arith.constant dense<0.000000e+00> : vector<8x64xf32>
    %5 = tpu.matmul %2, %4, %cst {dimension_numbers = #tpu.dot_dimension_numbers<[1], [0], [0], [1], [0, 0, 1, 1], [], []>} : vector<8x64xbf16>, vector<64x64xbf16>, vector<8x64xf32> -> vector<8x64xf32>
    %c0_7 = arith.constant 0 : index
    %c0_8 = arith.constant 0 : index
    %6 = vector.load %arg8[%c0_7, %c0_8] : memref<1x64xf32, #tpu.memory_space<vmem>>, vector<1x64xf32>
    %7 = vector.broadcast %6 : vector<1x64xf32> to vector<8x64xf32>
    %8 = arith.addf %5, %7 : vector<8x64xf32>
    %c0_9 = arith.constant 0 : index
    %c0_10 = arith.constant 0 : index
    %9 = vector.load %arg5[%c0_9, %c0_10] : memref<64x64xbf16, #tpu.memory_space<vmem>>, vector<64x64xbf16>
    %cst_11 = arith.constant dense<0.000000e+00> : vector<16x64xf32>
    %10 = tpu.matmul %3, %9, %cst_11 {dimension_numbers = #tpu.dot_dimension_numbers<[1], [0], [0], [1], [0, 0, 1, 1], [], []>} : vector<16x64xbf16>, vector<64x64xbf16>, vector<16x64xf32> -> vector<16x64xf32>
    %c0_12 = arith.constant 0 : index
    %c0_13 = arith.constant 0 : index
    %11 = vector.load %arg9[%c0_12, %c0_13] : memref<1x64xf32, #tpu.memory_space<vmem>>, vector<1x64xf32>
    %12 = vector.broadcast %11 : vector<1x64xf32> to vector<16x64xf32>
    %13 = arith.addf %10, %12 : vector<16x64xf32>
    %c0_14 = arith.constant 0 : index
    %c0_15 = arith.constant 0 : index
    %14 = vector.load %arg6[%c0_14, %c0_15] : memref<64x64xbf16, #tpu.memory_space<vmem>>, vector<64x64xbf16>
    %cst_16 = arith.constant dense<0.000000e+00> : vector<16x64xf32>
    %15 = tpu.matmul %3, %14, %cst_16 {dimension_numbers = #tpu.dot_dimension_numbers<[1], [0], [0], [1], [0, 0, 1, 1], [], []>} : vector<16x64xbf16>, vector<64x64xbf16>, vector<16x64xf32> -> vector<16x64xf32>
    %c0_17 = arith.constant 0 : index
    %c0_18 = arith.constant 0 : index
    %16 = vector.load %arg10[%c0_17, %c0_18] : memref<1x64xf32, #tpu.memory_space<vmem>>, vector<1x64xf32>
    %17 = vector.broadcast %16 : vector<1x64xf32> to vector<16x64xf32>
    %18 = arith.addf %15, %17 : vector<16x64xf32>
    %19 = vector.shape_cast %8 : vector<8x64xf32> to vector<1x8x64xf32>
    %20 = arith.truncf %19 : vector<1x8x64xf32> to vector<1x8x64xbf16>
    %21 = vector.shape_cast %13 : vector<16x64xf32> to vector<1x16x64xf32>
    %22 = arith.truncf %21 : vector<1x16x64xf32> to vector<1x16x64xbf16>
    %23 = vector.shape_cast %18 : vector<16x64xf32> to vector<1x16x64xf32>
    %24 = arith.truncf %23 : vector<1x16x64xf32> to vector<1x16x64xbf16>
    %25 = vector.extract_strided_slice %20 {offsets = [0, 0, 0], sizes = [1, 8, 8], strides = [1, 1, 1]} : vector<1x8x64xbf16> to vector<1x8x8xbf16>
    %26 = vector.extract_strided_slice %22 {offsets = [0, 0, 0], sizes = [1, 16, 8], strides = [1, 1, 1]} : vector<1x16x64xbf16> to vector<1x16x8xbf16>
    "tpu.trace_start"() <{level = 10 : i32, message = "bqd,bkd->bqk"}> : () -> ()
    %cst_19 = arith.constant dense<0.000000e+00> : vector<1x8x16xf32>
    %27 = tpu.matmul %25, %26, %cst_19 {dimension_numbers = #tpu.dot_dimension_numbers<[2], [2], [1], [1], [0, 0, 0, 1, 1, 1], [0], [0]>} : vector<1x8x8xbf16>, vector<1x16x8xbf16>, vector<1x8x16xf32> -> vector<1x8x16xf32>
    "tpu.trace_stop"() : () -> ()
    %cst_20 = arith.constant dense<0xFF800000> : vector<1x8xf32>
    %28 = vector.multi_reduction <maximumf>, %27, %cst_20 [2] : vector<1x8x16xf32> to vector<1x8xf32>
    %29 = vector.shape_cast %28 : vector<1x8xf32> to vector<1x8x1xf32>
    %30 = vector.broadcast %29 : vector<1x8x1xf32> to vector<1x8x16xf32>
    %31 = arith.subf %27, %30 : vector<1x8x16xf32>
    %32 = math.exp %31 : vector<1x8x16xf32>
    %cst_21 = arith.constant dense<0.000000e+00> : vector<1x8xf32>
    %33 = vector.multi_reduction <add>, %32, %cst_21 [2] : vector<1x8x16xf32> to vector<1x8xf32>
    %34 = vector.shape_cast %33 : vector<1x8xf32> to vector<1x8x1xf32>
    %35 = arith.truncf %32 : vector<1x8x16xf32> to vector<1x8x16xbf16>
    %36 = vector.extract_strided_slice %24 {offsets = [0, 0, 0], sizes = [1, 16, 8], strides = [1, 1, 1]} : vector<1x16x64xbf16> to vector<1x16x8xbf16>
    "tpu.trace_start"() <{level = 10 : i32, message = "bqk,bkd->bqd"}> : () -> ()
    %cst_22 = arith.constant dense<0.000000e+00> : vector<1x8x8xf32>
    %37 = tpu.matmul %35, %36, %cst_22 {dimension_numbers = #tpu.dot_dimension_numbers<[2], [1], [1], [2], [0, 0, 0, 1, 1, 2], [0], [0]>} : vector<1x8x16xbf16>, vector<1x16x8xbf16>, vector<1x8x8xf32> -> vector<1x8x8xf32>
    "tpu.trace_stop"() : () -> ()
    %38 = tpu.reciprocal %34 : vector<1x8x1xf32> -> vector<1x8x1xf32>
    %39 = vector.broadcast %38 : vector<1x8x1xf32> to vector<1x8x8xf32>
    %40 = arith.mulf %37, %39 : vector<1x8x8xf32>
    %41 = vector.extract_strided_slice %20 {offsets = [0, 0, 8], sizes = [1, 8, 8], strides = [1, 1, 1]} : vector<1x8x64xbf16> to vector<1x8x8xbf16>
    %42 = vector.extract_strided_slice %22 {offsets = [0, 0, 8], sizes = [1, 16, 8], strides = [1, 1, 1]} : vector<1x16x64xbf16> to vector<1x16x8xbf16>
    "tpu.trace_start"() <{level = 10 : i32, message = "bqd,bkd->bqk"}> : () -> ()
    %cst_23 = arith.constant dense<0.000000e+00> : vector<1x8x16xf32>
    %43 = tpu.matmul %41, %42, %cst_23 {dimension_numbers = #tpu.dot_dimension_numbers<[2], [2], [1], [1], [0, 0, 0, 1, 1, 1], [0], [0]>} : vector<1x8x8xbf16>, vector<1x16x8xbf16>, vector<1x8x16xf32> -> vector<1x8x16xf32>
    "tpu.trace_stop"() : () -> ()
    %cst_24 = arith.constant dense<0xFF800000> : vector<1x8xf32>
    %44 = vector.multi_reduction <maximumf>, %43, %cst_24 [2] : vector<1x8x16xf32> to vector<1x8xf32>
    %45 = vector.shape_cast %44 : vector<1x8xf32> to vector<1x8x1xf32>
    %46 = vector.broadcast %45 : vector<1x8x1xf32> to vector<1x8x16xf32>
    %47 = arith.subf %43, %46 : vector<1x8x16xf32>
    %48 = math.exp %47 : vector<1x8x16xf32>
    %cst_25 = arith.constant dense<0.000000e+00> : vector<1x8xf32>
    %49 = vector.multi_reduction <add>, %48, %cst_25 [2] : vector<1x8x16xf32> to vector<1x8xf32>
    %50 = vector.shape_cast %49 : vector<1x8xf32> to vector<1x8x1xf32>
    %51 = arith.truncf %48 : vector<1x8x16xf32> to vector<1x8x16xbf16>
    %52 = vector.extract_strided_slice %24 {offsets = [0, 0, 8], sizes = [1, 16, 8], strides = [1, 1, 1]} : vector<1x16x64xbf16> to vector<1x16x8xbf16>
    "tpu.trace_start"() <{level = 10 : i32, message = "bqk,bkd->bqd"}> : () -> ()
    %cst_26 = arith.constant dense<0.000000e+00> : vector<1x8x8xf32>
    %53 = tpu.matmul %51, %52, %cst_26 {dimension_numbers = #tpu.dot_dimension_numbers<[2], [1], [1], [2], [0, 0, 0, 1, 1, 2], [0], [0]>} : vector<1x8x16xbf16>, vector<1x16x8xbf16>, vector<1x8x8xf32> -> vector<1x8x8xf32>
    "tpu.trace_stop"() : () -> ()
    %54 = tpu.reciprocal %50 : vector<1x8x1xf32> -> vector<1x8x1xf32>
    %55 = vector.broadcast %54 : vector<1x8x1xf32> to vector<1x8x8xf32>
    %56 = arith.mulf %53, %55 : vector<1x8x8xf32>
    %57 = vector.extract_strided_slice %20 {offsets = [0, 0, 16], sizes = [1, 8, 8], strides = [1, 1, 1]} : vector<1x8x64xbf16> to vector<1x8x8xbf16>
    %58 = vector.extract_strided_slice %22 {offsets = [0, 0, 16], sizes = [1, 16, 8], strides = [1, 1, 1]} : vector<1x16x64xbf16> to vector<1x16x8xbf16>
    "tpu.trace_start"() <{level = 10 : i32, message = "bqd,bkd->bqk"}> : () -> ()
    %cst_27 = arith.constant dense<0.000000e+00> : vector<1x8x16xf32>
    %59 = tpu.matmul %57, %58, %cst_27 {dimension_numbers = #tpu.dot_dimension_numbers<[2], [2], [1], [1], [0, 0, 0, 1, 1, 1], [0], [0]>} : vector<1x8x8xbf16>, vector<1x16x8xbf16>, vector<1x8x16xf32> -> vector<1x8x16xf32>
    "tpu.trace_stop"() : () -> ()
    %cst_28 = arith.constant dense<0xFF800000> : vector<1x8xf32>
    %60 = vector.multi_reduction <maximumf>, %59, %cst_28 [2] : vector<1x8x16xf32> to vector<1x8xf32>
    %61 = vector.shape_cast %60 : vector<1x8xf32> to vector<1x8x1xf32>
    %62 = vector.broadcast %61 : vector<1x8x1xf32> to vector<1x8x16xf32>
    %63 = arith.subf %59, %62 : vector<1x8x16xf32>
    %64 = math.exp %63 : vector<1x8x16xf32>
    %cst_29 = arith.constant dense<0.000000e+00> : vector<1x8xf32>
    %65 = vector.multi_reduction <add>, %64, %cst_29 [2] : vector<1x8x16xf32> to vector<1x8xf32>
    %66 = vector.shape_cast %65 : vector<1x8xf32> to vector<1x8x1xf32>
    %67 = arith.truncf %64 : vector<1x8x16xf32> to vector<1x8x16xbf16>
    %68 = vector.extract_strided_slice %24 {offsets = [0, 0, 16], sizes = [1, 16, 8], strides = [1, 1, 1]} : vector<1x16x64xbf16> to vector<1x16x8xbf16>
    "tpu.trace_start"() <{level = 10 : i32, message = "bqk,bkd->bqd"}> : () -> ()
    %cst_30 = arith.constant dense<0.000000e+00> : vector<1x8x8xf32>
    %69 = tpu.matmul %67, %68, %cst_30 {dimension_numbers = #tpu.dot_dimension_numbers<[2], [1], [1], [2], [0, 0, 0, 1, 1, 2], [0], [0]>} : vector<1x8x16xbf16>, vector<1x16x8xbf16>, vector<1x8x8xf32> -> vector<1x8x8xf32>
    "tpu.trace_stop"() : () -> ()
    %70 = tpu.reciprocal %66 : vector<1x8x1xf32> -> vector<1x8x1xf32>
    %71 = vector.broadcast %70 : vector<1x8x1xf32> to vector<1x8x8xf32>
    %72 = arith.mulf %69, %71 : vector<1x8x8xf32>
    %73 = vector.extract_strided_slice %20 {offsets = [0, 0, 24], sizes = [1, 8, 8], strides = [1, 1, 1]} : vector<1x8x64xbf16> to vector<1x8x8xbf16>
    %74 = vector.extract_strided_slice %22 {offsets = [0, 0, 24], sizes = [1, 16, 8], strides = [1, 1, 1]} : vector<1x16x64xbf16> to vector<1x16x8xbf16>
    "tpu.trace_start"() <{level = 10 : i32, message = "bqd,bkd->bqk"}> : () -> ()
    %cst_31 = arith.constant dense<0.000000e+00> : vector<1x8x16xf32>
    %75 = tpu.matmul %73, %74, %cst_31 {dimension_numbers = #tpu.dot_dimension_numbers<[2], [2], [1], [1], [0, 0, 0, 1, 1, 1], [0], [0]>} : vector<1x8x8xbf16>, vector<1x16x8xbf16>, vector<1x8x16xf32> -> vector<1x8x16xf32>
    "tpu.trace_stop"() : () -> ()
    %cst_32 = arith.constant dense<0xFF800000> : vector<1x8xf32>
    %76 = vector.multi_reduction <maximumf>, %75, %cst_32 [2] : vector<1x8x16xf32> to vector<1x8xf32>
    %77 = vector.shape_cast %76 : vector<1x8xf32> to vector<1x8x1xf32>
    %78 = vector.broadcast %77 : vector<1x8x1xf32> to vector<1x8x16xf32>
    %79 = arith.subf %75, %78 : vector<1x8x16xf32>
    %80 = math.exp %79 : vector<1x8x16xf32>
    %cst_33 = arith.constant dense<0.000000e+00> : vector<1x8xf32>
    %81 = vector.multi_reduction <add>, %80, %cst_33 [2] : vector<1x8x16xf32> to vector<1x8xf32>
    %82 = vector.shape_cast %81 : vector<1x8xf32> to vector<1x8x1xf32>
    %83 = arith.truncf %80 : vector<1x8x16xf32> to vector<1x8x16xbf16>
    %84 = vector.extract_strided_slice %24 {offsets = [0, 0, 24], sizes = [1, 16, 8], strides = [1, 1, 1]} : vector<1x16x64xbf16> to vector<1x16x8xbf16>
    "tpu.trace_start"() <{level = 10 : i32, message = "bqk,bkd->bqd"}> : () -> ()
    %cst_34 = arith.constant dense<0.000000e+00> : vector<1x8x8xf32>
    %85 = tpu.matmul %83, %84, %cst_34 {dimension_numbers = #tpu.dot_dimension_numbers<[2], [1], [1], [2], [0, 0, 0, 1, 1, 2], [0], [0]>} : vector<1x8x16xbf16>, vector<1x16x8xbf16>, vector<1x8x8xf32> -> vector<1x8x8xf32>
    "tpu.trace_stop"() : () -> ()
    %86 = tpu.reciprocal %82 : vector<1x8x1xf32> -> vector<1x8x1xf32>
    %87 = vector.broadcast %86 : vector<1x8x1xf32> to vector<1x8x8xf32>
    %88 = arith.mulf %85, %87 : vector<1x8x8xf32>
    %89 = vector.extract_strided_slice %20 {offsets = [0, 0, 32], sizes = [1, 8, 8], strides = [1, 1, 1]} : vector<1x8x64xbf16> to vector<1x8x8xbf16>
    %90 = vector.extract_strided_slice %22 {offsets = [0, 0, 32], sizes = [1, 16, 8], strides = [1, 1, 1]} : vector<1x16x64xbf16> to vector<1x16x8xbf16>
    "tpu.trace_start"() <{level = 10 : i32, message = "bqd,bkd->bqk"}> : () -> ()
    %cst_35 = arith.constant dense<0.000000e+00> : vector<1x8x16xf32>
    %91 = tpu.matmul %89, %90, %cst_35 {dimension_numbers = #tpu.dot_dimension_numbers<[2], [2], [1], [1], [0, 0, 0, 1, 1, 1], [0], [0]>} : vector<1x8x8xbf16>, vector<1x16x8xbf16>, vector<1x8x16xf32> -> vector<1x8x16xf32>
    "tpu.trace_stop"() : () -> ()
    %cst_36 = arith.constant dense<0xFF800000> : vector<1x8xf32>
    %92 = vector.multi_reduction <maximumf>, %91, %cst_36 [2] : vector<1x8x16xf32> to vector<1x8xf32>
    %93 = vector.shape_cast %92 : vector<1x8xf32> to vector<1x8x1xf32>
    %94 = vector.broadcast %93 : vector<1x8x1xf32> to vector<1x8x16xf32>
    %95 = arith.subf %91, %94 : vector<1x8x16xf32>
    %96 = math.exp %95 : vector<1x8x16xf32>
    %cst_37 = arith.constant dense<0.000000e+00> : vector<1x8xf32>
    %97 = vector.multi_reduction <add>, %96, %cst_37 [2] : vector<1x8x16xf32> to vector<1x8xf32>
    %98 = vector.shape_cast %97 : vector<1x8xf32> to vector<1x8x1xf32>
    %99 = arith.truncf %96 : vector<1x8x16xf32> to vector<1x8x16xbf16>
    %100 = vector.extract_strided_slice %24 {offsets = [0, 0, 32], sizes = [1, 16, 8], strides = [1, 1, 1]} : vector<1x16x64xbf16> to vector<1x16x8xbf16>
    "tpu.trace_start"() <{level = 10 : i32, message = "bqk,bkd->bqd"}> : () -> ()
    %cst_38 = arith.constant dense<0.000000e+00> : vector<1x8x8xf32>
    %101 = tpu.matmul %99, %100, %cst_38 {dimension_numbers = #tpu.dot_dimension_numbers<[2], [1], [1], [2], [0, 0, 0, 1, 1, 2], [0], [0]>} : vector<1x8x16xbf16>, vector<1x16x8xbf16>, vector<1x8x8xf32> -> vector<1x8x8xf32>
    "tpu.trace_stop"() : () -> ()
    %102 = tpu.reciprocal %98 : vector<1x8x1xf32> -> vector<1x8x1xf32>
    %103 = vector.broadcast %102 : vector<1x8x1xf32> to vector<1x8x8xf32>
    %104 = arith.mulf %101, %103 : vector<1x8x8xf32>
    %105 = vector.extract_strided_slice %20 {offsets = [0, 0, 40], sizes = [1, 8, 8], strides = [1, 1, 1]} : vector<1x8x64xbf16> to vector<1x8x8xbf16>
    %106 = vector.extract_strided_slice %22 {offsets = [0, 0, 40], sizes = [1, 16, 8], strides = [1, 1, 1]} : vector<1x16x64xbf16> to vector<1x16x8xbf16>
    "tpu.trace_start"() <{level = 10 : i32, message = "bqd,bkd->bqk"}> : () -> ()
    %cst_39 = arith.constant dense<0.000000e+00> : vector<1x8x16xf32>
    %107 = tpu.matmul %105, %106, %cst_39 {dimension_numbers = #tpu.dot_dimension_numbers<[2], [2], [1], [1], [0, 0, 0, 1, 1, 1], [0], [0]>} : vector<1x8x8xbf16>, vector<1x16x8xbf16>, vector<1x8x16xf32> -> vector<1x8x16xf32>
    "tpu.trace_stop"() : () -> ()
    %cst_40 = arith.constant dense<0xFF800000> : vector<1x8xf32>
    %108 = vector.multi_reduction <maximumf>, %107, %cst_40 [2] : vector<1x8x16xf32> to vector<1x8xf32>
    %109 = vector.shape_cast %108 : vector<1x8xf32> to vector<1x8x1xf32>
    %110 = vector.broadcast %109 : vector<1x8x1xf32> to vector<1x8x16xf32>
    %111 = arith.subf %107, %110 : vector<1x8x16xf32>
    %112 = math.exp %111 : vector<1x8x16xf32>
    %cst_41 = arith.constant dense<0.000000e+00> : vector<1x8xf32>
    %113 = vector.multi_reduction <add>, %112, %cst_41 [2] : vector<1x8x16xf32> to vector<1x8xf32>
    %114 = vector.shape_cast %113 : vector<1x8xf32> to vector<1x8x1xf32>
    %115 = arith.truncf %112 : vector<1x8x16xf32> to vector<1x8x16xbf16>
    %116 = vector.extract_strided_slice %24 {offsets = [0, 0, 40], sizes = [1, 16, 8], strides = [1, 1, 1]} : vector<1x16x64xbf16> to vector<1x16x8xbf16>
    "tpu.trace_start"() <{level = 10 : i32, message = "bqk,bkd->bqd"}> : () -> ()
    %cst_42 = arith.constant dense<0.000000e+00> : vector<1x8x8xf32>
    %117 = tpu.matmul %115, %116, %cst_42 {dimension_numbers = #tpu.dot_dimension_numbers<[2], [1], [1], [2], [0, 0, 0, 1, 1, 2], [0], [0]>} : vector<1x8x16xbf16>, vector<1x16x8xbf16>, vector<1x8x8xf32> -> vector<1x8x8xf32>
    "tpu.trace_stop"() : () -> ()
    %118 = tpu.reciprocal %114 : vector<1x8x1xf32> -> vector<1x8x1xf32>
    %119 = vector.broadcast %118 : vector<1x8x1xf32> to vector<1x8x8xf32>
    %120 = arith.mulf %117, %119 : vector<1x8x8xf32>
    %121 = vector.extract_strided_slice %20 {offsets = [0, 0, 48], sizes = [1, 8, 8], strides = [1, 1, 1]} : vector<1x8x64xbf16> to vector<1x8x8xbf16>
    %122 = vector.extract_strided_slice %22 {offsets = [0, 0, 48], sizes = [1, 16, 8], strides = [1, 1, 1]} : vector<1x16x64xbf16> to vector<1x16x8xbf16>
    "tpu.trace_start"() <{level = 10 : i32, message = "bqd,bkd->bqk"}> : () -> ()
    %cst_43 = arith.constant dense<0.000000e+00> : vector<1x8x16xf32>
    %123 = tpu.matmul %121, %122, %cst_43 {dimension_numbers = #tpu.dot_dimension_numbers<[2], [2], [1], [1], [0, 0, 0, 1, 1, 1], [0], [0]>} : vector<1x8x8xbf16>, vector<1x16x8xbf16>, vector<1x8x16xf32> -> vector<1x8x16xf32>
    "tpu.trace_stop"() : () -> ()
    %cst_44 = arith.constant dense<0xFF800000> : vector<1x8xf32>
    %124 = vector.multi_reduction <maximumf>, %123, %cst_44 [2] : vector<1x8x16xf32> to vector<1x8xf32>
    %125 = vector.shape_cast %124 : vector<1x8xf32> to vector<1x8x1xf32>
    %126 = vector.broadcast %125 : vector<1x8x1xf32> to vector<1x8x16xf32>
    %127 = arith.subf %123, %126 : vector<1x8x16xf32>
    %128 = math.exp %127 : vector<1x8x16xf32>
    %cst_45 = arith.constant dense<0.000000e+00> : vector<1x8xf32>
    %129 = vector.multi_reduction <add>, %128, %cst_45 [2] : vector<1x8x16xf32> to vector<1x8xf32>
    %130 = vector.shape_cast %129 : vector<1x8xf32> to vector<1x8x1xf32>
    %131 = arith.truncf %128 : vector<1x8x16xf32> to vector<1x8x16xbf16>
    %132 = vector.extract_strided_slice %24 {offsets = [0, 0, 48], sizes = [1, 16, 8], strides = [1, 1, 1]} : vector<1x16x64xbf16> to vector<1x16x8xbf16>
    "tpu.trace_start"() <{level = 10 : i32, message = "bqk,bkd->bqd"}> : () -> ()
    %cst_46 = arith.constant dense<0.000000e+00> : vector<1x8x8xf32>
    %133 = tpu.matmul %131, %132, %cst_46 {dimension_numbers = #tpu.dot_dimension_numbers<[2], [1], [1], [2], [0, 0, 0, 1, 1, 2], [0], [0]>} : vector<1x8x16xbf16>, vector<1x16x8xbf16>, vector<1x8x8xf32> -> vector<1x8x8xf32>
    "tpu.trace_stop"() : () -> ()
    %134 = tpu.reciprocal %130 : vector<1x8x1xf32> -> vector<1x8x1xf32>
    %135 = vector.broadcast %134 : vector<1x8x1xf32> to vector<1x8x8xf32>
    %136 = arith.mulf %133, %135 : vector<1x8x8xf32>
    %137 = vector.extract_strided_slice %20 {offsets = [0, 0, 56], sizes = [1, 8, 8], strides = [1, 1, 1]} : vector<1x8x64xbf16> to vector<1x8x8xbf16>
    %138 = vector.extract_strided_slice %22 {offsets = [0, 0, 56], sizes = [1, 16, 8], strides = [1, 1, 1]} : vector<1x16x64xbf16> to vector<1x16x8xbf16>
    "tpu.trace_start"() <{level = 10 : i32, message = "bqd,bkd->bqk"}> : () -> ()
    %cst_47 = arith.constant dense<0.000000e+00> : vector<1x8x16xf32>
    %139 = tpu.matmul %137, %138, %cst_47 {dimension_numbers = #tpu.dot_dimension_numbers<[2], [2], [1], [1], [0, 0, 0, 1, 1, 1], [0], [0]>} : vector<1x8x8xbf16>, vector<1x16x8xbf16>, vector<1x8x16xf32> -> vector<1x8x16xf32>
    "tpu.trace_stop"() : () -> ()
    %cst_48 = arith.constant dense<0xFF800000> : vector<1x8xf32>
    %140 = vector.multi_reduction <maximumf>, %139, %cst_48 [2] : vector<1x8x16xf32> to vector<1x8xf32>
    %141 = vector.shape_cast %140 : vector<1x8xf32> to vector<1x8x1xf32>
    %142 = vector.broadcast %141 : vector<1x8x1xf32> to vector<1x8x16xf32>
    %143 = arith.subf %139, %142 : vector<1x8x16xf32>
    %144 = math.exp %143 : vector<1x8x16xf32>
    %cst_49 = arith.constant dense<0.000000e+00> : vector<1x8xf32>
    %145 = vector.multi_reduction <add>, %144, %cst_49 [2] : vector<1x8x16xf32> to vector<1x8xf32>
    %146 = vector.shape_cast %145 : vector<1x8xf32> to vector<1x8x1xf32>
    %147 = arith.truncf %144 : vector<1x8x16xf32> to vector<1x8x16xbf16>
    %148 = vector.extract_strided_slice %24 {offsets = [0, 0, 56], sizes = [1, 16, 8], strides = [1, 1, 1]} : vector<1x16x64xbf16> to vector<1x16x8xbf16>
    "tpu.trace_start"() <{level = 10 : i32, message = "bqk,bkd->bqd"}> : () -> ()
    %cst_50 = arith.constant dense<0.000000e+00> : vector<1x8x8xf32>
    %149 = tpu.matmul %147, %148, %cst_50 {dimension_numbers = #tpu.dot_dimension_numbers<[2], [1], [1], [2], [0, 0, 0, 1, 1, 2], [0], [0]>} : vector<1x8x16xbf16>, vector<1x16x8xbf16>, vector<1x8x8xf32> -> vector<1x8x8xf32>
    "tpu.trace_stop"() : () -> ()
    %150 = tpu.reciprocal %146 : vector<1x8x1xf32> -> vector<1x8x1xf32>
    %151 = vector.broadcast %150 : vector<1x8x1xf32> to vector<1x8x8xf32>
    %152 = arith.mulf %149, %151 : vector<1x8x8xf32>
    %153 = tpu.concatenate %40, %56, %72, %88, %104, %120, %136, %152 in 2 : vector<1x8x8xf32>, vector<1x8x8xf32>, vector<1x8x8xf32>, vector<1x8x8xf32>, vector<1x8x8xf32>, vector<1x8x8xf32>, vector<1x8x8xf32>, vector<1x8x8xf32> -> vector<1x8x64xf32>
    %154 = vector.shape_cast %153 : vector<1x8x64xf32> to vector<8x64xf32>
    %155 = arith.truncf %154 : vector<8x64xf32> to vector<8x64xbf16>
    %c0_51 = arith.constant 0 : index
    %c0_52 = arith.constant 0 : index
    %156 = vector.load %arg7[%c0_51, %c0_52] : memref<64x64xbf16, #tpu.memory_space<vmem>>, vector<64x64xbf16>
    %cst_53 = arith.constant dense<0.000000e+00> : vector<8x64xf32>
    %157 = tpu.matmul %155, %156, %cst_53 {dimension_numbers = #tpu.dot_dimension_numbers<[1], [0], [0], [1], [0, 0, 1, 1], [], []>} : vector<8x64xbf16>, vector<64x64xbf16>, vector<8x64xf32> -> vector<8x64xf32>
    %c0_54 = arith.constant 0 : index
    %c0_55 = arith.constant 0 : index
    %158 = vector.load %arg11[%c0_54, %c0_55] : memref<1x64xf32, #tpu.memory_space<vmem>>, vector<1x64xf32>
    %159 = vector.broadcast %158 : vector<1x64xf32> to vector<8x64xf32>
    %160 = arith.addf %157, %159 : vector<8x64xf32>
    %161 = vector.shape_cast %0 : vector<1x8x64xbf16> to vector<8x64xbf16>
    %162 = arith.extf %161 : vector<8x64xbf16> to vector<8x64xf32>
    %163 = arith.addf %162, %160 : vector<8x64xf32>
    %cst_56 = arith.constant dense<0.000000e+00> : vector<8xf32>
    %164 = vector.multi_reduction <add>, %163, %cst_56 [1] : vector<8x64xf32> to vector<8xf32>
    %165 = vector.shape_cast %164 : vector<8xf32> to vector<8x1xf32>
    %cst_57 = arith.constant 6.400000e+01 : f32
    %166 = vector.broadcast %cst_57 : f32 to vector<8x1xf32>
    %167 = arith.divf %165, %166 : vector<8x1xf32>
    %168 = vector.broadcast %167 : vector<8x1xf32> to vector<8x64xf32>
    %169 = arith.subf %163, %168 : vector<8x64xf32>
    %170 = arith.mulf %169, %169 : vector<8x64xf32>
    %cst_58 = arith.constant dense<0.000000e+00> : vector<8xf32>
    %171 = vector.multi_reduction <add>, %170, %cst_58 [1] : vector<8x64xf32> to vector<8xf32>
    %172 = vector.shape_cast %171 : vector<8xf32> to vector<8x1xf32>
    %cst_59 = arith.constant 6.400000e+01 : f32
    %173 = vector.broadcast %cst_59 : f32 to vector<8x1xf32>
    %174 = arith.divf %172, %173 : vector<8x1xf32>
    %175 = vector.broadcast %167 : vector<8x1xf32> to vector<8x64xf32>
    %176 = arith.subf %163, %175 : vector<8x64xf32>
    %cst_60 = arith.constant 9.99999974E-6 : f32
    %177 = vector.broadcast %cst_60 : f32 to vector<8x1xf32>
    %178 = arith.addf %174, %177 : vector<8x1xf32>
    %179 = math.rsqrt %178 : vector<8x1xf32>
    %180 = vector.broadcast %179 : vector<8x1xf32> to vector<8x64xf32>
    %181 = arith.mulf %176, %180 : vector<8x64xf32>
    %c0_61 = arith.constant 0 : index
    %c0_62 = arith.constant 0 : index
    %182 = vector.load %arg12[%c0_61, %c0_62] : memref<1x64xf32, #tpu.memory_space<vmem>>, vector<1x64xf32>
    %183 = vector.broadcast %182 : vector<1x64xf32> to vector<8x64xf32>
    %184 = arith.mulf %181, %183 : vector<8x64xf32>
    %c0_63 = arith.constant 0 : index
    %c0_64 = arith.constant 0 : index
    %185 = vector.load %arg13[%c0_63, %c0_64] : memref<1x64xf32, #tpu.memory_space<vmem>>, vector<1x64xf32>
    %186 = vector.broadcast %185 : vector<1x64xf32> to vector<8x64xf32>
    %187 = arith.addf %184, %186 : vector<8x64xf32>
    %188 = vector.shape_cast %187 : vector<8x64xf32> to vector<1x8x64xf32>
    %189 = arith.truncf %188 : vector<1x8x64xf32> to vector<1x8x64xbf16>
    %c0_65 = arith.constant 0 : index
    %c0_66 = arith.constant 0 : index
    %c0_67 = arith.constant 0 : index
    %190 = vector.load %arg14[%c0_65, %c0_66, %c0_67] : memref<1x8x64xbf16, #tpu.memory_space<vmem>>, vector<1x8x64xbf16>
    tpu.vector_store %arg14[%c0_65, %c0_66, %c0_67], %189 {strides = array<i32>} : memref<1x8x64xbf16, #tpu.memory_space<vmem>>, vector<1x8x64xbf16>,
    return
  }
  func.func @transform_0(%arg0: i32, %arg1: i32) -> (i32, i32, i32) {
    %c0_i32 = arith.constant 0 : i32
    %c0_i32_0 = arith.constant 0 : i32
    return %arg0, %arg1, %c0_i32 : i32, i32, i32
  }
  func.func @transform_1(%arg0: i32, %arg1: i32) -> (i32, i32, i32) {
    %c0_i32 = arith.constant 0 : i32
    %c0_i32_0 = arith.constant 0 : i32
    %c0_i32_1 = arith.constant 0 : i32
    return %arg0, %c0_i32, %c0_i32_0 : i32, i32, i32
  }
  func.func @transform_2(%arg0: i32, %arg1: i32) -> (i32, i32) {
    %c0_i32 = arith.constant 0 : i32
    %c0_i32_0 = arith.constant 0 : i32
    %c0_i32_1 = arith.constant 0 : i32
    return %c0_i32, %c0_i32_0 : i32, i32
  }
  func.func @transform_3(%arg0: i32, %arg1: i32) -> (i32, i32) {
    %c0_i32 = arith.constant 0 : i32
    %c0_i32_0 = arith.constant 0 : i32
    %c0_i32_1 = arith.constant 0 : i32
    return %c0_i32, %c0_i32_0 : i32, i32
  }
  func.func @transform_4(%arg0: i32, %arg1: i32) -> (i32, i32) {
    %c0_i32 = arith.constant 0 : i32
    %c0_i32_0 = arith.constant 0 : i32
    %c0_i32_1 = arith.constant 0 : i32
    return %c0_i32, %c0_i32_0 : i32, i32
  }
  func.func @transform_5(%arg0: i32, %arg1: i32) -> (i32, i32) {
    %c0_i32 = arith.constant 0 : i32
    %c0_i32_0 = arith.constant 0 : i32
    %c0_i32_1 = arith.constant 0 : i32
    return %c0_i32, %c0_i32_0 : i32, i32
  }
  func.func @transform_6(%arg0: i32, %arg1: i32) -> (i32, i32) {
    %c0_i32 = arith.constant 0 : i32
    %c0_i32_0 = arith.constant 0 : i32
    %c0_i32_1 = arith.constant 0 : i32
    return %c0_i32, %c0_i32_0 : i32, i32
  }
  func.func @transform_7(%arg0: i32, %arg1: i32) -> (i32, i32) {
    %c0_i32 = arith.constant 0 : i32
    %c0_i32_0 = arith.constant 0 : i32
    %c0_i32_1 = arith.constant 0 : i32
    return %c0_i32, %c0_i32_0 : i32, i32
  }
  func.func @transform_8(%arg0: i32, %arg1: i32) -> (i32, i32) {
    %c0_i32 = arith.constant 0 : i32
    %c0_i32_0 = arith.constant 0 : i32
    %c0_i32_1 = arith.constant 0 : i32
    return %c0_i32, %c0_i32_0 : i32, i32
  }
  func.func @transform_9(%arg0: i32, %arg1: i32) -> (i32, i32) {
    %c0_i32 = arith.constant 0 : i32
    %c0_i32_0 = arith.constant 0 : i32
    %c0_i32_1 = arith.constant 0 : i32
    return %c0_i32, %c0_i32_0 : i32, i32
  }
  func.func @transform_10(%arg0: i32, %arg1: i32) -> (i32, i32) {
    %c0_i32 = arith.constant 0 : i32
    %c0_i32_0 = arith.constant 0 : i32
    %c0_i32_1 = arith.constant 0 : i32
    return %c0_i32, %c0_i32_0 : i32, i32
  }
  func.func @transform_11(%arg0: i32, %arg1: i32) -> (i32, i32) {
    %c0_i32 = arith.constant 0 : i32
    %c0_i32_0 = arith.constant 0 : i32
    %c0_i32_1 = arith.constant 0 : i32
    return %c0_i32, %c0_i32_0 : i32, i32
  }
  func.func @transform_12(%arg0: i32, %arg1: i32) -> (i32, i32, i32) {
    %c0_i32 = arith.constant 0 : i32
    %c0_i32_0 = arith.constant 0 : i32
    return %arg0, %arg1, %c0_i32 : i32, i32, i32
  }
}

module attributes {stable_mosaic.version = 11 : i64} {
  func.func @mha_ln_kernel(%arg0: i32, %arg1: i32, %arg2: memref<1x16x64xbf16, #tpu.memory_space<vmem>>, %arg3: memref<1x8x64xbf16, #tpu.memory_space<vmem>>, %arg4: memref<64x64xbf16, #tpu.memory_space<vmem>>, %arg5: memref<64x64xbf16, #tpu.memory_space<vmem>>, %arg6: memref<64x64xbf16, #tpu.memory_space<vmem>>, %arg7: memref<64x64xbf16, #tpu.memory_space<vmem>>, %arg8: memref<1x64xf32, #tpu.memory_space<vmem>>, %arg9: memref<1x64xf32, #tpu.memory_space<vmem>>, %arg10: memref<1x64xf32, #tpu.memory_space<vmem>>, %arg11: memref<1x64xf32, #tpu.memory_space<vmem>>, %arg12: memref<1x64xf32, #tpu.memory_space<vmem>>, %arg13: memref<1x64xf32, #tpu.memory_space<vmem>>, %arg14: memref<1x16x64xbf16, #tpu.memory_space<vmem>>) attributes {dimension_semantics = [#tpu.dimension_semantics<parallel>, #tpu.dimension_semantics<parallel>], iteration_bounds = array<i64: 2, 1>, scalar_prefetch = 0 : i64, scratch_operands = 0 : i64, tpu.core_type = #tpu.core_type<tc>, window_params = [{transform_indices = @transform_0, window_bounds = array<i64: 1, 16, 64>}, {transform_indices = @transform_1, window_bounds = array<i64: 1, 8, 64>}, {pipeline_mode = #tpu.pipeline_mode<synchronous>, transform_indices = @transform_2, window_bounds = array<i64: 64, 64>}, {pipeline_mode = #tpu.pipeline_mode<synchronous>, transform_indices = @transform_3, window_bounds = array<i64: 64, 64>}, {pipeline_mode = #tpu.pipeline_mode<synchronous>, transform_indices = @transform_4, window_bounds = array<i64: 64, 64>}, {pipeline_mode = #tpu.pipeline_mode<synchronous>, transform_indices = @transform_5, window_bounds = array<i64: 64, 64>}, {pipeline_mode = #tpu.pipeline_mode<synchronous>, transform_indices = @transform_6, window_bounds = array<i64: 1, 64>}, {pipeline_mode = #tpu.pipeline_mode<synchronous>, transform_indices = @transform_7, window_bounds = array<i64: 1, 64>}, {pipeline_mode = #tpu.pipeline_mode<synchronous>, transform_indices = @transform_8, window_bounds = array<i64: 1, 64>}, {pipeline_mode = #tpu.pipeline_mode<synchronous>, transform_indices = @transform_9, window_bounds = array<i64: 1, 64>}, {pipeline_mode = #tpu.pipeline_mode<synchronous>, transform_indices = @transform_10, window_bounds = array<i64: 1, 64>}, {pipeline_mode = #tpu.pipeline_mode<synchronous>, transform_indices = @transform_11, window_bounds = array<i64: 1, 64>}, {transform_indices = @transform_12, window_bounds = array<i64: 1, 16, 64>}]} {
    %c0 = arith.constant 0 : index
    %c0_0 = arith.constant 0 : index
    %c0_1 = arith.constant 0 : index
    %0 = vector.load %arg2[%c0, %c0_0, %c0_1] : memref<1x16x64xbf16, #tpu.memory_space<vmem>>, vector<1x16x64xbf16>
    %c0_2 = arith.constant 0 : index
    %c0_3 = arith.constant 0 : index
    %c0_4 = arith.constant 0 : index
    %1 = vector.load %arg3[%c0_2, %c0_3, %c0_4] : memref<1x8x64xbf16, #tpu.memory_space<vmem>>, vector<1x8x64xbf16>
    %2 = vector.shape_cast %0 : vector<1x16x64xbf16> to vector<16x64xbf16>
    %3 = vector.shape_cast %1 : vector<1x8x64xbf16> to vector<8x64xbf16>
    %c0_5 = arith.constant 0 : index
    %c0_6 = arith.constant 0 : index
    %4 = vector.load %arg4[%c0_5, %c0_6] : memref<64x64xbf16, #tpu.memory_space<vmem>>, vector<64x64xbf16>
    %cst = arith.constant dense<0.000000e+00> : vector<16x64xf32>
    %5 = tpu.matmul %2, %4, %cst {dimension_numbers = #tpu.dot_dimension_numbers<[1], [0], [0], [1], [0, 0, 1, 1], [], []>} : vector<16x64xbf16>, vector<64x64xbf16>, vector<16x64xf32> -> vector<16x64xf32>
    %c0_7 = arith.constant 0 : index
    %c0_8 = arith.constant 0 : index
    %6 = vector.load %arg8[%c0_7, %c0_8] : memref<1x64xf32, #tpu.memory_space<vmem>>, vector<1x64xf32>
    %7 = vector.broadcast %6 : vector<1x64xf32> to vector<16x64xf32>
    %8 = arith.addf %5, %7 : vector<16x64xf32>
    %c0_9 = arith.constant 0 : index
    %c0_10 = arith.constant 0 : index
    %9 = vector.load %arg5[%c0_9, %c0_10] : memref<64x64xbf16, #tpu.memory_space<vmem>>, vector<64x64xbf16>
    %cst_11 = arith.constant dense<0.000000e+00> : vector<8x64xf32>
    %10 = tpu.matmul %3, %9, %cst_11 {dimension_numbers = #tpu.dot_dimension_numbers<[1], [0], [0], [1], [0, 0, 1, 1], [], []>} : vector<8x64xbf16>, vector<64x64xbf16>, vector<8x64xf32> -> vector<8x64xf32>
    %c0_12 = arith.constant 0 : index
    %c0_13 = arith.constant 0 : index
    %11 = vector.load %arg9[%c0_12, %c0_13] : memref<1x64xf32, #tpu.memory_space<vmem>>, vector<1x64xf32>
    %12 = vector.broadcast %11 : vector<1x64xf32> to vector<8x64xf32>
    %13 = arith.addf %10, %12 : vector<8x64xf32>
    %c0_14 = arith.constant 0 : index
    %c0_15 = arith.constant 0 : index
    %14 = vector.load %arg6[%c0_14, %c0_15] : memref<64x64xbf16, #tpu.memory_space<vmem>>, vector<64x64xbf16>
    %cst_16 = arith.constant dense<0.000000e+00> : vector<8x64xf32>
    %15 = tpu.matmul %3, %14, %cst_16 {dimension_numbers = #tpu.dot_dimension_numbers<[1], [0], [0], [1], [0, 0, 1, 1], [], []>} : vector<8x64xbf16>, vector<64x64xbf16>, vector<8x64xf32> -> vector<8x64xf32>
    %c0_17 = arith.constant 0 : index
    %c0_18 = arith.constant 0 : index
    %16 = vector.load %arg10[%c0_17, %c0_18] : memref<1x64xf32, #tpu.memory_space<vmem>>, vector<1x64xf32>
    %17 = vector.broadcast %16 : vector<1x64xf32> to vector<8x64xf32>
    %18 = arith.addf %15, %17 : vector<8x64xf32>
    %19 = vector.shape_cast %8 : vector<16x64xf32> to vector<1x16x64xf32>
    %20 = arith.truncf %19 : vector<1x16x64xf32> to vector<1x16x64xbf16>
    %21 = vector.shape_cast %13 : vector<8x64xf32> to vector<1x8x64xf32>
    %22 = arith.truncf %21 : vector<1x8x64xf32> to vector<1x8x64xbf16>
    %23 = vector.shape_cast %18 : vector<8x64xf32> to vector<1x8x64xf32>
    %24 = arith.truncf %23 : vector<1x8x64xf32> to vector<1x8x64xbf16>
    %25 = vector.extract_strided_slice %20 {offsets = [0, 0, 0], sizes = [1, 16, 8], strides = [1, 1, 1]} : vector<1x16x64xbf16> to vector<1x16x8xbf16>
    %26 = vector.extract_strided_slice %22 {offsets = [0, 0, 0], sizes = [1, 8, 8], strides = [1, 1, 1]} : vector<1x8x64xbf16> to vector<1x8x8xbf16>
    "tpu.trace_start"() <{level = 10 : i32, message = "bqd,bkd->bqk"}> : () -> ()
    %cst_19 = arith.constant dense<0.000000e+00> : vector<1x16x8xf32>
    %27 = tpu.matmul %25, %26, %cst_19 {dimension_numbers = #tpu.dot_dimension_numbers<[2], [2], [1], [1], [0, 0, 0, 1, 1, 1], [0], [0]>} : vector<1x16x8xbf16>, vector<1x8x8xbf16>, vector<1x16x8xf32> -> vector<1x16x8xf32>
    "tpu.trace_stop"() : () -> ()
    %cst_20 = arith.constant dense<0xFF800000> : vector<1x16xf32>
    %28 = vector.multi_reduction <maximumf>, %27, %cst_20 [2] : vector<1x16x8xf32> to vector<1x16xf32>
    %29 = vector.shape_cast %28 : vector<1x16xf32> to vector<1x16x1xf32>
    %30 = vector.broadcast %29 : vector<1x16x1xf32> to vector<1x16x8xf32>
    %31 = arith.subf %27, %30 : vector<1x16x8xf32>
    %32 = math.exp %31 : vector<1x16x8xf32>
    %cst_21 = arith.constant dense<0.000000e+00> : vector<1x16xf32>
    %33 = vector.multi_reduction <add>, %32, %cst_21 [2] : vector<1x16x8xf32> to vector<1x16xf32>
    %34 = vector.shape_cast %33 : vector<1x16xf32> to vector<1x16x1xf32>
    %35 = arith.truncf %32 : vector<1x16x8xf32> to vector<1x16x8xbf16>
    %36 = vector.extract_strided_slice %24 {offsets = [0, 0, 0], sizes = [1, 8, 8], strides = [1, 1, 1]} : vector<1x8x64xbf16> to vector<1x8x8xbf16>
    "tpu.trace_start"() <{level = 10 : i32, message = "bqk,bkd->bqd"}> : () -> ()
    %cst_22 = arith.constant dense<0.000000e+00> : vector<1x16x8xf32>
    %37 = tpu.matmul %35, %36, %cst_22 {dimension_numbers = #tpu.dot_dimension_numbers<[2], [1], [1], [2], [0, 0, 0, 1, 1, 2], [0], [0]>} : vector<1x16x8xbf16>, vector<1x8x8xbf16>, vector<1x16x8xf32> -> vector<1x16x8xf32>
    "tpu.trace_stop"() : () -> ()
    %38 = tpu.reciprocal %34 : vector<1x16x1xf32> -> vector<1x16x1xf32>
    %39 = vector.broadcast %38 : vector<1x16x1xf32> to vector<1x16x8xf32>
    %40 = arith.mulf %37, %39 : vector<1x16x8xf32>
    %41 = vector.extract_strided_slice %20 {offsets = [0, 0, 8], sizes = [1, 16, 8], strides = [1, 1, 1]} : vector<1x16x64xbf16> to vector<1x16x8xbf16>
    %42 = vector.extract_strided_slice %22 {offsets = [0, 0, 8], sizes = [1, 8, 8], strides = [1, 1, 1]} : vector<1x8x64xbf16> to vector<1x8x8xbf16>
    "tpu.trace_start"() <{level = 10 : i32, message = "bqd,bkd->bqk"}> : () -> ()
    %cst_23 = arith.constant dense<0.000000e+00> : vector<1x16x8xf32>
    %43 = tpu.matmul %41, %42, %cst_23 {dimension_numbers = #tpu.dot_dimension_numbers<[2], [2], [1], [1], [0, 0, 0, 1, 1, 1], [0], [0]>} : vector<1x16x8xbf16>, vector<1x8x8xbf16>, vector<1x16x8xf32> -> vector<1x16x8xf32>
    "tpu.trace_stop"() : () -> ()
    %cst_24 = arith.constant dense<0xFF800000> : vector<1x16xf32>
    %44 = vector.multi_reduction <maximumf>, %43, %cst_24 [2] : vector<1x16x8xf32> to vector<1x16xf32>
    %45 = vector.shape_cast %44 : vector<1x16xf32> to vector<1x16x1xf32>
    %46 = vector.broadcast %45 : vector<1x16x1xf32> to vector<1x16x8xf32>
    %47 = arith.subf %43, %46 : vector<1x16x8xf32>
    %48 = math.exp %47 : vector<1x16x8xf32>
    %cst_25 = arith.constant dense<0.000000e+00> : vector<1x16xf32>
    %49 = vector.multi_reduction <add>, %48, %cst_25 [2] : vector<1x16x8xf32> to vector<1x16xf32>
    %50 = vector.shape_cast %49 : vector<1x16xf32> to vector<1x16x1xf32>
    %51 = arith.truncf %48 : vector<1x16x8xf32> to vector<1x16x8xbf16>
    %52 = vector.extract_strided_slice %24 {offsets = [0, 0, 8], sizes = [1, 8, 8], strides = [1, 1, 1]} : vector<1x8x64xbf16> to vector<1x8x8xbf16>
    "tpu.trace_start"() <{level = 10 : i32, message = "bqk,bkd->bqd"}> : () -> ()
    %cst_26 = arith.constant dense<0.000000e+00> : vector<1x16x8xf32>
    %53 = tpu.matmul %51, %52, %cst_26 {dimension_numbers = #tpu.dot_dimension_numbers<[2], [1], [1], [2], [0, 0, 0, 1, 1, 2], [0], [0]>} : vector<1x16x8xbf16>, vector<1x8x8xbf16>, vector<1x16x8xf32> -> vector<1x16x8xf32>
    "tpu.trace_stop"() : () -> ()
    %54 = tpu.reciprocal %50 : vector<1x16x1xf32> -> vector<1x16x1xf32>
    %55 = vector.broadcast %54 : vector<1x16x1xf32> to vector<1x16x8xf32>
    %56 = arith.mulf %53, %55 : vector<1x16x8xf32>
    %57 = vector.extract_strided_slice %20 {offsets = [0, 0, 16], sizes = [1, 16, 8], strides = [1, 1, 1]} : vector<1x16x64xbf16> to vector<1x16x8xbf16>
    %58 = vector.extract_strided_slice %22 {offsets = [0, 0, 16], sizes = [1, 8, 8], strides = [1, 1, 1]} : vector<1x8x64xbf16> to vector<1x8x8xbf16>
    "tpu.trace_start"() <{level = 10 : i32, message = "bqd,bkd->bqk"}> : () -> ()
    %cst_27 = arith.constant dense<0.000000e+00> : vector<1x16x8xf32>
    %59 = tpu.matmul %57, %58, %cst_27 {dimension_numbers = #tpu.dot_dimension_numbers<[2], [2], [1], [1], [0, 0, 0, 1, 1, 1], [0], [0]>} : vector<1x16x8xbf16>, vector<1x8x8xbf16>, vector<1x16x8xf32> -> vector<1x16x8xf32>
    "tpu.trace_stop"() : () -> ()
    %cst_28 = arith.constant dense<0xFF800000> : vector<1x16xf32>
    %60 = vector.multi_reduction <maximumf>, %59, %cst_28 [2] : vector<1x16x8xf32> to vector<1x16xf32>
    %61 = vector.shape_cast %60 : vector<1x16xf32> to vector<1x16x1xf32>
    %62 = vector.broadcast %61 : vector<1x16x1xf32> to vector<1x16x8xf32>
    %63 = arith.subf %59, %62 : vector<1x16x8xf32>
    %64 = math.exp %63 : vector<1x16x8xf32>
    %cst_29 = arith.constant dense<0.000000e+00> : vector<1x16xf32>
    %65 = vector.multi_reduction <add>, %64, %cst_29 [2] : vector<1x16x8xf32> to vector<1x16xf32>
    %66 = vector.shape_cast %65 : vector<1x16xf32> to vector<1x16x1xf32>
    %67 = arith.truncf %64 : vector<1x16x8xf32> to vector<1x16x8xbf16>
    %68 = vector.extract_strided_slice %24 {offsets = [0, 0, 16], sizes = [1, 8, 8], strides = [1, 1, 1]} : vector<1x8x64xbf16> to vector<1x8x8xbf16>
    "tpu.trace_start"() <{level = 10 : i32, message = "bqk,bkd->bqd"}> : () -> ()
    %cst_30 = arith.constant dense<0.000000e+00> : vector<1x16x8xf32>
    %69 = tpu.matmul %67, %68, %cst_30 {dimension_numbers = #tpu.dot_dimension_numbers<[2], [1], [1], [2], [0, 0, 0, 1, 1, 2], [0], [0]>} : vector<1x16x8xbf16>, vector<1x8x8xbf16>, vector<1x16x8xf32> -> vector<1x16x8xf32>
    "tpu.trace_stop"() : () -> ()
    %70 = tpu.reciprocal %66 : vector<1x16x1xf32> -> vector<1x16x1xf32>
    %71 = vector.broadcast %70 : vector<1x16x1xf32> to vector<1x16x8xf32>
    %72 = arith.mulf %69, %71 : vector<1x16x8xf32>
    %73 = vector.extract_strided_slice %20 {offsets = [0, 0, 24], sizes = [1, 16, 8], strides = [1, 1, 1]} : vector<1x16x64xbf16> to vector<1x16x8xbf16>
    %74 = vector.extract_strided_slice %22 {offsets = [0, 0, 24], sizes = [1, 8, 8], strides = [1, 1, 1]} : vector<1x8x64xbf16> to vector<1x8x8xbf16>
    "tpu.trace_start"() <{level = 10 : i32, message = "bqd,bkd->bqk"}> : () -> ()
    %cst_31 = arith.constant dense<0.000000e+00> : vector<1x16x8xf32>
    %75 = tpu.matmul %73, %74, %cst_31 {dimension_numbers = #tpu.dot_dimension_numbers<[2], [2], [1], [1], [0, 0, 0, 1, 1, 1], [0], [0]>} : vector<1x16x8xbf16>, vector<1x8x8xbf16>, vector<1x16x8xf32> -> vector<1x16x8xf32>
    "tpu.trace_stop"() : () -> ()
    %cst_32 = arith.constant dense<0xFF800000> : vector<1x16xf32>
    %76 = vector.multi_reduction <maximumf>, %75, %cst_32 [2] : vector<1x16x8xf32> to vector<1x16xf32>
    %77 = vector.shape_cast %76 : vector<1x16xf32> to vector<1x16x1xf32>
    %78 = vector.broadcast %77 : vector<1x16x1xf32> to vector<1x16x8xf32>
    %79 = arith.subf %75, %78 : vector<1x16x8xf32>
    %80 = math.exp %79 : vector<1x16x8xf32>
    %cst_33 = arith.constant dense<0.000000e+00> : vector<1x16xf32>
    %81 = vector.multi_reduction <add>, %80, %cst_33 [2] : vector<1x16x8xf32> to vector<1x16xf32>
    %82 = vector.shape_cast %81 : vector<1x16xf32> to vector<1x16x1xf32>
    %83 = arith.truncf %80 : vector<1x16x8xf32> to vector<1x16x8xbf16>
    %84 = vector.extract_strided_slice %24 {offsets = [0, 0, 24], sizes = [1, 8, 8], strides = [1, 1, 1]} : vector<1x8x64xbf16> to vector<1x8x8xbf16>
    "tpu.trace_start"() <{level = 10 : i32, message = "bqk,bkd->bqd"}> : () -> ()
    %cst_34 = arith.constant dense<0.000000e+00> : vector<1x16x8xf32>
    %85 = tpu.matmul %83, %84, %cst_34 {dimension_numbers = #tpu.dot_dimension_numbers<[2], [1], [1], [2], [0, 0, 0, 1, 1, 2], [0], [0]>} : vector<1x16x8xbf16>, vector<1x8x8xbf16>, vector<1x16x8xf32> -> vector<1x16x8xf32>
    "tpu.trace_stop"() : () -> ()
    %86 = tpu.reciprocal %82 : vector<1x16x1xf32> -> vector<1x16x1xf32>
    %87 = vector.broadcast %86 : vector<1x16x1xf32> to vector<1x16x8xf32>
    %88 = arith.mulf %85, %87 : vector<1x16x8xf32>
    %89 = vector.extract_strided_slice %20 {offsets = [0, 0, 32], sizes = [1, 16, 8], strides = [1, 1, 1]} : vector<1x16x64xbf16> to vector<1x16x8xbf16>
    %90 = vector.extract_strided_slice %22 {offsets = [0, 0, 32], sizes = [1, 8, 8], strides = [1, 1, 1]} : vector<1x8x64xbf16> to vector<1x8x8xbf16>
    "tpu.trace_start"() <{level = 10 : i32, message = "bqd,bkd->bqk"}> : () -> ()
    %cst_35 = arith.constant dense<0.000000e+00> : vector<1x16x8xf32>
    %91 = tpu.matmul %89, %90, %cst_35 {dimension_numbers = #tpu.dot_dimension_numbers<[2], [2], [1], [1], [0, 0, 0, 1, 1, 1], [0], [0]>} : vector<1x16x8xbf16>, vector<1x8x8xbf16>, vector<1x16x8xf32> -> vector<1x16x8xf32>
    "tpu.trace_stop"() : () -> ()
    %cst_36 = arith.constant dense<0xFF800000> : vector<1x16xf32>
    %92 = vector.multi_reduction <maximumf>, %91, %cst_36 [2] : vector<1x16x8xf32> to vector<1x16xf32>
    %93 = vector.shape_cast %92 : vector<1x16xf32> to vector<1x16x1xf32>
    %94 = vector.broadcast %93 : vector<1x16x1xf32> to vector<1x16x8xf32>
    %95 = arith.subf %91, %94 : vector<1x16x8xf32>
    %96 = math.exp %95 : vector<1x16x8xf32>
    %cst_37 = arith.constant dense<0.000000e+00> : vector<1x16xf32>
    %97 = vector.multi_reduction <add>, %96, %cst_37 [2] : vector<1x16x8xf32> to vector<1x16xf32>
    %98 = vector.shape_cast %97 : vector<1x16xf32> to vector<1x16x1xf32>
    %99 = arith.truncf %96 : vector<1x16x8xf32> to vector<1x16x8xbf16>
    %100 = vector.extract_strided_slice %24 {offsets = [0, 0, 32], sizes = [1, 8, 8], strides = [1, 1, 1]} : vector<1x8x64xbf16> to vector<1x8x8xbf16>
    "tpu.trace_start"() <{level = 10 : i32, message = "bqk,bkd->bqd"}> : () -> ()
    %cst_38 = arith.constant dense<0.000000e+00> : vector<1x16x8xf32>
    %101 = tpu.matmul %99, %100, %cst_38 {dimension_numbers = #tpu.dot_dimension_numbers<[2], [1], [1], [2], [0, 0, 0, 1, 1, 2], [0], [0]>} : vector<1x16x8xbf16>, vector<1x8x8xbf16>, vector<1x16x8xf32> -> vector<1x16x8xf32>
    "tpu.trace_stop"() : () -> ()
    %102 = tpu.reciprocal %98 : vector<1x16x1xf32> -> vector<1x16x1xf32>
    %103 = vector.broadcast %102 : vector<1x16x1xf32> to vector<1x16x8xf32>
    %104 = arith.mulf %101, %103 : vector<1x16x8xf32>
    %105 = vector.extract_strided_slice %20 {offsets = [0, 0, 40], sizes = [1, 16, 8], strides = [1, 1, 1]} : vector<1x16x64xbf16> to vector<1x16x8xbf16>
    %106 = vector.extract_strided_slice %22 {offsets = [0, 0, 40], sizes = [1, 8, 8], strides = [1, 1, 1]} : vector<1x8x64xbf16> to vector<1x8x8xbf16>
    "tpu.trace_start"() <{level = 10 : i32, message = "bqd,bkd->bqk"}> : () -> ()
    %cst_39 = arith.constant dense<0.000000e+00> : vector<1x16x8xf32>
    %107 = tpu.matmul %105, %106, %cst_39 {dimension_numbers = #tpu.dot_dimension_numbers<[2], [2], [1], [1], [0, 0, 0, 1, 1, 1], [0], [0]>} : vector<1x16x8xbf16>, vector<1x8x8xbf16>, vector<1x16x8xf32> -> vector<1x16x8xf32>
    "tpu.trace_stop"() : () -> ()
    %cst_40 = arith.constant dense<0xFF800000> : vector<1x16xf32>
    %108 = vector.multi_reduction <maximumf>, %107, %cst_40 [2] : vector<1x16x8xf32> to vector<1x16xf32>
    %109 = vector.shape_cast %108 : vector<1x16xf32> to vector<1x16x1xf32>
    %110 = vector.broadcast %109 : vector<1x16x1xf32> to vector<1x16x8xf32>
    %111 = arith.subf %107, %110 : vector<1x16x8xf32>
    %112 = math.exp %111 : vector<1x16x8xf32>
    %cst_41 = arith.constant dense<0.000000e+00> : vector<1x16xf32>
    %113 = vector.multi_reduction <add>, %112, %cst_41 [2] : vector<1x16x8xf32> to vector<1x16xf32>
    %114 = vector.shape_cast %113 : vector<1x16xf32> to vector<1x16x1xf32>
    %115 = arith.truncf %112 : vector<1x16x8xf32> to vector<1x16x8xbf16>
    %116 = vector.extract_strided_slice %24 {offsets = [0, 0, 40], sizes = [1, 8, 8], strides = [1, 1, 1]} : vector<1x8x64xbf16> to vector<1x8x8xbf16>
    "tpu.trace_start"() <{level = 10 : i32, message = "bqk,bkd->bqd"}> : () -> ()
    %cst_42 = arith.constant dense<0.000000e+00> : vector<1x16x8xf32>
    %117 = tpu.matmul %115, %116, %cst_42 {dimension_numbers = #tpu.dot_dimension_numbers<[2], [1], [1], [2], [0, 0, 0, 1, 1, 2], [0], [0]>} : vector<1x16x8xbf16>, vector<1x8x8xbf16>, vector<1x16x8xf32> -> vector<1x16x8xf32>
    "tpu.trace_stop"() : () -> ()
    %118 = tpu.reciprocal %114 : vector<1x16x1xf32> -> vector<1x16x1xf32>
    %119 = vector.broadcast %118 : vector<1x16x1xf32> to vector<1x16x8xf32>
    %120 = arith.mulf %117, %119 : vector<1x16x8xf32>
    %121 = vector.extract_strided_slice %20 {offsets = [0, 0, 48], sizes = [1, 16, 8], strides = [1, 1, 1]} : vector<1x16x64xbf16> to vector<1x16x8xbf16>
    %122 = vector.extract_strided_slice %22 {offsets = [0, 0, 48], sizes = [1, 8, 8], strides = [1, 1, 1]} : vector<1x8x64xbf16> to vector<1x8x8xbf16>
    "tpu.trace_start"() <{level = 10 : i32, message = "bqd,bkd->bqk"}> : () -> ()
    %cst_43 = arith.constant dense<0.000000e+00> : vector<1x16x8xf32>
    %123 = tpu.matmul %121, %122, %cst_43 {dimension_numbers = #tpu.dot_dimension_numbers<[2], [2], [1], [1], [0, 0, 0, 1, 1, 1], [0], [0]>} : vector<1x16x8xbf16>, vector<1x8x8xbf16>, vector<1x16x8xf32> -> vector<1x16x8xf32>
    "tpu.trace_stop"() : () -> ()
    %cst_44 = arith.constant dense<0xFF800000> : vector<1x16xf32>
    %124 = vector.multi_reduction <maximumf>, %123, %cst_44 [2] : vector<1x16x8xf32> to vector<1x16xf32>
    %125 = vector.shape_cast %124 : vector<1x16xf32> to vector<1x16x1xf32>
    %126 = vector.broadcast %125 : vector<1x16x1xf32> to vector<1x16x8xf32>
    %127 = arith.subf %123, %126 : vector<1x16x8xf32>
    %128 = math.exp %127 : vector<1x16x8xf32>
    %cst_45 = arith.constant dense<0.000000e+00> : vector<1x16xf32>
    %129 = vector.multi_reduction <add>, %128, %cst_45 [2] : vector<1x16x8xf32> to vector<1x16xf32>
    %130 = vector.shape_cast %129 : vector<1x16xf32> to vector<1x16x1xf32>
    %131 = arith.truncf %128 : vector<1x16x8xf32> to vector<1x16x8xbf16>
    %132 = vector.extract_strided_slice %24 {offsets = [0, 0, 48], sizes = [1, 8, 8], strides = [1, 1, 1]} : vector<1x8x64xbf16> to vector<1x8x8xbf16>
    "tpu.trace_start"() <{level = 10 : i32, message = "bqk,bkd->bqd"}> : () -> ()
    %cst_46 = arith.constant dense<0.000000e+00> : vector<1x16x8xf32>
    %133 = tpu.matmul %131, %132, %cst_46 {dimension_numbers = #tpu.dot_dimension_numbers<[2], [1], [1], [2], [0, 0, 0, 1, 1, 2], [0], [0]>} : vector<1x16x8xbf16>, vector<1x8x8xbf16>, vector<1x16x8xf32> -> vector<1x16x8xf32>
    "tpu.trace_stop"() : () -> ()
    %134 = tpu.reciprocal %130 : vector<1x16x1xf32> -> vector<1x16x1xf32>
    %135 = vector.broadcast %134 : vector<1x16x1xf32> to vector<1x16x8xf32>
    %136 = arith.mulf %133, %135 : vector<1x16x8xf32>
    %137 = vector.extract_strided_slice %20 {offsets = [0, 0, 56], sizes = [1, 16, 8], strides = [1, 1, 1]} : vector<1x16x64xbf16> to vector<1x16x8xbf16>
    %138 = vector.extract_strided_slice %22 {offsets = [0, 0, 56], sizes = [1, 8, 8], strides = [1, 1, 1]} : vector<1x8x64xbf16> to vector<1x8x8xbf16>
    "tpu.trace_start"() <{level = 10 : i32, message = "bqd,bkd->bqk"}> : () -> ()
    %cst_47 = arith.constant dense<0.000000e+00> : vector<1x16x8xf32>
    %139 = tpu.matmul %137, %138, %cst_47 {dimension_numbers = #tpu.dot_dimension_numbers<[2], [2], [1], [1], [0, 0, 0, 1, 1, 1], [0], [0]>} : vector<1x16x8xbf16>, vector<1x8x8xbf16>, vector<1x16x8xf32> -> vector<1x16x8xf32>
    "tpu.trace_stop"() : () -> ()
    %cst_48 = arith.constant dense<0xFF800000> : vector<1x16xf32>
    %140 = vector.multi_reduction <maximumf>, %139, %cst_48 [2] : vector<1x16x8xf32> to vector<1x16xf32>
    %141 = vector.shape_cast %140 : vector<1x16xf32> to vector<1x16x1xf32>
    %142 = vector.broadcast %141 : vector<1x16x1xf32> to vector<1x16x8xf32>
    %143 = arith.subf %139, %142 : vector<1x16x8xf32>
    %144 = math.exp %143 : vector<1x16x8xf32>
    %cst_49 = arith.constant dense<0.000000e+00> : vector<1x16xf32>
    %145 = vector.multi_reduction <add>, %144, %cst_49 [2] : vector<1x16x8xf32> to vector<1x16xf32>
    %146 = vector.shape_cast %145 : vector<1x16xf32> to vector<1x16x1xf32>
    %147 = arith.truncf %144 : vector<1x16x8xf32> to vector<1x16x8xbf16>
    %148 = vector.extract_strided_slice %24 {offsets = [0, 0, 56], sizes = [1, 8, 8], strides = [1, 1, 1]} : vector<1x8x64xbf16> to vector<1x8x8xbf16>
    "tpu.trace_start"() <{level = 10 : i32, message = "bqk,bkd->bqd"}> : () -> ()
    %cst_50 = arith.constant dense<0.000000e+00> : vector<1x16x8xf32>
    %149 = tpu.matmul %147, %148, %cst_50 {dimension_numbers = #tpu.dot_dimension_numbers<[2], [1], [1], [2], [0, 0, 0, 1, 1, 2], [0], [0]>} : vector<1x16x8xbf16>, vector<1x8x8xbf16>, vector<1x16x8xf32> -> vector<1x16x8xf32>
    "tpu.trace_stop"() : () -> ()
    %150 = tpu.reciprocal %146 : vector<1x16x1xf32> -> vector<1x16x1xf32>
    %151 = vector.broadcast %150 : vector<1x16x1xf32> to vector<1x16x8xf32>
    %152 = arith.mulf %149, %151 : vector<1x16x8xf32>
    %153 = tpu.concatenate %40, %56, %72, %88, %104, %120, %136, %152 in 2 : vector<1x16x8xf32>, vector<1x16x8xf32>, vector<1x16x8xf32>, vector<1x16x8xf32>, vector<1x16x8xf32>, vector<1x16x8xf32>, vector<1x16x8xf32>, vector<1x16x8xf32> -> vector<1x16x64xf32>
    %154 = vector.shape_cast %153 : vector<1x16x64xf32> to vector<16x64xf32>
    %155 = arith.truncf %154 : vector<16x64xf32> to vector<16x64xbf16>
    %c0_51 = arith.constant 0 : index
    %c0_52 = arith.constant 0 : index
    %156 = vector.load %arg7[%c0_51, %c0_52] : memref<64x64xbf16, #tpu.memory_space<vmem>>, vector<64x64xbf16>
    %cst_53 = arith.constant dense<0.000000e+00> : vector<16x64xf32>
    %157 = tpu.matmul %155, %156, %cst_53 {dimension_numbers = #tpu.dot_dimension_numbers<[1], [0], [0], [1], [0, 0, 1, 1], [], []>} : vector<16x64xbf16>, vector<64x64xbf16>, vector<16x64xf32> -> vector<16x64xf32>
    %c0_54 = arith.constant 0 : index
    %c0_55 = arith.constant 0 : index
    %158 = vector.load %arg11[%c0_54, %c0_55] : memref<1x64xf32, #tpu.memory_space<vmem>>, vector<1x64xf32>
    %159 = vector.broadcast %158 : vector<1x64xf32> to vector<16x64xf32>
    %160 = arith.addf %157, %159 : vector<16x64xf32>
    %161 = vector.shape_cast %0 : vector<1x16x64xbf16> to vector<16x64xbf16>
    %162 = arith.extf %161 : vector<16x64xbf16> to vector<16x64xf32>
    %163 = arith.addf %162, %160 : vector<16x64xf32>
    %cst_56 = arith.constant dense<0.000000e+00> : vector<16xf32>
    %164 = vector.multi_reduction <add>, %163, %cst_56 [1] : vector<16x64xf32> to vector<16xf32>
    %165 = vector.shape_cast %164 : vector<16xf32> to vector<16x1xf32>
    %cst_57 = arith.constant 6.400000e+01 : f32
    %166 = vector.broadcast %cst_57 : f32 to vector<16x1xf32>
    %167 = arith.divf %165, %166 : vector<16x1xf32>
    %168 = vector.broadcast %167 : vector<16x1xf32> to vector<16x64xf32>
    %169 = arith.subf %163, %168 : vector<16x64xf32>
    %170 = arith.mulf %169, %169 : vector<16x64xf32>
    %cst_58 = arith.constant dense<0.000000e+00> : vector<16xf32>
    %171 = vector.multi_reduction <add>, %170, %cst_58 [1] : vector<16x64xf32> to vector<16xf32>
    %172 = vector.shape_cast %171 : vector<16xf32> to vector<16x1xf32>
    %cst_59 = arith.constant 6.400000e+01 : f32
    %173 = vector.broadcast %cst_59 : f32 to vector<16x1xf32>
    %174 = arith.divf %172, %173 : vector<16x1xf32>
    %175 = vector.broadcast %167 : vector<16x1xf32> to vector<16x64xf32>
    %176 = arith.subf %163, %175 : vector<16x64xf32>
    %cst_60 = arith.constant 9.99999974E-6 : f32
    %177 = vector.broadcast %cst_60 : f32 to vector<16x1xf32>
    %178 = arith.addf %174, %177 : vector<16x1xf32>
    %179 = math.rsqrt %178 : vector<16x1xf32>
    %180 = vector.broadcast %179 : vector<16x1xf32> to vector<16x64xf32>
    %181 = arith.mulf %176, %180 : vector<16x64xf32>
    %c0_61 = arith.constant 0 : index
    %c0_62 = arith.constant 0 : index
    %182 = vector.load %arg12[%c0_61, %c0_62] : memref<1x64xf32, #tpu.memory_space<vmem>>, vector<1x64xf32>
    %183 = vector.broadcast %182 : vector<1x64xf32> to vector<16x64xf32>
    %184 = arith.mulf %181, %183 : vector<16x64xf32>
    %c0_63 = arith.constant 0 : index
    %c0_64 = arith.constant 0 : index
    %185 = vector.load %arg13[%c0_63, %c0_64] : memref<1x64xf32, #tpu.memory_space<vmem>>, vector<1x64xf32>
    %186 = vector.broadcast %185 : vector<1x64xf32> to vector<16x64xf32>
    %187 = arith.addf %184, %186 : vector<16x64xf32>
    %188 = vector.shape_cast %187 : vector<16x64xf32> to vector<1x16x64xf32>
    %189 = arith.truncf %188 : vector<1x16x64xf32> to vector<1x16x64xbf16>
    %c0_65 = arith.constant 0 : index
    %c0_66 = arith.constant 0 : index
    %c0_67 = arith.constant 0 : index
    %190 = vector.load %arg14[%c0_65, %c0_66, %c0_67] : memref<1x16x64xbf16, #tpu.memory_space<vmem>>, vector<1x16x64xbf16>
    tpu.vector_store %arg14[%c0_65, %c0_66, %c0_67], %189 {strides = array<i32>} : memref<1x16x64xbf16, #tpu.memory_space<vmem>>, vector<1x16x64xbf16>,
    return
  }
  func.func @transform_0(%arg0: i32, %arg1: i32) -> (i32, i32, i32) {
    %c0_i32 = arith.constant 0 : i32
    %c0_i32_0 = arith.constant 0 : i32
    return %arg0, %arg1, %c0_i32 : i32, i32, i32
  }
  func.func @transform_1(%arg0: i32, %arg1: i32) -> (i32, i32, i32) {
    %c0_i32 = arith.constant 0 : i32
    %c0_i32_0 = arith.constant 0 : i32
    %c0_i32_1 = arith.constant 0 : i32
    return %arg0, %c0_i32, %c0_i32_0 : i32, i32, i32
  }
  func.func @transform_2(%arg0: i32, %arg1: i32) -> (i32, i32) {
    %c0_i32 = arith.constant 0 : i32
    %c0_i32_0 = arith.constant 0 : i32
    %c0_i32_1 = arith.constant 0 : i32
    return %c0_i32, %c0_i32_0 : i32, i32
  }
  func.func @transform_3(%arg0: i32, %arg1: i32) -> (i32, i32) {
    %c0_i32 = arith.constant 0 : i32
    %c0_i32_0 = arith.constant 0 : i32
    %c0_i32_1 = arith.constant 0 : i32
    return %c0_i32, %c0_i32_0 : i32, i32
  }
  func.func @transform_4(%arg0: i32, %arg1: i32) -> (i32, i32) {
    %c0_i32 = arith.constant 0 : i32
    %c0_i32_0 = arith.constant 0 : i32
    %c0_i32_1 = arith.constant 0 : i32
    return %c0_i32, %c0_i32_0 : i32, i32
  }
  func.func @transform_5(%arg0: i32, %arg1: i32) -> (i32, i32) {
    %c0_i32 = arith.constant 0 : i32
    %c0_i32_0 = arith.constant 0 : i32
    %c0_i32_1 = arith.constant 0 : i32
    return %c0_i32, %c0_i32_0 : i32, i32
  }
  func.func @transform_6(%arg0: i32, %arg1: i32) -> (i32, i32) {
    %c0_i32 = arith.constant 0 : i32
    %c0_i32_0 = arith.constant 0 : i32
    %c0_i32_1 = arith.constant 0 : i32
    return %c0_i32, %c0_i32_0 : i32, i32
  }
  func.func @transform_7(%arg0: i32, %arg1: i32) -> (i32, i32) {
    %c0_i32 = arith.constant 0 : i32
    %c0_i32_0 = arith.constant 0 : i32
    %c0_i32_1 = arith.constant 0 : i32
    return %c0_i32, %c0_i32_0 : i32, i32
  }
  func.func @transform_8(%arg0: i32, %arg1: i32) -> (i32, i32) {
    %c0_i32 = arith.constant 0 : i32
    %c0_i32_0 = arith.constant 0 : i32
    %c0_i32_1 = arith.constant 0 : i32
    return %c0_i32, %c0_i32_0 : i32, i32
  }
  func.func @transform_9(%arg0: i32, %arg1: i32) -> (i32, i32) {
    %c0_i32 = arith.constant 0 : i32
    %c0_i32_0 = arith.constant 0 : i32
    %c0_i32_1 = arith.constant 0 : i32
    return %c0_i32, %c0_i32_0 : i32, i32
  }
  func.func @transform_10(%arg0: i32, %arg1: i32) -> (i32, i32) {
    %c0_i32 = arith.constant 0 : i32
    %c0_i32_0 = arith.constant 0 : i32
    %c0_i32_1 = arith.constant 0 : i32
    return %c0_i32, %c0_i32_0 : i32, i32
  }
  func.func @transform_11(%arg0: i32, %arg1: i32) -> (i32, i32) {
    %c0_i32 = arith.constant 0 : i32
    %c0_i32_0 = arith.constant 0 : i32
    %c0_i32_1 = arith.constant 0 : i32
    return %c0_i32, %c0_i32_0 : i32, i32
  }
  func.func @transform_12(%arg0: i32, %arg1: i32) -> (i32, i32, i32) {
    %c0_i32 = arith.constant 0 : i32
    %c0_i32_0 = arith.constant 0 : i32
    return %arg0, %arg1, %c0_i32 : i32, i32, i32
  }
}

module attributes {stable_mosaic.version = 11 : i64} {
  func.func @mha_ln_kernel(%arg0: i32, %arg1: i32, %arg2: memref<1x16x64xf32, #tpu.memory_space<vmem>>, %arg3: memref<1x16x64xf32, #tpu.memory_space<vmem>>, %arg4: memref<64x64xbf16, #tpu.memory_space<vmem>>, %arg5: memref<64x64xbf16, #tpu.memory_space<vmem>>, %arg6: memref<64x64xbf16, #tpu.memory_space<vmem>>, %arg7: memref<64x64xbf16, #tpu.memory_space<vmem>>, %arg8: memref<1x64xf32, #tpu.memory_space<vmem>>, %arg9: memref<1x64xf32, #tpu.memory_space<vmem>>, %arg10: memref<1x64xf32, #tpu.memory_space<vmem>>, %arg11: memref<1x64xf32, #tpu.memory_space<vmem>>, %arg12: memref<1x64xf32, #tpu.memory_space<vmem>>, %arg13: memref<1x64xf32, #tpu.memory_space<vmem>>, %arg14: memref<1x16x64xbf16, #tpu.memory_space<vmem>>) attributes {dimension_semantics = [#tpu.dimension_semantics<parallel>, #tpu.dimension_semantics<parallel>], iteration_bounds = array<i64: 2, 1>, scalar_prefetch = 0 : i64, scratch_operands = 0 : i64, tpu.core_type = #tpu.core_type<tc>, window_params = [{transform_indices = @transform_0, window_bounds = array<i64: 1, 16, 64>}, {transform_indices = @transform_1, window_bounds = array<i64: 1, 16, 64>}, {pipeline_mode = #tpu.pipeline_mode<synchronous>, transform_indices = @transform_2, window_bounds = array<i64: 64, 64>}, {pipeline_mode = #tpu.pipeline_mode<synchronous>, transform_indices = @transform_3, window_bounds = array<i64: 64, 64>}, {pipeline_mode = #tpu.pipeline_mode<synchronous>, transform_indices = @transform_4, window_bounds = array<i64: 64, 64>}, {pipeline_mode = #tpu.pipeline_mode<synchronous>, transform_indices = @transform_5, window_bounds = array<i64: 64, 64>}, {pipeline_mode = #tpu.pipeline_mode<synchronous>, transform_indices = @transform_6, window_bounds = array<i64: 1, 64>}, {pipeline_mode = #tpu.pipeline_mode<synchronous>, transform_indices = @transform_7, window_bounds = array<i64: 1, 64>}, {pipeline_mode = #tpu.pipeline_mode<synchronous>, transform_indices = @transform_8, window_bounds = array<i64: 1, 64>}, {pipeline_mode = #tpu.pipeline_mode<synchronous>, transform_indices = @transform_9, window_bounds = array<i64: 1, 64>}, {pipeline_mode = #tpu.pipeline_mode<synchronous>, transform_indices = @transform_10, window_bounds = array<i64: 1, 64>}, {pipeline_mode = #tpu.pipeline_mode<synchronous>, transform_indices = @transform_11, window_bounds = array<i64: 1, 64>}, {transform_indices = @transform_12, window_bounds = array<i64: 1, 16, 64>}]} {
    %c0 = arith.constant 0 : index
    %c0_0 = arith.constant 0 : index
    %c0_1 = arith.constant 0 : index
    %0 = vector.load %arg2[%c0, %c0_0, %c0_1] : memref<1x16x64xf32, #tpu.memory_space<vmem>>, vector<1x16x64xf32>
    %c0_2 = arith.constant 0 : index
    %c0_3 = arith.constant 0 : index
    %c0_4 = arith.constant 0 : index
    %1 = vector.load %arg3[%c0_2, %c0_3, %c0_4] : memref<1x16x64xf32, #tpu.memory_space<vmem>>, vector<1x16x64xf32>
    %2 = vector.shape_cast %0 : vector<1x16x64xf32> to vector<16x64xf32>
    %3 = arith.truncf %2 : vector<16x64xf32> to vector<16x64xbf16>
    %4 = vector.shape_cast %1 : vector<1x16x64xf32> to vector<16x64xf32>
    %5 = arith.truncf %4 : vector<16x64xf32> to vector<16x64xbf16>
    %c0_5 = arith.constant 0 : index
    %c0_6 = arith.constant 0 : index
    %6 = vector.load %arg4[%c0_5, %c0_6] : memref<64x64xbf16, #tpu.memory_space<vmem>>, vector<64x64xbf16>
    %cst = arith.constant dense<0.000000e+00> : vector<16x64xf32>
    %7 = tpu.matmul %3, %6, %cst {dimension_numbers = #tpu.dot_dimension_numbers<[1], [0], [0], [1], [0, 0, 1, 1], [], []>} : vector<16x64xbf16>, vector<64x64xbf16>, vector<16x64xf32> -> vector<16x64xf32>
    %c0_7 = arith.constant 0 : index
    %c0_8 = arith.constant 0 : index
    %8 = vector.load %arg8[%c0_7, %c0_8] : memref<1x64xf32, #tpu.memory_space<vmem>>, vector<1x64xf32>
    %9 = vector.broadcast %8 : vector<1x64xf32> to vector<16x64xf32>
    %10 = arith.addf %7, %9 : vector<16x64xf32>
    %c0_9 = arith.constant 0 : index
    %c0_10 = arith.constant 0 : index
    %11 = vector.load %arg5[%c0_9, %c0_10] : memref<64x64xbf16, #tpu.memory_space<vmem>>, vector<64x64xbf16>
    %cst_11 = arith.constant dense<0.000000e+00> : vector<16x64xf32>
    %12 = tpu.matmul %5, %11, %cst_11 {dimension_numbers = #tpu.dot_dimension_numbers<[1], [0], [0], [1], [0, 0, 1, 1], [], []>} : vector<16x64xbf16>, vector<64x64xbf16>, vector<16x64xf32> -> vector<16x64xf32>
    %c0_12 = arith.constant 0 : index
    %c0_13 = arith.constant 0 : index
    %13 = vector.load %arg9[%c0_12, %c0_13] : memref<1x64xf32, #tpu.memory_space<vmem>>, vector<1x64xf32>
    %14 = vector.broadcast %13 : vector<1x64xf32> to vector<16x64xf32>
    %15 = arith.addf %12, %14 : vector<16x64xf32>
    %c0_14 = arith.constant 0 : index
    %c0_15 = arith.constant 0 : index
    %16 = vector.load %arg6[%c0_14, %c0_15] : memref<64x64xbf16, #tpu.memory_space<vmem>>, vector<64x64xbf16>
    %cst_16 = arith.constant dense<0.000000e+00> : vector<16x64xf32>
    %17 = tpu.matmul %5, %16, %cst_16 {dimension_numbers = #tpu.dot_dimension_numbers<[1], [0], [0], [1], [0, 0, 1, 1], [], []>} : vector<16x64xbf16>, vector<64x64xbf16>, vector<16x64xf32> -> vector<16x64xf32>
    %c0_17 = arith.constant 0 : index
    %c0_18 = arith.constant 0 : index
    %18 = vector.load %arg10[%c0_17, %c0_18] : memref<1x64xf32, #tpu.memory_space<vmem>>, vector<1x64xf32>
    %19 = vector.broadcast %18 : vector<1x64xf32> to vector<16x64xf32>
    %20 = arith.addf %17, %19 : vector<16x64xf32>
    %21 = vector.shape_cast %10 : vector<16x64xf32> to vector<1x16x64xf32>
    %22 = arith.truncf %21 : vector<1x16x64xf32> to vector<1x16x64xbf16>
    %23 = vector.shape_cast %15 : vector<16x64xf32> to vector<1x16x64xf32>
    %24 = arith.truncf %23 : vector<1x16x64xf32> to vector<1x16x64xbf16>
    %25 = vector.shape_cast %20 : vector<16x64xf32> to vector<1x16x64xf32>
    %26 = arith.truncf %25 : vector<1x16x64xf32> to vector<1x16x64xbf16>
    %27 = vector.extract_strided_slice %22 {offsets = [0, 0, 0], sizes = [1, 16, 8], strides = [1, 1, 1]} : vector<1x16x64xbf16> to vector<1x16x8xbf16>
    %28 = vector.extract_strided_slice %24 {offsets = [0, 0, 0], sizes = [1, 16, 8], strides = [1, 1, 1]} : vector<1x16x64xbf16> to vector<1x16x8xbf16>
    "tpu.trace_start"() <{level = 10 : i32, message = "bqd,bkd->bqk"}> : () -> ()
    %cst_19 = arith.constant dense<0.000000e+00> : vector<1x16x16xf32>
    %29 = tpu.matmul %27, %28, %cst_19 {dimension_numbers = #tpu.dot_dimension_numbers<[2], [2], [1], [1], [0, 0, 0, 1, 1, 1], [0], [0]>} : vector<1x16x8xbf16>, vector<1x16x8xbf16>, vector<1x16x16xf32> -> vector<1x16x16xf32>
    "tpu.trace_stop"() : () -> ()
    %cst_20 = arith.constant dense<0xFF800000> : vector<1x16xf32>
    %30 = vector.multi_reduction <maximumf>, %29, %cst_20 [2] : vector<1x16x16xf32> to vector<1x16xf32>
    %31 = vector.shape_cast %30 : vector<1x16xf32> to vector<1x16x1xf32>
    %32 = vector.broadcast %31 : vector<1x16x1xf32> to vector<1x16x16xf32>
    %33 = arith.subf %29, %32 : vector<1x16x16xf32>
    %34 = math.exp %33 : vector<1x16x16xf32>
    %cst_21 = arith.constant dense<0.000000e+00> : vector<1x16xf32>
    %35 = vector.multi_reduction <add>, %34, %cst_21 [2] : vector<1x16x16xf32> to vector<1x16xf32>
    %36 = vector.shape_cast %35 : vector<1x16xf32> to vector<1x16x1xf32>
    %37 = arith.truncf %34 : vector<1x16x16xf32> to vector<1x16x16xbf16>
    %38 = vector.extract_strided_slice %26 {offsets = [0, 0, 0], sizes = [1, 16, 8], strides = [1, 1, 1]} : vector<1x16x64xbf16> to vector<1x16x8xbf16>
    "tpu.trace_start"() <{level = 10 : i32, message = "bqk,bkd->bqd"}> : () -> ()
    %cst_22 = arith.constant dense<0.000000e+00> : vector<1x16x8xf32>
    %39 = tpu.matmul %37, %38, %cst_22 {dimension_numbers = #tpu.dot_dimension_numbers<[2], [1], [1], [2], [0, 0, 0, 1, 1, 2], [0], [0]>} : vector<1x16x16xbf16>, vector<1x16x8xbf16>, vector<1x16x8xf32> -> vector<1x16x8xf32>
    "tpu.trace_stop"() : () -> ()
    %40 = tpu.reciprocal %36 : vector<1x16x1xf32> -> vector<1x16x1xf32>
    %41 = vector.broadcast %40 : vector<1x16x1xf32> to vector<1x16x8xf32>
    %42 = arith.mulf %39, %41 : vector<1x16x8xf32>
    %43 = vector.extract_strided_slice %22 {offsets = [0, 0, 8], sizes = [1, 16, 8], strides = [1, 1, 1]} : vector<1x16x64xbf16> to vector<1x16x8xbf16>
    %44 = vector.extract_strided_slice %24 {offsets = [0, 0, 8], sizes = [1, 16, 8], strides = [1, 1, 1]} : vector<1x16x64xbf16> to vector<1x16x8xbf16>
    "tpu.trace_start"() <{level = 10 : i32, message = "bqd,bkd->bqk"}> : () -> ()
    %cst_23 = arith.constant dense<0.000000e+00> : vector<1x16x16xf32>
    %45 = tpu.matmul %43, %44, %cst_23 {dimension_numbers = #tpu.dot_dimension_numbers<[2], [2], [1], [1], [0, 0, 0, 1, 1, 1], [0], [0]>} : vector<1x16x8xbf16>, vector<1x16x8xbf16>, vector<1x16x16xf32> -> vector<1x16x16xf32>
    "tpu.trace_stop"() : () -> ()
    %cst_24 = arith.constant dense<0xFF800000> : vector<1x16xf32>
    %46 = vector.multi_reduction <maximumf>, %45, %cst_24 [2] : vector<1x16x16xf32> to vector<1x16xf32>
    %47 = vector.shape_cast %46 : vector<1x16xf32> to vector<1x16x1xf32>
    %48 = vector.broadcast %47 : vector<1x16x1xf32> to vector<1x16x16xf32>
    %49 = arith.subf %45, %48 : vector<1x16x16xf32>
    %50 = math.exp %49 : vector<1x16x16xf32>
    %cst_25 = arith.constant dense<0.000000e+00> : vector<1x16xf32>
    %51 = vector.multi_reduction <add>, %50, %cst_25 [2] : vector<1x16x16xf32> to vector<1x16xf32>
    %52 = vector.shape_cast %51 : vector<1x16xf32> to vector<1x16x1xf32>
    %53 = arith.truncf %50 : vector<1x16x16xf32> to vector<1x16x16xbf16>
    %54 = vector.extract_strided_slice %26 {offsets = [0, 0, 8], sizes = [1, 16, 8], strides = [1, 1, 1]} : vector<1x16x64xbf16> to vector<1x16x8xbf16>
    "tpu.trace_start"() <{level = 10 : i32, message = "bqk,bkd->bqd"}> : () -> ()
    %cst_26 = arith.constant dense<0.000000e+00> : vector<1x16x8xf32>
    %55 = tpu.matmul %53, %54, %cst_26 {dimension_numbers = #tpu.dot_dimension_numbers<[2], [1], [1], [2], [0, 0, 0, 1, 1, 2], [0], [0]>} : vector<1x16x16xbf16>, vector<1x16x8xbf16>, vector<1x16x8xf32> -> vector<1x16x8xf32>
    "tpu.trace_stop"() : () -> ()
    %56 = tpu.reciprocal %52 : vector<1x16x1xf32> -> vector<1x16x1xf32>
    %57 = vector.broadcast %56 : vector<1x16x1xf32> to vector<1x16x8xf32>
    %58 = arith.mulf %55, %57 : vector<1x16x8xf32>
    %59 = vector.extract_strided_slice %22 {offsets = [0, 0, 16], sizes = [1, 16, 8], strides = [1, 1, 1]} : vector<1x16x64xbf16> to vector<1x16x8xbf16>
    %60 = vector.extract_strided_slice %24 {offsets = [0, 0, 16], sizes = [1, 16, 8], strides = [1, 1, 1]} : vector<1x16x64xbf16> to vector<1x16x8xbf16>
    "tpu.trace_start"() <{level = 10 : i32, message = "bqd,bkd->bqk"}> : () -> ()
    %cst_27 = arith.constant dense<0.000000e+00> : vector<1x16x16xf32>
    %61 = tpu.matmul %59, %60, %cst_27 {dimension_numbers = #tpu.dot_dimension_numbers<[2], [2], [1], [1], [0, 0, 0, 1, 1, 1], [0], [0]>} : vector<1x16x8xbf16>, vector<1x16x8xbf16>, vector<1x16x16xf32> -> vector<1x16x16xf32>
    "tpu.trace_stop"() : () -> ()
    %cst_28 = arith.constant dense<0xFF800000> : vector<1x16xf32>
    %62 = vector.multi_reduction <maximumf>, %61, %cst_28 [2] : vector<1x16x16xf32> to vector<1x16xf32>
    %63 = vector.shape_cast %62 : vector<1x16xf32> to vector<1x16x1xf32>
    %64 = vector.broadcast %63 : vector<1x16x1xf32> to vector<1x16x16xf32>
    %65 = arith.subf %61, %64 : vector<1x16x16xf32>
    %66 = math.exp %65 : vector<1x16x16xf32>
    %cst_29 = arith.constant dense<0.000000e+00> : vector<1x16xf32>
    %67 = vector.multi_reduction <add>, %66, %cst_29 [2] : vector<1x16x16xf32> to vector<1x16xf32>
    %68 = vector.shape_cast %67 : vector<1x16xf32> to vector<1x16x1xf32>
    %69 = arith.truncf %66 : vector<1x16x16xf32> to vector<1x16x16xbf16>
    %70 = vector.extract_strided_slice %26 {offsets = [0, 0, 16], sizes = [1, 16, 8], strides = [1, 1, 1]} : vector<1x16x64xbf16> to vector<1x16x8xbf16>
    "tpu.trace_start"() <{level = 10 : i32, message = "bqk,bkd->bqd"}> : () -> ()
    %cst_30 = arith.constant dense<0.000000e+00> : vector<1x16x8xf32>
    %71 = tpu.matmul %69, %70, %cst_30 {dimension_numbers = #tpu.dot_dimension_numbers<[2], [1], [1], [2], [0, 0, 0, 1, 1, 2], [0], [0]>} : vector<1x16x16xbf16>, vector<1x16x8xbf16>, vector<1x16x8xf32> -> vector<1x16x8xf32>
    "tpu.trace_stop"() : () -> ()
    %72 = tpu.reciprocal %68 : vector<1x16x1xf32> -> vector<1x16x1xf32>
    %73 = vector.broadcast %72 : vector<1x16x1xf32> to vector<1x16x8xf32>
    %74 = arith.mulf %71, %73 : vector<1x16x8xf32>
    %75 = vector.extract_strided_slice %22 {offsets = [0, 0, 24], sizes = [1, 16, 8], strides = [1, 1, 1]} : vector<1x16x64xbf16> to vector<1x16x8xbf16>
    %76 = vector.extract_strided_slice %24 {offsets = [0, 0, 24], sizes = [1, 16, 8], strides = [1, 1, 1]} : vector<1x16x64xbf16> to vector<1x16x8xbf16>
    "tpu.trace_start"() <{level = 10 : i32, message = "bqd,bkd->bqk"}> : () -> ()
    %cst_31 = arith.constant dense<0.000000e+00> : vector<1x16x16xf32>
    %77 = tpu.matmul %75, %76, %cst_31 {dimension_numbers = #tpu.dot_dimension_numbers<[2], [2], [1], [1], [0, 0, 0, 1, 1, 1], [0], [0]>} : vector<1x16x8xbf16>, vector<1x16x8xbf16>, vector<1x16x16xf32> -> vector<1x16x16xf32>
    "tpu.trace_stop"() : () -> ()
    %cst_32 = arith.constant dense<0xFF800000> : vector<1x16xf32>
    %78 = vector.multi_reduction <maximumf>, %77, %cst_32 [2] : vector<1x16x16xf32> to vector<1x16xf32>
    %79 = vector.shape_cast %78 : vector<1x16xf32> to vector<1x16x1xf32>
    %80 = vector.broadcast %79 : vector<1x16x1xf32> to vector<1x16x16xf32>
    %81 = arith.subf %77, %80 : vector<1x16x16xf32>
    %82 = math.exp %81 : vector<1x16x16xf32>
    %cst_33 = arith.constant dense<0.000000e+00> : vector<1x16xf32>
    %83 = vector.multi_reduction <add>, %82, %cst_33 [2] : vector<1x16x16xf32> to vector<1x16xf32>
    %84 = vector.shape_cast %83 : vector<1x16xf32> to vector<1x16x1xf32>
    %85 = arith.truncf %82 : vector<1x16x16xf32> to vector<1x16x16xbf16>
    %86 = vector.extract_strided_slice %26 {offsets = [0, 0, 24], sizes = [1, 16, 8], strides = [1, 1, 1]} : vector<1x16x64xbf16> to vector<1x16x8xbf16>
    "tpu.trace_start"() <{level = 10 : i32, message = "bqk,bkd->bqd"}> : () -> ()
    %cst_34 = arith.constant dense<0.000000e+00> : vector<1x16x8xf32>
    %87 = tpu.matmul %85, %86, %cst_34 {dimension_numbers = #tpu.dot_dimension_numbers<[2], [1], [1], [2], [0, 0, 0, 1, 1, 2], [0], [0]>} : vector<1x16x16xbf16>, vector<1x16x8xbf16>, vector<1x16x8xf32> -> vector<1x16x8xf32>
    "tpu.trace_stop"() : () -> ()
    %88 = tpu.reciprocal %84 : vector<1x16x1xf32> -> vector<1x16x1xf32>
    %89 = vector.broadcast %88 : vector<1x16x1xf32> to vector<1x16x8xf32>
    %90 = arith.mulf %87, %89 : vector<1x16x8xf32>
    %91 = vector.extract_strided_slice %22 {offsets = [0, 0, 32], sizes = [1, 16, 8], strides = [1, 1, 1]} : vector<1x16x64xbf16> to vector<1x16x8xbf16>
    %92 = vector.extract_strided_slice %24 {offsets = [0, 0, 32], sizes = [1, 16, 8], strides = [1, 1, 1]} : vector<1x16x64xbf16> to vector<1x16x8xbf16>
    "tpu.trace_start"() <{level = 10 : i32, message = "bqd,bkd->bqk"}> : () -> ()
    %cst_35 = arith.constant dense<0.000000e+00> : vector<1x16x16xf32>
    %93 = tpu.matmul %91, %92, %cst_35 {dimension_numbers = #tpu.dot_dimension_numbers<[2], [2], [1], [1], [0, 0, 0, 1, 1, 1], [0], [0]>} : vector<1x16x8xbf16>, vector<1x16x8xbf16>, vector<1x16x16xf32> -> vector<1x16x16xf32>
    "tpu.trace_stop"() : () -> ()
    %cst_36 = arith.constant dense<0xFF800000> : vector<1x16xf32>
    %94 = vector.multi_reduction <maximumf>, %93, %cst_36 [2] : vector<1x16x16xf32> to vector<1x16xf32>
    %95 = vector.shape_cast %94 : vector<1x16xf32> to vector<1x16x1xf32>
    %96 = vector.broadcast %95 : vector<1x16x1xf32> to vector<1x16x16xf32>
    %97 = arith.subf %93, %96 : vector<1x16x16xf32>
    %98 = math.exp %97 : vector<1x16x16xf32>
    %cst_37 = arith.constant dense<0.000000e+00> : vector<1x16xf32>
    %99 = vector.multi_reduction <add>, %98, %cst_37 [2] : vector<1x16x16xf32> to vector<1x16xf32>
    %100 = vector.shape_cast %99 : vector<1x16xf32> to vector<1x16x1xf32>
    %101 = arith.truncf %98 : vector<1x16x16xf32> to vector<1x16x16xbf16>
    %102 = vector.extract_strided_slice %26 {offsets = [0, 0, 32], sizes = [1, 16, 8], strides = [1, 1, 1]} : vector<1x16x64xbf16> to vector<1x16x8xbf16>
    "tpu.trace_start"() <{level = 10 : i32, message = "bqk,bkd->bqd"}> : () -> ()
    %cst_38 = arith.constant dense<0.000000e+00> : vector<1x16x8xf32>
    %103 = tpu.matmul %101, %102, %cst_38 {dimension_numbers = #tpu.dot_dimension_numbers<[2], [1], [1], [2], [0, 0, 0, 1, 1, 2], [0], [0]>} : vector<1x16x16xbf16>, vector<1x16x8xbf16>, vector<1x16x8xf32> -> vector<1x16x8xf32>
    "tpu.trace_stop"() : () -> ()
    %104 = tpu.reciprocal %100 : vector<1x16x1xf32> -> vector<1x16x1xf32>
    %105 = vector.broadcast %104 : vector<1x16x1xf32> to vector<1x16x8xf32>
    %106 = arith.mulf %103, %105 : vector<1x16x8xf32>
    %107 = vector.extract_strided_slice %22 {offsets = [0, 0, 40], sizes = [1, 16, 8], strides = [1, 1, 1]} : vector<1x16x64xbf16> to vector<1x16x8xbf16>
    %108 = vector.extract_strided_slice %24 {offsets = [0, 0, 40], sizes = [1, 16, 8], strides = [1, 1, 1]} : vector<1x16x64xbf16> to vector<1x16x8xbf16>
    "tpu.trace_start"() <{level = 10 : i32, message = "bqd,bkd->bqk"}> : () -> ()
    %cst_39 = arith.constant dense<0.000000e+00> : vector<1x16x16xf32>
    %109 = tpu.matmul %107, %108, %cst_39 {dimension_numbers = #tpu.dot_dimension_numbers<[2], [2], [1], [1], [0, 0, 0, 1, 1, 1], [0], [0]>} : vector<1x16x8xbf16>, vector<1x16x8xbf16>, vector<1x16x16xf32> -> vector<1x16x16xf32>
    "tpu.trace_stop"() : () -> ()
    %cst_40 = arith.constant dense<0xFF800000> : vector<1x16xf32>
    %110 = vector.multi_reduction <maximumf>, %109, %cst_40 [2] : vector<1x16x16xf32> to vector<1x16xf32>
    %111 = vector.shape_cast %110 : vector<1x16xf32> to vector<1x16x1xf32>
    %112 = vector.broadcast %111 : vector<1x16x1xf32> to vector<1x16x16xf32>
    %113 = arith.subf %109, %112 : vector<1x16x16xf32>
    %114 = math.exp %113 : vector<1x16x16xf32>
    %cst_41 = arith.constant dense<0.000000e+00> : vector<1x16xf32>
    %115 = vector.multi_reduction <add>, %114, %cst_41 [2] : vector<1x16x16xf32> to vector<1x16xf32>
    %116 = vector.shape_cast %115 : vector<1x16xf32> to vector<1x16x1xf32>
    %117 = arith.truncf %114 : vector<1x16x16xf32> to vector<1x16x16xbf16>
    %118 = vector.extract_strided_slice %26 {offsets = [0, 0, 40], sizes = [1, 16, 8], strides = [1, 1, 1]} : vector<1x16x64xbf16> to vector<1x16x8xbf16>
    "tpu.trace_start"() <{level = 10 : i32, message = "bqk,bkd->bqd"}> : () -> ()
    %cst_42 = arith.constant dense<0.000000e+00> : vector<1x16x8xf32>
    %119 = tpu.matmul %117, %118, %cst_42 {dimension_numbers = #tpu.dot_dimension_numbers<[2], [1], [1], [2], [0, 0, 0, 1, 1, 2], [0], [0]>} : vector<1x16x16xbf16>, vector<1x16x8xbf16>, vector<1x16x8xf32> -> vector<1x16x8xf32>
    "tpu.trace_stop"() : () -> ()
    %120 = tpu.reciprocal %116 : vector<1x16x1xf32> -> vector<1x16x1xf32>
    %121 = vector.broadcast %120 : vector<1x16x1xf32> to vector<1x16x8xf32>
    %122 = arith.mulf %119, %121 : vector<1x16x8xf32>
    %123 = vector.extract_strided_slice %22 {offsets = [0, 0, 48], sizes = [1, 16, 8], strides = [1, 1, 1]} : vector<1x16x64xbf16> to vector<1x16x8xbf16>
    %124 = vector.extract_strided_slice %24 {offsets = [0, 0, 48], sizes = [1, 16, 8], strides = [1, 1, 1]} : vector<1x16x64xbf16> to vector<1x16x8xbf16>
    "tpu.trace_start"() <{level = 10 : i32, message = "bqd,bkd->bqk"}> : () -> ()
    %cst_43 = arith.constant dense<0.000000e+00> : vector<1x16x16xf32>
    %125 = tpu.matmul %123, %124, %cst_43 {dimension_numbers = #tpu.dot_dimension_numbers<[2], [2], [1], [1], [0, 0, 0, 1, 1, 1], [0], [0]>} : vector<1x16x8xbf16>, vector<1x16x8xbf16>, vector<1x16x16xf32> -> vector<1x16x16xf32>
    "tpu.trace_stop"() : () -> ()
    %cst_44 = arith.constant dense<0xFF800000> : vector<1x16xf32>
    %126 = vector.multi_reduction <maximumf>, %125, %cst_44 [2] : vector<1x16x16xf32> to vector<1x16xf32>
    %127 = vector.shape_cast %126 : vector<1x16xf32> to vector<1x16x1xf32>
    %128 = vector.broadcast %127 : vector<1x16x1xf32> to vector<1x16x16xf32>
    %129 = arith.subf %125, %128 : vector<1x16x16xf32>
    %130 = math.exp %129 : vector<1x16x16xf32>
    %cst_45 = arith.constant dense<0.000000e+00> : vector<1x16xf32>
    %131 = vector.multi_reduction <add>, %130, %cst_45 [2] : vector<1x16x16xf32> to vector<1x16xf32>
    %132 = vector.shape_cast %131 : vector<1x16xf32> to vector<1x16x1xf32>
    %133 = arith.truncf %130 : vector<1x16x16xf32> to vector<1x16x16xbf16>
    %134 = vector.extract_strided_slice %26 {offsets = [0, 0, 48], sizes = [1, 16, 8], strides = [1, 1, 1]} : vector<1x16x64xbf16> to vector<1x16x8xbf16>
    "tpu.trace_start"() <{level = 10 : i32, message = "bqk,bkd->bqd"}> : () -> ()
    %cst_46 = arith.constant dense<0.000000e+00> : vector<1x16x8xf32>
    %135 = tpu.matmul %133, %134, %cst_46 {dimension_numbers = #tpu.dot_dimension_numbers<[2], [1], [1], [2], [0, 0, 0, 1, 1, 2], [0], [0]>} : vector<1x16x16xbf16>, vector<1x16x8xbf16>, vector<1x16x8xf32> -> vector<1x16x8xf32>
    "tpu.trace_stop"() : () -> ()
    %136 = tpu.reciprocal %132 : vector<1x16x1xf32> -> vector<1x16x1xf32>
    %137 = vector.broadcast %136 : vector<1x16x1xf32> to vector<1x16x8xf32>
    %138 = arith.mulf %135, %137 : vector<1x16x8xf32>
    %139 = vector.extract_strided_slice %22 {offsets = [0, 0, 56], sizes = [1, 16, 8], strides = [1, 1, 1]} : vector<1x16x64xbf16> to vector<1x16x8xbf16>
    %140 = vector.extract_strided_slice %24 {offsets = [0, 0, 56], sizes = [1, 16, 8], strides = [1, 1, 1]} : vector<1x16x64xbf16> to vector<1x16x8xbf16>
    "tpu.trace_start"() <{level = 10 : i32, message = "bqd,bkd->bqk"}> : () -> ()
    %cst_47 = arith.constant dense<0.000000e+00> : vector<1x16x16xf32>
    %141 = tpu.matmul %139, %140, %cst_47 {dimension_numbers = #tpu.dot_dimension_numbers<[2], [2], [1], [1], [0, 0, 0, 1, 1, 1], [0], [0]>} : vector<1x16x8xbf16>, vector<1x16x8xbf16>, vector<1x16x16xf32> -> vector<1x16x16xf32>
    "tpu.trace_stop"() : () -> ()
    %cst_48 = arith.constant dense<0xFF800000> : vector<1x16xf32>
    %142 = vector.multi_reduction <maximumf>, %141, %cst_48 [2] : vector<1x16x16xf32> to vector<1x16xf32>
    %143 = vector.shape_cast %142 : vector<1x16xf32> to vector<1x16x1xf32>
    %144 = vector.broadcast %143 : vector<1x16x1xf32> to vector<1x16x16xf32>
    %145 = arith.subf %141, %144 : vector<1x16x16xf32>
    %146 = math.exp %145 : vector<1x16x16xf32>
    %cst_49 = arith.constant dense<0.000000e+00> : vector<1x16xf32>
    %147 = vector.multi_reduction <add>, %146, %cst_49 [2] : vector<1x16x16xf32> to vector<1x16xf32>
    %148 = vector.shape_cast %147 : vector<1x16xf32> to vector<1x16x1xf32>
    %149 = arith.truncf %146 : vector<1x16x16xf32> to vector<1x16x16xbf16>
    %150 = vector.extract_strided_slice %26 {offsets = [0, 0, 56], sizes = [1, 16, 8], strides = [1, 1, 1]} : vector<1x16x64xbf16> to vector<1x16x8xbf16>
    "tpu.trace_start"() <{level = 10 : i32, message = "bqk,bkd->bqd"}> : () -> ()
    %cst_50 = arith.constant dense<0.000000e+00> : vector<1x16x8xf32>
    %151 = tpu.matmul %149, %150, %cst_50 {dimension_numbers = #tpu.dot_dimension_numbers<[2], [1], [1], [2], [0, 0, 0, 1, 1, 2], [0], [0]>} : vector<1x16x16xbf16>, vector<1x16x8xbf16>, vector<1x16x8xf32> -> vector<1x16x8xf32>
    "tpu.trace_stop"() : () -> ()
    %152 = tpu.reciprocal %148 : vector<1x16x1xf32> -> vector<1x16x1xf32>
    %153 = vector.broadcast %152 : vector<1x16x1xf32> to vector<1x16x8xf32>
    %154 = arith.mulf %151, %153 : vector<1x16x8xf32>
    %155 = tpu.concatenate %42, %58, %74, %90, %106, %122, %138, %154 in 2 : vector<1x16x8xf32>, vector<1x16x8xf32>, vector<1x16x8xf32>, vector<1x16x8xf32>, vector<1x16x8xf32>, vector<1x16x8xf32>, vector<1x16x8xf32>, vector<1x16x8xf32> -> vector<1x16x64xf32>
    %156 = vector.shape_cast %155 : vector<1x16x64xf32> to vector<16x64xf32>
    %157 = arith.truncf %156 : vector<16x64xf32> to vector<16x64xbf16>
    %c0_51 = arith.constant 0 : index
    %c0_52 = arith.constant 0 : index
    %158 = vector.load %arg7[%c0_51, %c0_52] : memref<64x64xbf16, #tpu.memory_space<vmem>>, vector<64x64xbf16>
    %cst_53 = arith.constant dense<0.000000e+00> : vector<16x64xf32>
    %159 = tpu.matmul %157, %158, %cst_53 {dimension_numbers = #tpu.dot_dimension_numbers<[1], [0], [0], [1], [0, 0, 1, 1], [], []>} : vector<16x64xbf16>, vector<64x64xbf16>, vector<16x64xf32> -> vector<16x64xf32>
    %c0_54 = arith.constant 0 : index
    %c0_55 = arith.constant 0 : index
    %160 = vector.load %arg11[%c0_54, %c0_55] : memref<1x64xf32, #tpu.memory_space<vmem>>, vector<1x64xf32>
    %161 = vector.broadcast %160 : vector<1x64xf32> to vector<16x64xf32>
    %162 = arith.addf %159, %161 : vector<16x64xf32>
    %163 = vector.shape_cast %0 : vector<1x16x64xf32> to vector<16x64xf32>
    %164 = arith.addf %163, %162 : vector<16x64xf32>
    %cst_56 = arith.constant dense<0.000000e+00> : vector<16xf32>
    %165 = vector.multi_reduction <add>, %164, %cst_56 [1] : vector<16x64xf32> to vector<16xf32>
    %166 = vector.shape_cast %165 : vector<16xf32> to vector<16x1xf32>
    %cst_57 = arith.constant 6.400000e+01 : f32
    %167 = vector.broadcast %cst_57 : f32 to vector<16x1xf32>
    %168 = arith.divf %166, %167 : vector<16x1xf32>
    %169 = vector.broadcast %168 : vector<16x1xf32> to vector<16x64xf32>
    %170 = arith.subf %164, %169 : vector<16x64xf32>
    %171 = arith.mulf %170, %170 : vector<16x64xf32>
    %cst_58 = arith.constant dense<0.000000e+00> : vector<16xf32>
    %172 = vector.multi_reduction <add>, %171, %cst_58 [1] : vector<16x64xf32> to vector<16xf32>
    %173 = vector.shape_cast %172 : vector<16xf32> to vector<16x1xf32>
    %cst_59 = arith.constant 6.400000e+01 : f32
    %174 = vector.broadcast %cst_59 : f32 to vector<16x1xf32>
    %175 = arith.divf %173, %174 : vector<16x1xf32>
    %176 = vector.broadcast %168 : vector<16x1xf32> to vector<16x64xf32>
    %177 = arith.subf %164, %176 : vector<16x64xf32>
    %cst_60 = arith.constant 9.99999974E-6 : f32
    %178 = vector.broadcast %cst_60 : f32 to vector<16x1xf32>
    %179 = arith.addf %175, %178 : vector<16x1xf32>
    %180 = math.rsqrt %179 : vector<16x1xf32>
    %181 = vector.broadcast %180 : vector<16x1xf32> to vector<16x64xf32>
    %182 = arith.mulf %177, %181 : vector<16x64xf32>
    %c0_61 = arith.constant 0 : index
    %c0_62 = arith.constant 0 : index
    %183 = vector.load %arg12[%c0_61, %c0_62] : memref<1x64xf32, #tpu.memory_space<vmem>>, vector<1x64xf32>
    %184 = vector.broadcast %183 : vector<1x64xf32> to vector<16x64xf32>
    %185 = arith.mulf %182, %184 : vector<16x64xf32>
    %c0_63 = arith.constant 0 : index
    %c0_64 = arith.constant 0 : index
    %186 = vector.load %arg13[%c0_63, %c0_64] : memref<1x64xf32, #tpu.memory_space<vmem>>, vector<1x64xf32>
    %187 = vector.broadcast %186 : vector<1x64xf32> to vector<16x64xf32>
    %188 = arith.addf %185, %187 : vector<16x64xf32>
    %189 = vector.shape_cast %188 : vector<16x64xf32> to vector<1x16x64xf32>
    %190 = arith.truncf %189 : vector<1x16x64xf32> to vector<1x16x64xbf16>
    %c0_65 = arith.constant 0 : index
    %c0_66 = arith.constant 0 : index
    %c0_67 = arith.constant 0 : index
    %191 = vector.load %arg14[%c0_65, %c0_66, %c0_67] : memref<1x16x64xbf16, #tpu.memory_space<vmem>>, vector<1x16x64xbf16>
    tpu.vector_store %arg14[%c0_65, %c0_66, %c0_67], %190 {strides = array<i32>} : memref<1x16x64xbf16, #tpu.memory_space<vmem>>, vector<1x16x64xbf16>,
    return
  }
  func.func @transform_0(%arg0: i32, %arg1: i32) -> (i32, i32, i32) {
    %c0_i32 = arith.constant 0 : i32
    %c0_i32_0 = arith.constant 0 : i32
    return %arg0, %arg1, %c0_i32 : i32, i32, i32
  }
  func.func @transform_1(%arg0: i32, %arg1: i32) -> (i32, i32, i32) {
    %c0_i32 = arith.constant 0 : i32
    %c0_i32_0 = arith.constant 0 : i32
    %c0_i32_1 = arith.constant 0 : i32
    return %arg0, %c0_i32, %c0_i32_0 : i32, i32, i32
  }
  func.func @transform_2(%arg0: i32, %arg1: i32) -> (i32, i32) {
    %c0_i32 = arith.constant 0 : i32
    %c0_i32_0 = arith.constant 0 : i32
    %c0_i32_1 = arith.constant 0 : i32
    return %c0_i32, %c0_i32_0 : i32, i32
  }
  func.func @transform_3(%arg0: i32, %arg1: i32) -> (i32, i32) {
    %c0_i32 = arith.constant 0 : i32
    %c0_i32_0 = arith.constant 0 : i32
    %c0_i32_1 = arith.constant 0 : i32
    return %c0_i32, %c0_i32_0 : i32, i32
  }
  func.func @transform_4(%arg0: i32, %arg1: i32) -> (i32, i32) {
    %c0_i32 = arith.constant 0 : i32
    %c0_i32_0 = arith.constant 0 : i32
    %c0_i32_1 = arith.constant 0 : i32
    return %c0_i32, %c0_i32_0 : i32, i32
  }
  func.func @transform_5(%arg0: i32, %arg1: i32) -> (i32, i32) {
    %c0_i32 = arith.constant 0 : i32
    %c0_i32_0 = arith.constant 0 : i32
    %c0_i32_1 = arith.constant 0 : i32
    return %c0_i32, %c0_i32_0 : i32, i32
  }
  func.func @transform_6(%arg0: i32, %arg1: i32) -> (i32, i32) {
    %c0_i32 = arith.constant 0 : i32
    %c0_i32_0 = arith.constant 0 : i32
    %c0_i32_1 = arith.constant 0 : i32
    return %c0_i32, %c0_i32_0 : i32, i32
  }
  func.func @transform_7(%arg0: i32, %arg1: i32) -> (i32, i32) {
    %c0_i32 = arith.constant 0 : i32
    %c0_i32_0 = arith.constant 0 : i32
    %c0_i32_1 = arith.constant 0 : i32
    return %c0_i32, %c0_i32_0 : i32, i32
  }
  func.func @transform_8(%arg0: i32, %arg1: i32) -> (i32, i32) {
    %c0_i32 = arith.constant 0 : i32
    %c0_i32_0 = arith.constant 0 : i32
    %c0_i32_1 = arith.constant 0 : i32
    return %c0_i32, %c0_i32_0 : i32, i32
  }
  func.func @transform_9(%arg0: i32, %arg1: i32) -> (i32, i32) {
    %c0_i32 = arith.constant 0 : i32
    %c0_i32_0 = arith.constant 0 : i32
    %c0_i32_1 = arith.constant 0 : i32
    return %c0_i32, %c0_i32_0 : i32, i32
  }
  func.func @transform_10(%arg0: i32, %arg1: i32) -> (i32, i32) {
    %c0_i32 = arith.constant 0 : i32
    %c0_i32_0 = arith.constant 0 : i32
    %c0_i32_1 = arith.constant 0 : i32
    return %c0_i32, %c0_i32_0 : i32, i32
  }
  func.func @transform_11(%arg0: i32, %arg1: i32) -> (i32, i32) {
    %c0_i32 = arith.constant 0 : i32
    %c0_i32_0 = arith.constant 0 : i32
    %c0_i32_1 = arith.constant 0 : i32
    return %c0_i32, %c0_i32_0 : i32, i32
  }
  func.func @transform_12(%arg0: i32, %arg1: i32) -> (i32, i32, i32) {
    %c0_i32 = arith.constant 0 : i32
    %c0_i32_0 = arith.constant 0 : i32
    return %arg0, %arg1, %c0_i32 : i32, i32, i32
  }
}

module attributes {stable_mosaic.version = 11 : i64} {
  func.func @mha_ln_kernel(%arg0: i32, %arg1: i32, %arg2: memref<1x8x64xf32, #tpu.memory_space<vmem>>, %arg3: memref<1x8x64xf32, #tpu.memory_space<vmem>>, %arg4: memref<64x64xbf16, #tpu.memory_space<vmem>>, %arg5: memref<64x64xbf16, #tpu.memory_space<vmem>>, %arg6: memref<64x64xbf16, #tpu.memory_space<vmem>>, %arg7: memref<64x64xbf16, #tpu.memory_space<vmem>>, %arg8: memref<1x64xf32, #tpu.memory_space<vmem>>, %arg9: memref<1x64xf32, #tpu.memory_space<vmem>>, %arg10: memref<1x64xf32, #tpu.memory_space<vmem>>, %arg11: memref<1x64xf32, #tpu.memory_space<vmem>>, %arg12: memref<1x64xf32, #tpu.memory_space<vmem>>, %arg13: memref<1x64xf32, #tpu.memory_space<vmem>>, %arg14: memref<1x8x64xbf16, #tpu.memory_space<vmem>>) attributes {dimension_semantics = [#tpu.dimension_semantics<parallel>, #tpu.dimension_semantics<parallel>], iteration_bounds = array<i64: 2, 1>, scalar_prefetch = 0 : i64, scratch_operands = 0 : i64, tpu.core_type = #tpu.core_type<tc>, window_params = [{transform_indices = @transform_0, window_bounds = array<i64: 1, 8, 64>}, {transform_indices = @transform_1, window_bounds = array<i64: 1, 8, 64>}, {pipeline_mode = #tpu.pipeline_mode<synchronous>, transform_indices = @transform_2, window_bounds = array<i64: 64, 64>}, {pipeline_mode = #tpu.pipeline_mode<synchronous>, transform_indices = @transform_3, window_bounds = array<i64: 64, 64>}, {pipeline_mode = #tpu.pipeline_mode<synchronous>, transform_indices = @transform_4, window_bounds = array<i64: 64, 64>}, {pipeline_mode = #tpu.pipeline_mode<synchronous>, transform_indices = @transform_5, window_bounds = array<i64: 64, 64>}, {pipeline_mode = #tpu.pipeline_mode<synchronous>, transform_indices = @transform_6, window_bounds = array<i64: 1, 64>}, {pipeline_mode = #tpu.pipeline_mode<synchronous>, transform_indices = @transform_7, window_bounds = array<i64: 1, 64>}, {pipeline_mode = #tpu.pipeline_mode<synchronous>, transform_indices = @transform_8, window_bounds = array<i64: 1, 64>}, {pipeline_mode = #tpu.pipeline_mode<synchronous>, transform_indices = @transform_9, window_bounds = array<i64: 1, 64>}, {pipeline_mode = #tpu.pipeline_mode<synchronous>, transform_indices = @transform_10, window_bounds = array<i64: 1, 64>}, {pipeline_mode = #tpu.pipeline_mode<synchronous>, transform_indices = @transform_11, window_bounds = array<i64: 1, 64>}, {transform_indices = @transform_12, window_bounds = array<i64: 1, 8, 64>}]} {
    %c0 = arith.constant 0 : index
    %c0_0 = arith.constant 0 : index
    %c0_1 = arith.constant 0 : index
    %0 = vector.load %arg2[%c0, %c0_0, %c0_1] : memref<1x8x64xf32, #tpu.memory_space<vmem>>, vector<1x8x64xf32>
    %c0_2 = arith.constant 0 : index
    %c0_3 = arith.constant 0 : index
    %c0_4 = arith.constant 0 : index
    %1 = vector.load %arg3[%c0_2, %c0_3, %c0_4] : memref<1x8x64xf32, #tpu.memory_space<vmem>>, vector<1x8x64xf32>
    %2 = vector.shape_cast %0 : vector<1x8x64xf32> to vector<8x64xf32>
    %3 = arith.truncf %2 : vector<8x64xf32> to vector<8x64xbf16>
    %4 = vector.shape_cast %1 : vector<1x8x64xf32> to vector<8x64xf32>
    %5 = arith.truncf %4 : vector<8x64xf32> to vector<8x64xbf16>
    %c0_5 = arith.constant 0 : index
    %c0_6 = arith.constant 0 : index
    %6 = vector.load %arg4[%c0_5, %c0_6] : memref<64x64xbf16, #tpu.memory_space<vmem>>, vector<64x64xbf16>
    %cst = arith.constant dense<0.000000e+00> : vector<8x64xf32>
    %7 = tpu.matmul %3, %6, %cst {dimension_numbers = #tpu.dot_dimension_numbers<[1], [0], [0], [1], [0, 0, 1, 1], [], []>} : vector<8x64xbf16>, vector<64x64xbf16>, vector<8x64xf32> -> vector<8x64xf32>
    %c0_7 = arith.constant 0 : index
    %c0_8 = arith.constant 0 : index
    %8 = vector.load %arg8[%c0_7, %c0_8] : memref<1x64xf32, #tpu.memory_space<vmem>>, vector<1x64xf32>
    %9 = vector.broadcast %8 : vector<1x64xf32> to vector<8x64xf32>
    %10 = arith.addf %7, %9 : vector<8x64xf32>
    %c0_9 = arith.constant 0 : index
    %c0_10 = arith.constant 0 : index
    %11 = vector.load %arg5[%c0_9, %c0_10] : memref<64x64xbf16, #tpu.memory_space<vmem>>, vector<64x64xbf16>
    %cst_11 = arith.constant dense<0.000000e+00> : vector<8x64xf32>
    %12 = tpu.matmul %5, %11, %cst_11 {dimension_numbers = #tpu.dot_dimension_numbers<[1], [0], [0], [1], [0, 0, 1, 1], [], []>} : vector<8x64xbf16>, vector<64x64xbf16>, vector<8x64xf32> -> vector<8x64xf32>
    %c0_12 = arith.constant 0 : index
    %c0_13 = arith.constant 0 : index
    %13 = vector.load %arg9[%c0_12, %c0_13] : memref<1x64xf32, #tpu.memory_space<vmem>>, vector<1x64xf32>
    %14 = vector.broadcast %13 : vector<1x64xf32> to vector<8x64xf32>
    %15 = arith.addf %12, %14 : vector<8x64xf32>
    %c0_14 = arith.constant 0 : index
    %c0_15 = arith.constant 0 : index
    %16 = vector.load %arg6[%c0_14, %c0_15] : memref<64x64xbf16, #tpu.memory_space<vmem>>, vector<64x64xbf16>
    %cst_16 = arith.constant dense<0.000000e+00> : vector<8x64xf32>
    %17 = tpu.matmul %5, %16, %cst_16 {dimension_numbers = #tpu.dot_dimension_numbers<[1], [0], [0], [1], [0, 0, 1, 1], [], []>} : vector<8x64xbf16>, vector<64x64xbf16>, vector<8x64xf32> -> vector<8x64xf32>
    %c0_17 = arith.constant 0 : index
    %c0_18 = arith.constant 0 : index
    %18 = vector.load %arg10[%c0_17, %c0_18] : memref<1x64xf32, #tpu.memory_space<vmem>>, vector<1x64xf32>
    %19 = vector.broadcast %18 : vector<1x64xf32> to vector<8x64xf32>
    %20 = arith.addf %17, %19 : vector<8x64xf32>
    %21 = vector.shape_cast %10 : vector<8x64xf32> to vector<1x8x64xf32>
    %22 = arith.truncf %21 : vector<1x8x64xf32> to vector<1x8x64xbf16>
    %23 = vector.shape_cast %15 : vector<8x64xf32> to vector<1x8x64xf32>
    %24 = arith.truncf %23 : vector<1x8x64xf32> to vector<1x8x64xbf16>
    %25 = vector.shape_cast %20 : vector<8x64xf32> to vector<1x8x64xf32>
    %26 = arith.truncf %25 : vector<1x8x64xf32> to vector<1x8x64xbf16>
    %27 = vector.extract_strided_slice %22 {offsets = [0, 0, 0], sizes = [1, 8, 8], strides = [1, 1, 1]} : vector<1x8x64xbf16> to vector<1x8x8xbf16>
    %28 = vector.extract_strided_slice %24 {offsets = [0, 0, 0], sizes = [1, 8, 8], strides = [1, 1, 1]} : vector<1x8x64xbf16> to vector<1x8x8xbf16>
    "tpu.trace_start"() <{level = 10 : i32, message = "bqd,bkd->bqk"}> : () -> ()
    %cst_19 = arith.constant dense<0.000000e+00> : vector<1x8x8xf32>
    %29 = tpu.matmul %27, %28, %cst_19 {dimension_numbers = #tpu.dot_dimension_numbers<[2], [2], [1], [1], [0, 0, 0, 1, 1, 1], [0], [0]>} : vector<1x8x8xbf16>, vector<1x8x8xbf16>, vector<1x8x8xf32> -> vector<1x8x8xf32>
    "tpu.trace_stop"() : () -> ()
    %cst_20 = arith.constant dense<0xFF800000> : vector<1x8xf32>
    %30 = vector.multi_reduction <maximumf>, %29, %cst_20 [2] : vector<1x8x8xf32> to vector<1x8xf32>
    %31 = vector.shape_cast %30 : vector<1x8xf32> to vector<1x8x1xf32>
    %32 = vector.broadcast %31 : vector<1x8x1xf32> to vector<1x8x8xf32>
    %33 = arith.subf %29, %32 : vector<1x8x8xf32>
    %34 = math.exp %33 : vector<1x8x8xf32>
    %cst_21 = arith.constant dense<0.000000e+00> : vector<1x8xf32>
    %35 = vector.multi_reduction <add>, %34, %cst_21 [2] : vector<1x8x8xf32> to vector<1x8xf32>
    %36 = vector.shape_cast %35 : vector<1x8xf32> to vector<1x8x1xf32>
    %37 = arith.truncf %34 : vector<1x8x8xf32> to vector<1x8x8xbf16>
    %38 = vector.extract_strided_slice %26 {offsets = [0, 0, 0], sizes = [1, 8, 8], strides = [1, 1, 1]} : vector<1x8x64xbf16> to vector<1x8x8xbf16>
    "tpu.trace_start"() <{level = 10 : i32, message = "bqk,bkd->bqd"}> : () -> ()
    %cst_22 = arith.constant dense<0.000000e+00> : vector<1x8x8xf32>
    %39 = tpu.matmul %37, %38, %cst_22 {dimension_numbers = #tpu.dot_dimension_numbers<[2], [1], [1], [2], [0, 0, 0, 1, 1, 2], [0], [0]>} : vector<1x8x8xbf16>, vector<1x8x8xbf16>, vector<1x8x8xf32> -> vector<1x8x8xf32>
    "tpu.trace_stop"() : () -> ()
    %40 = tpu.reciprocal %36 : vector<1x8x1xf32> -> vector<1x8x1xf32>
    %41 = vector.broadcast %40 : vector<1x8x1xf32> to vector<1x8x8xf32>
    %42 = arith.mulf %39, %41 : vector<1x8x8xf32>
    %43 = vector.extract_strided_slice %22 {offsets = [0, 0, 8], sizes = [1, 8, 8], strides = [1, 1, 1]} : vector<1x8x64xbf16> to vector<1x8x8xbf16>
    %44 = vector.extract_strided_slice %24 {offsets = [0, 0, 8], sizes = [1, 8, 8], strides = [1, 1, 1]} : vector<1x8x64xbf16> to vector<1x8x8xbf16>
    "tpu.trace_start"() <{level = 10 : i32, message = "bqd,bkd->bqk"}> : () -> ()
    %cst_23 = arith.constant dense<0.000000e+00> : vector<1x8x8xf32>
    %45 = tpu.matmul %43, %44, %cst_23 {dimension_numbers = #tpu.dot_dimension_numbers<[2], [2], [1], [1], [0, 0, 0, 1, 1, 1], [0], [0]>} : vector<1x8x8xbf16>, vector<1x8x8xbf16>, vector<1x8x8xf32> -> vector<1x8x8xf32>
    "tpu.trace_stop"() : () -> ()
    %cst_24 = arith.constant dense<0xFF800000> : vector<1x8xf32>
    %46 = vector.multi_reduction <maximumf>, %45, %cst_24 [2] : vector<1x8x8xf32> to vector<1x8xf32>
    %47 = vector.shape_cast %46 : vector<1x8xf32> to vector<1x8x1xf32>
    %48 = vector.broadcast %47 : vector<1x8x1xf32> to vector<1x8x8xf32>
    %49 = arith.subf %45, %48 : vector<1x8x8xf32>
    %50 = math.exp %49 : vector<1x8x8xf32>
    %cst_25 = arith.constant dense<0.000000e+00> : vector<1x8xf32>
    %51 = vector.multi_reduction <add>, %50, %cst_25 [2] : vector<1x8x8xf32> to vector<1x8xf32>
    %52 = vector.shape_cast %51 : vector<1x8xf32> to vector<1x8x1xf32>
    %53 = arith.truncf %50 : vector<1x8x8xf32> to vector<1x8x8xbf16>
    %54 = vector.extract_strided_slice %26 {offsets = [0, 0, 8], sizes = [1, 8, 8], strides = [1, 1, 1]} : vector<1x8x64xbf16> to vector<1x8x8xbf16>
    "tpu.trace_start"() <{level = 10 : i32, message = "bqk,bkd->bqd"}> : () -> ()
    %cst_26 = arith.constant dense<0.000000e+00> : vector<1x8x8xf32>
    %55 = tpu.matmul %53, %54, %cst_26 {dimension_numbers = #tpu.dot_dimension_numbers<[2], [1], [1], [2], [0, 0, 0, 1, 1, 2], [0], [0]>} : vector<1x8x8xbf16>, vector<1x8x8xbf16>, vector<1x8x8xf32> -> vector<1x8x8xf32>
    "tpu.trace_stop"() : () -> ()
    %56 = tpu.reciprocal %52 : vector<1x8x1xf32> -> vector<1x8x1xf32>
    %57 = vector.broadcast %56 : vector<1x8x1xf32> to vector<1x8x8xf32>
    %58 = arith.mulf %55, %57 : vector<1x8x8xf32>
    %59 = vector.extract_strided_slice %22 {offsets = [0, 0, 16], sizes = [1, 8, 8], strides = [1, 1, 1]} : vector<1x8x64xbf16> to vector<1x8x8xbf16>
    %60 = vector.extract_strided_slice %24 {offsets = [0, 0, 16], sizes = [1, 8, 8], strides = [1, 1, 1]} : vector<1x8x64xbf16> to vector<1x8x8xbf16>
    "tpu.trace_start"() <{level = 10 : i32, message = "bqd,bkd->bqk"}> : () -> ()
    %cst_27 = arith.constant dense<0.000000e+00> : vector<1x8x8xf32>
    %61 = tpu.matmul %59, %60, %cst_27 {dimension_numbers = #tpu.dot_dimension_numbers<[2], [2], [1], [1], [0, 0, 0, 1, 1, 1], [0], [0]>} : vector<1x8x8xbf16>, vector<1x8x8xbf16>, vector<1x8x8xf32> -> vector<1x8x8xf32>
    "tpu.trace_stop"() : () -> ()
    %cst_28 = arith.constant dense<0xFF800000> : vector<1x8xf32>
    %62 = vector.multi_reduction <maximumf>, %61, %cst_28 [2] : vector<1x8x8xf32> to vector<1x8xf32>
    %63 = vector.shape_cast %62 : vector<1x8xf32> to vector<1x8x1xf32>
    %64 = vector.broadcast %63 : vector<1x8x1xf32> to vector<1x8x8xf32>
    %65 = arith.subf %61, %64 : vector<1x8x8xf32>
    %66 = math.exp %65 : vector<1x8x8xf32>
    %cst_29 = arith.constant dense<0.000000e+00> : vector<1x8xf32>
    %67 = vector.multi_reduction <add>, %66, %cst_29 [2] : vector<1x8x8xf32> to vector<1x8xf32>
    %68 = vector.shape_cast %67 : vector<1x8xf32> to vector<1x8x1xf32>
    %69 = arith.truncf %66 : vector<1x8x8xf32> to vector<1x8x8xbf16>
    %70 = vector.extract_strided_slice %26 {offsets = [0, 0, 16], sizes = [1, 8, 8], strides = [1, 1, 1]} : vector<1x8x64xbf16> to vector<1x8x8xbf16>
    "tpu.trace_start"() <{level = 10 : i32, message = "bqk,bkd->bqd"}> : () -> ()
    %cst_30 = arith.constant dense<0.000000e+00> : vector<1x8x8xf32>
    %71 = tpu.matmul %69, %70, %cst_30 {dimension_numbers = #tpu.dot_dimension_numbers<[2], [1], [1], [2], [0, 0, 0, 1, 1, 2], [0], [0]>} : vector<1x8x8xbf16>, vector<1x8x8xbf16>, vector<1x8x8xf32> -> vector<1x8x8xf32>
    "tpu.trace_stop"() : () -> ()
    %72 = tpu.reciprocal %68 : vector<1x8x1xf32> -> vector<1x8x1xf32>
    %73 = vector.broadcast %72 : vector<1x8x1xf32> to vector<1x8x8xf32>
    %74 = arith.mulf %71, %73 : vector<1x8x8xf32>
    %75 = vector.extract_strided_slice %22 {offsets = [0, 0, 24], sizes = [1, 8, 8], strides = [1, 1, 1]} : vector<1x8x64xbf16> to vector<1x8x8xbf16>
    %76 = vector.extract_strided_slice %24 {offsets = [0, 0, 24], sizes = [1, 8, 8], strides = [1, 1, 1]} : vector<1x8x64xbf16> to vector<1x8x8xbf16>
    "tpu.trace_start"() <{level = 10 : i32, message = "bqd,bkd->bqk"}> : () -> ()
    %cst_31 = arith.constant dense<0.000000e+00> : vector<1x8x8xf32>
    %77 = tpu.matmul %75, %76, %cst_31 {dimension_numbers = #tpu.dot_dimension_numbers<[2], [2], [1], [1], [0, 0, 0, 1, 1, 1], [0], [0]>} : vector<1x8x8xbf16>, vector<1x8x8xbf16>, vector<1x8x8xf32> -> vector<1x8x8xf32>
    "tpu.trace_stop"() : () -> ()
    %cst_32 = arith.constant dense<0xFF800000> : vector<1x8xf32>
    %78 = vector.multi_reduction <maximumf>, %77, %cst_32 [2] : vector<1x8x8xf32> to vector<1x8xf32>
    %79 = vector.shape_cast %78 : vector<1x8xf32> to vector<1x8x1xf32>
    %80 = vector.broadcast %79 : vector<1x8x1xf32> to vector<1x8x8xf32>
    %81 = arith.subf %77, %80 : vector<1x8x8xf32>
    %82 = math.exp %81 : vector<1x8x8xf32>
    %cst_33 = arith.constant dense<0.000000e+00> : vector<1x8xf32>
    %83 = vector.multi_reduction <add>, %82, %cst_33 [2] : vector<1x8x8xf32> to vector<1x8xf32>
    %84 = vector.shape_cast %83 : vector<1x8xf32> to vector<1x8x1xf32>
    %85 = arith.truncf %82 : vector<1x8x8xf32> to vector<1x8x8xbf16>
    %86 = vector.extract_strided_slice %26 {offsets = [0, 0, 24], sizes = [1, 8, 8], strides = [1, 1, 1]} : vector<1x8x64xbf16> to vector<1x8x8xbf16>
    "tpu.trace_start"() <{level = 10 : i32, message = "bqk,bkd->bqd"}> : () -> ()
    %cst_34 = arith.constant dense<0.000000e+00> : vector<1x8x8xf32>
    %87 = tpu.matmul %85, %86, %cst_34 {dimension_numbers = #tpu.dot_dimension_numbers<[2], [1], [1], [2], [0, 0, 0, 1, 1, 2], [0], [0]>} : vector<1x8x8xbf16>, vector<1x8x8xbf16>, vector<1x8x8xf32> -> vector<1x8x8xf32>
    "tpu.trace_stop"() : () -> ()
    %88 = tpu.reciprocal %84 : vector<1x8x1xf32> -> vector<1x8x1xf32>
    %89 = vector.broadcast %88 : vector<1x8x1xf32> to vector<1x8x8xf32>
    %90 = arith.mulf %87, %89 : vector<1x8x8xf32>
    %91 = vector.extract_strided_slice %22 {offsets = [0, 0, 32], sizes = [1, 8, 8], strides = [1, 1, 1]} : vector<1x8x64xbf16> to vector<1x8x8xbf16>
    %92 = vector.extract_strided_slice %24 {offsets = [0, 0, 32], sizes = [1, 8, 8], strides = [1, 1, 1]} : vector<1x8x64xbf16> to vector<1x8x8xbf16>
    "tpu.trace_start"() <{level = 10 : i32, message = "bqd,bkd->bqk"}> : () -> ()
    %cst_35 = arith.constant dense<0.000000e+00> : vector<1x8x8xf32>
    %93 = tpu.matmul %91, %92, %cst_35 {dimension_numbers = #tpu.dot_dimension_numbers<[2], [2], [1], [1], [0, 0, 0, 1, 1, 1], [0], [0]>} : vector<1x8x8xbf16>, vector<1x8x8xbf16>, vector<1x8x8xf32> -> vector<1x8x8xf32>
    "tpu.trace_stop"() : () -> ()
    %cst_36 = arith.constant dense<0xFF800000> : vector<1x8xf32>
    %94 = vector.multi_reduction <maximumf>, %93, %cst_36 [2] : vector<1x8x8xf32> to vector<1x8xf32>
    %95 = vector.shape_cast %94 : vector<1x8xf32> to vector<1x8x1xf32>
    %96 = vector.broadcast %95 : vector<1x8x1xf32> to vector<1x8x8xf32>
    %97 = arith.subf %93, %96 : vector<1x8x8xf32>
    %98 = math.exp %97 : vector<1x8x8xf32>
    %cst_37 = arith.constant dense<0.000000e+00> : vector<1x8xf32>
    %99 = vector.multi_reduction <add>, %98, %cst_37 [2] : vector<1x8x8xf32> to vector<1x8xf32>
    %100 = vector.shape_cast %99 : vector<1x8xf32> to vector<1x8x1xf32>
    %101 = arith.truncf %98 : vector<1x8x8xf32> to vector<1x8x8xbf16>
    %102 = vector.extract_strided_slice %26 {offsets = [0, 0, 32], sizes = [1, 8, 8], strides = [1, 1, 1]} : vector<1x8x64xbf16> to vector<1x8x8xbf16>
    "tpu.trace_start"() <{level = 10 : i32, message = "bqk,bkd->bqd"}> : () -> ()
    %cst_38 = arith.constant dense<0.000000e+00> : vector<1x8x8xf32>
    %103 = tpu.matmul %101, %102, %cst_38 {dimension_numbers = #tpu.dot_dimension_numbers<[2], [1], [1], [2], [0, 0, 0, 1, 1, 2], [0], [0]>} : vector<1x8x8xbf16>, vector<1x8x8xbf16>, vector<1x8x8xf32> -> vector<1x8x8xf32>
    "tpu.trace_stop"() : () -> ()
    %104 = tpu.reciprocal %100 : vector<1x8x1xf32> -> vector<1x8x1xf32>
    %105 = vector.broadcast %104 : vector<1x8x1xf32> to vector<1x8x8xf32>
    %106 = arith.mulf %103, %105 : vector<1x8x8xf32>
    %107 = vector.extract_strided_slice %22 {offsets = [0, 0, 40], sizes = [1, 8, 8], strides = [1, 1, 1]} : vector<1x8x64xbf16> to vector<1x8x8xbf16>
    %108 = vector.extract_strided_slice %24 {offsets = [0, 0, 40], sizes = [1, 8, 8], strides = [1, 1, 1]} : vector<1x8x64xbf16> to vector<1x8x8xbf16>
    "tpu.trace_start"() <{level = 10 : i32, message = "bqd,bkd->bqk"}> : () -> ()
    %cst_39 = arith.constant dense<0.000000e+00> : vector<1x8x8xf32>
    %109 = tpu.matmul %107, %108, %cst_39 {dimension_numbers = #tpu.dot_dimension_numbers<[2], [2], [1], [1], [0, 0, 0, 1, 1, 1], [0], [0]>} : vector<1x8x8xbf16>, vector<1x8x8xbf16>, vector<1x8x8xf32> -> vector<1x8x8xf32>
    "tpu.trace_stop"() : () -> ()
    %cst_40 = arith.constant dense<0xFF800000> : vector<1x8xf32>
    %110 = vector.multi_reduction <maximumf>, %109, %cst_40 [2] : vector<1x8x8xf32> to vector<1x8xf32>
    %111 = vector.shape_cast %110 : vector<1x8xf32> to vector<1x8x1xf32>
    %112 = vector.broadcast %111 : vector<1x8x1xf32> to vector<1x8x8xf32>
    %113 = arith.subf %109, %112 : vector<1x8x8xf32>
    %114 = math.exp %113 : vector<1x8x8xf32>
    %cst_41 = arith.constant dense<0.000000e+00> : vector<1x8xf32>
    %115 = vector.multi_reduction <add>, %114, %cst_41 [2] : vector<1x8x8xf32> to vector<1x8xf32>
    %116 = vector.shape_cast %115 : vector<1x8xf32> to vector<1x8x1xf32>
    %117 = arith.truncf %114 : vector<1x8x8xf32> to vector<1x8x8xbf16>
    %118 = vector.extract_strided_slice %26 {offsets = [0, 0, 40], sizes = [1, 8, 8], strides = [1, 1, 1]} : vector<1x8x64xbf16> to vector<1x8x8xbf16>
    "tpu.trace_start"() <{level = 10 : i32, message = "bqk,bkd->bqd"}> : () -> ()
    %cst_42 = arith.constant dense<0.000000e+00> : vector<1x8x8xf32>
    %119 = tpu.matmul %117, %118, %cst_42 {dimension_numbers = #tpu.dot_dimension_numbers<[2], [1], [1], [2], [0, 0, 0, 1, 1, 2], [0], [0]>} : vector<1x8x8xbf16>, vector<1x8x8xbf16>, vector<1x8x8xf32> -> vector<1x8x8xf32>
    "tpu.trace_stop"() : () -> ()
    %120 = tpu.reciprocal %116 : vector<1x8x1xf32> -> vector<1x8x1xf32>
    %121 = vector.broadcast %120 : vector<1x8x1xf32> to vector<1x8x8xf32>
    %122 = arith.mulf %119, %121 : vector<1x8x8xf32>
    %123 = vector.extract_strided_slice %22 {offsets = [0, 0, 48], sizes = [1, 8, 8], strides = [1, 1, 1]} : vector<1x8x64xbf16> to vector<1x8x8xbf16>
    %124 = vector.extract_strided_slice %24 {offsets = [0, 0, 48], sizes = [1, 8, 8], strides = [1, 1, 1]} : vector<1x8x64xbf16> to vector<1x8x8xbf16>
    "tpu.trace_start"() <{level = 10 : i32, message = "bqd,bkd->bqk"}> : () -> ()
    %cst_43 = arith.constant dense<0.000000e+00> : vector<1x8x8xf32>
    %125 = tpu.matmul %123, %124, %cst_43 {dimension_numbers = #tpu.dot_dimension_numbers<[2], [2], [1], [1], [0, 0, 0, 1, 1, 1], [0], [0]>} : vector<1x8x8xbf16>, vector<1x8x8xbf16>, vector<1x8x8xf32> -> vector<1x8x8xf32>
    "tpu.trace_stop"() : () -> ()
    %cst_44 = arith.constant dense<0xFF800000> : vector<1x8xf32>
    %126 = vector.multi_reduction <maximumf>, %125, %cst_44 [2] : vector<1x8x8xf32> to vector<1x8xf32>
    %127 = vector.shape_cast %126 : vector<1x8xf32> to vector<1x8x1xf32>
    %128 = vector.broadcast %127 : vector<1x8x1xf32> to vector<1x8x8xf32>
    %129 = arith.subf %125, %128 : vector<1x8x8xf32>
    %130 = math.exp %129 : vector<1x8x8xf32>
    %cst_45 = arith.constant dense<0.000000e+00> : vector<1x8xf32>
    %131 = vector.multi_reduction <add>, %130, %cst_45 [2] : vector<1x8x8xf32> to vector<1x8xf32>
    %132 = vector.shape_cast %131 : vector<1x8xf32> to vector<1x8x1xf32>
    %133 = arith.truncf %130 : vector<1x8x8xf32> to vector<1x8x8xbf16>
    %134 = vector.extract_strided_slice %26 {offsets = [0, 0, 48], sizes = [1, 8, 8], strides = [1, 1, 1]} : vector<1x8x64xbf16> to vector<1x8x8xbf16>
    "tpu.trace_start"() <{level = 10 : i32, message = "bqk,bkd->bqd"}> : () -> ()
    %cst_46 = arith.constant dense<0.000000e+00> : vector<1x8x8xf32>
    %135 = tpu.matmul %133, %134, %cst_46 {dimension_numbers = #tpu.dot_dimension_numbers<[2], [1], [1], [2], [0, 0, 0, 1, 1, 2], [0], [0]>} : vector<1x8x8xbf16>, vector<1x8x8xbf16>, vector<1x8x8xf32> -> vector<1x8x8xf32>
    "tpu.trace_stop"() : () -> ()
    %136 = tpu.reciprocal %132 : vector<1x8x1xf32> -> vector<1x8x1xf32>
    %137 = vector.broadcast %136 : vector<1x8x1xf32> to vector<1x8x8xf32>
    %138 = arith.mulf %135, %137 : vector<1x8x8xf32>
    %139 = vector.extract_strided_slice %22 {offsets = [0, 0, 56], sizes = [1, 8, 8], strides = [1, 1, 1]} : vector<1x8x64xbf16> to vector<1x8x8xbf16>
    %140 = vector.extract_strided_slice %24 {offsets = [0, 0, 56], sizes = [1, 8, 8], strides = [1, 1, 1]} : vector<1x8x64xbf16> to vector<1x8x8xbf16>
    "tpu.trace_start"() <{level = 10 : i32, message = "bqd,bkd->bqk"}> : () -> ()
    %cst_47 = arith.constant dense<0.000000e+00> : vector<1x8x8xf32>
    %141 = tpu.matmul %139, %140, %cst_47 {dimension_numbers = #tpu.dot_dimension_numbers<[2], [2], [1], [1], [0, 0, 0, 1, 1, 1], [0], [0]>} : vector<1x8x8xbf16>, vector<1x8x8xbf16>, vector<1x8x8xf32> -> vector<1x8x8xf32>
    "tpu.trace_stop"() : () -> ()
    %cst_48 = arith.constant dense<0xFF800000> : vector<1x8xf32>
    %142 = vector.multi_reduction <maximumf>, %141, %cst_48 [2] : vector<1x8x8xf32> to vector<1x8xf32>
    %143 = vector.shape_cast %142 : vector<1x8xf32> to vector<1x8x1xf32>
    %144 = vector.broadcast %143 : vector<1x8x1xf32> to vector<1x8x8xf32>
    %145 = arith.subf %141, %144 : vector<1x8x8xf32>
    %146 = math.exp %145 : vector<1x8x8xf32>
    %cst_49 = arith.constant dense<0.000000e+00> : vector<1x8xf32>
    %147 = vector.multi_reduction <add>, %146, %cst_49 [2] : vector<1x8x8xf32> to vector<1x8xf32>
    %148 = vector.shape_cast %147 : vector<1x8xf32> to vector<1x8x1xf32>
    %149 = arith.truncf %146 : vector<1x8x8xf32> to vector<1x8x8xbf16>
    %150 = vector.extract_strided_slice %26 {offsets = [0, 0, 56], sizes = [1, 8, 8], strides = [1, 1, 1]} : vector<1x8x64xbf16> to vector<1x8x8xbf16>
    "tpu.trace_start"() <{level = 10 : i32, message = "bqk,bkd->bqd"}> : () -> ()
    %cst_50 = arith.constant dense<0.000000e+00> : vector<1x8x8xf32>
    %151 = tpu.matmul %149, %150, %cst_50 {dimension_numbers = #tpu.dot_dimension_numbers<[2], [1], [1], [2], [0, 0, 0, 1, 1, 2], [0], [0]>} : vector<1x8x8xbf16>, vector<1x8x8xbf16>, vector<1x8x8xf32> -> vector<1x8x8xf32>
    "tpu.trace_stop"() : () -> ()
    %152 = tpu.reciprocal %148 : vector<1x8x1xf32> -> vector<1x8x1xf32>
    %153 = vector.broadcast %152 : vector<1x8x1xf32> to vector<1x8x8xf32>
    %154 = arith.mulf %151, %153 : vector<1x8x8xf32>
    %155 = tpu.concatenate %42, %58, %74, %90, %106, %122, %138, %154 in 2 : vector<1x8x8xf32>, vector<1x8x8xf32>, vector<1x8x8xf32>, vector<1x8x8xf32>, vector<1x8x8xf32>, vector<1x8x8xf32>, vector<1x8x8xf32>, vector<1x8x8xf32> -> vector<1x8x64xf32>
    %156 = vector.shape_cast %155 : vector<1x8x64xf32> to vector<8x64xf32>
    %157 = arith.truncf %156 : vector<8x64xf32> to vector<8x64xbf16>
    %c0_51 = arith.constant 0 : index
    %c0_52 = arith.constant 0 : index
    %158 = vector.load %arg7[%c0_51, %c0_52] : memref<64x64xbf16, #tpu.memory_space<vmem>>, vector<64x64xbf16>
    %cst_53 = arith.constant dense<0.000000e+00> : vector<8x64xf32>
    %159 = tpu.matmul %157, %158, %cst_53 {dimension_numbers = #tpu.dot_dimension_numbers<[1], [0], [0], [1], [0, 0, 1, 1], [], []>} : vector<8x64xbf16>, vector<64x64xbf16>, vector<8x64xf32> -> vector<8x64xf32>
    %c0_54 = arith.constant 0 : index
    %c0_55 = arith.constant 0 : index
    %160 = vector.load %arg11[%c0_54, %c0_55] : memref<1x64xf32, #tpu.memory_space<vmem>>, vector<1x64xf32>
    %161 = vector.broadcast %160 : vector<1x64xf32> to vector<8x64xf32>
    %162 = arith.addf %159, %161 : vector<8x64xf32>
    %163 = vector.shape_cast %0 : vector<1x8x64xf32> to vector<8x64xf32>
    %164 = arith.addf %163, %162 : vector<8x64xf32>
    %cst_56 = arith.constant dense<0.000000e+00> : vector<8xf32>
    %165 = vector.multi_reduction <add>, %164, %cst_56 [1] : vector<8x64xf32> to vector<8xf32>
    %166 = vector.shape_cast %165 : vector<8xf32> to vector<8x1xf32>
    %cst_57 = arith.constant 6.400000e+01 : f32
    %167 = vector.broadcast %cst_57 : f32 to vector<8x1xf32>
    %168 = arith.divf %166, %167 : vector<8x1xf32>
    %169 = vector.broadcast %168 : vector<8x1xf32> to vector<8x64xf32>
    %170 = arith.subf %164, %169 : vector<8x64xf32>
    %171 = arith.mulf %170, %170 : vector<8x64xf32>
    %cst_58 = arith.constant dense<0.000000e+00> : vector<8xf32>
    %172 = vector.multi_reduction <add>, %171, %cst_58 [1] : vector<8x64xf32> to vector<8xf32>
    %173 = vector.shape_cast %172 : vector<8xf32> to vector<8x1xf32>
    %cst_59 = arith.constant 6.400000e+01 : f32
    %174 = vector.broadcast %cst_59 : f32 to vector<8x1xf32>
    %175 = arith.divf %173, %174 : vector<8x1xf32>
    %176 = vector.broadcast %168 : vector<8x1xf32> to vector<8x64xf32>
    %177 = arith.subf %164, %176 : vector<8x64xf32>
    %cst_60 = arith.constant 9.99999974E-6 : f32
    %178 = vector.broadcast %cst_60 : f32 to vector<8x1xf32>
    %179 = arith.addf %175, %178 : vector<8x1xf32>
    %180 = math.rsqrt %179 : vector<8x1xf32>
    %181 = vector.broadcast %180 : vector<8x1xf32> to vector<8x64xf32>
    %182 = arith.mulf %177, %181 : vector<8x64xf32>
    %c0_61 = arith.constant 0 : index
    %c0_62 = arith.constant 0 : index
    %183 = vector.load %arg12[%c0_61, %c0_62] : memref<1x64xf32, #tpu.memory_space<vmem>>, vector<1x64xf32>
    %184 = vector.broadcast %183 : vector<1x64xf32> to vector<8x64xf32>
    %185 = arith.mulf %182, %184 : vector<8x64xf32>
    %c0_63 = arith.constant 0 : index
    %c0_64 = arith.constant 0 : index
    %186 = vector.load %arg13[%c0_63, %c0_64] : memref<1x64xf32, #tpu.memory_space<vmem>>, vector<1x64xf32>
    %187 = vector.broadcast %186 : vector<1x64xf32> to vector<8x64xf32>
    %188 = arith.addf %185, %187 : vector<8x64xf32>
    %189 = vector.shape_cast %188 : vector<8x64xf32> to vector<1x8x64xf32>
    %190 = arith.truncf %189 : vector<1x8x64xf32> to vector<1x8x64xbf16>
    %c0_65 = arith.constant 0 : index
    %c0_66 = arith.constant 0 : index
    %c0_67 = arith.constant 0 : index
    %191 = vector.load %arg14[%c0_65, %c0_66, %c0_67] : memref<1x8x64xbf16, #tpu.memory_space<vmem>>, vector<1x8x64xbf16>
    tpu.vector_store %arg14[%c0_65, %c0_66, %c0_67], %190 {strides = array<i32>} : memref<1x8x64xbf16, #tpu.memory_space<vmem>>, vector<1x8x64xbf16>,
    return
  }
  func.func @transform_0(%arg0: i32, %arg1: i32) -> (i32, i32, i32) {
    %c0_i32 = arith.constant 0 : i32
    %c0_i32_0 = arith.constant 0 : i32
    return %arg0, %arg1, %c0_i32 : i32, i32, i32
  }
  func.func @transform_1(%arg0: i32, %arg1: i32) -> (i32, i32, i32) {
    %c0_i32 = arith.constant 0 : i32
    %c0_i32_0 = arith.constant 0 : i32
    %c0_i32_1 = arith.constant 0 : i32
    return %arg0, %c0_i32, %c0_i32_0 : i32, i32, i32
  }
  func.func @transform_2(%arg0: i32, %arg1: i32) -> (i32, i32) {
    %c0_i32 = arith.constant 0 : i32
    %c0_i32_0 = arith.constant 0 : i32
    %c0_i32_1 = arith.constant 0 : i32
    return %c0_i32, %c0_i32_0 : i32, i32
  }
  func.func @transform_3(%arg0: i32, %arg1: i32) -> (i32, i32) {
    %c0_i32 = arith.constant 0 : i32
    %c0_i32_0 = arith.constant 0 : i32
    %c0_i32_1 = arith.constant 0 : i32
    return %c0_i32, %c0_i32_0 : i32, i32
  }
  func.func @transform_4(%arg0: i32, %arg1: i32) -> (i32, i32) {
    %c0_i32 = arith.constant 0 : i32
    %c0_i32_0 = arith.constant 0 : i32
    %c0_i32_1 = arith.constant 0 : i32
    return %c0_i32, %c0_i32_0 : i32, i32
  }
  func.func @transform_5(%arg0: i32, %arg1: i32) -> (i32, i32) {
    %c0_i32 = arith.constant 0 : i32
    %c0_i32_0 = arith.constant 0 : i32
    %c0_i32_1 = arith.constant 0 : i32
    return %c0_i32, %c0_i32_0 : i32, i32
  }
  func.func @transform_6(%arg0: i32, %arg1: i32) -> (i32, i32) {
    %c0_i32 = arith.constant 0 : i32
    %c0_i32_0 = arith.constant 0 : i32
    %c0_i32_1 = arith.constant 0 : i32
    return %c0_i32, %c0_i32_0 : i32, i32
  }
  func.func @transform_7(%arg0: i32, %arg1: i32) -> (i32, i32) {
    %c0_i32 = arith.constant 0 : i32
    %c0_i32_0 = arith.constant 0 : i32
    %c0_i32_1 = arith.constant 0 : i32
    return %c0_i32, %c0_i32_0 : i32, i32
  }
  func.func @transform_8(%arg0: i32, %arg1: i32) -> (i32, i32) {
    %c0_i32 = arith.constant 0 : i32
    %c0_i32_0 = arith.constant 0 : i32
    %c0_i32_1 = arith.constant 0 : i32
    return %c0_i32, %c0_i32_0 : i32, i32
  }
  func.func @transform_9(%arg0: i32, %arg1: i32) -> (i32, i32) {
    %c0_i32 = arith.constant 0 : i32
    %c0_i32_0 = arith.constant 0 : i32
    %c0_i32_1 = arith.constant 0 : i32
    return %c0_i32, %c0_i32_0 : i32, i32
  }
  func.func @transform_10(%arg0: i32, %arg1: i32) -> (i32, i32) {
    %c0_i32 = arith.constant 0 : i32
    %c0_i32_0 = arith.constant 0 : i32
    %c0_i32_1 = arith.constant 0 : i32
    return %c0_i32, %c0_i32_0 : i32, i32
  }
  func.func @transform_11(%arg0: i32, %arg1: i32) -> (i32, i32) {
    %c0_i32 = arith.constant 0 : i32
    %c0_i32_0 = arith.constant 0 : i32
    %c0_i32_1 = arith.constant 0 : i32
    return %c0_i32, %c0_i32_0 : i32, i32
  }
  func.func @transform_12(%arg0: i32, %arg1: i32) -> (i32, i32, i32) {
    %c0_i32 = arith.constant 0 : i32
    %c0_i32_0 = arith.constant 0 : i32
    return %arg0, %arg1, %c0_i32 : i32, i32, i32
  }
}

module attributes {stable_mosaic.version = 11 : i64} {
  func.func @ffn_ln_kernel(%arg0: i32, %arg1: i32, %arg2: memref<1x8x64xbf16, #tpu.memory_space<vmem>>, %arg3: memref<64x256xbf16, #tpu.memory_space<vmem>>, %arg4: memref<1x256xf32, #tpu.memory_space<vmem>>, %arg5: memref<256x64xbf16, #tpu.memory_space<vmem>>, %arg6: memref<1x64xf32, #tpu.memory_space<vmem>>, %arg7: memref<1x64xf32, #tpu.memory_space<vmem>>, %arg8: memref<1x64xf32, #tpu.memory_space<vmem>>, %arg9: memref<1x8x64xf32, #tpu.memory_space<vmem>>, %arg10: memref<8x64xf32, #tpu.memory_space<vmem>>) attributes {dimension_semantics = [#tpu.dimension_semantics<parallel>, #tpu.dimension_semantics<arbitrary>], iteration_bounds = array<i64: 2, 1>, scalar_prefetch = 0 : i64, scratch_operands = 1 : i64, tpu.core_type = #tpu.core_type<tc>, window_params = [{transform_indices = @transform_0, window_bounds = array<i64: 1, 8, 64>}, {transform_indices = @transform_1, window_bounds = array<i64: 64, 256>}, {transform_indices = @transform_2, window_bounds = array<i64: 1, 256>}, {transform_indices = @transform_3, window_bounds = array<i64: 256, 64>}, {pipeline_mode = #tpu.pipeline_mode<synchronous>, transform_indices = @transform_4, window_bounds = array<i64: 1, 64>}, {pipeline_mode = #tpu.pipeline_mode<synchronous>, transform_indices = @transform_5, window_bounds = array<i64: 1, 64>}, {pipeline_mode = #tpu.pipeline_mode<synchronous>, transform_indices = @transform_6, window_bounds = array<i64: 1, 64>}, {transform_indices = @transform_7, window_bounds = array<i64: 1, 8, 64>}]} {
    %c0_i32 = arith.constant 0 : i32
    %0 = arith.cmpi eq, %arg1, %c0_i32 : i32
    %1 = arith.extui %0 : i1 to i32
    %c0_i32_0 = arith.constant 0 : i32
    %2 = arith.cmpi ne, %1, %c0_i32_0 : i32
    scf.if %2 {
      %cst_17 = arith.constant 0.000000e+00 : f32
      %21 = vector.broadcast %cst_17 : f32 to vector<8x64xf32>
      %c0_18 = arith.constant 0 : index
      %c0_19 = arith.constant 0 : index
      %22 = vector.load %arg10[%c0_18, %c0_19] : memref<8x64xf32, #tpu.memory_space<vmem>>, vector<8x64xf32>
      tpu.vector_store %arg10[%c0_18, %c0_19], %21 {strides = array<i32>} : memref<8x64xf32, #tpu.memory_space<vmem>>, vector<8x64xf32>,
    } else {
    }
    %c0 = arith.constant 0 : index
    %c0_1 = arith.constant 0 : index
    %c0_2 = arith.constant 0 : index
    %3 = vector.load %arg2[%c0, %c0_1, %c0_2] : memref<1x8x64xbf16, #tpu.memory_space<vmem>>, vector<1x8x64xbf16>
    %4 = vector.shape_cast %3 : vector<1x8x64xbf16> to vector<8x64xbf16>
    %c0_3 = arith.constant 0 : index
    %c0_4 = arith.constant 0 : index
    %5 = vector.load %arg3[%c0_3, %c0_4] : memref<64x256xbf16, #tpu.memory_space<vmem>>, vector<64x256xbf16>
    %cst = arith.constant dense<0.000000e+00> : vector<8x256xf32>
    %6 = tpu.matmul %4, %5, %cst {dimension_numbers = #tpu.dot_dimension_numbers<[1], [0], [0], [1], [0, 0, 1, 1], [], []>} : vector<8x64xbf16>, vector<64x256xbf16>, vector<8x256xf32> -> vector<8x256xf32>
    %c0_5 = arith.constant 0 : index
    %c0_6 = arith.constant 0 : index
    %7 = vector.load %arg4[%c0_5, %c0_6] : memref<1x256xf32, #tpu.memory_space<vmem>>, vector<1x256xf32>
    %8 = vector.broadcast %7 : vector<1x256xf32> to vector<8x256xf32>
    %9 = arith.addf %6, %8 : vector<8x256xf32>
    %cst_7 = arith.constant 0.000000e+00 : f32
    %10 = vector.broadcast %cst_7 : f32 to vector<8x256xf32>
    %11 = arith.maximumf %9, %10 : vector<8x256xf32>
    %12 = arith.truncf %11 : vector<8x256xf32> to vector<8x256xbf16>
    %c0_8 = arith.constant 0 : index
    %c0_9 = arith.constant 0 : index
    %13 = vector.load %arg10[%c0_8, %c0_9] : memref<8x64xf32, #tpu.memory_space<vmem>>, vector<8x64xf32>
    %c0_10 = arith.constant 0 : index
    %c0_11 = arith.constant 0 : index
    %14 = vector.load %arg5[%c0_10, %c0_11] : memref<256x64xbf16, #tpu.memory_space<vmem>>, vector<256x64xbf16>
    %cst_12 = arith.constant dense<0.000000e+00> : vector<8x64xf32>
    %15 = tpu.matmul %12, %14, %cst_12 {dimension_numbers = #tpu.dot_dimension_numbers<[1], [0], [0], [1], [0, 0, 1, 1], [], []>} : vector<8x256xbf16>, vector<256x64xbf16>, vector<8x64xf32> -> vector<8x64xf32>
    %16 = arith.addf %13, %15 : vector<8x64xf32>
    %c0_13 = arith.constant 0 : index
    %c0_14 = arith.constant 0 : index
    %17 = vector.load %arg10[%c0_13, %c0_14] : memref<8x64xf32, #tpu.memory_space<vmem>>, vector<8x64xf32>
    tpu.vector_store %arg10[%c0_13, %c0_14], %16 {strides = array<i32>} : memref<8x64xf32, #tpu.memory_space<vmem>>, vector<8x64xf32>,
    %c0_i32_15 = arith.constant 0 : i32
    %18 = arith.cmpi eq, %arg1, %c0_i32_15 : i32
    %19 = arith.extui %18 : i1 to i32
    %c0_i32_16 = arith.constant 0 : i32
    %20 = arith.cmpi ne, %19, %c0_i32_16 : i32
    scf.if %20 {
      %c0_17 = arith.constant 0 : index
      %c0_18 = arith.constant 0 : index
      %c0_19 = arith.constant 0 : index
      %21 = vector.load %arg2[%c0_17, %c0_18, %c0_19] : memref<1x8x64xbf16, #tpu.memory_space<vmem>>, vector<1x8x64xbf16>
      %22 = vector.shape_cast %21 : vector<1x8x64xbf16> to vector<8x64xbf16>
      %23 = arith.extf %22 : vector<8x64xbf16> to vector<8x64xf32>
      %c0_20 = arith.constant 0 : index
      %c0_21 = arith.constant 0 : index
      %24 = vector.load %arg10[%c0_20, %c0_21] : memref<8x64xf32, #tpu.memory_space<vmem>>, vector<8x64xf32>
      %25 = arith.addf %23, %24 : vector<8x64xf32>
      %c0_22 = arith.constant 0 : index
      %c0_23 = arith.constant 0 : index
      %26 = vector.load %arg6[%c0_22, %c0_23] : memref<1x64xf32, #tpu.memory_space<vmem>>, vector<1x64xf32>
      %27 = vector.broadcast %26 : vector<1x64xf32> to vector<8x64xf32>
      %28 = arith.addf %25, %27 : vector<8x64xf32>
      %cst_24 = arith.constant dense<0.000000e+00> : vector<8xf32>
      %29 = vector.multi_reduction <add>, %28, %cst_24 [1] : vector<8x64xf32> to vector<8xf32>
      %30 = vector.shape_cast %29 : vector<8xf32> to vector<8x1xf32>
      %cst_25 = arith.constant 6.400000e+01 : f32
      %31 = vector.broadcast %cst_25 : f32 to vector<8x1xf32>
      %32 = arith.divf %30, %31 : vector<8x1xf32>
      %33 = vector.broadcast %32 : vector<8x1xf32> to vector<8x64xf32>
      %34 = arith.subf %28, %33 : vector<8x64xf32>
      %35 = arith.mulf %34, %34 : vector<8x64xf32>
      %cst_26 = arith.constant dense<0.000000e+00> : vector<8xf32>
      %36 = vector.multi_reduction <add>, %35, %cst_26 [1] : vector<8x64xf32> to vector<8xf32>
      %37 = vector.shape_cast %36 : vector<8xf32> to vector<8x1xf32>
      %cst_27 = arith.constant 6.400000e+01 : f32
      %38 = vector.broadcast %cst_27 : f32 to vector<8x1xf32>
      %39 = arith.divf %37, %38 : vector<8x1xf32>
      %40 = vector.broadcast %32 : vector<8x1xf32> to vector<8x64xf32>
      %41 = arith.subf %28, %40 : vector<8x64xf32>
      %cst_28 = arith.constant 9.99999974E-6 : f32
      %42 = vector.broadcast %cst_28 : f32 to vector<8x1xf32>
      %43 = arith.addf %39, %42 : vector<8x1xf32>
      %44 = math.rsqrt %43 : vector<8x1xf32>
      %45 = vector.broadcast %44 : vector<8x1xf32> to vector<8x64xf32>
      %46 = arith.mulf %41, %45 : vector<8x64xf32>
      %c0_29 = arith.constant 0 : index
      %c0_30 = arith.constant 0 : index
      %47 = vector.load %arg7[%c0_29, %c0_30] : memref<1x64xf32, #tpu.memory_space<vmem>>, vector<1x64xf32>
      %48 = vector.broadcast %47 : vector<1x64xf32> to vector<8x64xf32>
      %49 = arith.mulf %46, %48 : vector<8x64xf32>
      %c0_31 = arith.constant 0 : index
      %c0_32 = arith.constant 0 : index
      %50 = vector.load %arg8[%c0_31, %c0_32] : memref<1x64xf32, #tpu.memory_space<vmem>>, vector<1x64xf32>
      %51 = vector.broadcast %50 : vector<1x64xf32> to vector<8x64xf32>
      %52 = arith.addf %49, %51 : vector<8x64xf32>
      %53 = vector.shape_cast %52 : vector<8x64xf32> to vector<1x8x64xf32>
      %c0_33 = arith.constant 0 : index
      %c0_34 = arith.constant 0 : index
      %c0_35 = arith.constant 0 : index
      %54 = vector.load %arg9[%c0_33, %c0_34, %c0_35] : memref<1x8x64xf32, #tpu.memory_space<vmem>>, vector<1x8x64xf32>
      tpu.vector_store %arg9[%c0_33, %c0_34, %c0_35], %53 {strides = array<i32>} : memref<1x8x64xf32, #tpu.memory_space<vmem>>, vector<1x8x64xf32>,
    } else {
    }
    return
  }
  func.func @transform_0(%arg0: i32, %arg1: i32) -> (i32, i32, i32) {
    %c0_i32 = arith.constant 0 : i32
    %c0_i32_0 = arith.constant 0 : i32
    %c0_i32_1 = arith.constant 0 : i32
    return %arg0, %c0_i32, %c0_i32_0 : i32, i32, i32
  }
  func.func @transform_1(%arg0: i32, %arg1: i32) -> (i32, i32) {
    %c0_i32 = arith.constant 0 : i32
    %c0_i32_0 = arith.constant 0 : i32
    return %c0_i32, %arg1 : i32, i32
  }
  func.func @transform_2(%arg0: i32, %arg1: i32) -> (i32, i32) {
    %c0_i32 = arith.constant 0 : i32
    %c0_i32_0 = arith.constant 0 : i32
    return %c0_i32, %arg1 : i32, i32
  }
  func.func @transform_3(%arg0: i32, %arg1: i32) -> (i32, i32) {
    %c0_i32 = arith.constant 0 : i32
    %c0_i32_0 = arith.constant 0 : i32
    return %arg1, %c0_i32 : i32, i32
  }
  func.func @transform_4(%arg0: i32, %arg1: i32) -> (i32, i32) {
    %c0_i32 = arith.constant 0 : i32
    %c0_i32_0 = arith.constant 0 : i32
    %c0_i32_1 = arith.constant 0 : i32
    return %c0_i32, %c0_i32_0 : i32, i32
  }
  func.func @transform_5(%arg0: i32, %arg1: i32) -> (i32, i32) {
    %c0_i32 = arith.constant 0 : i32
    %c0_i32_0 = arith.constant 0 : i32
    %c0_i32_1 = arith.constant 0 : i32
    return %c0_i32, %c0_i32_0 : i32, i32
  }
  func.func @transform_6(%arg0: i32, %arg1: i32) -> (i32, i32) {
    %c0_i32 = arith.constant 0 : i32
    %c0_i32_0 = arith.constant 0 : i32
    %c0_i32_1 = arith.constant 0 : i32
    return %c0_i32, %c0_i32_0 : i32, i32
  }
  func.func @transform_7(%arg0: i32, %arg1: i32) -> (i32, i32, i32) {
    %c0_i32 = arith.constant 0 : i32
    %c0_i32_0 = arith.constant 0 : i32
    %c0_i32_1 = arith.constant 0 : i32
    return %arg0, %c0_i32, %c0_i32_0 : i32, i32, i32
  }
}

module attributes {stable_mosaic.version = 11 : i64} {
  func.func @ffn_ln_kernel(%arg0: i32, %arg1: i32, %arg2: memref<1x16x64xbf16, #tpu.memory_space<vmem>>, %arg3: memref<64x256xbf16, #tpu.memory_space<vmem>>, %arg4: memref<1x256xf32, #tpu.memory_space<vmem>>, %arg5: memref<256x64xbf16, #tpu.memory_space<vmem>>, %arg6: memref<1x64xf32, #tpu.memory_space<vmem>>, %arg7: memref<1x64xf32, #tpu.memory_space<vmem>>, %arg8: memref<1x64xf32, #tpu.memory_space<vmem>>, %arg9: memref<1x16x64xf32, #tpu.memory_space<vmem>>, %arg10: memref<16x64xf32, #tpu.memory_space<vmem>>) attributes {dimension_semantics = [#tpu.dimension_semantics<parallel>, #tpu.dimension_semantics<arbitrary>], iteration_bounds = array<i64: 2, 1>, scalar_prefetch = 0 : i64, scratch_operands = 1 : i64, tpu.core_type = #tpu.core_type<tc>, window_params = [{transform_indices = @transform_0, window_bounds = array<i64: 1, 16, 64>}, {transform_indices = @transform_1, window_bounds = array<i64: 64, 256>}, {transform_indices = @transform_2, window_bounds = array<i64: 1, 256>}, {transform_indices = @transform_3, window_bounds = array<i64: 256, 64>}, {pipeline_mode = #tpu.pipeline_mode<synchronous>, transform_indices = @transform_4, window_bounds = array<i64: 1, 64>}, {pipeline_mode = #tpu.pipeline_mode<synchronous>, transform_indices = @transform_5, window_bounds = array<i64: 1, 64>}, {pipeline_mode = #tpu.pipeline_mode<synchronous>, transform_indices = @transform_6, window_bounds = array<i64: 1, 64>}, {transform_indices = @transform_7, window_bounds = array<i64: 1, 16, 64>}]} {
    %c0_i32 = arith.constant 0 : i32
    %0 = arith.cmpi eq, %arg1, %c0_i32 : i32
    %1 = arith.extui %0 : i1 to i32
    %c0_i32_0 = arith.constant 0 : i32
    %2 = arith.cmpi ne, %1, %c0_i32_0 : i32
    scf.if %2 {
      %cst_17 = arith.constant 0.000000e+00 : f32
      %21 = vector.broadcast %cst_17 : f32 to vector<16x64xf32>
      %c0_18 = arith.constant 0 : index
      %c0_19 = arith.constant 0 : index
      %22 = vector.load %arg10[%c0_18, %c0_19] : memref<16x64xf32, #tpu.memory_space<vmem>>, vector<16x64xf32>
      tpu.vector_store %arg10[%c0_18, %c0_19], %21 {strides = array<i32>} : memref<16x64xf32, #tpu.memory_space<vmem>>, vector<16x64xf32>,
    } else {
    }
    %c0 = arith.constant 0 : index
    %c0_1 = arith.constant 0 : index
    %c0_2 = arith.constant 0 : index
    %3 = vector.load %arg2[%c0, %c0_1, %c0_2] : memref<1x16x64xbf16, #tpu.memory_space<vmem>>, vector<1x16x64xbf16>
    %4 = vector.shape_cast %3 : vector<1x16x64xbf16> to vector<16x64xbf16>
    %c0_3 = arith.constant 0 : index
    %c0_4 = arith.constant 0 : index
    %5 = vector.load %arg3[%c0_3, %c0_4] : memref<64x256xbf16, #tpu.memory_space<vmem>>, vector<64x256xbf16>
    %cst = arith.constant dense<0.000000e+00> : vector<16x256xf32>
    %6 = tpu.matmul %4, %5, %cst {dimension_numbers = #tpu.dot_dimension_numbers<[1], [0], [0], [1], [0, 0, 1, 1], [], []>} : vector<16x64xbf16>, vector<64x256xbf16>, vector<16x256xf32> -> vector<16x256xf32>
    %c0_5 = arith.constant 0 : index
    %c0_6 = arith.constant 0 : index
    %7 = vector.load %arg4[%c0_5, %c0_6] : memref<1x256xf32, #tpu.memory_space<vmem>>, vector<1x256xf32>
    %8 = vector.broadcast %7 : vector<1x256xf32> to vector<16x256xf32>
    %9 = arith.addf %6, %8 : vector<16x256xf32>
    %cst_7 = arith.constant 0.000000e+00 : f32
    %10 = vector.broadcast %cst_7 : f32 to vector<16x256xf32>
    %11 = arith.maximumf %9, %10 : vector<16x256xf32>
    %12 = arith.truncf %11 : vector<16x256xf32> to vector<16x256xbf16>
    %c0_8 = arith.constant 0 : index
    %c0_9 = arith.constant 0 : index
    %13 = vector.load %arg10[%c0_8, %c0_9] : memref<16x64xf32, #tpu.memory_space<vmem>>, vector<16x64xf32>
    %c0_10 = arith.constant 0 : index
    %c0_11 = arith.constant 0 : index
    %14 = vector.load %arg5[%c0_10, %c0_11] : memref<256x64xbf16, #tpu.memory_space<vmem>>, vector<256x64xbf16>
    %cst_12 = arith.constant dense<0.000000e+00> : vector<16x64xf32>
    %15 = tpu.matmul %12, %14, %cst_12 {dimension_numbers = #tpu.dot_dimension_numbers<[1], [0], [0], [1], [0, 0, 1, 1], [], []>} : vector<16x256xbf16>, vector<256x64xbf16>, vector<16x64xf32> -> vector<16x64xf32>
    %16 = arith.addf %13, %15 : vector<16x64xf32>
    %c0_13 = arith.constant 0 : index
    %c0_14 = arith.constant 0 : index
    %17 = vector.load %arg10[%c0_13, %c0_14] : memref<16x64xf32, #tpu.memory_space<vmem>>, vector<16x64xf32>
    tpu.vector_store %arg10[%c0_13, %c0_14], %16 {strides = array<i32>} : memref<16x64xf32, #tpu.memory_space<vmem>>, vector<16x64xf32>,
    %c0_i32_15 = arith.constant 0 : i32
    %18 = arith.cmpi eq, %arg1, %c0_i32_15 : i32
    %19 = arith.extui %18 : i1 to i32
    %c0_i32_16 = arith.constant 0 : i32
    %20 = arith.cmpi ne, %19, %c0_i32_16 : i32
    scf.if %20 {
      %c0_17 = arith.constant 0 : index
      %c0_18 = arith.constant 0 : index
      %c0_19 = arith.constant 0 : index
      %21 = vector.load %arg2[%c0_17, %c0_18, %c0_19] : memref<1x16x64xbf16, #tpu.memory_space<vmem>>, vector<1x16x64xbf16>
      %22 = vector.shape_cast %21 : vector<1x16x64xbf16> to vector<16x64xbf16>
      %23 = arith.extf %22 : vector<16x64xbf16> to vector<16x64xf32>
      %c0_20 = arith.constant 0 : index
      %c0_21 = arith.constant 0 : index
      %24 = vector.load %arg10[%c0_20, %c0_21] : memref<16x64xf32, #tpu.memory_space<vmem>>, vector<16x64xf32>
      %25 = arith.addf %23, %24 : vector<16x64xf32>
      %c0_22 = arith.constant 0 : index
      %c0_23 = arith.constant 0 : index
      %26 = vector.load %arg6[%c0_22, %c0_23] : memref<1x64xf32, #tpu.memory_space<vmem>>, vector<1x64xf32>
      %27 = vector.broadcast %26 : vector<1x64xf32> to vector<16x64xf32>
      %28 = arith.addf %25, %27 : vector<16x64xf32>
      %cst_24 = arith.constant dense<0.000000e+00> : vector<16xf32>
      %29 = vector.multi_reduction <add>, %28, %cst_24 [1] : vector<16x64xf32> to vector<16xf32>
      %30 = vector.shape_cast %29 : vector<16xf32> to vector<16x1xf32>
      %cst_25 = arith.constant 6.400000e+01 : f32
      %31 = vector.broadcast %cst_25 : f32 to vector<16x1xf32>
      %32 = arith.divf %30, %31 : vector<16x1xf32>
      %33 = vector.broadcast %32 : vector<16x1xf32> to vector<16x64xf32>
      %34 = arith.subf %28, %33 : vector<16x64xf32>
      %35 = arith.mulf %34, %34 : vector<16x64xf32>
      %cst_26 = arith.constant dense<0.000000e+00> : vector<16xf32>
      %36 = vector.multi_reduction <add>, %35, %cst_26 [1] : vector<16x64xf32> to vector<16xf32>
      %37 = vector.shape_cast %36 : vector<16xf32> to vector<16x1xf32>
      %cst_27 = arith.constant 6.400000e+01 : f32
      %38 = vector.broadcast %cst_27 : f32 to vector<16x1xf32>
      %39 = arith.divf %37, %38 : vector<16x1xf32>
      %40 = vector.broadcast %32 : vector<16x1xf32> to vector<16x64xf32>
      %41 = arith.subf %28, %40 : vector<16x64xf32>
      %cst_28 = arith.constant 9.99999974E-6 : f32
      %42 = vector.broadcast %cst_28 : f32 to vector<16x1xf32>
      %43 = arith.addf %39, %42 : vector<16x1xf32>
      %44 = math.rsqrt %43 : vector<16x1xf32>
      %45 = vector.broadcast %44 : vector<16x1xf32> to vector<16x64xf32>
      %46 = arith.mulf %41, %45 : vector<16x64xf32>
      %c0_29 = arith.constant 0 : index
      %c0_30 = arith.constant 0 : index
      %47 = vector.load %arg7[%c0_29, %c0_30] : memref<1x64xf32, #tpu.memory_space<vmem>>, vector<1x64xf32>
      %48 = vector.broadcast %47 : vector<1x64xf32> to vector<16x64xf32>
      %49 = arith.mulf %46, %48 : vector<16x64xf32>
      %c0_31 = arith.constant 0 : index
      %c0_32 = arith.constant 0 : index
      %50 = vector.load %arg8[%c0_31, %c0_32] : memref<1x64xf32, #tpu.memory_space<vmem>>, vector<1x64xf32>
      %51 = vector.broadcast %50 : vector<1x64xf32> to vector<16x64xf32>
      %52 = arith.addf %49, %51 : vector<16x64xf32>
      %53 = vector.shape_cast %52 : vector<16x64xf32> to vector<1x16x64xf32>
      %c0_33 = arith.constant 0 : index
      %c0_34 = arith.constant 0 : index
      %c0_35 = arith.constant 0 : index
      %54 = vector.load %arg9[%c0_33, %c0_34, %c0_35] : memref<1x16x64xf32, #tpu.memory_space<vmem>>, vector<1x16x64xf32>
      tpu.vector_store %arg9[%c0_33, %c0_34, %c0_35], %53 {strides = array<i32>} : memref<1x16x64xf32, #tpu.memory_space<vmem>>, vector<1x16x64xf32>,
    } else {
    }
    return
  }
  func.func @transform_0(%arg0: i32, %arg1: i32) -> (i32, i32, i32) {
    %c0_i32 = arith.constant 0 : i32
    %c0_i32_0 = arith.constant 0 : i32
    %c0_i32_1 = arith.constant 0 : i32
    return %arg0, %c0_i32, %c0_i32_0 : i32, i32, i32
  }
  func.func @transform_1(%arg0: i32, %arg1: i32) -> (i32, i32) {
    %c0_i32 = arith.constant 0 : i32
    %c0_i32_0 = arith.constant 0 : i32
    return %c0_i32, %arg1 : i32, i32
  }
  func.func @transform_2(%arg0: i32, %arg1: i32) -> (i32, i32) {
    %c0_i32 = arith.constant 0 : i32
    %c0_i32_0 = arith.constant 0 : i32
    return %c0_i32, %arg1 : i32, i32
  }
  func.func @transform_3(%arg0: i32, %arg1: i32) -> (i32, i32) {
    %c0_i32 = arith.constant 0 : i32
    %c0_i32_0 = arith.constant 0 : i32
    return %arg1, %c0_i32 : i32, i32
  }
  func.func @transform_4(%arg0: i32, %arg1: i32) -> (i32, i32) {
    %c0_i32 = arith.constant 0 : i32
    %c0_i32_0 = arith.constant 0 : i32
    %c0_i32_1 = arith.constant 0 : i32
    return %c0_i32, %c0_i32_0 : i32, i32
  }
  func.func @transform_5(%arg0: i32, %arg1: i32) -> (i32, i32) {
    %c0_i32 = arith.constant 0 : i32
    %c0_i32_0 = arith.constant 0 : i32
    %c0_i32_1 = arith.constant 0 : i32
    return %c0_i32, %c0_i32_0 : i32, i32
  }
  func.func @transform_6(%arg0: i32, %arg1: i32) -> (i32, i32) {
    %c0_i32 = arith.constant 0 : i32
    %c0_i32_0 = arith.constant 0 : i32
    %c0_i32_1 = arith.constant 0 : i32
    return %c0_i32, %c0_i32_0 : i32, i32
  }
  func.func @transform_7(%arg0: i32, %arg1: i32) -> (i32, i32, i32) {
    %c0_i32 = arith.constant 0 : i32
    %c0_i32_0 = arith.constant 0 : i32
    %c0_i32_1 = arith.constant 0 : i32
    return %arg0, %c0_i32, %c0_i32_0 : i32, i32, i32
  }
}

</mosaic_0001>

<bundles_post_ra>
// kernel: tpu_custom_call.1
= control target key start
LH: loop header
LB: loop body
LE: loop exit
PB: predicated region body
PF: predicated region fallthrough
CT: control target
= control target key end

     0   :  { %6 = vsyncpa [#allocation3], 0  ;;  %s1166_s0 = inlined_call_operand.hbm [shape: f32[2,8,16], index: 0, kind: input, shape index: {}]   ;;  %s1167_s1 = inlined_call_operand.hbm [shape: f32[2,8,16], index: 1, kind: output, shape index: {}]  }
   0x1   :  { %7 = vsyncpa [#allocation4], 0  ;;  %s1023_s6 = smov [#allocation2]  }
   0x2   :  { %s13_s7 = sshll.u32 %s1023_s6, 4  ;;  %s14_s7 = int_to_ptr.vmem [resolvable:$true] %s13_s7 }
   0x3   :  { %s987_s8 = scalar_lea.vmem %s14_s7, 256  ;;  %p992_p1 = scmp.lt.s32.totalorder %s14_s7, %s14_s7 }
   0x4   :  { %p988_p0 = scmp.ne.s32.totalorder %s14_s7, %s987_s8  ;;  %p993_p2 = scmp.lt.s32.totalorder %s987_s8, %s987_s8 }
   0x6   :  { %p994_p3 = por %p993_p2, %p992_p1 }
   0x8   :  { %p995_p4 = pnand %p994_p3, %p988_p0 }
   0xa   :  { %998 = shalt.err (!%p995_p4)
}
   0xb   :  { %s1024_s9 = smov 128   ;;  %s1025_s10 = smov 8  }
   0xc   :  { %19 = dma.hbm_to_vmem [thread:$0]  %s1166_s0, 256, %s14_s7, [#allocation3], %s1024_s9, %s1024_s9, %s1025_s10  }
   0xd   :  { %1019 = dma.done.wait [#allocation3], 256  }
   0xe   :  { %1020 = vsyncadd [#allocation3], 4294967040  ;;  %v1026_v0 = vmov 0.0   ;;  %v24_v1 = vld [vmem:[#allocation2] sm:$0xff]  ;;  %s1027_s13 = smov 120   ;;  %v25_v2 = vld [vmem:[#allocation2 + $0x8] sm:$0xff]  ;;  %v38_v5 = vlaneseq }
   0xf   :  { %922 = vmatprep.subr.bf16.mxu0 %v1026_v0  ;;  %928 = vmatprep.subr.bf16.mxu1 %v1026_v0  ;;  %vm1028_vm0 = vmmov 0   ;;  %v1029_v3 = vmov 1983009808   ;;  %v1030_v8 = vmov 1934713408   ;;  %v34_v11 = vcombine.high %v24_v1, %v1026_v0  ;;  %s1031_s0 = smov [#allocation5]  }
  0x10   :  { %28 = vrot.lane.b32.xlu0 %v24_v1, %s1027_s13  ;;  %924 = vmatprep.mubr.msk.bf16.mxu0 %vm1028_vm0, %v1026_v0  ;;  %v36_v4 = vunpack.c.l.s4 %v1029_v3  ;;  %v39_v7 = vshrl.u32 %v38_v5, 7  ;;  %v67_v9 = vunpack.c.l.s4 %v1030_v8  ;;  %v100_v19 = vcombine.high %v25_v2, %v1026_v0  ;;  %s878_s14 = sshll.u32 %s1031_s0, 4  ;;  %s879_s14 = int_to_ptr.vmem [resolvable:$true] %s878_s14 }
  0x11   :  { %930 = vmatprep.mubr.msk.bf16.mxu1 %vm1028_vm0, %v1026_v0  ;;  %vm270_vm1 = vcmask 64512   ;;  %vm450_vm2 = vcmask 1043456   ;;  %vm870_vm3 = vcmask 130048   ;;  %s999_s15 = scalar_lea.vmem %s879_s14, 256  ;;  %p1004_p6 = scmp.lt.s32.totalorder %s879_s14, %s879_s14 }
  0x12   :  { %v37_v6 = vunpack.c.0.s8 %v36_v4  ;;  %v68_v12 = vunpack.c.0.s8 %v67_v9  ;;  %p1000_p5 = scmp.ne.s32.totalorder %s879_s14, %s999_s15  ;;  %p1005_p7 = scmp.lt.s32.totalorder %s999_s15, %s999_s15 }
  0x14   :  { %30 = vrot.lane.b32.xlu0 %v25_v2, %s1027_s13  ;;  %v1054_v10 = vsub.s32 %v37_v6, %v39_v7  ;;  %v1059_v16 = vsub.s32 %v68_v12, %v39_v7  ;;  %p1006_p8 = por %p1005_p7, %p1004_p6 }
  0x16   :  { %v41_v13 = vrot.slane %v24_v1, %v1054_v10  ;;  %v48_v15 = vrot.slane %v34_v11, %v1054_v10  ;;  %v107_v23 = vrot.slane %v25_v2, %v1054_v10  ;;  %v114_v29 = vrot.slane %v100_v19, %v1054_v10  ;;  %p1007_p9 = pnand %p1006_p8, %p1000_p5 }
  0x82   :  { %v29_v14 = vpop.permute.xlu0 %28 }
  0x83   :  { %v49_v17 = vcombine.high %v29_v14, %v1026_v0  ;;  %v56_v18 = vrot.slane %v29_v14, %v1054_v10 }
  0x85   :  { %v63_v20 = vrot.slane %v49_v17, %v1054_v10  ;;  %v64_v21 = vcombine.low %v41_v13, %v56_v18  ;;  %v65_v22 = vcombine.high %v41_v13, %v56_v18 }
  0x86   :  { %v31_v24 = vpop.permute.xlu0 %30 }
  0x87   :  { %v72_v25 = vrot.slane %v64_v21, %v1059_v16  ;;  %v79_v26 = vrot.slane %v65_v22, %v1059_v16  ;;  %v80_v27 = vcombine.low %v48_v15, %v63_v20  ;;  %v81_v28 = vcombine.high %v48_v15, %v63_v20 }
  0x88   :  { %v115_v30 = vcombine.high %v31_v24, %v1026_v0  ;;  %v122_v31 = vrot.slane %v31_v24, %v1054_v10 }
  0x89   :  { %v88_v32 = vrot.slane %v80_v27, %v1059_v16  ;;  %v95_v33 = vrot.slane %v81_v28, %v1059_v16  ;;  %v166_v34 = vcombine.low %v72_v25, %v79_v26  ;;  %v890_v35 = vcombine.high %v72_v25, %v79_v26 }
  0x8a   :  { %v129_v36 = vrot.slane %v115_v30, %v1054_v10  ;;  %v130_v37 = vcombine.low %v107_v23, %v122_v31  ;;  %v131_v38 = vcombine.high %v107_v23, %v122_v31 }
  0x8b   :  { %v173_v39 = vrot.slane %v166_v34, %v1054_v10  ;;  %v181_v40 = vrot.slane %v890_v35, %v1054_v10  ;;  %v182_v41 = vcombine.low %v88_v32, %v95_v33  ;;  %v891_v42 = vcombine.high %v88_v32, %v95_v33 }
  0x8c   :  { %v138_v43 = vrot.slane %v130_v37, %v1059_v16  ;;  %v145_v44 = vrot.slane %v131_v38, %v1059_v16  ;;  %v146_v45 = vcombine.low %v114_v29, %v129_v36  ;;  %v147_v46 = vcombine.high %v114_v29, %v129_v36 }
  0x8d   :  { %v189_v47 = vrot.slane %v182_v41, %v1054_v10  ;;  %v197_v48 = vrot.slane %v891_v42, %v1054_v10  ;;  %v198_v49 = vcombine.low %v173_v39, %v181_v40 }
  0x8e   :  { %v154_v50 = vrot.slane %v146_v45, %v1059_v16  ;;  %v161_v51 = vrot.slane %v147_v46, %v1059_v16  ;;  %v216_v52 = vcombine.low %v138_v43, %v145_v44  ;;  %v892_v53 = vcombine.high %v138_v43, %v145_v44 }
  0x8f   :  { %v206_v54 = vcombine.low %v189_v47, %v197_v48  ;;  %v205_v59 = vrot.slane %v198_v49, %v1059_v16 }
  0x90   :  { %v223_v55 = vrot.slane %v216_v52, %v1054_v10  ;;  %v231_v56 = vrot.slane %v892_v53, %v1054_v10  ;;  %v232_v57 = vcombine.low %v154_v50, %v161_v51  ;;  %v893_v58 = vcombine.high %v154_v50, %v161_v51 }
  0x91   :  { %v213_v60 = vrot.slane %v206_v54, %v1059_v16 }
  0x92   :  { %v239_v61 = vrot.slane %v232_v57, %v1054_v10  ;;  %v247_v62 = vrot.slane %v893_v58, %v1054_v10  ;;  %v248_v63 = vcombine.low %v223_v55, %v231_v56 }
  0x93   :  { %v214_v1 = vcombine.low %v205_v59, %v213_v60  ;;  %v215_v2 = vcombine.high %v205_v59, %v213_v60 }
  0x94   :  { %v255_v3 = vrot.slane %v248_v63, %v1059_v16  ;;  %v256_v4 = vcombine.low %v239_v61, %v247_v62 }
  0x95   :  { %v266_v5 = vpack.c.bf16 %v214_v1, %v214_v1  ;;  %v267_v6 = vpack.c.bf16 %v215_v2, %v215_v2 }
  0x96   :  { %v263_v7 = vrot.slane %v256_v4, %v1059_v16 }
  0x97   :  { %v272_v8 = vsel %vm270_vm1, %v266_v5, 0  ;;  %v315_v9 = vsel %vm270_vm1, %v267_v6, 0  ;;  %v451_v20 = vsel %vm450_vm2, %v266_v5, 0  ;;  %v496_v21 = vsel %vm450_vm2, %v267_v6, 0 }
  0x98   :  { %923 = vmatpush3.bf16.xpose.msra.mxu0 %v272_v8  ;;  %929 = vmatpush3.bf16.xpose.msra.mxu1 %v315_v9  ;;  %v264_v11 = vcombine.low %v255_v3, %v263_v7  ;;  %v265_v12 = vcombine.high %v255_v3, %v263_v7 }
  0x99   :  { %934 = vmatprep.subr.bf16.mxu0 %v1026_v0  ;;  %940 = vmatprep.subr.bf16.mxu1 %v1026_v0 }
  0x9a   :  { %v268_v13 = vpack.c.bf16 %v264_v11, %v264_v11  ;;  %v269_v14 = vpack.c.bf16 %v265_v12, %v265_v12 }
  0x9c   :  { %v541_v15 = vsel %vm450_vm2, %v268_v13, 0  ;;  %v586_v17 = vsel %vm450_vm2, %v269_v14, 0  ;;  %v358_v18 = vsel %vm270_vm1, %v268_v13, 0  ;;  %v401_v19 = vsel %vm270_vm1, %v269_v14, 0 }
  0x9f   :  { %925 = vmatmul.mubr.msk.bf16.vlgmr.msra.gmra.mxu0 %vm270_vm1, %v266_v5  ;;  %931 = vmatmul.mubr.msk.bf16.vlgmr.msra.gmra.mxu1 %vm270_vm1, %v267_v6 }
  0xa0   :  { %935 = vmatpush3.bf16.xpose.msra.mxu0 %v358_v18  ;;  %941 = vmatpush3.bf16.xpose.msra.mxu1 %v401_v19 }
  0xa1   :  { %936 = vmatprep.mubr.msk.bf16.mxu0 %vm1028_vm0, %v1026_v0  ;;  %942 = vmatprep.mubr.msk.bf16.mxu1 %vm1028_vm0, %v1026_v0 }
  0xa2   :  { %946 = vmatprep.subr.bf16.mxu0 %v1026_v0  ;;  %952 = vmatprep.subr.bf16.mxu1 %v1026_v0 }
  0xa7   :  { %937 = vmatmul.mubr.msk.bf16.vlgmr.msra.gmra.mxu0 %vm270_vm1, %v268_v13  ;;  %943 = vmatmul.mubr.msk.bf16.vlgmr.msra.gmra.mxu1 %vm270_vm1, %v269_v14 }
  0xa8   :  { %947 = vmatpush3.bf16.msra.mxu0 %v451_v20  ;;  %953 = vmatpush3.bf16.msra.mxu1 %v496_v21 }
  0xa9   :  { %948 = vmatprep.mubr.msk.bf16.mxu0 %vm1028_vm0, %v1026_v0  ;;  %954 = vmatprep.mubr.msk.bf16.mxu1 %vm1028_vm0, %v1026_v0 }
  0xaa   :  { %958 = vmatprep.subr.bf16.mxu0 %v1026_v0  ;;  %964 = vmatprep.subr.bf16.mxu1 %v1026_v0 }
 0x15f   :  { %v308_v22 = vpop.f32.mrf.mxu0  ;;  %v351_v23 = vpop.f32.mrf.mxu1 }
 0x160   :  { %v443_v24 = vpack.c.bf16 %v308_v22, %v308_v22  ;;  %v444_v25 = vpack.c.bf16 %v351_v23, %v351_v23 }
 0x161   :  { %v926_v26 = vpop.f32.mrf.mxu0  ;;  %v932_v27 = vpop.f32.mrf.mxu1 }
 0x162   :  { %949 = vmatmul.mubr.msk.bf16.vlgmr.msra.gmra.mxu0 %vm270_vm1, %v443_v24  ;;  %955 = vmatmul.mubr.msk.bf16.vlgmr.msra.gmra.mxu1 %vm270_vm1, %v444_v25 }
 0x163   :  { %959 = vmatpush3.bf16.msra.mxu0 %v541_v15  ;;  %965 = vmatpush3.bf16.msra.mxu1 %v586_v17  ;;  %v311_v28 = vpop.f32.mrf.mxu0  ;;  %v354_v29 = vpop.f32.mrf.mxu1 }
 0x164   :  { %960 = vmatprep.mubr.msk.bf16.mxu0 %vm1028_vm0, %v1026_v0  ;;  %966 = vmatprep.mubr.msk.bf16.mxu1 %vm1028_vm0, %v1026_v0 }
 0x165   :  { %v927_v30 = vpop.f32.mrf.mxu0  ;;  %v933_v31 = vpop.f32.mrf.mxu1 }
 0x167   :  { %v394_v32 = vpop.f32.mrf.mxu0  ;;  %v437_v33 = vpop.f32.mrf.mxu1 }
 0x168   :  { %v445_v34 = vpack.c.bf16 %v394_v32, %v394_v32  ;;  %v446_v35 = vpack.c.bf16 %v437_v33, %v437_v33 }
 0x169   :  { %v938_v36 = vpop.f32.mrf.mxu0  ;;  %v944_v37 = vpop.f32.mrf.mxu1 }
 0x16a   :  { %961 = vmatmul.mubr.msk.bf16.vlgmr.msra.gmra.mxu0 %vm270_vm1, %v445_v34  ;;  %967 = vmatmul.mubr.msk.bf16.vlgmr.msra.gmra.mxu1 %vm270_vm1, %v446_v35 }
 0x16b   :  { %v397_v38 = vpop.f32.mrf.mxu0  ;;  %v440_v39 = vpop.f32.mrf.mxu1 }
 0x16d   :  { %v939_v40 = vpop.f32.mrf.mxu0  ;;  %v945_v41 = vpop.f32.mrf.mxu1 }
 0x222   :  { %v487_v42 = vpop.f32.mrf.mxu0  ;;  %v532_v43 = vpop.f32.mrf.mxu1 }
 0x223   :  { %v628_v44 = vcombine.high %v487_v42, %v1026_v0  ;;  %v635_v45 = vrot.slane %v487_v42, %v1054_v10  ;;  %v643_v46 = vcombine.high %v532_v43, %v1026_v0  ;;  %v650_v47 = vrot.slane %v532_v43, %v1054_v10 }
 0x224   :  { %v950_v48 = vpop.f32.mrf.mxu0  ;;  %v956_v49 = vpop.f32.mrf.mxu1 }
 0x225   :  { %v642_v50 = vrot.slane %v628_v44, %v1054_v10  ;;  %v657_v51 = vrot.slane %v643_v46, %v1054_v10  ;;  %v658_v52 = vcombine.low %v635_v45, %v650_v47  ;;  %v659_v53 = vcombine.high %v635_v45, %v650_v47 }
 0x226   :  { %v490_v54 = vpop.f32.mrf.mxu0  ;;  %v535_v55 = vpop.f32.mrf.mxu1 }
 0x227   :  { %v666_v56 = vrot.slane %v658_v52, %v1059_v16  ;;  %v673_v57 = vrot.slane %v659_v53, %v1059_v16  ;;  %v674_v58 = vcombine.low %v642_v50, %v657_v51  ;;  %v675_v59 = vcombine.high %v642_v50, %v657_v51 }
 0x228   :  { %v951_v60 = vpop.f32.mrf.mxu0  ;;  %v957_v61 = vpop.f32.mrf.mxu1 }
 0x229   :  { %v682_v62 = vrot.slane %v674_v58, %v1059_v16  ;;  %v689_v63 = vrot.slane %v675_v59, %v1059_v16  ;;  %v760_v1 = vcombine.low %v666_v56, %v673_v57  ;;  %v902_v2 = vcombine.high %v666_v56, %v673_v57 }
 0x22a   :  { %v577_v3 = vpop.f32.mrf.mxu0  ;;  %v622_v4 = vpop.f32.mrf.mxu1 }
 0x22b   :  { %v694_v5 = vcombine.high %v577_v3, %v1026_v0  ;;  %v701_v6 = vrot.slane %v577_v3, %v1054_v10  ;;  %v709_v7 = vcombine.high %v622_v4, %v1026_v0  ;;  %v716_v8 = vrot.slane %v622_v4, %v1054_v10 }
 0x22c   :  { %v962_v9 = vpop.f32.mrf.mxu0  ;;  %v968_v11 = vpop.f32.mrf.mxu1  ;;  %v767_v12 = vrot.slane %v760_v1, %v1054_v10  ;;  %v775_v13 = vrot.slane %v902_v2, %v1054_v10  ;;  %v776_v14 = vcombine.low %v682_v62, %v689_v63  ;;  %v903_v15 = vcombine.high %v682_v62, %v689_v63 }
 0x22d   :  { %v708_v17 = vrot.slane %v694_v5, %v1054_v10  ;;  %v723_v18 = vrot.slane %v709_v7, %v1054_v10  ;;  %v724_v19 = vcombine.low %v701_v6, %v716_v8  ;;  %v725_v20 = vcombine.high %v701_v6, %v716_v8 }
 0x22e   :  { %v580_v21 = vpop.f32.mrf.mxu0  ;;  %v625_v22 = vpop.f32.mrf.mxu1  ;;  %v783_v0 = vrot.slane %v776_v14, %v1054_v10  ;;  %v791_v23 = vrot.slane %v903_v15, %v1054_v10  ;;  %v792_v24 = vcombine.low %v767_v12, %v775_v13 }
 0x22f   :  { %v732_v25 = vrot.slane %v724_v19, %v1059_v16  ;;  %v739_v26 = vrot.slane %v725_v20, %v1059_v16  ;;  %v740_v27 = vcombine.low %v708_v17, %v723_v18  ;;  %v741_v28 = vcombine.high %v708_v17, %v723_v18 }
 0x230   :  { %v963_v29 = vpop.f32.mrf.mxu0  ;;  %v969_v30 = vpop.f32.mrf.mxu1  ;;  %v800_v31 = vcombine.low %v783_v0, %v791_v23  ;;  %v799_v36 = vrot.slane %v792_v24, %v1059_v16 }
 0x231   :  { %v748_v32 = vrot.slane %v740_v27, %v1059_v16  ;;  %v755_v33 = vrot.slane %v741_v28, %v1059_v16  ;;  %v810_v34 = vcombine.low %v732_v25, %v739_v26  ;;  %v904_v35 = vcombine.high %v732_v25, %v739_v26 }
 0x232   :  { %v807_v37 = vrot.slane %v800_v31, %v1059_v16 }
 0x233   :  { %v817_v38 = vrot.slane %v810_v34, %v1054_v10  ;;  %v825_v39 = vrot.slane %v904_v35, %v1054_v10  ;;  %v826_v40 = vcombine.low %v748_v32, %v755_v33  ;;  %v905_v41 = vcombine.high %v748_v32, %v755_v33 }
 0x234   :  { %v809_v42 = vcombine.high %v799_v36, %v807_v37  ;;  %v808_v43 = vcombine.low %v799_v36, %v807_v37 }
 0x235   :  { %v833_v44 = vrot.slane %v826_v40, %v1054_v10  ;;  %v841_v45 = vrot.slane %v905_v41, %v1054_v10  ;;  %v842_v46 = vcombine.low %v817_v38, %v825_v39 }
 0x236   :  { %862 = vrot.lane.b32.xlu1 %v809_v42, %s1025_s10 }
 0x237   :  { %v850_v47 = vcombine.low %v833_v44, %v841_v45  ;;  %v849_v48 = vrot.slane %v842_v46, %v1059_v16 }
 0x239   :  { %v857_v49 = vrot.slane %v850_v47, %v1059_v16 }
 0x23b   :  { %v859_v50 = vcombine.high %v849_v48, %v857_v49  ;;  %v858_v51 = vcombine.low %v849_v48, %v857_v49 }
 0x23d   :  { %864 = vrot.lane.b32.xlu1 %v859_v50, %s1025_s10 }
 0x2a8   :  { %v863_v52 = vpop.permute.xlu1 %862 }
 0x2a9   :  { %v868_v53 = vsel %vm270_vm1, %v808_v43, %v863_v52 }
 0x2aa   :  { %871 = vst.msk [vmem:[#allocation5] sm:$0xff] %vm870_vm3, %v868_v53 }
 0x2af   :  { %v865_v10 = vpop.permute.xlu1 %864 }
 0x2b0   :  { %v869_v54 = vsel %vm270_vm1, %v858_v51, %v865_v10 }
 0x2b1   :  { %872 = vst.msk [vmem:[#allocation5 + $0x8] sm:$0xff] %vm870_vm3, %v869_v54 }
 0x2b2   :  { %1010 = shalt.err (!%p1007_p9)
}
 0x2b3   :  { %884 = dma.vmem_to_hbm [thread:$0]  %s879_s14, 256, %s1167_s1, [#allocation4], %s1024_s9, %s1024_s9, %s1025_s10  }
 0x2b4   :  { %1021 = dma.done.wait [#allocation4], 256  }
 0x2b5   :  { %1022 = vsyncadd [#allocation4], 4294967040 }
 0x2b6   :  { %888 = vsyncpa [#allocation3], 1 }
 0x2b7   :  { %889 = vsyncpa [#allocation4], 1 }

// kernel: co_attention_forward.8
= control target key start
LH: loop header
LB: loop body
LE: loop exit
PB: predicated region body
PF: predicated region fallthrough
CT: control target
= control target key end

     0   :  { %s2271_s21 = smov 0   ;;  %s2273_s22 = smov 0   ;;  %s2563_s0 = inlined_call_operand.vmem [shape: bf16[2,8,64], index: 0, kind: input, shape index: {}]   ;;  %s2564_s1 = inlined_call_operand.vmem [shape: bf16[2,16,64], index: 1, kind: input, shape index: {}]   ;;  %s2565_s2 = inlined_call_operand.vmem [shape: bf16[64,64], index: 2, kind: input, shape index: {}]   ;;  %s2566_s3 = inlined_call_operand.vmem [shape: bf16[64,64], index: 3, kind: input, shape index: {}]   ;;  %s2567_s4 = inlined_call_operand.vmem [shape: bf16[64,64], index: 4, kind: input, shape index: {}]   ;;  %s2568_s5 = inlined_call_operand.vmem [shape: bf16[64,64], index: 5, kind: input, shape index: {}]   ;;  %s2569_s6 = inlined_call_operand.vmem [shape: f32[1,64], index: 6, kind: input, shape index: {}]   ;;  %s2570_s7 = inlined_call_operand.vmem [shape: f32[1,64], index: 7, kind: input, shape index: {}]   ;;  %s2571_s8 = inlined_call_operand.vmem [shape: f32[1,64], index: 8, kind: input, shape index: {}]   ;;  %s2572_s9 = inlined_call_operand.vmem [shape: f32[1,64], index: 9, kind: input, shape index: {}]   ;;  %s2573_s10 = inlined_call_operand.vmem [shape: f32[1,64], index: 10, kind: input, shape index: {}]   ;;  %s2574_s11 = inlined_call_operand.vmem [shape: f32[1,64], index: 11, kind: input, shape index: {}]   ;;  %s2575_s12 = inlined_call_operand.vmem [shape: bf16[2,8,64], index: 12, kind: output, shape index: {}]  }
   0x1   :  { %s2275_s23 = smov 0  }
   0x2 LB: > { %s34_s24 = sadd.s32 1, %s2184_s22  ;;  %p1828_p0 = scmp.ge.s32.totalorder %s2188_s23, 1  ;;  %s2188_s23 = sphi %s2275_s23, %s22_s23   ;;  %s2184_s22 = sphi %s2273_s22, %s2577_s22   ;;  %s2180_s21 = sphi %s2271_s21, %s2576_s21  }
   0x3   : > { %p36_p1 = scmp.ge.s32.totalorder %s34_s24, 2  ;;  %p390_p2 = scmp.lt.s32.totalorder %s2188_s23, 3 }
   0x5   : > { %s2579_s24 = smov (%p36_p1, %s34_s24), 0  ;;  %p391_p3 = pnand %p1828_p0, %p390_p2 }
   0x6   : > { %p441_p4 = scmp.lt.s32.totalorder (!%p391_p3), %s2180_s21, 1  ;;  %s2193_s18 = smov (!%p391_p3), 112  }
   0x7   : > { %394 = sbr.rel (%p391_p3) target bundleno = 1828 (0x724), region = 68  ;;  %s2194_s19 = smov (!%p391_p3), 104  }
   0x8   : > { %s2196_s25 = smov (!%p391_p3), 88   ;;  %s2197_s26 = smov (!%p391_p3), 80  }
   0x9   : > { %s2198_s27 = smov (!%p391_p3), 72   ;;  %s2199_s30 = smov (!%p391_p3), 8  }
   0xa   : > { %s2200_s13 = smov (!%p391_p3), 16   ;;  %s2201_s14 = smov (!%p391_p3), 24  }
   0xb   : > { %s2202_s15 = smov (!%p391_p3), 32  }
   0xc   : > { %v2115_v0 = vld [vmem:[%s2565_s2 + $0x18] sm:$0xff]   ;;  %v2190_v1 = vmov 0.0   ;;  %v2117_v3 = vld [vmem:[%s2565_s2 + $0x10] sm:$0xff]   ;;  %vm2191_vm0 = vmmov 0   ;;  %s2581_s21 = smov (!%p441_p4, %s2180_s21), 1  ;;  %v2119_v5 = vld [vmem:[%s2565_s2 + $0x8] sm:$0xff]  }
   0xd   : > { %1931 = vmatprep.subr.bf16.mxu0 %v2190_v1  ;;  %1943 = vmatprep.subr.bf16.mxu1 %v2190_v1  ;;  %v2116_v2 = vld [vmem:[%s2566_s3 + $0x18] sm:$0xff]   ;;  %v2118_v4 = vld [vmem:[%s2566_s3 + $0x10] sm:$0xff]   ;;  %s1829_s17 = sshll.u32 %s2581_s21, 2  ;;  %v2120_v6 = vld [vmem:[%s2566_s3 + $0x8] sm:$0xff]   ;;  %s1878_s20 = sshll.u32 %s2581_s21, 3  ;;  %vm503_vm1 = vcmask 523264  }
   0xe   : > { %1932 = vmatpush3.bf16.msra.mxu0 %v2115_v0  ;;  %1939 = vmatprep.mubr.msk.bf16.mxu0 %vm2191_vm0, %v2190_v1  ;;  %v2121_v7 = vld [vmem:[%s2565_s2] sm:$0xff]   ;;  %s452_s29 = scalar_lea.vmem %s2564_s1, %s1878_s20  ;;  %s447_s16 = scalar_lea.vmem %s2563_s0, %s1829_s17  ;;  %v2124_v11 = vld [vmem:[%s2567_s4 + $0x18] sm:$0xff]   ;;  %v2125_v12 = vld [vmem:[%s2567_s4 + $0x10] sm:$0xff]   ;;  %vm718_vm2 = vcmask 64512   ;;  %vm765_vm3 = vcmask 130048   ;;  %vm1610_vm4 = vcmask 195584  }
   0xf   : > { %1944 = vmatpush3.bf16.msra.mxu1 %v2116_v2  ;;  %1933 = vmatprep.subr.bf16.mxu0 %v2190_v1  ;;  %v2122_v8 = vld [vmem:[%s2566_s3] sm:$0xff]   ;;  %v2126_v13 = vld [vmem:[%s2567_s4 + $0x8] sm:$0xff]   ;;  %s2195_s20 = smov 96   ;;  %vm1612_vm5 = vcmask 261120   ;;  %vm1614_vm6 = vcmask 326656   ;;  %vm1616_vm7 = vcmask 392192  }
  0x10   : > { %1945 = vmatprep.subr.bf16.mxu1 %v2190_v1  ;;  %1951 = vmatprep.mubr.msk.bf16.mxu1 %vm2191_vm0, %v2190_v1  ;;  %v2337_v9 = vld [vmem:[%s447_s16] sm:$0xf]  ;;  %s2192_s16 = smov 120   ;;  %vm1618_vm8 = vcmask 457728   ;;  %vm1736_vm9 = vcmask 519168  }
  0x11   : > { %v2123_v10 = vld [vmem:[%s452_s29] sm:$0xff]  }
  0x12   : > { %1934 = vmatpush3.bf16.msra.mxu0 %v2117_v3  ;;  %v2127_v14 = vld [vmem:[%s2567_s4] sm:$0xff]  }
  0x13   : > { %1946 = vmatpush3.bf16.msra.mxu1 %v2118_v4  ;;  %1935 = vmatprep.subr.bf16.mxu0 %v2190_v1  ;;  %v1833_v15 = vld [vmem:[%s2569_s6] ss:$0 sm:$0xff] }
  0x14   : > { %1947 = vmatprep.subr.bf16.mxu1 %v2190_v1  ;;  %v1839_v21 = vld [vmem:[%s2570_s7] ss:$0 sm:$0xff] }
  0x15   : > { %v1846_v32 = vld [vmem:[%s2571_s8] ss:$0 sm:$0xff] }
  0x16   : > { %1936 = vmatpush3.bf16.msra.mxu0 %v2119_v5 }
  0x17   : > { %1948 = vmatpush3.bf16.msra.mxu1 %v2120_v6  ;;  %1937 = vmatprep.subr.bf16.mxu0 %v2190_v1 }
  0x18   : > { %1949 = vmatprep.subr.bf16.mxu1 %v2190_v1 }
  0x1a   : > { %1938 = vmatpush3.bf16.msra.mxu0 %v2121_v7 }
  0x1b   : > { %1950 = vmatpush3.bf16.msra.mxu1 %v2122_v8  ;;  %1955 = vmatprep.subr.bf16.mxu0 %v2190_v1 }
  0x1c   : > { %1967 = vmatprep.subr.bf16.mxu1 %v2190_v1 }
  0x1d   : > { %1940 = vmatmul.mubr.msk.bf16.vlgmr.msra.gmra.mxu0 %vm503_vm1, %v2337_v9 }
  0x1e   : > { %1952 = vmatmul.mubr.msk.bf16.vlgmr.msra.gmra.mxu1 %vm503_vm1, %v2123_v10  ;;  %1963 = vmatprep.mubr.msk.bf16.mxu0 %vm2191_vm0, %v2190_v1 }
  0x1f   : > { %1969 = vmatprep.mubr.msk.bf16.mxu1 %vm2191_vm0, %v2190_v1  ;;  %1956 = vmatpush3.bf16.msra.mxu0 %v2124_v11 }
  0x20   : > { %1957 = vmatprep.subr.bf16.mxu0 %v2190_v1 }
  0x23   : > { %1958 = vmatpush3.bf16.msra.mxu0 %v2125_v12 }
  0x24   : > { %1959 = vmatprep.subr.bf16.mxu0 %v2190_v1 }
  0x27   : > { %1960 = vmatpush3.bf16.msra.mxu0 %v2126_v13 }
  0x28   : > { %1961 = vmatprep.subr.bf16.mxu0 %v2190_v1 }
  0x2b   : > { %1962 = vmatpush3.bf16.msra.mxu0 %v2127_v14 }
  0x2c   : > { %1991 = vmatprep.subr.bf16.mxu0 %v2190_v1 }
  0x2e   : > { %1964 = vmatmul.mubr.msk.bf16.vlgmr.msra.gmra.mxu0 %vm503_vm1, %v2123_v10 }
  0x2f   : > { %1993 = vmatprep.mubr.msk.bf16.mxu0 %vm2191_vm0, %v2190_v1 }
  0xdd   : > { %v541_v16 = vpop.f32.mrf.mxu0 }
  0xde   : > { %v542_v17 = vadd.f32 %v1833_v15, %v541_v16  ;;  %v628_v18 = vpop.f32.mrf.mxu1 }
  0xdf   : > { %v1941_v19 = vpop.f32.mrf.mxu0  ;;  %v629_v25 = vadd.f32 %v1839_v21, %v628_v18 }
  0xe0   : > { %v715_v20 = vpack.c.bf16 %v542_v17, %v542_v17  ;;  %v1953_v22 = vpop.f32.mrf.mxu1 }
  0xe1   : > { %v544_v23 = vpop.f32.mrf.mxu0 }
  0xe2   : > { %v631_v24 = vpop.f32.mrf.mxu1  ;;  %822 = vrot.lane.b32.xlu1 %v715_v20, %s2192_s16 }
  0xe3   : > { %v632_v26 = vadd.f32 %v1839_v21, %v631_v24  ;;  %v1942_v27 = vpop.f32.mrf.mxu0 }
  0xe4   : > { %v1954_v28 = vpop.f32.mrf.mxu1 }
  0xe5   : > { %v716_v29 = vpack.c.bf16 %v632_v26, %v629_v25 }
  0xe7   : > { %934 = vrot.lane.b32.xlu1 %v716_v29, %s2193_s18  ;;  %v723_v30 = vsel %vm718_vm2, %v716_v29, 0 }
  0xe8   : > { %1968 = vmatpush3.bf16.xpose.msra.mxu1 %v723_v30 }
  0xe9   : > { %1973 = vmatprep.subr.bf16.mxu1 %v2190_v1 }
  0xeb   : > { %932 = vrot.lane.b32.xlu1 %v715_v20, %s2193_s18 }
  0xee   : > { %v708_v33 = vpop.f32.mrf.mxu0 }
  0xef   : > { %1042 = vrot.lane.b32.xlu1 %v716_v29, %s2194_s19  ;;  %1970 = vmatmul.mubr.msk.bf16.vlgmr.msra.gmra.mxu1 %vm718_vm2, %v715_v20  ;;  %v709_v37 = vadd.f32 %v1846_v32, %v708_v33 }
  0xf0   : > { %1975 = vmatprep.mubr.msk.bf16.mxu1 %vm2191_vm0, %v2190_v1  ;;  %v1965_v36 = vpop.f32.mrf.mxu0 }
  0xf2   : > { %v711_v38 = vpop.f32.mrf.mxu0 }
  0xf3   : > { %1040 = vrot.lane.b32.xlu1 %v715_v20, %s2194_s19  ;;  %v712_v40 = vadd.f32 %v1846_v32, %v711_v38 }
  0xf4   : > { %v1966_v41 = vpop.f32.mrf.mxu0 }
  0xf5   : > { %v2395_v42 = vpack.c.bf16 %v712_v40, %v709_v37 }
  0xf7   : > { %1150 = vrot.lane.b32.xlu1 %v716_v29, %s2195_s20  ;;  %1974 = vmatpush3.bf16.msra.mxu1 %v2395_v42 }
  0xf8   : > { %1979 = vmatprep.subr.bf16.mxu1 %v2190_v1 }
  0xfb   : > { %1148 = vrot.lane.b32.xlu1 %v715_v20, %s2195_s20 }
  0xff   : > { %1256 = vrot.lane.b32.xlu1 %v715_v20, %s2196_s25 }
 0x103   : > { %1364 = vrot.lane.b32.xlu1 %v715_v20, %s2197_s26 }
 0x107   : > { %1472 = vrot.lane.b32.xlu1 %v715_v20, %s2198_s27 }
 0x154   : > { %v2388_v31 = vpop.permute.xlu1 %822 }
 0x159   : > { %v935_v34 = vpop.permute.xlu1 %934 }
 0x15a   : > { %v940_v35 = vsel %vm718_vm2, %v935_v34, 0 }
 0x15b   : > { %1992 = vmatpush3.bf16.xpose.msra.mxu0 %v940_v35 }
 0x15c   : > { %2003 = vmatprep.subr.bf16.mxu0 %v2190_v1 }
 0x15d   : > { %v933_v39 = vpop.permute.xlu1 %932 }
 0x161   : > { %v1043_v43 = vpop.permute.xlu1 %1042 }
 0x162   : > { %v1048_v44 = vsel %vm718_vm2, %v1043_v43, 0  ;;  %1994 = vmatmul.mubr.msk.bf16.vlgmr.msra.gmra.mxu0 %vm718_vm2, %v933_v39 }
 0x163   : > { %2004 = vmatpush3.bf16.xpose.msra.mxu0 %v1048_v44  ;;  %2005 = vmatprep.mubr.msk.bf16.mxu0 %vm2191_vm0, %v2190_v1 }
 0x164   : > { %2015 = vmatprep.subr.bf16.mxu0 %v2190_v1 }
 0x165   : > { %v1041_v45 = vpop.permute.xlu1 %1040 }
 0x169   : > { %v1151_v46 = vpop.permute.xlu1 %1150 }
 0x16a   : > { %v1156_v47 = vsel %vm718_vm2, %v1151_v46, 0  ;;  %2006 = vmatmul.mubr.msk.bf16.vlgmr.msra.gmra.mxu0 %vm718_vm2, %v1041_v45 }
 0x16b   : > { %2016 = vmatpush3.bf16.xpose.msra.mxu0 %v1156_v47  ;;  %2017 = vmatprep.mubr.msk.bf16.mxu0 %vm2191_vm0, %v2190_v1 }
 0x16c   : > { %2027 = vmatprep.subr.bf16.mxu0 %v2190_v1 }
 0x16d   : > { %v1149_v48 = vpop.permute.xlu1 %1148 }
 0x171   : > { %v1257_v14 = vpop.permute.xlu1 %1256 }
 0x172   : > { %2018 = vmatmul.mubr.msk.bf16.vlgmr.msra.gmra.mxu0 %vm718_vm2, %v1149_v48 }
 0x173   : > { %2029 = vmatprep.mubr.msk.bf16.mxu0 %vm2191_vm0, %v2190_v1 }
 0x175   : > { %v1365_v20 = vpop.permute.xlu1 %1364 }
 0x179   : > { %v1473_v22 = vpop.permute.xlu1 %1472 }
 0x1af   : > { %v759_v49 = vpop.f32.mrf.mxu1 }
 0x1b0   : > { %v766_v50 = vsel %vm765_vm3, %v759_v49, -inf }
 0x1b1   : > { %767 = vmax.xlane.f32.xlu0 %v766_v50  ;;  %v1971_v51 = vpop.f32.mrf.mxu1 }
 0x1b3   : > { %v762_v52 = vpop.f32.mrf.mxu1 }
 0x1b5   : > { %v1972_v53 = vpop.f32.mrf.mxu1 }
 0x1c7   : > { %825 = vrot.lane.b32.xlu0 %v716_v29, %s2192_s16 }
 0x1cb   : > { %1258 = vrot.lane.b32.xlu0 %v716_v29, %s2196_s25 }
 0x1cf   : > { %1366 = vrot.lane.b32.xlu0 %v716_v29, %s2197_s26 }
 0x1d3   : > { %1474 = vrot.lane.b32.xlu0 %v716_v29, %s2198_s27 }
 0x1d7   : > { %992 = vrot.lane.b32.xlu0 %v2395_v42, %s2193_s18 }
 0x222   : > { %v2419_v54 = vpop.f32.mrf.mxu0 }
 0x223   : > { %v982_v55 = vsel %vm765_vm3, %v2419_v54, -inf }
 0x224   : > { %983 = vmax.xlane.f32.xlu1 %v982_v55  ;;  %v1995_v56 = vpop.f32.mrf.mxu0 }
 0x226   : > { %v979_v57 = vpop.f32.mrf.mxu0 }
 0x228   : > { %v1996_v58 = vpop.f32.mrf.mxu0 }
 0x22a   : > { %v2423_v59 = vpop.f32.mrf.mxu0 }
 0x22b   : > { %v1090_v60 = vsel %vm765_vm3, %v2423_v59, -inf }
 0x22c   : > { %1091 = vmax.xlane.f32.xlu0 %v1090_v60  ;;  %v2007_v61 = vpop.f32.mrf.mxu0 }
 0x22e   : > { %v1087_v62 = vpop.f32.mrf.mxu0 }
 0x230   : > { %v2008_v63 = vpop.f32.mrf.mxu0 }
 0x232   : > { %v2427_v0 = vpop.f32.mrf.mxu0 }
 0x233   : > { %v1198_v2 = vsel %vm765_vm3, %v2427_v0, -inf }
 0x234   : > { %1199 = vmax.xlane.f32.xlu0 %v1198_v2  ;;  %v2019_v3 = vpop.f32.mrf.mxu0 }
 0x235   : > { %884 = vrot.lane.b32.xlu1 %v2395_v42, %s2192_s16 }
 0x236   : > { %v1195_v4 = vpop.f32.mrf.mxu0 }
 0x238   : > { %v2020_v5 = vpop.f32.mrf.mxu0 }
 0x23a   : > { %v768_v6 = vpop.xlane.xlu0 %767 }
 0x23b   : > { %v769_v7 = vsub.f32 %v759_v49, %v768_v6 }
 0x23d   : > { %v770_v8 = vmul.f32 1.442695, %v769_v7 }
 0x23e   : > { %v826_v10 = vpop.permute.xlu0 %825 }
 0x23f   : > { %2132 = vpow2.f32 %v770_v8  ;;  %v831_v18 = vsel %vm718_vm2, %v826_v10, 0 }
 0x242   : > { %v1259_v11 = vpop.permute.xlu0 %1258 }
 0x243   : > { %v1264_v12 = vsel %vm718_vm2, %v1259_v11, 0 }
 0x244   : > { %2028 = vmatpush3.bf16.xpose.msra.mxu0 %v1264_v12 }
 0x245   : > { %2039 = vmatprep.subr.bf16.mxu0 %v2190_v1 }
 0x246   : > { %v1367_v13 = vpop.permute.xlu0 %1366 }
 0x247   : > { %v1372_v15 = vsel %vm718_vm2, %v1367_v13, 0 }
 0x24a   : > { %v1475_v19 = vpop.permute.xlu0 %1474 }
 0x24b   : > { %2030 = vmatmul.mubr.msk.bf16.vlgmr.msra.gmra.mxu0 %vm718_vm2, %v1257_v14  ;;  %v1480_v21 = vsel %vm718_vm2, %v1475_v19, 0 }
 0x24c   : > { %v2437_v16 = vpop.eup %2132  ;;  %2040 = vmatpush3.bf16.xpose.msra.mxu0 %v1372_v15  ;;  %2041 = vmatprep.mubr.msk.bf16.mxu0 %vm2191_vm0, %v2190_v1 }
 0x24d   : > { %v775_v17 = vpack.c.bf16 %v2437_v16, %v2437_v16  ;;  %2051 = vmatprep.subr.bf16.mxu0 %v2190_v1  ;;  %v772_v15 = vsel %vm765_vm3, %v2437_v16, 0.0 }
 0x24e   : > { %v993_v49 = vpop.permute.xlu0 %992 }
 0x24f   : > { %1976 = vmatmul.mubr.msk.bf16.vlgmr.msra.gmra.mxu1 %vm765_vm3, %v775_v17 }
 0x250   : > { %1980 = vmatpush3.bf16.xpose.msra.mxu1 %v831_v18  ;;  %1981 = vmatprep.mubr.msk.bf16.mxu1 %vm2191_vm0, %v2190_v1 }
 0x251   : > { %1985 = vmatprep.subr.bf16.mxu1 %v2190_v1 }
 0x253   : > { %2042 = vmatmul.mubr.msk.bf16.vlgmr.msra.gmra.mxu0 %vm718_vm2, %v1365_v20 }
 0x254   : > { %2052 = vmatpush3.bf16.xpose.msra.mxu0 %v1480_v21  ;;  %2053 = vmatprep.mubr.msk.bf16.mxu0 %vm2191_vm0, %v2190_v1 }
 0x255   : > { %2063 = vmatprep.subr.bf16.mxu0 %v2190_v1 }
 0x257   : > { %1982 = vmatmul.mubr.msk.bf16.vlgmr.msra.gmra.mxu1 %vm718_vm2, %v2388_v31 }
 0x258   : > { %1987 = vmatprep.mubr.msk.bf16.mxu1 %vm2191_vm0, %v2190_v1 }
 0x25b   : > { %2054 = vmatmul.mubr.msk.bf16.vlgmr.msra.gmra.mxu0 %vm718_vm2, %v1473_v22 }
 0x25c   : > { %2071 = vmatprep.mubr.msk.bf16.mxu0 %vm2191_vm0, %v2190_v1 }
 0x2ad   : > { %v984_v23 = vpop.xlane.xlu1 %983 }
 0x2ae   : > { %v985_v57 = vsub.f32 %v2419_v54, %v984_v23 }
 0x2b0   : > { %v986_v60 = vmul.f32 1.442695, %v985_v57 }
 0x2b1   : > { %v885_v24 = vpop.permute.xlu1 %884 }
 0x2b2   : > { %1986 = vmatpush3.bf16.msra.mxu1 %v885_v24 }
 0x2b3   : > { %1997 = vmatprep.subr.bf16.mxu1 %v2190_v1 }
 0x2b5   : > { %v1092_v50 = vpop.xlane.xlu0 %1091 }
 0x2b6   : > { %v1093_v51 = vsub.f32 %v2423_v59, %v1092_v50 }
 0x2b8   : > { %v1094_v52 = vmul.f32 1.442695, %v1093_v51 }
 0x2ba   : > { %2134 = vpow2.f32 %v1094_v52 }
 0x2bb   : > { %2136 = vpow2.f32 %v986_v60 }
 0x2bd   : > { %v1200_v58 = vpop.xlane.xlu0 %1199 }
 0x2be   : > { %v1201_v61 = vsub.f32 %v2427_v0, %v1200_v58 }
 0x2c0   : > { %v1202_v59 = vmul.f32 1.442695, %v1201_v61 }
 0x2c2   : > { %2138 = vpow2.f32 %v1202_v59 }
 0x2c7   : > { %v2135_v55 = vpop.eup %2134 }
 0x2c8   : > { %v1096_v56 = vsel %vm765_vm3, %v2135_v55, 0.0  ;;  %v2137_v62 = vpop.eup %2136  ;;  %v1099_v16 = vpack.c.bf16 %v2135_v55, %v2135_v55 }
 0x2c9   : > { %v988_v63 = vsel %vm765_vm3, %v2137_v62, 0.0  ;;  %v991_v20 = vpack.c.bf16 %v2137_v62, %v2137_v62 }
 0x2cf   : > { %v2139_v2 = vpop.eup %2138 }
 0x2d0   : > { %v1204_v3 = vsel %vm765_vm3, %v2139_v2, 0.0  ;;  %v1207_v23 = vpack.c.bf16 %v2139_v2, %v2139_v2 }
 0x30b   : > { %v1300_v25 = vpop.f32.mrf.mxu0 }
 0x30c   : > { %v1306_v26 = vsel %vm765_vm3, %v1300_v25, -inf }
 0x30d   : > { %1307 = vmax.xlane.f32.xlu0 %v1306_v26  ;;  %v2031_v27 = vpop.f32.mrf.mxu0 }
 0x30f   : > { %v2463_v28 = vpop.f32.mrf.mxu1  ;;  %v1303_v29 = vpop.f32.mrf.mxu0 }
 0x311   : > { %v1977_v30 = vpop.f32.mrf.mxu1  ;;  %v2032_v31 = vpop.f32.mrf.mxu0 }
 0x313   : > { %v816_v32 = vpop.f32.mrf.mxu1  ;;  %v1408_v33 = vpop.f32.mrf.mxu0 }
 0x314   : > { %v1414_v34 = vsel %vm765_vm3, %v1408_v33, -inf }
 0x315   : > { %v1978_v35 = vpop.f32.mrf.mxu1  ;;  %1415 = vmax.xlane.f32.xlu1 %v1414_v34  ;;  %v2043_v36 = vpop.f32.mrf.mxu0 }
 0x317   : > { %v867_v37 = vpop.f32.mrf.mxu1  ;;  %v1411_v38 = vpop.f32.mrf.mxu0 }
 0x318   : > { %v873_v39 = vsel %vm765_vm3, %v867_v37, -inf }
 0x319   : > { %v1983_v40 = vpop.f32.mrf.mxu1  ;;  %874 = vmax.xlane.f32.xlu0 %v873_v39  ;;  %v2044_v41 = vpop.f32.mrf.mxu0 }
 0x31b   : > { %v870_v43 = vpop.f32.mrf.mxu1  ;;  %v2467_v44 = vpop.f32.mrf.mxu0 }
 0x31c   : > { %v1522_v53 = vsel %vm765_vm3, %v2467_v44, -inf }
 0x31d   : > { %v1984_v45 = vpop.f32.mrf.mxu1  ;;  %v2055_v46 = vpop.f32.mrf.mxu0 }
 0x31f   : > { %v1519_v47 = vpop.f32.mrf.mxu0 }
 0x321   : > { %v2056_v48 = vpop.f32.mrf.mxu0 }
 0x326   : > { %1208 = vrot.lane.b32.xlu1 %v2395_v42, %s2195_s20 }
 0x32a   : > { %1424 = vrot.lane.b32.xlu1 %v2395_v42, %s2197_s26 }
 0x32e   : > { %1532 = vrot.lane.b32.xlu1 %v2395_v42, %s2198_s27  ;;  %s2203_s27 = smov 40  }
 0x32f   : > { %1100 = vrot.lane.b32.xlu0 %v2395_v42, %s2194_s19 }
 0x34e   : > { %1523 = vmax.xlane.f32.xlu0 %v1522_v53 }
 0x352   : > { %1097 = vadd.xlane.f32.xlu1 %v1096_v56 }
 0x364   : > { %1316 = vrot.lane.b32.xlu0 %v2395_v42, %s2196_s25 }
 0x383   : > { %989 = vadd.xlane.f32.xlu0 %v988_v63 }
 0x387   : > { %1205 = vadd.xlane.f32.xlu0 %v1204_v3 }
 0x396   : > { %v1308_v4 = vpop.xlane.xlu0 %1307 }
 0x397   : > { %v1309_v6 = vsub.f32 %v1300_v25, %v1308_v4 }
 0x399   : > { %v1310_v0 = vmul.f32 1.442695, %v1309_v6  ;;  %v2129_v6 = vld [vmem:[%s2568_s5 + $0x10] sm:$0xff]  }
 0x39e   : > { %v1416_v5 = vpop.xlane.xlu1 %1415 }
 0x39f   : > { %v1417_v42 = vsub.f32 %v1408_v33, %v1416_v5  ;;  %v2128_v5 = vld [vmem:[%s2568_s5 + $0x18] sm:$0xff]  }
 0x3a0   : > { %2064 = vmatpush3.bf16.msra.mxu0 %v2128_v5 }
 0x3a1   : > { %v1418_v54 = vmul.f32 1.442695, %v1417_v42  ;;  %2065 = vmatprep.subr.bf16.mxu0 %v2190_v1 }
 0x3a2   : > { %v875_v7 = vpop.xlane.xlu0 %874  ;;  %v1209_v22 = vpop.permute.xlu1 %1208 }
 0x3a3   : > { %2140 = vpow2.f32 %v1418_v54  ;;  %v876_v8 = vsub.f32 %v867_v37, %v875_v7  ;;  %v2130_v54 = vld [vmem:[%s2568_s5 + $0x8] sm:$0xff]  }
 0x3a4   : > { %2066 = vmatpush3.bf16.msra.mxu0 %v2129_v6 }
 0x3a5   : > { %v877_v10 = vmul.f32 1.442695, %v876_v8  ;;  %2067 = vmatprep.subr.bf16.mxu0 %v2190_v1 }
 0x3a6   : > { %v1101_v21 = vpop.permute.xlu0 %1100  ;;  %v1425_v30 = vpop.permute.xlu1 %1424 }
 0x3a7   : > { %2142 = vpow2.f32 %v877_v10 }
 0x3a8   : > { %2144 = vpow2.f32 %v1310_v0  ;;  %2068 = vmatpush3.bf16.msra.mxu0 %v2130_v54 }
 0x3a9   : > { %2069 = vmatprep.subr.bf16.mxu0 %v2190_v1 }
 0x3aa   : > { %v1533_v32 = vpop.permute.xlu1 %1532 }
 0x3b0   : > { %v2141_v11 = vpop.eup %2140 }
 0x3b1   : > { %v1420_v12 = vsel %vm765_vm3, %v2141_v11, 0.0  ;;  %v1423_v31 = vpack.c.bf16 %v2141_v11, %v2141_v11 }
 0x3b2   : > { %1421 = vadd.xlane.f32.xlu0 %v1420_v12 }
 0x3b4   : > { %v2143_v13 = vpop.eup %2142 }
 0x3b5   : > { %v879_v14 = vsel %vm765_vm3, %v2143_v13, 0.0  ;;  %v882_v17 = vpack.c.bf16 %v2143_v13, %v2143_v13  ;;  %v2145_v18 = vpop.eup %2144  ;;  %v2131_v13 = vld [vmem:[%s2568_s5] sm:$0xff]  }
 0x3b6   : > { %880 = vadd.xlane.f32.xlu1 %v879_v14  ;;  %773 = vadd.xlane.f32.xlu0 %v772_v15  ;;  %v1312_v19 = vsel %vm765_vm3, %v2145_v18, 0.0  ;;  %v1315_v29 = vpack.c.bf16 %v2145_v18, %v2145_v18 }
 0x3b7   : > { %1988 = vmatmul.mubr.msk.bf16.vlgmr.msra.gmra.mxu1 %vm765_vm3, %v882_v17  ;;  %2070 = vmatpush3.bf16.msra.mxu0 %v2131_v13 }
 0x3b8   : > { %1998 = vmatpush3.bf16.msra.mxu1 %v993_v49  ;;  %1999 = vmatprep.mubr.msk.bf16.mxu1 %vm2191_vm0, %v2190_v1 }
 0x3b9   : > { %2009 = vmatprep.subr.bf16.mxu1 %v2190_v1 }
 0x3ba   : > { %1313 = vadd.xlane.f32.xlu1 %v1312_v19 }
 0x3bf   : > { %2000 = vmatmul.mubr.msk.bf16.vlgmr.msra.gmra.mxu1 %vm765_vm3, %v991_v20 }
 0x3c0   : > { %2010 = vmatpush3.bf16.msra.mxu1 %v1101_v21  ;;  %2011 = vmatprep.mubr.msk.bf16.mxu1 %vm2191_vm0, %v2190_v1 }
 0x3c1   : > { %2021 = vmatprep.subr.bf16.mxu1 %v2190_v1 }
 0x3c7   : > { %2012 = vmatmul.mubr.msk.bf16.vlgmr.msra.gmra.mxu1 %vm765_vm3, %v1099_v16 }
 0x3c8   : > { %2022 = vmatpush3.bf16.msra.mxu1 %v1209_v22  ;;  %2023 = vmatprep.mubr.msk.bf16.mxu1 %vm2191_vm0, %v2190_v1 }
 0x3c9   : > { %2033 = vmatprep.subr.bf16.mxu1 %v2190_v1 }
 0x3cf   : > { %2024 = vmatmul.mubr.msk.bf16.vlgmr.msra.gmra.mxu1 %vm765_vm3, %v1207_v23 }
 0x3d0   : > { %2035 = vmatprep.mubr.msk.bf16.mxu1 %vm2191_vm0, %v2190_v1 }
 0x3d7   : > { %v1524_v24 = vpop.xlane.xlu0 %1523 }
 0x3d8   : > { %v1525_v25 = vsub.f32 %v2467_v44, %v1524_v24 }
 0x3da   : > { %v1526_v26 = vmul.f32 1.442695, %v1525_v25 }
 0x3db   : > { %v1317_v27 = vpop.permute.xlu0 %1316  ;;  %v1098_v36 = vpop.xlane.xlu1 %1097 }
 0x3dc   : > { %2146 = vpow2.f32 %v1526_v26  ;;  %2034 = vmatpush3.bf16.msra.mxu1 %v1317_v27 }
 0x3dd   : > { %2045 = vmatprep.subr.bf16.mxu1 %v2190_v1 }
 0x3df   : > { %2036 = vmatmul.mubr.msk.bf16.vlgmr.msra.gmra.mxu1 %vm765_vm3, %v1315_v29 }
 0x3e0   : > { %2046 = vmatpush3.bf16.msra.mxu1 %v1425_v30  ;;  %2047 = vmatprep.mubr.msk.bf16.mxu1 %vm2191_vm0, %v2190_v1 }
 0x3e1   : > { %2057 = vmatprep.subr.bf16.mxu1 %v2190_v1 }
 0x3e7   : > { %2048 = vmatmul.mubr.msk.bf16.vlgmr.msra.gmra.mxu1 %vm765_vm3, %v1423_v31 }
 0x3e8   : > { %2058 = vmatpush3.bf16.msra.mxu1 %v1533_v32  ;;  %2059 = vmatprep.mubr.msk.bf16.mxu1 %vm2191_vm0, %v2190_v1 }
 0x3e9   : > { %v2147_v33 = vpop.eup %2146 }
 0x3ea   : > { %v1528_v34 = vsel %vm765_vm3, %v2147_v33, 0.0  ;;  %v1531_v35 = vpack.c.bf16 %v2147_v33, %v2147_v33 }
 0x3eb   : > { %1529 = vadd.xlane.f32.xlu1 %v1528_v34 }
 0x3ef   : > { %2060 = vmatmul.mubr.msk.bf16.vlgmr.msra.gmra.mxu1 %vm765_vm3, %v1531_v35 }
 0x40c   : > { %v990_v38 = vpop.xlane.xlu0 %989 }
 0x410   : > { %v1206_v47 = vpop.xlane.xlu0 %1205 }
 0x43b   : > { %v1422_v42 = vpop.xlane.xlu0 %1421 }
 0x43f   : > { %v881_v37 = vpop.xlane.xlu1 %880  ;;  %v774_v26 = vpop.xlane.xlu0 %773 }
 0x440   : > { %2148 = vrcp.f32 %v881_v37 }
 0x441   : > { %2150 = vrcp.f32 %v990_v38 }
 0x442   : > { %2152 = vrcp.f32 %v1098_v36 }
 0x443   : > { %2154 = vrcp.f32 %v1206_v47  ;;  %v1314_v59 = vpop.xlane.xlu1 %1313 }
 0x444   : > { %2156 = vrcp.f32 %v1314_v59 }
 0x445   : > { %2158 = vrcp.f32 %v1422_v42 }
 0x44d   : > { %v2149_v39 = vpop.eup %2148 }
 0x44e   : > { %v2151_v46 = vpop.eup %2150 }
 0x44f   : > { %v2153_v53 = vpop.eup %2152 }
 0x450   : > { %v2155_v61 = vpop.eup %2154 }
 0x451   : > { %v2157_v7 = vpop.eup %2156 }
 0x452   : > { %v2159_v15 = vpop.eup %2158 }
 0x474   : > { %v1530_v8 = vpop.xlane.xlu1 %1529 }
 0x475   : > { %2160 = vrcp.f32 %v1530_v8 }
 0x476   : > { %2162 = vrcp.f32 %v774_v26 }
 0x477   : > { %v924_v40 = vpop.f32.mrf.mxu1 }
 0x478   : > { %v931_v41 = vmul.f32 %v2149_v39, %v924_v40 }
 0x479   : > { %v1989_v43 = vpop.f32.mrf.mxu1 }
 0x47a   : > { %1581 = vrot.lane.b32.xlu1 %v931_v41, %s2199_s30  ;;  %s2204_s30 = smov 48  }
 0x47b   : > { %v927_v44 = vpop.f32.mrf.mxu1 }
 0x47d   : > { %v1990_v45 = vpop.f32.mrf.mxu1 }
 0x47f   : > { %v1032_v48 = vpop.f32.mrf.mxu1 }
 0x480   : > { %v1039_v49 = vmul.f32 %v2151_v46, %v1032_v48  ;;  %v1703_v46 = vunpack.c.l.bf16 %v2337_v9 }
 0x481   : > { %v2001_v50 = vpop.f32.mrf.mxu1 }
 0x482   : > { %1585 = vrot.lane.b32.xlu0 %v1039_v49, %s2200_s13  ;;  %v2161_v16 = vpop.eup %2160  ;;  %s2205_s13 = smov 56  }
 0x483   : > { %v1035_v51 = vpop.f32.mrf.mxu1  ;;  %v2163_v30 = vpop.eup %2162 }
 0x484   : > { %v820_v32 = vmul.f32 %v2163_v30, %v2463_v28  ;;  %v1868_v28 = vld [vmem:[%s2572_s9] ss:$0 sm:$0xff] }
 0x485   : > { %v2002_v52 = vpop.f32.mrf.mxu1 }
 0x487   : > { %v1140_v55 = vpop.f32.mrf.mxu1 }
 0x488   : > { %v1147_v56 = vmul.f32 %v2153_v53, %v1140_v55 }
 0x489   : > { %v2013_v57 = vpop.f32.mrf.mxu1 }
 0x48a   : > { %1589 = vrot.lane.b32.xlu1 %v1147_v56, %s2201_s14 }
 0x48b   : > { %v1143_v58 = vpop.f32.mrf.mxu1 }
 0x48d   : > { %v2014_v60 = vpop.f32.mrf.mxu1 }
 0x48f   : > { %v1248_v62 = vpop.f32.mrf.mxu1 }
 0x490   : > { %v1255_v63 = vmul.f32 %v2155_v61, %v1248_v62 }
 0x491   : > { %v2025_v2 = vpop.f32.mrf.mxu1 }
 0x492   : > { %1593 = vrot.lane.b32.xlu1 %v1255_v63, %s2202_s15  ;;  %v1874_v63 = vld [vmem:[%s2573_s10] ss:$0 sm:$0xff] }
 0x493   : > { %v1251_v3 = vpop.f32.mrf.mxu1 }
 0x494   : > { %v1875_v3 = vld [vmem:[%s2574_s11] ss:$0 sm:$0xff] }
 0x495   : > { %v2026_v4 = vpop.f32.mrf.mxu1 }
 0x49f   : > { %v1356_v0 = vpop.f32.mrf.mxu1 }
 0x4a0   : > { %v1363_v10 = vmul.f32 %v2157_v7, %v1356_v0 }
 0x4a1   : > { %v2037_v11 = vpop.f32.mrf.mxu1 }
 0x4a2   : > { %1597 = vrot.lane.b32.xlu0 %v1363_v10, %s2203_s27  ;;  %s459_s27 = scalar_lea.vmem %s2575_s12, %s1829_s17 }
 0x4a3   : > { %v1359_v12 = vpop.f32.mrf.mxu1 }
 0x4a5   : > { %v2038_v14 = vpop.f32.mrf.mxu1 }
 0x4a7   : > { %v1464_v17 = vpop.f32.mrf.mxu1 }
 0x4a8   : > { %v1471_v18 = vmul.f32 %v2159_v15, %v1464_v17 }
 0x4a9   : > { %v2049_v19 = vpop.f32.mrf.mxu1 }
 0x4aa   : > { %1601 = vrot.lane.b32.xlu1 %v1471_v18, %s2204_s30 }
 0x4ab   : > { %v1467_v20 = vpop.f32.mrf.mxu1 }
 0x4ad   : > { %v2050_v21 = vpop.f32.mrf.mxu1 }
 0x4af   : > { %v1572_v22 = vpop.f32.mrf.mxu1 }
 0x4b0   : > { %v1579_v23 = vmul.f32 %v2161_v16, %v1572_v22 }
 0x4b1   : > { %v2061_v24 = vpop.f32.mrf.mxu1 }
 0x4b2   : > { %1605 = vrot.lane.b32.xlu0 %v1579_v23, %s2205_s13 }
 0x4b3   : > { %v1575_v1 = vpop.f32.mrf.mxu1 }
 0x4b5   : > { %v2062_v25 = vpop.f32.mrf.mxu1 }
 0x4ec   : > { %v1582_v27 = vpop.permute.xlu1 %1581 }
 0x4ed   : > { %v1608_v34 = vsel %vm718_vm2, %v820_v32, %v1582_v27 }
 0x4f4   : > { %v1586_v31 = vpop.permute.xlu0 %1585 }
 0x4f5   : > { %v1609_v35 = vsel %vm765_vm3, %v1608_v34, %v1586_v31 }
 0x4fc   : > { %v1590_v29 = vpop.permute.xlu1 %1589 }
 0x4fd   : > { %v1611_v37 = vsel %vm1610_vm4, %v1609_v35, %v1590_v29 }
 0x504   : > { %v1594_v33 = vpop.permute.xlu1 %1593 }
 0x505   : > { %v1613_v39 = vsel %vm1612_vm5, %v1611_v37, %v1594_v33 }
 0x514   : > { %v1598_v36 = vpop.permute.xlu0 %1597 }
 0x515   : > { %v1615_v40 = vsel %vm1614_vm6, %v1613_v39, %v1598_v36 }
 0x51c   : > { %v1602_v38 = vpop.permute.xlu1 %1601 }
 0x51d   : > { %v1617_v41 = vsel %vm1616_vm7, %v1615_v40, %v1602_v38 }
 0x524   : > { %v1606_v43 = vpop.permute.xlu0 %1605 }
 0x525   : > { %v1619_v44 = vsel %vm1618_vm8, %v1617_v41, %v1606_v43 }
 0x526   : > { %v1620_v45 = vpack.c.bf16 %v1619_v44, %v1619_v44 }
 0x528   : > { %2072 = vmatmul.mubr.msk.bf16.vlgmr.msra.gmra.mxu0 %vm503_vm1, %v1620_v45 }
 0x5e8   : > { %v1697_v47 = vpop.f32.mrf.mxu0 }
 0x5e9   : > { %v1698_v48 = vadd.f32 %v1868_v28, %v1697_v47 }
 0x5ea   : > { %v2073_v49 = vpop.f32.mrf.mxu0 }
 0x5eb   : > { %v1704_v50 = vadd.f32 %v1703_v46, %v1698_v48 }
 0x5ec   : > { %v1700_v51 = vpop.f32.mrf.mxu0 }
 0x5ed   : > { %v1705_v52 = vsel %vm503_vm1, %v1704_v50, 0.0 }
 0x5ee   : > { %1706 = vadd.xlane.f32.xlu1 %v1705_v52  ;;  %v2074_v53 = vpop.f32.mrf.mxu0 }
 0x677   : > { %v1707_v55 = vpop.xlane.xlu1 %1706 }
 0x678   : > { %v1709_v56 = vmul.f32 0.015625, %v1707_v55 }
 0x67a   : > { %v1710_v57 = vsub.f32 %v1704_v50, %v1709_v56 }
 0x67c   : > { %v1711_v58 = vmul.f32 %v1710_v57, %v1710_v57 }
 0x67e   : > { %v1712_v60 = vsel %vm503_vm1, %v1711_v58, 0.0 }
 0x67f   : > { %1713 = vadd.xlane.f32.xlu0 %v1712_v60 }
 0x708   : > { %v1714_v61 = vpop.xlane.xlu0 %1713 }
 0x709   : > { %v1715_v59 = vmul.f32 0.015625, %v1714_v61 }
 0x70b   : > { %v1716_v9 = vadd.f32 1e-05, %v1715_v59 }
 0x70d   : > { %2164 = vrsqrt.f32 %v1716_v9 }
 0x71a   : > { %v2165_v62 = vpop.eup %2164 }
 0x71b   : > { %v1718_v2 = vmul.f32 %v2165_v62, %v1710_v57 }
 0x71d   : > { %v1726_v4 = vmul.f32 %v1874_v63, %v1718_v2 }
 0x71f   : > { %v1734_v5 = vadd.f32 %v1875_v3, %v1726_v4 }
 0x721   : > { %v1735_v42 = vpack.c.bf16 %v1734_v5, %v1734_v5 }
 0x723   : > { %1737 = vst.msk [vmem:[%s459_s27] sm:$0xf] %vm1736_vm9, %v1735_v42 }
 0x724 PF: > { %s22_s23 = sadd.s32 1, %s2188_s23   ;;  %s2576_s21 = smov %s2184_s22 }
 0x725   : > { %p19_p5 = scmp.ge.s32.totalorder %s22_s23, 4   ;;  %s2577_s22 = smov %s2579_s24 }
 0x727   :  { %21 = sbr.rel (!%p19_p5) target bundleno = 2 (0x2), region = 101 }

// kernel: co_attention_forward.9
= control target key start
LH: loop header
LB: loop body
LE: loop exit
PB: predicated region body
PF: predicated region fallthrough
CT: control target
= control target key end

     0   :  { %s2553_s21 = smov 0   ;;  %s2555_s22 = smov 0   ;;  %s2930_s0 = inlined_call_operand.vmem [shape: bf16[2,16,64], index: 0, kind: input, shape index: {}]   ;;  %s2931_s1 = inlined_call_operand.vmem [shape: bf16[2,8,64], index: 1, kind: input, shape index: {}]   ;;  %s2932_s2 = inlined_call_operand.vmem [shape: bf16[64,64], index: 2, kind: input, shape index: {}]   ;;  %s2933_s3 = inlined_call_operand.vmem [shape: bf16[64,64], index: 3, kind: input, shape index: {}]   ;;  %s2934_s4 = inlined_call_operand.vmem [shape: bf16[64,64], index: 4, kind: input, shape index: {}]   ;;  %s2935_s5 = inlined_call_operand.vmem [shape: bf16[64,64], index: 5, kind: input, shape index: {}]   ;;  %s2936_s6 = inlined_call_operand.vmem [shape: f32[1,64], index: 6, kind: input, shape index: {}]   ;;  %s2937_s7 = inlined_call_operand.vmem [shape: f32[1,64], index: 7, kind: input, shape index: {}]   ;;  %s2938_s8 = inlined_call_operand.vmem [shape: f32[1,64], index: 8, kind: input, shape index: {}]   ;;  %s2939_s9 = inlined_call_operand.vmem [shape: f32[1,64], index: 9, kind: input, shape index: {}]   ;;  %s2940_s10 = inlined_call_operand.vmem [shape: f32[1,64], index: 10, kind: input, shape index: {}]   ;;  %s2941_s11 = inlined_call_operand.vmem [shape: f32[1,64], index: 11, kind: input, shape index: {}]   ;;  %s2942_s12 = inlined_call_operand.vmem [shape: bf16[2,16,64], index: 12, kind: output, shape index: {}]  }
   0x1   :  { %s2557_s23 = smov 0  }
   0x2 LB: > { %s34_s24 = sadd.s32 1, %s2466_s22  ;;  %p2033_p0 = scmp.ge.s32.totalorder %s2470_s23, 1  ;;  %s2470_s23 = sphi %s2557_s23, %s22_s23   ;;  %s2466_s22 = sphi %s2555_s22, %s2944_s22   ;;  %s2462_s21 = sphi %s2553_s21, %s2943_s21  }
   0x3   : > { %p36_p1 = scmp.ge.s32.totalorder %s34_s24, 2  ;;  %p392_p2 = scmp.lt.s32.totalorder %s2470_s23, 3 }
   0x5   : > { %s2946_s24 = smov (%p36_p1, %s34_s24), 0  ;;  %p393_p3 = pnand %p2033_p0, %p392_p2 }
   0x6   : > { %p447_p4 = scmp.lt.s32.totalorder (!%p393_p3), %s2462_s21, 1  ;;  %s2474_s27 = smov (!%p393_p3), 120  }
   0x7   : > { %396 = sbr.rel (%p393_p3) target bundleno = 1873 (0x751), region = 68  ;;  %s2475_s28 = smov (!%p393_p3), 112  }
   0x8   : > { %s2477_s14 = smov (!%p393_p3), 96   ;;  %s2478_s30 = smov (!%p393_p3), 88  }
   0x9   : > { %s2479_s13 = smov (!%p393_p3), 80   ;;  %s2480_s15 = smov (!%p393_p3), 72  }
   0xa   : > { %s2484_s20 = smov (!%p393_p3), 32  }
   0xc   : > { %v2361_v0 = vld [vmem:[%s2932_s2 + $0x18] sm:$0xff]   ;;  %v2472_v1 = vmov 0.0   ;;  %v2363_v3 = vld [vmem:[%s2932_s2 + $0x10] sm:$0xff]   ;;  %vm2473_vm0 = vmmov 0   ;;  %s2948_s21 = smov (!%p447_p4, %s2462_s21), 1  ;;  %v2365_v5 = vld [vmem:[%s2932_s2 + $0x8] sm:$0xff]  }
   0xd   : > { %2142 = vmatprep.subr.bf16.mxu0 %v2472_v1  ;;  %2154 = vmatprep.subr.bf16.mxu1 %v2472_v1  ;;  %v2362_v2 = vld [vmem:[%s2933_s3 + $0x18] sm:$0xff]   ;;  %v2364_v4 = vld [vmem:[%s2933_s3 + $0x10] sm:$0xff]   ;;  %s2086_s17 = sshll.u32 %s2948_s21, 3  ;;  %v2366_v6 = vld [vmem:[%s2933_s3 + $0x8] sm:$0xff]   ;;  %s2036_s29 = sshll.u32 %s2948_s21, 2  ;;  %vm518_vm1 = vcmask 523264  }
   0xe   : > { %2143 = vmatpush3.bf16.msra.mxu0 %v2361_v0  ;;  %2150 = vmatprep.mubr.msk.bf16.mxu0 %vm2473_vm0, %v2472_v1  ;;  %s2606_s26 = scalar_lea.vmem %s2930_s0, %s2086_s17  ;;  %v2367_v7 = vld [vmem:[%s2932_s2] sm:$0xff]   ;;  %s459_s16 = scalar_lea.vmem %s2931_s1, %s2036_s29  ;;  %vm727_vm2 = vcmask 64512   ;;  %v2370_v27 = vld [vmem:[%s2934_s4 + $0x18] sm:$0xff]   ;;  %v2371_v28 = vld [vmem:[%s2934_s4 + $0x10] sm:$0xff]   ;;  %vm797_vm3 = vcmask 1043456   ;;  %vm1768_vm4 = vcmask 130048  }
   0xf   : > { %2155 = vmatpush3.bf16.msra.mxu1 %v2362_v2  ;;  %2144 = vmatprep.subr.bf16.mxu0 %v2472_v1  ;;  %v2368_v8 = vld [vmem:[%s2933_s3] sm:$0xff]   ;;  %s2476_s29 = smov 104   ;;  %v2372_v29 = vld [vmem:[%s2934_s4 + $0x8] sm:$0xff]   ;;  %vm1771_vm5 = vcmask 195584   ;;  %vm1774_vm6 = vcmask 261120   ;;  %vm1777_vm7 = vcmask 326656  }
  0x10   : > { %2156 = vmatprep.subr.bf16.mxu1 %v2472_v1  ;;  %2162 = vmatprep.mubr.msk.bf16.mxu1 %vm2473_vm0, %v2472_v1  ;;  %v471_v9 = vld [vmem:[%s2606_s26] sm:$0xff]   ;;  %vm1780_vm8 = vcmask 392192   ;;  %vm1783_vm9 = vcmask 457728   ;;  %vm1927_vm10 = vcmask 519168  }
  0x11   : > { %v473_v10 = vld [vmem:[%s459_s16] sm:$0xf]  ;;  %s2485_s16 = smov 40  }
  0x12   : > { %2145 = vmatpush3.bf16.msra.mxu0 %v2363_v3  ;;  %v2046_v11 = vld [vmem:[%s2937_s7] ss:$0 sm:$0xff] }
  0x13   : > { %2157 = vmatpush3.bf16.msra.mxu1 %v2364_v4  ;;  %2146 = vmatprep.subr.bf16.mxu0 %v2472_v1  ;;  %v2039_v12 = vld [vmem:[%s2936_s6] ss:$0 sm:$0xff] }
  0x14   : > { %2158 = vmatprep.subr.bf16.mxu1 %v2472_v1  ;;  %v2373_v30 = vld [vmem:[%s2934_s4] sm:$0xff]  }
  0x15   : > { %v2052_v37 = vld [vmem:[%s2938_s8] ss:$0 sm:$0xff] }
  0x16   : > { %2147 = vmatpush3.bf16.msra.mxu0 %v2365_v5 }
  0x17   : > { %2159 = vmatpush3.bf16.msra.mxu1 %v2366_v6  ;;  %2148 = vmatprep.subr.bf16.mxu0 %v2472_v1 }
  0x18   : > { %2160 = vmatprep.subr.bf16.mxu1 %v2472_v1 }
  0x1a   : > { %2149 = vmatpush3.bf16.msra.mxu0 %v2367_v7 }
  0x1b   : > { %2161 = vmatpush3.bf16.msra.mxu1 %v2368_v8  ;;  %2166 = vmatprep.subr.bf16.mxu0 %v2472_v1 }
  0x1c   : > { %2178 = vmatprep.subr.bf16.mxu1 %v2472_v1 }
  0x1d   : > { %2151 = vmatmul.mubr.msk.bf16.vlgmr.msra.gmra.mxu0 %vm518_vm1, %v471_v9 }
  0x1e   : > { %2163 = vmatmul.mubr.msk.bf16.vlgmr.msra.gmra.mxu1 %vm518_vm1, %v473_v10  ;;  %2174 = vmatprep.mubr.msk.bf16.mxu0 %vm2473_vm0, %v2472_v1 }
  0x1f   : > { %2180 = vmatprep.mubr.msk.bf16.mxu1 %vm2473_vm0, %v2472_v1  ;;  %2167 = vmatpush3.bf16.msra.mxu0 %v2370_v27 }
  0x20   : > { %2168 = vmatprep.subr.bf16.mxu0 %v2472_v1 }
  0x23   : > { %2169 = vmatpush3.bf16.msra.mxu0 %v2371_v28 }
  0x24   : > { %2170 = vmatprep.subr.bf16.mxu0 %v2472_v1 }
  0x27   : > { %2171 = vmatpush3.bf16.msra.mxu0 %v2372_v29 }
  0x28   : > { %2172 = vmatprep.subr.bf16.mxu0 %v2472_v1 }
  0x2b   : > { %2173 = vmatpush3.bf16.msra.mxu0 %v2373_v30 }
  0x2c   : > { %2202 = vmatprep.subr.bf16.mxu0 %v2472_v1 }
  0x2e   : > { %2175 = vmatmul.mubr.msk.bf16.vlgmr.msra.gmra.mxu0 %vm518_vm1, %v473_v10 }
  0x2f   : > { %2204 = vmatprep.mubr.msk.bf16.mxu0 %vm2473_vm0, %v2472_v1 }
  0xdd   : > { %v556_v13 = vpop.f32.mrf.mxu0 }
  0xde   : > { %v639_v14 = vpop.f32.mrf.mxu1  ;;  %v557_v17 = vadd.f32 %v2039_v12, %v556_v13 }
  0xdf   : > { %v640_v15 = vadd.f32 %v2046_v11, %v639_v14  ;;  %v2152_v16 = vpop.f32.mrf.mxu0 }
  0xe0   : > { %v2164_v18 = vpop.f32.mrf.mxu1 }
  0xe1   : > { %v725_v19 = vpack.c.bf16 %v640_v15, %v640_v15  ;;  %v559_v20 = vpop.f32.mrf.mxu0 }
  0xe2   : > { %v560_v21 = vadd.f32 %v2039_v12, %v559_v20  ;;  %v642_v22 = vpop.f32.mrf.mxu1 }
  0xe3   : > { %850 = vrot.lane.b32.xlu1 %v725_v19, %s2474_s27  ;;  %v2153_v23 = vpop.f32.mrf.mxu0  ;;  %v732_v24 = vsel %vm727_vm2, %v725_v19, 0 }
  0xe4   : > { %v724_v25 = vpack.c.bf16 %v560_v21, %v557_v17  ;;  %v2165_v26 = vpop.f32.mrf.mxu1  ;;  %2179 = vmatpush3.bf16.xpose.msra.mxu1 %v732_v24 }
  0xe5   : > { %2184 = vmatprep.subr.bf16.mxu1 %v2472_v1 }
  0xe7   : > { %847 = vrot.lane.b32.xlu1 %v724_v25, %s2474_s27 }
  0xeb   : > { %972 = vrot.lane.b32.xlu1 %v724_v25, %s2475_s28  ;;  %2181 = vmatmul.mubr.msk.bf16.vlgmr.msra.gmra.mxu1 %vm727_vm2, %v724_v25 }
  0xec   : > { %2186 = vmatprep.mubr.msk.bf16.mxu1 %vm2473_vm0, %v2472_v1 }
  0xee   : > { %v718_v38 = vpop.f32.mrf.mxu0 }
  0xef   : > { %1097 = vrot.lane.b32.xlu1 %v725_v19, %s2476_s29  ;;  %v719_v39 = vadd.f32 %v2052_v37, %v718_v38 }
  0xf0   : > { %v2176_v40 = vpop.f32.mrf.mxu0 }
  0xf1   : > { %v2676_v41 = vpack.c.bf16 %v719_v39, %v719_v39 }
  0xf2   : > { %v721_v42 = vpop.f32.mrf.mxu0 }
  0xf3   : > { %1095 = vrot.lane.b32.xlu1 %v724_v25, %s2476_s29  ;;  %v799_v43 = vsel %vm797_vm3, %v2676_v41, 0 }
  0xf4   : > { %2185 = vmatpush3.bf16.msra.mxu1 %v799_v43  ;;  %v2177_v44 = vpop.f32.mrf.mxu0 }
  0xf5   : > { %2190 = vmatprep.subr.bf16.mxu1 %v2472_v1 }
  0xf7   : > { %1220 = vrot.lane.b32.xlu1 %v725_v19, %s2477_s14 }
  0xfb   : > { %1218 = vrot.lane.b32.xlu1 %v724_v25, %s2477_s14 }
  0xff   : > { %1343 = vrot.lane.b32.xlu1 %v725_v19, %s2478_s30 }
 0x103   : > { %1466 = vrot.lane.b32.xlu1 %v725_v19, %s2479_s13 }
 0x107   : > { %1589 = vrot.lane.b32.xlu1 %v725_v19, %s2480_s15 }
 0x155   : > { %v851_v45 = vpop.permute.xlu1 %850 }
 0x156   : > { %v856_v0 = vsel %vm727_vm2, %v851_v45, 0 }
 0x159   : > { %v848_v46 = vpop.permute.xlu1 %847 }
 0x15d   : > { %v973_v47 = vpop.permute.xlu1 %972 }
 0x161   : > { %v1098_v53 = vpop.permute.xlu1 %1097 }
 0x162   : > { %v1103_v58 = vsel %vm727_vm2, %v1098_v53, 0 }
 0x165   : > { %v1096_v57 = vpop.permute.xlu1 %1095 }
 0x169   : > { %v1221_v59 = vpop.permute.xlu1 %1220 }
 0x16a   : > { %v1226_v2 = vsel %vm727_vm2, %v1221_v59, 0 }
 0x16d   : > { %v1219_v63 = vpop.permute.xlu1 %1218 }
 0x171   : > { %v1344_v3 = vpop.permute.xlu1 %1343 }
 0x172   : > { %v1349_v4 = vsel %vm727_vm2, %v1344_v3, 0 }
 0x175   : > { %v1467_v5 = vpop.permute.xlu1 %1466 }
 0x176   : > { %v1472_v7 = vsel %vm727_vm2, %v1467_v5, 0 }
 0x179   : > { %v1590_v8 = vpop.permute.xlu1 %1589 }
 0x17a   : > { %v1595_v10 = vsel %vm727_vm2, %v1590_v8, 0 }
 0x1ab   : > { %v768_v31 = vpop.f32.mrf.mxu1 }
 0x1ac   : > { %v775_v32 = vsel %vm727_vm2, %v768_v31, -inf }
 0x1ad   : > { %776 = vmax.xlane.f32.xlu0 %v775_v32  ;;  %v2182_v33 = vpop.f32.mrf.mxu1 }
 0x1af   : > { %v771_v34 = vpop.f32.mrf.mxu1 }
 0x1b0   : > { %v778_v35 = vsel %vm727_vm2, %v771_v34, -inf }
 0x1b1   : > { %779 = vmax.xlane.f32.xlu0 %v778_v35  ;;  %v2183_v36 = vpop.f32.mrf.mxu1 }
 0x1c7   : > { %974 = vrot.lane.b32.xlu0 %v725_v19, %s2475_s28 }
 0x1cb   : > { %1341 = vrot.lane.b32.xlu0 %v724_v25, %s2478_s30 }
 0x1cf   : > { %1464 = vrot.lane.b32.xlu0 %v724_v25, %s2479_s13 }
 0x1d3   : > { %1587 = vrot.lane.b32.xlu0 %v724_v25, %s2480_s15 }
 0x236   : > { %v777_v48 = vpop.xlane.xlu0 %776 }
 0x237   : > { %v781_v49 = vsub.f32 %v768_v31, %v777_v48 }
 0x239   : > { %v783_v50 = vmul.f32 1.442695, %v781_v49 }
 0x23a   : > { %v780_v51 = vpop.xlane.xlu0 %779 }
 0x23b   : > { %v782_v52 = vsub.f32 %v771_v34, %v780_v51  ;;  %2379 = vpow2.f32 %v783_v50 }
 0x23d   : > { %v785_v54 = vmul.f32 1.442695, %v782_v52 }
 0x23e   : > { %v975_v55 = vpop.permute.xlu0 %974 }
 0x23f   : > { %2381 = vpow2.f32 %v785_v54  ;;  %v980_v56 = vsel %vm727_vm2, %v975_v55, 0 }
 0x240   : > { %2203 = vmatpush3.bf16.xpose.msra.mxu0 %v980_v56 }
 0x241   : > { %2214 = vmatprep.subr.bf16.mxu0 %v2472_v1 }
 0x242   : > { %v1342_v6 = vpop.permute.xlu0 %1341 }
 0x246   : > { %v1465_v9 = vpop.permute.xlu0 %1464 }
 0x247   : > { %2205 = vmatmul.mubr.msk.bf16.vlgmr.msra.gmra.mxu0 %vm727_vm2, %v973_v47 }
 0x248   : > { %2215 = vmatpush3.bf16.xpose.msra.mxu0 %v1103_v58  ;;  %2216 = vmatprep.mubr.msk.bf16.mxu0 %vm2473_vm0, %v2472_v1  ;;  %v2691_v60 = vpop.eup %2379 }
 0x249   : > { %2226 = vmatprep.subr.bf16.mxu0 %v2472_v1 }
 0x24a   : > { %v1588_v11 = vpop.permute.xlu0 %1587 }
 0x24c   : > { %v2693_v61 = vpop.eup %2381 }
 0x24d   : > { %v793_v62 = vpack.c.bf16 %v2693_v61, %v2691_v60 }
 0x24f   : > { %2187 = vmatmul.mubr.msk.bf16.vlgmr.msra.gmra.mxu1 %vm727_vm2, %v793_v62  ;;  %2217 = vmatmul.mubr.msk.bf16.vlgmr.msra.gmra.mxu0 %vm727_vm2, %v1096_v57 }
 0x250   : > { %2191 = vmatpush3.bf16.xpose.msra.mxu1 %v856_v0  ;;  %2227 = vmatpush3.bf16.xpose.msra.mxu0 %v1226_v2 }
 0x251   : > { %2192 = vmatprep.mubr.msk.bf16.mxu1 %vm2473_vm0, %v2472_v1  ;;  %2228 = vmatprep.mubr.msk.bf16.mxu0 %vm2473_vm0, %v2472_v1 }
 0x252   : > { %2238 = vmatprep.subr.bf16.mxu0 %v2472_v1  ;;  %2196 = vmatprep.subr.bf16.mxu1 %v2472_v1 }
 0x257   : > { %2193 = vmatmul.mubr.msk.bf16.vlgmr.msra.gmra.mxu1 %vm727_vm2, %v848_v46  ;;  %2229 = vmatmul.mubr.msk.bf16.vlgmr.msra.gmra.mxu0 %vm727_vm2, %v1219_v63 }
 0x258   : > { %2239 = vmatpush3.bf16.xpose.msra.mxu0 %v1349_v4  ;;  %2240 = vmatprep.mubr.msk.bf16.mxu0 %vm2473_vm0, %v2472_v1 }
 0x259   : > { %2250 = vmatprep.subr.bf16.mxu0 %v2472_v1  ;;  %2198 = vmatprep.mubr.msk.bf16.mxu1 %vm2473_vm0, %v2472_v1 }
 0x25f   : > { %2241 = vmatmul.mubr.msk.bf16.vlgmr.msra.gmra.mxu0 %vm727_vm2, %v1342_v6 }
 0x260   : > { %2251 = vmatpush3.bf16.xpose.msra.mxu0 %v1472_v7  ;;  %2252 = vmatprep.mubr.msk.bf16.mxu0 %vm2473_vm0, %v2472_v1 }
 0x261   : > { %2262 = vmatprep.subr.bf16.mxu0 %v2472_v1 }
 0x267   : > { %2253 = vmatmul.mubr.msk.bf16.vlgmr.msra.gmra.mxu0 %vm727_vm2, %v1465_v9 }
 0x268   : > { %2263 = vmatpush3.bf16.xpose.msra.mxu0 %v1595_v10  ;;  %2264 = vmatprep.mubr.msk.bf16.mxu0 %vm2473_vm0, %v2472_v1 }
 0x269   : > { %2274 = vmatprep.subr.bf16.mxu0 %v2472_v1 }
 0x26f   : > { %2265 = vmatmul.mubr.msk.bf16.vlgmr.msra.gmra.mxu0 %vm727_vm2, %v1588_v11 }
 0x270   : > { %2282 = vmatprep.mubr.msk.bf16.mxu0 %vm2473_vm0, %v2472_v1 }
 0x307   : > { %v2728_v12 = vpop.f32.mrf.mxu0 }
 0x308   : > { %v1023_v13 = vsel %vm727_vm2, %v2728_v12, -inf }
 0x309   : > { %1024 = vmax.xlane.f32.xlu0 %v1023_v13  ;;  %v2206_v14 = vpop.f32.mrf.mxu0 }
 0x30b   : > { %v2732_v15 = vpop.f32.mrf.mxu0 }
 0x30c   : > { %v1026_v16 = vsel %vm727_vm2, %v2732_v15, -inf }
 0x30d   : > { %1027 = vmax.xlane.f32.xlu1 %v1026_v16  ;;  %v2207_v17 = vpop.f32.mrf.mxu0 }
 0x30f   : > { %v2736_v18 = vpop.f32.mrf.mxu1  ;;  %v2738_v19 = vpop.f32.mrf.mxu0 }
 0x310   : > { %v1146_v20 = vsel %vm727_vm2, %v2738_v19, -inf }
 0x311   : > { %v2188_v21 = vpop.f32.mrf.mxu1  ;;  %1147 = vmax.xlane.f32.xlu0 %v1146_v20  ;;  %v2218_v22 = vpop.f32.mrf.mxu0 }
 0x313   : > { %v2742_v23 = vpop.f32.mrf.mxu1  ;;  %v2744_v24 = vpop.f32.mrf.mxu0 }
 0x314   : > { %v1149_v25 = vsel %vm727_vm2, %v2744_v24, -inf }
 0x315   : > { %v2189_v26 = vpop.f32.mrf.mxu1  ;;  %1150 = vmax.xlane.f32.xlu1 %v1149_v25  ;;  %v2219_v27 = vpop.f32.mrf.mxu0 }
 0x317   : > { %v2748_v28 = vpop.f32.mrf.mxu1  ;;  %v2750_v29 = vpop.f32.mrf.mxu0 }
 0x318   : > { %v1269_v30 = vsel %vm727_vm2, %v2750_v29, -inf  ;;  %v899_v40 = vsel %vm727_vm2, %v2748_v28, -inf }
 0x319   : > { %v2194_v31 = vpop.f32.mrf.mxu1  ;;  %1270 = vmax.xlane.f32.xlu0 %v1269_v30  ;;  %v2230_v32 = vpop.f32.mrf.mxu0 }
 0x31b   : > { %v2754_v33 = vpop.f32.mrf.mxu1  ;;  %v2756_v34 = vpop.f32.mrf.mxu0 }
 0x31c   : > { %v902_v35 = vsel %vm727_vm2, %v2754_v33, -inf  ;;  %v1272_v36 = vsel %vm727_vm2, %v2756_v34, -inf }
 0x31d   : > { %v2195_v37 = vpop.f32.mrf.mxu1  ;;  %903 = vmax.xlane.f32.xlu0 %v902_v35  ;;  %1273 = vmax.xlane.f32.xlu1 %v1272_v36  ;;  %v2231_v38 = vpop.f32.mrf.mxu0 }
 0x31f   : > { %v2762_v39 = vpop.f32.mrf.mxu0 }
 0x320   : > { %v1392_v44 = vsel %vm727_vm2, %v2762_v39, -inf }
 0x321   : > { %900 = vmax.xlane.f32.xlu1 %v899_v40  ;;  %v2242_v42 = vpop.f32.mrf.mxu0 }
 0x323   : > { %v2766_v43 = vpop.f32.mrf.mxu0 }
 0x324   : > { %v1395_v47 = vsel %vm727_vm2, %v2766_v43, -inf }
 0x325   : > { %1393 = vmax.xlane.f32.xlu1 %v1392_v44  ;;  %v2243_v45 = vpop.f32.mrf.mxu0 }
 0x327   : > { %v2770_v46 = vpop.f32.mrf.mxu0 }
 0x328   : > { %v1515_v55 = vsel %vm727_vm2, %v2770_v46, -inf }
 0x329   : > { %1396 = vmax.xlane.f32.xlu1 %v1395_v47  ;;  %v2254_v48 = vpop.f32.mrf.mxu0 }
 0x32b   : > { %v2774_v49 = vpop.f32.mrf.mxu0 }
 0x32c   : > { %v1518_v56 = vsel %vm727_vm2, %v2774_v49, -inf }
 0x32d   : > { %v2255_v50 = vpop.f32.mrf.mxu0 }
 0x32f   : > { %v2776_v51 = vpop.f32.mrf.mxu0 }
 0x330   : > { %v1638_v57 = vsel %vm727_vm2, %v2776_v51, -inf }
 0x331   : > { %v2266_v52 = vpop.f32.mrf.mxu0 }
 0x333   : > { %919 = vrot.lane.b32.xlu0 %v2676_v41, %s2474_s27  ;;  %v2780_v53 = vpop.f32.mrf.mxu0  ;;  %s2481_s27 = smov 8  }
 0x334   : > { %v1641_v58 = vsel %vm727_vm2, %v2780_v53, -inf }
 0x335   : > { %v2267_v54 = vpop.f32.mrf.mxu0 }
 0x33a   : > { %1042 = vrot.lane.b32.xlu1 %v2676_v41, %s2475_s28  ;;  %s2482_s28 = smov 16  }
 0x352   : > { %1516 = vmax.xlane.f32.xlu0 %v1515_v55 }
 0x35e   : > { %1519 = vmax.xlane.f32.xlu1 %v1518_v56 }
 0x362   : > { %1639 = vmax.xlane.f32.xlu1 %v1638_v57 }
 0x366   : > { %1642 = vmax.xlane.f32.xlu1 %v1641_v58 }
 0x368   : > { %1165 = vrot.lane.b32.xlu0 %v2676_v41, %s2476_s29  ;;  %s2483_s29 = smov 24  }
 0x36c   : > { %1411 = vrot.lane.b32.xlu0 %v2676_v41, %s2478_s30 }
 0x370   : > { %1534 = vrot.lane.b32.xlu0 %v2676_v41, %s2479_s13 }
 0x374   : > { %1657 = vrot.lane.b32.xlu0 %v2676_v41, %s2480_s15 }
 0x377   : > { %1288 = vrot.lane.b32.xlu1 %v2676_v41, %s2477_s14 }
 0x392   : > { %v1025_v59 = vpop.xlane.xlu0 %1024 }
 0x393   : > { %v1029_v62 = vsub.f32 %v2728_v12, %v1025_v59 }
 0x395   : > { %v1031_v63 = vmul.f32 1.442695, %v1029_v62 }
 0x396   : > { %v1028_v0 = vpop.xlane.xlu1 %1027 }
 0x397   : > { %2383 = vpow2.f32 %v1031_v63  ;;  %v1030_v2 = vsub.f32 %v2732_v15, %v1028_v0 }
 0x399   : > { %v1033_v3 = vmul.f32 1.442695, %v1030_v2 }
 0x39a   : > { %v1148_v4 = vpop.xlane.xlu0 %1147 }
 0x39b   : > { %2385 = vpow2.f32 %v1033_v3  ;;  %v1152_v5 = vsub.f32 %v2738_v19, %v1148_v4 }
 0x39d   : > { %v1154_v6 = vmul.f32 1.442695, %v1152_v5 }
 0x39e   : > { %v1151_v7 = vpop.xlane.xlu1 %1150 }
 0x39f   : > { %2387 = vpow2.f32 %v1154_v6  ;;  %v1153_v8 = vsub.f32 %v2744_v24, %v1151_v7 }
 0x3a1   : > { %v1156_v9 = vmul.f32 1.442695, %v1153_v8 }
 0x3a2   : > { %v1271_v41 = vpop.xlane.xlu0 %1270 }
 0x3a3   : > { %2389 = vpow2.f32 %v1156_v9  ;;  %v1275_v10 = vsub.f32 %v2750_v29, %v1271_v41 }
 0x3a4   : > { %v2807_v11 = vpop.eup %2383 }
 0x3a5   : > { %v1277_v12 = vmul.f32 1.442695, %v1275_v10  ;;  %v1035_v13 = vsel %vm727_vm2, %v2807_v11, 0.0 }
 0x3a6   : > { %v904_v14 = vpop.xlane.xlu0 %903  ;;  %v1274_v15 = vpop.xlane.xlu1 %1273  ;;  %1036 = vadd.xlane.f32.xlu0 %v1035_v13 }
 0x3a7   : > { %2391 = vpow2.f32 %v1277_v12  ;;  %v906_v16 = vsub.f32 %v2754_v33, %v904_v14  ;;  %v1276_v17 = vsub.f32 %v2756_v34, %v1274_v15 }
 0x3a8   : > { %v2386_v19 = vpop.eup %2385 }
 0x3a9   : > { %v1279_v20 = vmul.f32 1.442695, %v1276_v17  ;;  %v1038_v21 = vsel %vm727_vm2, %v2386_v19, 0.0  ;;  %v909_v22 = vmul.f32 1.442695, %v906_v16  ;;  %v1041_v59 = vpack.c.bf16 %v2386_v19, %v2807_v11 }
 0x3aa   : > { %v920_v24 = vpop.permute.xlu0 %919  ;;  %v901_v25 = vpop.xlane.xlu1 %900  ;;  %1039 = vadd.xlane.f32.xlu0 %v1038_v21 }
 0x3ab   : > { %v925_v26 = vsel %vm797_vm3, %v920_v24, 0  ;;  %v905_v27 = vsub.f32 %v2748_v28, %v901_v25  ;;  %2393 = vpow2.f32 %v1279_v20 }
 0x3ac   : > { %v2388_v29 = vpop.eup %2387  ;;  %2197 = vmatpush3.bf16.msra.mxu1 %v925_v26  ;;  %2395 = vpow2.f32 %v909_v22  ;;  %v787_v26 = vsel %vm727_vm2, %v2691_v60, 0.0 }
 0x3ad   : > { %v907_v30 = vmul.f32 1.442695, %v905_v27  ;;  %v1158_v31 = vsel %vm727_vm2, %v2388_v29, 0.0  ;;  %2208 = vmatprep.subr.bf16.mxu1 %v2472_v1 }
 0x3ae   : > { %v1394_v32 = vpop.xlane.xlu1 %1393  ;;  %1159 = vadd.xlane.f32.xlu1 %v1158_v31 }
 0x3af   : > { %2397 = vpow2.f32 %v907_v30  ;;  %v1398_v33 = vsub.f32 %v2762_v39, %v1394_v32  ;;  %v790_v30 = vsel %vm727_vm2, %v2693_v61, 0.0 }
 0x3b0   : > { %v2390_v34 = vpop.eup %2389 }
 0x3b1   : > { %v1400_v35 = vmul.f32 1.442695, %v1398_v33  ;;  %v1161_v36 = vsel %vm727_vm2, %v2390_v34, 0.0  ;;  %v1164_v6 = vpack.c.bf16 %v2390_v34, %v2388_v29 }
 0x3b2   : > { %v1397_v37 = vpop.xlane.xlu1 %1396  ;;  %1162 = vadd.xlane.f32.xlu0 %v1161_v36 }
 0x3b3   : > { %2399 = vpow2.f32 %v1400_v35  ;;  %v1399_v28 = vsub.f32 %v2766_v43, %v1397_v37 }
 0x3b4   : > { %v2821_v38 = vpop.eup %2391 }
 0x3b5   : > { %v1402_v40 = vmul.f32 1.442695, %v1399_v28  ;;  %v1281_v42 = vsel %vm727_vm2, %v2821_v38, 0.0 }
 0x3b6   : > { %1282 = vadd.xlane.f32.xlu1 %v1281_v42  ;;  %v1043_v50 = vpop.permute.xlu1 %1042 }
 0x3b7   : > { %2401 = vpow2.f32 %v1402_v40  ;;  %v1048_v43 = vsel %vm797_vm3, %v1043_v50, 0 }
 0x3b8   : > { %v2394_v44 = vpop.eup %2393 }
 0x3b9   : > { %v1284_v39 = vsel %vm727_vm2, %v2394_v44, 0.0  ;;  %v1287_v45 = vpack.c.bf16 %v2394_v44, %v2821_v38  ;;  %v2396_v47 = vpop.eup %2395 }
 0x3ba   : > { %1285 = vadd.xlane.f32.xlu0 %v1284_v39  ;;  %v914_v58 = vsel %vm727_vm2, %v2396_v47, 0.0 }
 0x3bc   : > { %v2398_v48 = vpop.eup %2397 }
 0x3bd   : > { %v917_v52 = vpack.c.bf16 %v2396_v47, %v2398_v48  ;;  %v911_v63 = vsel %vm727_vm2, %v2398_v48, 0.0 }
 0x3bf   : > { %2199 = vmatmul.mubr.msk.bf16.vlgmr.msra.gmra.mxu1 %vm727_vm2, %v917_v52 }
 0x3c0   : > { %v2400_v54 = vpop.eup %2399  ;;  %2209 = vmatpush3.bf16.msra.mxu1 %v1048_v43  ;;  %2210 = vmatprep.mubr.msk.bf16.mxu1 %vm2473_vm0, %v2472_v1 }
 0x3c1   : > { %v1404_v55 = vsel %vm727_vm2, %v2400_v54, 0.0  ;;  %2220 = vmatprep.subr.bf16.mxu1 %v2472_v1 }
 0x3c2   : > { %1405 = vadd.xlane.f32.xlu1 %v1404_v55 }
 0x3c4   : > { %v2402_v56 = vpop.eup %2401 }
 0x3c5   : > { %v1407_v57 = vsel %vm727_vm2, %v2402_v56, 0.0  ;;  %v1410_v62 = vpack.c.bf16 %v2402_v56, %v2400_v54 }
 0x3c6   : > { %1408 = vadd.xlane.f32.xlu0 %v1407_v57  ;;  %915 = vadd.xlane.f32.xlu1 %v914_v58 }
 0x3c7   : > { %2211 = vmatmul.mubr.msk.bf16.vlgmr.msra.gmra.mxu1 %vm727_vm2, %v1041_v59 }
 0x3c8   : > { %2222 = vmatprep.mubr.msk.bf16.mxu1 %vm2473_vm0, %v2472_v1 }
 0x3ca   : > { %912 = vadd.xlane.f32.xlu0 %v911_v63 }
 0x3db   : > { %v1517_v0 = vpop.xlane.xlu0 %1516 }
 0x3dc   : > { %v1521_v2 = vsub.f32 %v2770_v46, %v1517_v0 }
 0x3de   : > { %v1523_v3 = vmul.f32 1.442695, %v1521_v2 }
 0x3df   : > { %v1166_v4 = vpop.permute.xlu0 %1165 }
 0x3e0   : > { %2403 = vpow2.f32 %v1523_v3  ;;  %v1171_v5 = vsel %vm797_vm3, %v1166_v4, 0 }
 0x3e1   : > { %2221 = vmatpush3.bf16.msra.mxu1 %v1171_v5 }
 0x3e2   : > { %2232 = vmatprep.subr.bf16.mxu1 %v2472_v1 }
 0x3e4   : > { %2223 = vmatmul.mubr.msk.bf16.vlgmr.msra.gmra.mxu1 %vm727_vm2, %v1164_v6 }
 0x3e5   : > { %2234 = vmatprep.mubr.msk.bf16.mxu1 %vm2473_vm0, %v2472_v1 }
 0x3e7   : > { %v1520_v7 = vpop.xlane.xlu1 %1519 }
 0x3e8   : > { %v1522_v8 = vsub.f32 %v2774_v49, %v1520_v7  ;;  %v1412_v49 = vpop.permute.xlu0 %1411 }
 0x3ea   : > { %v1525_v9 = vmul.f32 1.442695, %v1522_v8 }
 0x3eb   : > { %v1640_v41 = vpop.xlane.xlu1 %1639 }
 0x3ec   : > { %2405 = vpow2.f32 %v1525_v9  ;;  %v1644_v46 = vsub.f32 %v2776_v51, %v1640_v41  ;;  %v1417_v51 = vsel %vm797_vm3, %v1412_v49, 0  ;;  %v1535_v21 = vpop.permute.xlu0 %1534 }
 0x3ed   : > { %v2404_v10 = vpop.eup %2403  ;;  %v1540_v24 = vsel %vm797_vm3, %v1535_v21, 0 }
 0x3ee   : > { %v1646_v11 = vmul.f32 1.442695, %v1644_v46  ;;  %v1527_v12 = vsel %vm727_vm2, %v2404_v10, 0.0 }
 0x3ef   : > { %1528 = vadd.xlane.f32.xlu1 %v1527_v12  ;;  %v1643_v13 = vpop.xlane.xlu1 %1642 }
 0x3f0   : > { %2407 = vpow2.f32 %v1646_v11  ;;  %v1645_v14 = vsub.f32 %v2780_v53, %v1643_v13  ;;  %v1658_v29 = vpop.permute.xlu0 %1657 }
 0x3f1   : > { %v1663_v32 = vsel %vm797_vm3, %v1658_v29, 0 }
 0x3f2   : > { %v1648_v15 = vmul.f32 1.442695, %v1645_v14 }
 0x3f3   : > { %v1289_v16 = vpop.permute.xlu1 %1288 }
 0x3f4   : > { %2409 = vpow2.f32 %v1648_v15  ;;  %v1294_v17 = vsel %vm797_vm3, %v1289_v16, 0 }
 0x3f5   : > { %2233 = vmatpush3.bf16.msra.mxu1 %v1294_v17 }
 0x3f6   : > { %2244 = vmatprep.subr.bf16.mxu1 %v2472_v1 }
 0x3f8   : > { %2235 = vmatmul.mubr.msk.bf16.vlgmr.msra.gmra.mxu1 %vm727_vm2, %v1287_v45 }
 0x3f9   : > { %v2406_v19 = vpop.eup %2405  ;;  %2245 = vmatpush3.bf16.msra.mxu1 %v1417_v51  ;;  %2246 = vmatprep.mubr.msk.bf16.mxu1 %vm2473_vm0, %v2472_v1 }
 0x3fa   : > { %v1530_v53 = vsel %vm727_vm2, %v2406_v19, 0.0  ;;  %2256 = vmatprep.subr.bf16.mxu1 %v2472_v1  ;;  %v1533_v31 = vpack.c.bf16 %v2406_v19, %v2404_v10  ;;  %v2374_v19 = vld [vmem:[%s2935_s5 + $0x18] sm:$0xff]  }
 0x3fb   : > { %1531 = vadd.xlane.f32.xlu0 %v1530_v53  ;;  %2275 = vmatpush3.bf16.msra.mxu0 %v2374_v19 }
 0x3fc   : > { %2276 = vmatprep.subr.bf16.mxu0 %v2472_v1 }
 0x3fd   : > { %v2408_v20 = vpop.eup %2407 }
 0x3fe   : > { %v1650_v22 = vsel %vm727_vm2, %v2408_v20, 0.0 }
 0x3ff   : > { %1651 = vadd.xlane.f32.xlu1 %v1650_v22 }
 0x400   : > { %2247 = vmatmul.mubr.msk.bf16.vlgmr.msra.gmra.mxu1 %vm727_vm2, %v1410_v62 }
 0x401   : > { %v2410_v25 = vpop.eup %2409  ;;  %2257 = vmatpush3.bf16.msra.mxu1 %v1540_v24  ;;  %2258 = vmatprep.mubr.msk.bf16.mxu1 %vm2473_vm0, %v2472_v1 }
 0x402   : > { %v1653_v27 = vsel %vm727_vm2, %v2410_v25, 0.0  ;;  %2268 = vmatprep.subr.bf16.mxu1 %v2472_v1  ;;  %v1656_v60 = vpack.c.bf16 %v2410_v25, %v2408_v20 }
 0x403   : > { %788 = vadd.xlane.f32.xlu1 %v787_v26  ;;  %1654 = vadd.xlane.f32.xlu0 %v1653_v27 }
 0x407   : > { %791 = vadd.xlane.f32.xlu0 %v790_v30 }
 0x408   : > { %2259 = vmatmul.mubr.msk.bf16.vlgmr.msra.gmra.mxu1 %vm727_vm2, %v1533_v31  ;;  %v2375_v31 = vld [vmem:[%s2935_s5 + $0x10] sm:$0xff]  }
 0x409   : > { %2269 = vmatpush3.bf16.msra.mxu1 %v1663_v32  ;;  %2270 = vmatprep.mubr.msk.bf16.mxu1 %vm2473_vm0, %v2472_v1 }
 0x40a   : > { %2277 = vmatpush3.bf16.msra.mxu0 %v2375_v31 }
 0x40b   : > { %2278 = vmatprep.subr.bf16.mxu0 %v2472_v1 }
 0x410   : > { %2271 = vmatmul.mubr.msk.bf16.vlgmr.msra.gmra.mxu1 %vm727_vm2, %v1656_v60 }
 0x42f   : > { %v1037_v33 = vpop.xlane.xlu0 %1036 }
 0x433   : > { %v1040_v34 = vpop.xlane.xlu0 %1039 }
 0x437   : > { %v1160_v35 = vpop.xlane.xlu1 %1159 }
 0x43b   : > { %v1163_v36 = vpop.xlane.xlu0 %1162 }
 0x43f   : > { %v1283_v37 = vpop.xlane.xlu1 %1282 }
 0x443   : > { %v1286_v28 = vpop.xlane.xlu0 %1285 }
 0x44b   : > { %v1406_v61 = vpop.xlane.xlu1 %1405 }
 0x44f   : > { %v1409_v38 = vpop.xlane.xlu0 %1408  ;;  %v916_v40 = vpop.xlane.xlu1 %915 }
 0x450   : > { %2411 = vrcp.f32 %v916_v40  ;;  %v2377_v40 = vld [vmem:[%s2935_s5] sm:$0xff]  }
 0x453   : > { %v913_v42 = vpop.xlane.xlu0 %912 }
 0x454   : > { %2413 = vrcp.f32 %v913_v42 }
 0x455   : > { %2415 = vrcp.f32 %v1037_v33  ;;  %v2376_v33 = vld [vmem:[%s2935_s5 + $0x8] sm:$0xff]  }
 0x456   : > { %2417 = vrcp.f32 %v1040_v34  ;;  %2279 = vmatpush3.bf16.msra.mxu0 %v2376_v33 }
 0x457   : > { %2419 = vrcp.f32 %v1160_v35  ;;  %2280 = vmatprep.subr.bf16.mxu0 %v2472_v1 }
 0x458   : > { %2421 = vrcp.f32 %v1163_v36 }
 0x459   : > { %2423 = vrcp.f32 %v1283_v37 }
 0x45a   : > { %2425 = vrcp.f32 %v1286_v28  ;;  %2281 = vmatpush3.bf16.msra.mxu0 %v2377_v40 }
 0x45b   : > { %2427 = vrcp.f32 %v1406_v61 }
 0x45c   : > { %2429 = vrcp.f32 %v1409_v38 }
 0x45d   : > { %v2412_v45 = vpop.eup %2411 }
 0x461   : > { %v2414_v47 = vpop.eup %2413 }
 0x462   : > { %v2416_v57 = vpop.eup %2415 }
 0x463   : > { %v2418_v58 = vpop.eup %2417 }
 0x464   : > { %v2420_v5 = vpop.eup %2419 }
 0x465   : > { %v2422_v6 = vpop.eup %2421 }
 0x466   : > { %v2424_v12 = vpop.eup %2423 }
 0x467   : > { %v2426_v14 = vpop.eup %2425 }
 0x468   : > { %v2428_v22 = vpop.eup %2427 }
 0x469   : > { %v2430_v25 = vpop.eup %2429 }
 0x478   : > { %v1529_v13 = vpop.xlane.xlu1 %1528 }
 0x479   : > { %2431 = vrcp.f32 %v1529_v13 }
 0x47f   : > { %v961_v44 = vpop.f32.mrf.mxu1 }
 0x480   : > { %v970_v50 = vmul.f32 %v2414_v47, %v961_v44 }
 0x481   : > { %v2200_v39 = vpop.f32.mrf.mxu1 }
 0x483   : > { %v964_v48 = vpop.f32.mrf.mxu1 }
 0x484   : > { %v971_v52 = vmul.f32 %v2412_v45, %v964_v48  ;;  %v1532_v15 = vpop.xlane.xlu0 %1531 }
 0x485   : > { %v2201_v43 = vpop.f32.mrf.mxu1  ;;  %2433 = vrcp.f32 %v1532_v15 }
 0x486   : > { %v2326_v54 = vpack.i.bf16 %v971_v52, %v970_v50  ;;  %v2432_v36 = vpop.eup %2431 }
 0x487   : > { %v1084_v55 = vpop.f32.mrf.mxu1 }
 0x488   : > { %2327 = vrot.lane.b32.xlu1 %v2326_v54, %s2481_s27  ;;  %v1093_v62 = vmul.f32 %v2416_v57, %v1084_v55  ;;  %v1652_v24 = vpop.xlane.xlu1 %1651 }
 0x489   : > { %v2212_v56 = vpop.f32.mrf.mxu1  ;;  %2435 = vrcp.f32 %v1652_v24 }
 0x48b   : > { %v1087_v59 = vpop.f32.mrf.mxu1 }
 0x48c   : > { %v1094_v63 = vmul.f32 %v2418_v58, %v1087_v59  ;;  %v1655_v26 = vpop.xlane.xlu0 %1654  ;;  %v789_v55 = vpop.xlane.xlu1 %788 }
 0x48d   : > { %v2213_v0 = vpop.f32.mrf.mxu1  ;;  %2437 = vrcp.f32 %v1655_v26 }
 0x48e   : > { %v2331_v2 = vpack.i.bf16 %v1094_v63, %v1093_v62  ;;  %2439 = vrcp.f32 %v789_v55 }
 0x490   : > { %2332 = vrot.lane.b32.xlu0 %v2331_v2, %s2482_s28  ;;  %s2486_s28 = smov 48   ;;  %v792_v56 = vpop.xlane.xlu0 %791 }
 0x491   : > { %2441 = vrcp.f32 %v792_v56 }
 0x492   : > { %v2434_v37 = vpop.eup %2433 }
 0x496   : > { %v2436_v47 = vpop.eup %2435 }
 0x49a   : > { %v2438_v48 = vpop.eup %2437 }
 0x49b   : > { %v2440_v62 = vpop.eup %2439 }
 0x49e   : > { %v2442_v0 = vpop.eup %2441 }
 0x4a4   : > { %v1207_v3 = vpop.f32.mrf.mxu1 }
 0x4a5   : > { %v1216_v8 = vmul.f32 %v2420_v5, %v1207_v3 }
 0x4a6   : > { %v2224_v4 = vpop.f32.mrf.mxu1 }
 0x4a8   : > { %v1210_v7 = vpop.f32.mrf.mxu1 }
 0x4a9   : > { %v1217_v9 = vmul.f32 %v2422_v6, %v1210_v7  ;;  %v844_v7 = vmul.f32 %v2440_v62, %v2736_v18 }
 0x4aa   : > { %v2225_v41 = vpop.f32.mrf.mxu1 }
 0x4ab   : > { %v2336_v46 = vpack.i.bf16 %v1217_v9, %v1216_v8  ;;  %v845_v8 = vmul.f32 %v2442_v0, %v2742_v23 }
 0x4ad   : > { %2337 = vrot.lane.b32.xlu1 %v2336_v46, %s2483_s29  ;;  %s2487_s29 = smov 56  }
 0x4b8   : > { %v1330_v10 = vpop.f32.mrf.mxu1 }
 0x4b9   : > { %v1339_v17 = vmul.f32 %v2424_v12, %v1330_v10 }
 0x4ba   : > { %v2236_v11 = vpop.f32.mrf.mxu1 }
 0x4bc   : > { %v1333_v16 = vpop.f32.mrf.mxu1 }
 0x4bd   : > { %v1340_v49 = vmul.f32 %v2426_v14, %v1333_v16 }
 0x4be   : > { %v2237_v51 = vpop.f32.mrf.mxu1 }
 0x4bf   : > { %v2341_v53 = vpack.i.bf16 %v1340_v49, %v1339_v17 }
 0x4c0   : > { %v1453_v20 = vpop.f32.mrf.mxu1 }
 0x4c1   : > { %2342 = vrot.lane.b32.xlu1 %v2341_v53, %s2484_s20  ;;  %v1462_v29 = vmul.f32 %v2428_v22, %v1453_v20 }
 0x4c2   : > { %v2248_v21 = vpop.f32.mrf.mxu1 }
 0x4c4   : > { %v1456_v27 = vpop.f32.mrf.mxu1 }
 0x4c5   : > { %v1463_v30 = vmul.f32 %v2430_v25, %v1456_v27 }
 0x4c6   : > { %v2249_v32 = vpop.f32.mrf.mxu1 }
 0x4c7   : > { %v2346_v60 = vpack.i.bf16 %v1463_v30, %v1462_v29  ;;  %v2074_v32 = vld [vmem:[%s2939_s9] ss:$0 sm:$0xff] }
 0x4c8   : > { %v1576_v34 = vpop.f32.mrf.mxu1 }
 0x4c9   : > { %2347 = vrot.lane.b32.xlu0 %v2346_v60, %s2485_s16  ;;  %v1585_v61 = vmul.f32 %v2432_v36, %v1576_v34  ;;  %v2447_v60 = vld [vmem:[%s2606_s26] sm:$0xff]   ;;  %s468_s16 = scalar_lea.vmem %s2942_s12, %s2086_s17 }
 0x4ca   : > { %v2260_v35 = vpop.f32.mrf.mxu1  ;;  %v1870_v33 = vunpack.c.l.bf16 %v2447_v60 }
 0x4cc   : > { %v1579_v28 = vpop.f32.mrf.mxu1 }
 0x4cd   : > { %v1586_v38 = vmul.f32 %v2434_v37, %v1579_v28  ;;  %v1871_v28 = vunpack.c.h.bf16 %v2447_v60 }
 0x4ce   : > { %v2261_v42 = vpop.f32.mrf.mxu1 }
 0x4cf   : > { %v2351_v44 = vpack.i.bf16 %v1586_v38, %v1585_v61 }
 0x4d0   : > { %v1699_v39 = vpop.f32.mrf.mxu1 }
 0x4d1   : > { %2352 = vrot.lane.b32.xlu1 %v2351_v44, %s2486_s28  ;;  %v1708_v52 = vmul.f32 %v2436_v47, %v1699_v39 }
 0x4d2   : > { %v2272_v45 = vpop.f32.mrf.mxu1 }
 0x4d4   : > { %v1702_v50 = vpop.f32.mrf.mxu1 }
 0x4d5   : > { %v1709_v43 = vmul.f32 %v2438_v48, %v1702_v50 }
 0x4d6   : > { %v2273_v54 = vpop.f32.mrf.mxu1 }
 0x4d7   : > { %v2356_v1 = vpack.i.bf16 %v1709_v43, %v1708_v52 }
 0x4d9   : > { %2357 = vrot.lane.b32.xlu0 %v2356_v1, %s2487_s29 }
 0x4fa   : > { %v2328_v57 = vpop.permute.xlu1 %2327 }
 0x4fb   : > { %v2330_v2 = vunpack.i.h.bf16 %v2328_v57  ;;  %v2329_v3 = vunpack.i.l.bf16 %v2328_v57 }
 0x4fd   : > { %v1767_v12 = vsel %vm727_vm2, %v845_v8, %v2330_v2  ;;  %v1766_v13 = vsel %vm727_vm2, %v844_v7, %v2329_v3  ;;  %v2080_v3 = vld [vmem:[%s2940_s10] ss:$0 sm:$0xff] }
 0x502   : > { %v2333_v59 = vpop.permute.xlu0 %2332 }
 0x503   : > { %v2335_v4 = vunpack.i.h.bf16 %v2333_v59  ;;  %v2334_v5 = vunpack.i.l.bf16 %v2333_v59 }
 0x505   : > { %v1769_v16 = vsel %vm1768_vm4, %v1766_v13, %v2334_v5  ;;  %v1770_v17 = vsel %vm1768_vm4, %v1767_v12, %v2335_v4  ;;  %v2081_v5 = vld [vmem:[%s2941_s11] ss:$0 sm:$0xff] }
 0x51f   : > { %v2338_v58 = vpop.permute.xlu1 %2337 }
 0x520   : > { %v2340_v9 = vunpack.i.h.bf16 %v2338_v58  ;;  %v2339_v41 = vunpack.i.l.bf16 %v2338_v58 }
 0x522   : > { %v1772_v23 = vsel %vm1771_vm5, %v1769_v16, %v2339_v41  ;;  %v1773_v51 = vsel %vm1771_vm5, %v1770_v17, %v2340_v9 }
 0x533   : > { %v2343_v63 = vpop.permute.xlu1 %2342 }
 0x534   : > { %v2345_v10 = vunpack.i.h.bf16 %v2343_v63  ;;  %v2344_v11 = vunpack.i.l.bf16 %v2343_v63 }
 0x536   : > { %v1775_v19 = vsel %vm1774_vm6, %v1772_v23, %v2344_v11  ;;  %v1776_v53 = vsel %vm1774_vm6, %v1773_v51, %v2345_v10 }
 0x53b   : > { %v2348_v6 = vpop.permute.xlu0 %2347 }
 0x53c   : > { %v2350_v14 = vunpack.i.h.bf16 %v2348_v6  ;;  %v2349_v15 = vunpack.i.l.bf16 %v2348_v6 }
 0x53e   : > { %v1778_v21 = vsel %vm1777_vm7, %v1775_v19, %v2349_v15  ;;  %v1779_v22 = vsel %vm1777_vm7, %v1776_v53, %v2350_v14 }
 0x543   : > { %v2353_v46 = vpop.permute.xlu1 %2352 }
 0x544   : > { %v2355_v18 = vunpack.i.h.bf16 %v2353_v46  ;;  %v2354_v49 = vunpack.i.l.bf16 %v2353_v46 }
 0x546   : > { %v1781_v26 = vsel %vm1780_vm8, %v1778_v21, %v2354_v49  ;;  %v1782_v27 = vsel %vm1780_vm8, %v1779_v22, %v2355_v18 }
 0x54b   : > { %v2358_v20 = vpop.permute.xlu0 %2357 }
 0x54c   : > { %v2360_v24 = vunpack.i.h.bf16 %v2358_v20  ;;  %v2359_v25 = vunpack.i.l.bf16 %v2358_v20 }
 0x54e   : > { %v1784_v29 = vsel %vm1783_vm9, %v1781_v26, %v2359_v25  ;;  %v1785_v30 = vsel %vm1783_vm9, %v1782_v27, %v2360_v24 }
 0x54f   : > { %v1786_v31 = vpack.c.bf16 %v1785_v30, %v1784_v29 }
 0x551   : > { %2283 = vmatmul.mubr.msk.bf16.vlgmr.msra.gmra.mxu0 %vm518_vm1, %v1786_v31 }
 0x611   : > { %v1863_v34 = vpop.f32.mrf.mxu0 }
 0x612   : > { %v1864_v35 = vadd.f32 %v2074_v32, %v1863_v34 }
 0x613   : > { %v2284_v36 = vpop.f32.mrf.mxu0 }
 0x614   : > { %v1872_v37 = vadd.f32 %v1870_v33, %v1864_v35 }
 0x615   : > { %v1866_v61 = vpop.f32.mrf.mxu0 }
 0x616   : > { %v1867_v38 = vadd.f32 %v2074_v32, %v1866_v61  ;;  %v1874_v40 = vsel %vm518_vm1, %v1872_v37, 0.0 }
 0x617   : > { %1875 = vadd.xlane.f32.xlu1 %v1874_v40  ;;  %v2285_v42 = vpop.f32.mrf.mxu0 }
 0x618   : > { %v1873_v44 = vadd.f32 %v1871_v28, %v1867_v38 }
 0x61a   : > { %v1877_v39 = vsel %vm518_vm1, %v1873_v44, 0.0 }
 0x61b   : > { %1878 = vadd.xlane.f32.xlu0 %v1877_v39 }
 0x6a0   : > { %v1876_v45 = vpop.xlane.xlu1 %1875 }
 0x6a1   : > { %v1881_v47 = vmul.f32 0.015625, %v1876_v45 }
 0x6a3   : > { %v1883_v48 = vsub.f32 %v1872_v37, %v1881_v47 }
 0x6a4   : > { %v1879_v50 = vpop.xlane.xlu0 %1878 }
 0x6a5   : > { %v1882_v52 = vmul.f32 0.015625, %v1879_v50  ;;  %v1885_v43 = vmul.f32 %v1883_v48, %v1883_v48 }
 0x6a7   : > { %v1884_v54 = vsub.f32 %v1873_v44, %v1882_v52  ;;  %v1887_v1 = vsel %vm518_vm1, %v1885_v43, 0.0 }
 0x6a8   : > { %1888 = vadd.xlane.f32.xlu0 %v1887_v1 }
 0x6a9   : > { %v1886_v55 = vmul.f32 %v1884_v54, %v1884_v54 }
 0x6ab   : > { %v1890_v56 = vsel %vm518_vm1, %v1886_v55, 0.0 }
 0x6ac   : > { %1891 = vadd.xlane.f32.xlu1 %v1890_v56 }
 0x731   : > { %v1889_v57 = vpop.xlane.xlu0 %1888 }
 0x732   : > { %v1893_v58 = vmul.f32 0.015625, %v1889_v57 }
 0x734   : > { %v1895_v59 = vadd.f32 1e-05, %v1893_v58 }
 0x735   : > { %v1892_v62 = vpop.xlane.xlu1 %1891 }
 0x736   : > { %2443 = vrsqrt.f32 %v1895_v59  ;;  %v1894_v63 = vmul.f32 0.015625, %v1892_v62 }
 0x738   : > { %v1896_v0 = vadd.f32 1e-05, %v1894_v63 }
 0x73a   : > { %2445 = vrsqrt.f32 %v1896_v0 }
 0x743   : > { %v2444_v2 = vpop.eup %2443 }
 0x744   : > { %v1899_v4 = vmul.f32 %v2444_v2, %v1883_v48 }
 0x746   : > { %v1908_v6 = vmul.f32 %v2080_v3, %v1899_v4 }
 0x747   : > { %v2446_v7 = vpop.eup %2445 }
 0x748   : > { %v1917_v8 = vadd.f32 %v2081_v5, %v1908_v6  ;;  %v1900_v9 = vmul.f32 %v2446_v7, %v1884_v54 }
 0x74a   : > { %v2088_v41 = vpack.c.bf16 %v1917_v8, %v1917_v8  ;;  %v1909_v46 = vmul.f32 %v2080_v3, %v1900_v9 }
 0x74c   : > { %1928 = vst.msk [vmem:[%s468_s16] sm:$0xf] %vm1927_vm10, %v2088_v41  ;;  %v1918_v10 = vadd.f32 %v2081_v5, %v1909_v46 }
 0x74e   : > { %v2089_v11 = vpack.c.bf16 %v1918_v10, %v1918_v10 }
 0x750   : > { %1929 = vst.msk [vmem:[%s468_s16 + $0x4] sm:$0xf] %vm1927_vm10, %v2089_v11 }
 0x751 PF: > { %s22_s23 = sadd.s32 1, %s2470_s23   ;;  %s2943_s21 = smov %s2466_s22 }
 0x752   : > { %p19_p5 = scmp.ge.s32.totalorder %s22_s23, 4   ;;  %s2944_s22 = smov %s2946_s24 }
 0x754   :  { %21 = sbr.rel (!%p19_p5) target bundleno = 2 (0x2), region = 101 }

// kernel: co_attention_forward.6
= control target key start
LH: loop header
LB: loop body
LE: loop exit
PB: predicated region body
PF: predicated region fallthrough
CT: control target
= control target key end

     0   :  { %s2275_s21 = smov 0   ;;  %s2277_s22 = smov 0   ;;  %s2581_s0 = inlined_call_operand.vmem [shape: f32[2,8,64], index: 0, kind: input, shape index: {}, may-alias: {0,1}]   ;;  %s2582_s1 = inlined_call_operand.vmem [shape: f32[2,8,64], index: 1, kind: input, shape index: {}, may-alias: {0,1}]   ;;  %s2583_s2 = inlined_call_operand.vmem [shape: bf16[64,64], index: 2, kind: input, shape index: {}]   ;;  %s2584_s3 = inlined_call_operand.vmem [shape: bf16[64,64], index: 3, kind: input, shape index: {}]   ;;  %s2585_s4 = inlined_call_operand.vmem [shape: bf16[64,64], index: 4, kind: input, shape index: {}]   ;;  %s2586_s5 = inlined_call_operand.vmem [shape: bf16[64,64], index: 5, kind: input, shape index: {}]   ;;  %s2587_s6 = inlined_call_operand.vmem [shape: f32[1,64], index: 6, kind: input, shape index: {}]   ;;  %s2588_s7 = inlined_call_operand.vmem [shape: f32[1,64], index: 7, kind: input, shape index: {}]   ;;  %s2589_s8 = inlined_call_operand.vmem [shape: f32[1,64], index: 8, kind: input, shape index: {}]   ;;  %s2590_s9 = inlined_call_operand.vmem [shape: f32[1,64], index: 9, kind: input, shape index: {}]   ;;  %s2591_s10 = inlined_call_operand.vmem [shape: f32[1,64], index: 10, kind: input, shape index: {}]   ;;  %s2592_s11 = inlined_call_operand.vmem [shape: f32[1,64], index: 11, kind: input, shape index: {}]   ;;  %s2593_s12 = inlined_call_operand.vmem [shape: bf16[2,8,64], index: 12, kind: output, shape index: {}]  }
   0x1   :  { %s2279_s23 = smov 0  }
   0x2 LB: > { %s34_s24 = sadd.s32 1, %s2188_s22  ;;  %p1836_p0 = scmp.ge.s32.totalorder %s2192_s23, 1  ;;  %s2192_s23 = sphi %s2279_s23, %s22_s23   ;;  %s2188_s22 = sphi %s2277_s22, %s2595_s22   ;;  %s2184_s21 = sphi %s2275_s21, %s2594_s21  }
   0x3   : > { %p36_p1 = scmp.ge.s32.totalorder %s34_s24, 2  ;;  %p389_p2 = scmp.lt.s32.totalorder %s2192_s23, 3 }
   0x5   : > { %s2597_s24 = smov (%p36_p1, %s34_s24), 0  ;;  %p390_p3 = pnand %p1836_p0, %p389_p2 }
   0x6   : > { %p439_p4 = scmp.lt.s32.totalorder (!%p390_p3), %s2184_s21, 1  ;;  %s2196_s14 = smov (!%p390_p3), 120  }
   0x7   : > { %393 = sbr.rel (%p390_p3) target bundleno = 1825 (0x721), region = 68  ;;  %s2197_s15 = smov (!%p390_p3), 112  }
   0x8   : > { %s2198_s16 = smov (!%p390_p3), 104   ;;  %s2200_s18 = smov (!%p390_p3), 88  }
   0x9   : > { %s2201_s19 = smov (!%p390_p3), 80   ;;  %s2202_s20 = smov (!%p390_p3), 72  }
   0xa   : > { %s2203_s27 = smov (!%p390_p3), 8   ;;  %s2204_s28 = smov (!%p390_p3), 16  }
   0xb   : > { %s2205_s29 = smov (!%p390_p3), 24   ;;  %s2206_s30 = smov (!%p390_p3), 32  }
   0xc   : > { %v2120_v0 = vld [vmem:[%s2583_s2 + $0x18] sm:$0xff]   ;;  %v2194_v1 = vmov 0.0   ;;  %v2122_v3 = vld [vmem:[%s2583_s2 + $0x10] sm:$0xff]   ;;  %vm2195_vm0 = vmmov 0   ;;  %s2599_s21 = smov (!%p439_p4, %s2184_s21), 1  ;;  %v2124_v5 = vld [vmem:[%s2583_s2 + $0x8] sm:$0xff]  }
   0xd   : > { %1936 = vmatprep.subr.bf16.mxu0 %v2194_v1  ;;  %1948 = vmatprep.subr.bf16.mxu1 %v2194_v1  ;;  %v2121_v2 = vld [vmem:[%s2584_s3 + $0x18] sm:$0xff]   ;;  %v2123_v4 = vld [vmem:[%s2584_s3 + $0x10] sm:$0xff]   ;;  %s1837_s17 = sshll.u32 %s2599_s21, 3  ;;  %v2125_v6 = vld [vmem:[%s2584_s3 + $0x8] sm:$0xff]   ;;  %vm501_vm1 = vcmask 523264   ;;  %vm709_vm2 = vcmask 64512  }
   0xe   : > { %1937 = vmatpush3.bf16.msra.mxu0 %v2120_v0  ;;  %1944 = vmatprep.mubr.msk.bf16.mxu0 %vm2195_vm0, %v2194_v1  ;;  %s445_s26 = scalar_lea.vmem %s2581_s0, %s1837_s17  ;;  %v2126_v7 = vld [vmem:[%s2583_s2] sm:$0xff]   ;;  %s449_s13 = scalar_lea.vmem %s2582_s1, %s1837_s17  ;;  %v2128_v13 = vld [vmem:[%s2585_s4 + $0x18] sm:$0xff]   ;;  %v2129_v14 = vld [vmem:[%s2585_s4 + $0x10] sm:$0xff]   ;;  %vm769_vm3 = vcmask 1043456   ;;  %vm1617_vm4 = vcmask 130048   ;;  %vm1619_vm5 = vcmask 195584  }
   0xf   : > { %1949 = vmatpush3.bf16.msra.mxu1 %v2121_v2  ;;  %1938 = vmatprep.subr.bf16.mxu0 %v2194_v1  ;;  %v2330_v8 = vld [vmem:[%s445_s26] sm:$0xff]  ;;  %v2130_v15 = vld [vmem:[%s2585_s4 + $0x8] sm:$0xff]   ;;  %s2199_s17 = smov 96   ;;  %s2208_s26 = smov 48   ;;  %vm1621_vm6 = vcmask 261120   ;;  %vm1623_vm7 = vcmask 326656  }
  0x10   : > { %1950 = vmatprep.subr.bf16.mxu1 %v2194_v1  ;;  %1956 = vmatprep.mubr.msk.bf16.mxu1 %vm2195_vm0, %v2194_v1  ;;  %v2127_v9 = vld [vmem:[%s2584_s3] sm:$0xff]   ;;  %v460_v11 = vpack.c.bf16 %v2330_v8, %v2330_v8  ;;  %vm1625_vm8 = vcmask 392192   ;;  %vm1627_vm9 = vcmask 457728   ;;  %vm1744_vm10 = vcmask 519168  }
  0x11   : > { %v459_v10 = vld [vmem:[%s449_s13] sm:$0xff] }
  0x12   : > { %1939 = vmatpush3.bf16.msra.mxu0 %v2122_v3  ;;  %v461_v12 = vpack.c.bf16 %v459_v10, %v459_v10  ;;  %v2131_v16 = vld [vmem:[%s2585_s4] sm:$0xff]  }
  0x13   : > { %1951 = vmatpush3.bf16.msra.mxu1 %v2123_v4  ;;  %1940 = vmatprep.subr.bf16.mxu0 %v2194_v1  ;;  %v1840_v17 = vld [vmem:[%s2587_s6] ss:$0 sm:$0xff] }
  0x14   : > { %1952 = vmatprep.subr.bf16.mxu1 %v2194_v1  ;;  %v1846_v18 = vld [vmem:[%s2588_s7] ss:$0 sm:$0xff] }
  0x15   : > { %v1852_v51 = vld [vmem:[%s2589_s8] ss:$0 sm:$0xff] }
  0x16   : > { %1941 = vmatpush3.bf16.msra.mxu0 %v2124_v5 }
  0x17   : > { %1953 = vmatpush3.bf16.msra.mxu1 %v2125_v6  ;;  %1942 = vmatprep.subr.bf16.mxu0 %v2194_v1 }
  0x18   : > { %1954 = vmatprep.subr.bf16.mxu1 %v2194_v1 }
  0x1a   : > { %1943 = vmatpush3.bf16.msra.mxu0 %v2126_v7 }
  0x1b   : > { %1955 = vmatpush3.bf16.msra.mxu1 %v2127_v9  ;;  %1960 = vmatprep.subr.bf16.mxu0 %v2194_v1 }
  0x1c   : > { %1972 = vmatprep.subr.bf16.mxu1 %v2194_v1 }
  0x1d   : > { %1945 = vmatmul.mubr.msk.bf16.vlgmr.msra.gmra.mxu0 %vm501_vm1, %v460_v11 }
  0x1e   : > { %1957 = vmatmul.mubr.msk.bf16.vlgmr.msra.gmra.mxu1 %vm501_vm1, %v461_v12  ;;  %1968 = vmatprep.mubr.msk.bf16.mxu0 %vm2195_vm0, %v2194_v1 }
  0x1f   : > { %1974 = vmatprep.mubr.msk.bf16.mxu1 %vm2195_vm0, %v2194_v1  ;;  %1961 = vmatpush3.bf16.msra.mxu0 %v2128_v13 }
  0x20   : > { %1962 = vmatprep.subr.bf16.mxu0 %v2194_v1 }
  0x23   : > { %1963 = vmatpush3.bf16.msra.mxu0 %v2129_v14 }
  0x24   : > { %1964 = vmatprep.subr.bf16.mxu0 %v2194_v1 }
  0x27   : > { %1965 = vmatpush3.bf16.msra.mxu0 %v2130_v15 }
  0x28   : > { %1966 = vmatprep.subr.bf16.mxu0 %v2194_v1 }
  0x2b   : > { %1967 = vmatpush3.bf16.msra.mxu0 %v2131_v16 }
  0x2c   : > { %1996 = vmatprep.subr.bf16.mxu0 %v2194_v1 }
  0x2e   : > { %1969 = vmatmul.mubr.msk.bf16.vlgmr.msra.gmra.mxu0 %vm501_vm1, %v461_v12 }
  0x2f   : > { %1998 = vmatprep.mubr.msk.bf16.mxu0 %vm2195_vm0, %v2194_v1 }
  0xdd   : > { %v539_v19 = vpop.f32.mrf.mxu0 }
  0xde   : > { %v540_v20 = vadd.f32 %v1840_v17, %v539_v19  ;;  %v621_v21 = vpop.f32.mrf.mxu1 }
  0xdf   : > { %v622_v22 = vadd.f32 %v1846_v18, %v621_v21  ;;  %v1946_v23 = vpop.f32.mrf.mxu0 }
  0xe0   : > { %v706_v24 = vpack.c.bf16 %v540_v20, %v540_v20  ;;  %v1958_v25 = vpop.f32.mrf.mxu1 }
  0xe1   : > { %v2375_v26 = vpack.c.bf16 %v622_v22, %v622_v22  ;;  %v542_v27 = vpop.f32.mrf.mxu0 }
  0xe2   : > { %v624_v28 = vpop.f32.mrf.mxu1  ;;  %816 = vrot.lane.b32.xlu1 %v706_v24, %s2196_s14 }
  0xe3   : > { %v714_v29 = vsel %vm709_vm2, %v2375_v26, 0  ;;  %v1947_v30 = vpop.f32.mrf.mxu0 }
  0xe4   : > { %v1959_v31 = vpop.f32.mrf.mxu1  ;;  %1973 = vmatpush3.bf16.xpose.msra.mxu1 %v714_v29 }
  0xe5   : > { %1978 = vmatprep.subr.bf16.mxu1 %v2194_v1 }
  0xe6   : > { %930 = vrot.lane.b32.xlu1 %v2375_v26, %s2197_s15 }
  0xea   : > { %928 = vrot.lane.b32.xlu1 %v706_v24, %s2197_s15 }
  0xeb   : > { %1975 = vmatmul.mubr.msk.bf16.vlgmr.msra.gmra.mxu1 %vm709_vm2, %v706_v24 }
  0xec   : > { %1980 = vmatprep.mubr.msk.bf16.mxu1 %vm2195_vm0, %v2194_v1 }
  0xee   : > { %1040 = vrot.lane.b32.xlu1 %v2375_v26, %s2198_s16  ;;  %v700_v33 = vpop.f32.mrf.mxu0 }
  0xef   : > { %v701_v52 = vadd.f32 %v1852_v51, %v700_v33 }
  0xf0   : > { %v1970_v36 = vpop.f32.mrf.mxu0 }
  0xf1   : > { %v2419_v53 = vpack.c.bf16 %v701_v52, %v701_v52 }
  0xf2   : > { %1038 = vrot.lane.b32.xlu1 %v706_v24, %s2198_s16  ;;  %v703_v37 = vpop.f32.mrf.mxu0 }
  0xf3   : > { %v771_v54 = vsel %vm769_vm3, %v2419_v53, 0 }
  0xf4   : > { %v1971_v39 = vpop.f32.mrf.mxu0  ;;  %1979 = vmatpush3.bf16.msra.mxu1 %v771_v54 }
  0xf5   : > { %1984 = vmatprep.subr.bf16.mxu1 %v2194_v1 }
  0xf6   : > { %1150 = vrot.lane.b32.xlu1 %v2375_v26, %s2199_s17 }
  0xfa   : > { %1148 = vrot.lane.b32.xlu1 %v706_v24, %s2199_s17 }
  0xfe   : > { %1258 = vrot.lane.b32.xlu1 %v706_v24, %s2200_s18 }
 0x102   : > { %1368 = vrot.lane.b32.xlu1 %v706_v24, %s2201_s19 }
 0x106   : > { %1478 = vrot.lane.b32.xlu1 %v706_v24, %s2202_s20 }
 0x154   : > { %v2396_v32 = vpop.permute.xlu1 %816 }
 0x158   : > { %v931_v34 = vpop.permute.xlu1 %930 }
 0x159   : > { %v936_v35 = vsel %vm709_vm2, %v931_v34, 0 }
 0x15a   : > { %1997 = vmatpush3.bf16.xpose.msra.mxu0 %v936_v35 }
 0x15b   : > { %2008 = vmatprep.subr.bf16.mxu0 %v2194_v1 }
 0x15c   : > { %v929_v38 = vpop.permute.xlu1 %928 }
 0x160   : > { %v1041_v40 = vpop.permute.xlu1 %1040 }
 0x161   : > { %v1046_v41 = vsel %vm709_vm2, %v1041_v40, 0  ;;  %1999 = vmatmul.mubr.msk.bf16.vlgmr.msra.gmra.mxu0 %vm709_vm2, %v929_v38 }
 0x162   : > { %2009 = vmatpush3.bf16.xpose.msra.mxu0 %v1046_v41  ;;  %2010 = vmatprep.mubr.msk.bf16.mxu0 %vm2195_vm0, %v2194_v1 }
 0x163   : > { %2020 = vmatprep.subr.bf16.mxu0 %v2194_v1 }
 0x164   : > { %v1039_v42 = vpop.permute.xlu1 %1038 }
 0x168   : > { %v1151_v43 = vpop.permute.xlu1 %1150 }
 0x169   : > { %v1156_v44 = vsel %vm709_vm2, %v1151_v43, 0  ;;  %2011 = vmatmul.mubr.msk.bf16.vlgmr.msra.gmra.mxu0 %vm709_vm2, %v1039_v42 }
 0x16a   : > { %2021 = vmatpush3.bf16.xpose.msra.mxu0 %v1156_v44  ;;  %2022 = vmatprep.mubr.msk.bf16.mxu0 %vm2195_vm0, %v2194_v1 }
 0x16b   : > { %2032 = vmatprep.subr.bf16.mxu0 %v2194_v1 }
 0x16c   : > { %v1149_v45 = vpop.permute.xlu1 %1148 }
 0x170   : > { %v1259_v15 = vpop.permute.xlu1 %1258 }
 0x171   : > { %2023 = vmatmul.mubr.msk.bf16.vlgmr.msra.gmra.mxu0 %vm709_vm2, %v1149_v45 }
 0x172   : > { %2034 = vmatprep.mubr.msk.bf16.mxu0 %vm2195_vm0, %v2194_v1 }
 0x174   : > { %v1369_v21 = vpop.permute.xlu1 %1368 }
 0x178   : > { %v1479_v23 = vpop.permute.xlu1 %1478 }
 0x1ab   : > { %v750_v46 = vpop.f32.mrf.mxu1 }
 0x1ac   : > { %v756_v47 = vsel %vm709_vm2, %v750_v46, -inf }
 0x1ad   : > { %757 = vmax.xlane.f32.xlu0 %v756_v47  ;;  %v1976_v48 = vpop.f32.mrf.mxu1 }
 0x1af   : > { %v753_v49 = vpop.f32.mrf.mxu1 }
 0x1b1   : > { %v1977_v50 = vpop.f32.mrf.mxu1 }
 0x1c3   : > { %819 = vrot.lane.b32.xlu0 %v2375_v26, %s2196_s14 }
 0x1c7   : > { %1260 = vrot.lane.b32.xlu0 %v2375_v26, %s2200_s18 }
 0x1cb   : > { %1370 = vrot.lane.b32.xlu0 %v2375_v26, %s2201_s19 }
 0x1cf   : > { %1480 = vrot.lane.b32.xlu0 %v2375_v26, %s2202_s20 }
 0x1d3   : > { %988 = vrot.lane.b32.xlu0 %v2419_v53, %s2197_s15 }
 0x221   : > { %v2432_v55 = vpop.f32.mrf.mxu0 }
 0x222   : > { %v978_v56 = vsel %vm709_vm2, %v2432_v55, -inf }
 0x223   : > { %979 = vmax.xlane.f32.xlu1 %v978_v56  ;;  %v2000_v57 = vpop.f32.mrf.mxu0 }
 0x225   : > { %v975_v58 = vpop.f32.mrf.mxu0 }
 0x227   : > { %v2001_v59 = vpop.f32.mrf.mxu0 }
 0x229   : > { %v2436_v60 = vpop.f32.mrf.mxu0 }
 0x22a   : > { %v1088_v61 = vsel %vm709_vm2, %v2436_v60, -inf }
 0x22b   : > { %1089 = vmax.xlane.f32.xlu0 %v1088_v61  ;;  %v2012_v62 = vpop.f32.mrf.mxu0 }
 0x22d   : > { %v1085_v63 = vpop.f32.mrf.mxu0 }
 0x22f   : > { %v2013_v0 = vpop.f32.mrf.mxu0 }
 0x231   : > { %v2440_v2 = vpop.f32.mrf.mxu0 }
 0x232   : > { %v1198_v3 = vsel %vm709_vm2, %v2440_v2, -inf }
 0x233   : > { %1199 = vmax.xlane.f32.xlu0 %v1198_v3  ;;  %v2024_v4 = vpop.f32.mrf.mxu0 }
 0x234   : > { %878 = vrot.lane.b32.xlu1 %v2419_v53, %s2196_s14 }
 0x235   : > { %v1195_v5 = vpop.f32.mrf.mxu0 }
 0x236   : > { %v758_v6 = vpop.xlane.xlu0 %757 }
 0x237   : > { %v759_v7 = vsub.f32 %v750_v46, %v758_v6  ;;  %v2025_v9 = vpop.f32.mrf.mxu0 }
 0x239   : > { %v760_v10 = vmul.f32 1.442695, %v759_v7 }
 0x23a   : > { %v820_v11 = vpop.permute.xlu0 %819 }
 0x23b   : > { %2136 = vpow2.f32 %v760_v10  ;;  %v825_v19 = vsel %vm709_vm2, %v820_v11, 0 }
 0x23e   : > { %v1261_v12 = vpop.permute.xlu0 %1260 }
 0x23f   : > { %v1266_v13 = vsel %vm709_vm2, %v1261_v12, 0 }
 0x240   : > { %2033 = vmatpush3.bf16.xpose.msra.mxu0 %v1266_v13 }
 0x241   : > { %2044 = vmatprep.subr.bf16.mxu0 %v2194_v1 }
 0x242   : > { %v1371_v14 = vpop.permute.xlu0 %1370 }
 0x243   : > { %v1376_v16 = vsel %vm709_vm2, %v1371_v14, 0 }
 0x246   : > { %v1481_v20 = vpop.permute.xlu0 %1480 }
 0x247   : > { %2035 = vmatmul.mubr.msk.bf16.vlgmr.msra.gmra.mxu0 %vm709_vm2, %v1259_v15  ;;  %v1486_v22 = vsel %vm709_vm2, %v1481_v20, 0 }
 0x248   : > { %v2450_v17 = vpop.eup %2136  ;;  %2045 = vmatpush3.bf16.xpose.msra.mxu0 %v1376_v16  ;;  %2046 = vmatprep.mubr.msk.bf16.mxu0 %vm2195_vm0, %v2194_v1 }
 0x249   : > { %v765_v18 = vpack.c.bf16 %v2450_v17, %v2450_v17  ;;  %2056 = vmatprep.subr.bf16.mxu0 %v2194_v1 }
 0x24a   : > { %v989_v50 = vpop.permute.xlu0 %988 }
 0x24b   : > { %1981 = vmatmul.mubr.msk.bf16.vlgmr.msra.gmra.mxu1 %vm709_vm2, %v765_v18  ;;  %v762_v18 = vsel %vm709_vm2, %v2450_v17, 0.0 }
 0x24c   : > { %1985 = vmatpush3.bf16.xpose.msra.mxu1 %v825_v19  ;;  %1986 = vmatprep.mubr.msk.bf16.mxu1 %vm2195_vm0, %v2194_v1 }
 0x24d   : > { %1990 = vmatprep.subr.bf16.mxu1 %v2194_v1 }
 0x24f   : > { %2047 = vmatmul.mubr.msk.bf16.vlgmr.msra.gmra.mxu0 %vm709_vm2, %v1369_v21  ;;  %v994_v21 = vsel %vm769_vm3, %v989_v50, 0 }
 0x250   : > { %2057 = vmatpush3.bf16.xpose.msra.mxu0 %v1486_v22  ;;  %2058 = vmatprep.mubr.msk.bf16.mxu0 %vm2195_vm0, %v2194_v1 }
 0x251   : > { %2068 = vmatprep.subr.bf16.mxu0 %v2194_v1 }
 0x253   : > { %1987 = vmatmul.mubr.msk.bf16.vlgmr.msra.gmra.mxu1 %vm709_vm2, %v2396_v32 }
 0x254   : > { %1992 = vmatprep.mubr.msk.bf16.mxu1 %vm2195_vm0, %v2194_v1 }
 0x257   : > { %2059 = vmatmul.mubr.msk.bf16.vlgmr.msra.gmra.mxu0 %vm709_vm2, %v1479_v23 }
 0x258   : > { %2076 = vmatprep.mubr.msk.bf16.mxu0 %vm2195_vm0, %v2194_v1 }
 0x2ac   : > { %v980_v24 = vpop.xlane.xlu1 %979 }
 0x2ad   : > { %v981_v59 = vsub.f32 %v2432_v55, %v980_v24 }
 0x2af   : > { %v982_v62 = vmul.f32 1.442695, %v981_v59 }
 0x2b0   : > { %v879_v25 = vpop.permute.xlu1 %878 }
 0x2b1   : > { %v884_v26 = vsel %vm769_vm3, %v879_v25, 0 }
 0x2b2   : > { %1991 = vmatpush3.bf16.msra.mxu1 %v884_v26 }
 0x2b3   : > { %2002 = vmatprep.subr.bf16.mxu1 %v2194_v1 }
 0x2b4   : > { %v1090_v51 = vpop.xlane.xlu0 %1089 }
 0x2b5   : > { %v1091_v52 = vsub.f32 %v2436_v60, %v1090_v51 }
 0x2b7   : > { %v1092_v54 = vmul.f32 1.442695, %v1091_v52 }
 0x2b9   : > { %2138 = vpow2.f32 %v1092_v54 }
 0x2ba   : > { %2140 = vpow2.f32 %v982_v62 }
 0x2bc   : > { %v1200_v61 = vpop.xlane.xlu0 %1199 }
 0x2bd   : > { %v1201_v63 = vsub.f32 %v2440_v2, %v1200_v61 }
 0x2bf   : > { %v1202_v60 = vmul.f32 1.442695, %v1201_v63 }
 0x2c1   : > { %2142 = vpow2.f32 %v1202_v60 }
 0x2c6   : > { %v2139_v57 = vpop.eup %2138 }
 0x2c7   : > { %v1094_v58 = vsel %vm709_vm2, %v2139_v57, 0.0  ;;  %v2141_v0 = vpop.eup %2140  ;;  %v1097_v26 = vpack.c.bf16 %v2139_v57, %v2139_v57 }
 0x2c8   : > { %v984_v3 = vsel %vm709_vm2, %v2141_v0, 0.0  ;;  %v987_v24 = vpack.c.bf16 %v2141_v0, %v2141_v0 }
 0x2ce   : > { %v2143_v4 = vpop.eup %2142 }
 0x2cf   : > { %v1204_v5 = vsel %vm709_vm2, %v2143_v4, 0.0 }
 0x307   : > { %v1302_v27 = vpop.f32.mrf.mxu0 }
 0x308   : > { %v1308_v28 = vsel %vm709_vm2, %v1302_v27, -inf }
 0x309   : > { %1309 = vmax.xlane.f32.xlu0 %v1308_v28  ;;  %v2036_v29 = vpop.f32.mrf.mxu0  ;;  %v1207_v28 = vpack.c.bf16 %v2143_v4, %v2143_v4 }
 0x30b   : > { %v2477_v30 = vpop.f32.mrf.mxu1  ;;  %v1305_v31 = vpop.f32.mrf.mxu0 }
 0x30d   : > { %v1982_v32 = vpop.f32.mrf.mxu1  ;;  %v2037_v33 = vpop.f32.mrf.mxu0 }
 0x30f   : > { %v810_v34 = vpop.f32.mrf.mxu1  ;;  %v1412_v35 = vpop.f32.mrf.mxu0 }
 0x310   : > { %v1418_v36 = vsel %vm709_vm2, %v1412_v35, -inf }
 0x311   : > { %v1983_v37 = vpop.f32.mrf.mxu1  ;;  %1419 = vmax.xlane.f32.xlu1 %v1418_v36  ;;  %v2048_v38 = vpop.f32.mrf.mxu0 }
 0x313   : > { %v861_v39 = vpop.f32.mrf.mxu1  ;;  %v1415_v40 = vpop.f32.mrf.mxu0 }
 0x314   : > { %v867_v41 = vsel %vm709_vm2, %v861_v39, -inf }
 0x315   : > { %v1988_v42 = vpop.f32.mrf.mxu1  ;;  %868 = vmax.xlane.f32.xlu0 %v867_v41  ;;  %v2049_v43 = vpop.f32.mrf.mxu0 }
 0x317   : > { %v864_v44 = vpop.f32.mrf.mxu1  ;;  %v2481_v45 = vpop.f32.mrf.mxu0 }
 0x318   : > { %v1528_v56 = vsel %vm709_vm2, %v2481_v45, -inf }
 0x319   : > { %v1989_v46 = vpop.f32.mrf.mxu1  ;;  %v2060_v47 = vpop.f32.mrf.mxu0 }
 0x31b   : > { %v1525_v48 = vpop.f32.mrf.mxu0 }
 0x31d   : > { %v2061_v49 = vpop.f32.mrf.mxu0 }
 0x322   : > { %1208 = vrot.lane.b32.xlu1 %v2419_v53, %s2199_s17 }
 0x326   : > { %1428 = vrot.lane.b32.xlu1 %v2419_v53, %s2201_s19  ;;  %s2207_s19 = smov 40  }
 0x32a   : > { %1538 = vrot.lane.b32.xlu1 %v2419_v53, %s2202_s20 }
 0x32b   : > { %1098 = vrot.lane.b32.xlu0 %v2419_v53, %s2198_s16  ;;  %s1839_s16 = sshll.u32 %s2599_s21, 2 }
 0x34a   : > { %1529 = vmax.xlane.f32.xlu0 %v1528_v56 }
 0x34e   : > { %1095 = vadd.xlane.f32.xlu1 %v1094_v58 }
 0x360   : > { %1318 = vrot.lane.b32.xlu0 %v2419_v53, %s2200_s18 }
 0x37f   : > { %985 = vadd.xlane.f32.xlu0 %v984_v3 }
 0x383   : > { %1205 = vadd.xlane.f32.xlu0 %v1204_v5 }
 0x392   : > { %v1310_v6 = vpop.xlane.xlu0 %1309 }
 0x393   : > { %v1311_v9 = vsub.f32 %v1302_v27, %v1310_v6 }
 0x395   : > { %v1312_v2 = vmul.f32 1.442695, %v1311_v9 }
 0x39a   : > { %v1420_v7 = vpop.xlane.xlu1 %1419 }
 0x39b   : > { %v1421_v53 = vsub.f32 %v1412_v35, %v1420_v7 }
 0x39d   : > { %v1422_v55 = vmul.f32 1.442695, %v1421_v53 }
 0x39e   : > { %v869_v10 = vpop.xlane.xlu0 %868  ;;  %v1209_v25 = vpop.permute.xlu1 %1208 }
 0x39f   : > { %2144 = vpow2.f32 %v1422_v55  ;;  %v870_v11 = vsub.f32 %v861_v39, %v869_v10  ;;  %v1214_v27 = vsel %vm769_vm3, %v1209_v25, 0 }
 0x3a1   : > { %v871_v12 = vmul.f32 1.442695, %v870_v11 }
 0x3a2   : > { %v1099_v23 = vpop.permute.xlu0 %1098  ;;  %v1429_v35 = vpop.permute.xlu1 %1428 }
 0x3a3   : > { %2146 = vpow2.f32 %v871_v12  ;;  %v1104_v17 = vsel %vm769_vm3, %v1099_v23, 0  ;;  %v1434_v37 = vsel %vm769_vm3, %v1429_v35, 0 }
 0x3a4   : > { %2148 = vpow2.f32 %v1312_v2  ;;  %v2132_v2 = vld [vmem:[%s2586_s5 + $0x18] sm:$0xff]  }
 0x3a5   : > { %2069 = vmatpush3.bf16.msra.mxu0 %v2132_v2 }
 0x3a6   : > { %v1539_v38 = vpop.permute.xlu1 %1538  ;;  %2070 = vmatprep.subr.bf16.mxu0 %v2194_v1 }
 0x3a7   : > { %v1544_v40 = vsel %vm769_vm3, %v1539_v38, 0 }
 0x3ac   : > { %v2145_v13 = vpop.eup %2144 }
 0x3ad   : > { %v1424_v14 = vsel %vm709_vm2, %v2145_v13, 0.0  ;;  %v1427_v39 = vpack.c.bf16 %v2145_v13, %v2145_v13  ;;  %v2133_v13 = vld [vmem:[%s2586_s5 + $0x10] sm:$0xff]  }
 0x3ae   : > { %1425 = vadd.xlane.f32.xlu0 %v1424_v14  ;;  %2071 = vmatpush3.bf16.msra.mxu0 %v2133_v13  ;;  %v2134_v14 = vld [vmem:[%s2586_s5 + $0x8] sm:$0xff]  }
 0x3af   : > { %2072 = vmatprep.subr.bf16.mxu0 %v2194_v1 }
 0x3b0   : > { %v2147_v15 = vpop.eup %2146 }
 0x3b1   : > { %v873_v16 = vsel %vm709_vm2, %v2147_v15, 0.0  ;;  %v876_v19 = vpack.c.bf16 %v2147_v15, %v2147_v15  ;;  %v2149_v20 = vpop.eup %2148 }
 0x3b2   : > { %874 = vadd.xlane.f32.xlu1 %v873_v16  ;;  %763 = vadd.xlane.f32.xlu0 %v762_v18  ;;  %v1314_v22 = vsel %vm709_vm2, %v2149_v20, 0.0  ;;  %v1317_v36 = vpack.c.bf16 %v2149_v20, %v2149_v20 }
 0x3b3   : > { %1993 = vmatmul.mubr.msk.bf16.vlgmr.msra.gmra.mxu1 %vm709_vm2, %v876_v19  ;;  %2073 = vmatpush3.bf16.msra.mxu0 %v2134_v14 }
 0x3b4   : > { %2003 = vmatpush3.bf16.msra.mxu1 %v994_v21  ;;  %2004 = vmatprep.mubr.msk.bf16.mxu1 %vm2195_vm0, %v2194_v1 }
 0x3b5   : > { %2014 = vmatprep.subr.bf16.mxu1 %v2194_v1  ;;  %2074 = vmatprep.subr.bf16.mxu0 %v2194_v1 }
 0x3b6   : > { %1315 = vadd.xlane.f32.xlu1 %v1314_v22  ;;  %v2135_v22 = vld [vmem:[%s2586_s5] sm:$0xff]  }
 0x3b7   : > { %2075 = vmatpush3.bf16.msra.mxu0 %v2135_v22 }
 0x3bb   : > { %2005 = vmatmul.mubr.msk.bf16.vlgmr.msra.gmra.mxu1 %vm709_vm2, %v987_v24 }
 0x3bc   : > { %2015 = vmatpush3.bf16.msra.mxu1 %v1104_v17  ;;  %2016 = vmatprep.mubr.msk.bf16.mxu1 %vm2195_vm0, %v2194_v1 }
 0x3bd   : > { %2026 = vmatprep.subr.bf16.mxu1 %v2194_v1 }
 0x3c3   : > { %2017 = vmatmul.mubr.msk.bf16.vlgmr.msra.gmra.mxu1 %vm709_vm2, %v1097_v26 }
 0x3c4   : > { %2027 = vmatpush3.bf16.msra.mxu1 %v1214_v27  ;;  %2028 = vmatprep.mubr.msk.bf16.mxu1 %vm2195_vm0, %v2194_v1 }
 0x3c5   : > { %2038 = vmatprep.subr.bf16.mxu1 %v2194_v1 }
 0x3cb   : > { %2029 = vmatmul.mubr.msk.bf16.vlgmr.msra.gmra.mxu1 %vm709_vm2, %v1207_v28 }
 0x3cc   : > { %2040 = vmatprep.mubr.msk.bf16.mxu1 %vm2195_vm0, %v2194_v1 }
 0x3d3   : > { %v1530_v29 = vpop.xlane.xlu0 %1529 }
 0x3d4   : > { %v1531_v31 = vsub.f32 %v2481_v45, %v1530_v29 }
 0x3d6   : > { %v1532_v32 = vmul.f32 1.442695, %v1531_v31 }
 0x3d7   : > { %v1319_v33 = vpop.permute.xlu0 %1318  ;;  %v1096_v44 = vpop.xlane.xlu1 %1095 }
 0x3d8   : > { %2150 = vpow2.f32 %v1532_v32  ;;  %v1324_v34 = vsel %vm769_vm3, %v1319_v33, 0 }
 0x3d9   : > { %2039 = vmatpush3.bf16.msra.mxu1 %v1324_v34 }
 0x3da   : > { %2050 = vmatprep.subr.bf16.mxu1 %v2194_v1 }
 0x3dc   : > { %2041 = vmatmul.mubr.msk.bf16.vlgmr.msra.gmra.mxu1 %vm709_vm2, %v1317_v36 }
 0x3dd   : > { %2051 = vmatpush3.bf16.msra.mxu1 %v1434_v37  ;;  %2052 = vmatprep.mubr.msk.bf16.mxu1 %vm2195_vm0, %v2194_v1 }
 0x3de   : > { %2062 = vmatprep.subr.bf16.mxu1 %v2194_v1 }
 0x3e4   : > { %2053 = vmatmul.mubr.msk.bf16.vlgmr.msra.gmra.mxu1 %vm709_vm2, %v1427_v39 }
 0x3e5   : > { %v2151_v41 = vpop.eup %2150  ;;  %2063 = vmatpush3.bf16.msra.mxu1 %v1544_v40  ;;  %2064 = vmatprep.mubr.msk.bf16.mxu1 %vm2195_vm0, %v2194_v1 }
 0x3e6   : > { %v1534_v42 = vsel %vm709_vm2, %v2151_v41, 0.0  ;;  %v1537_v43 = vpack.c.bf16 %v2151_v41, %v2151_v41 }
 0x3e7   : > { %1535 = vadd.xlane.f32.xlu1 %v1534_v42 }
 0x3ec   : > { %2065 = vmatmul.mubr.msk.bf16.vlgmr.msra.gmra.mxu1 %vm709_vm2, %v1537_v43 }
 0x408   : > { %v986_v46 = vpop.xlane.xlu0 %985 }
 0x40c   : > { %v1206_v56 = vpop.xlane.xlu0 %1205 }
 0x437   : > { %v1426_v12 = vpop.xlane.xlu0 %1425 }
 0x43b   : > { %v875_v45 = vpop.xlane.xlu1 %874  ;;  %v764_v35 = vpop.xlane.xlu0 %763 }
 0x43c   : > { %2152 = vrcp.f32 %v875_v45 }
 0x43d   : > { %2154 = vrcp.f32 %v986_v46 }
 0x43e   : > { %2156 = vrcp.f32 %v1096_v44 }
 0x43f   : > { %2158 = vrcp.f32 %v1206_v56  ;;  %v1316_v53 = vpop.xlane.xlu1 %1315 }
 0x440   : > { %2160 = vrcp.f32 %v1316_v53 }
 0x441   : > { %2162 = vrcp.f32 %v1426_v12 }
 0x449   : > { %v2153_v47 = vpop.eup %2152 }
 0x44a   : > { %v2155_v54 = vpop.eup %2154 }
 0x44b   : > { %v2157_v63 = vpop.eup %2156 }
 0x44c   : > { %v2159_v6 = vpop.eup %2158 }
 0x44d   : > { %v2161_v15 = vpop.eup %2160 }
 0x44e   : > { %v2163_v24 = vpop.eup %2162 }
 0x470   : > { %v1536_v16 = vpop.xlane.xlu1 %1535 }
 0x471   : > { %2164 = vrcp.f32 %v1536_v16 }
 0x472   : > { %2166 = vrcp.f32 %v764_v35 }
 0x473   : > { %v920_v48 = vpop.f32.mrf.mxu1 }
 0x474   : > { %v927_v49 = vmul.f32 %v2153_v47, %v920_v48 }
 0x475   : > { %v1994_v50 = vpop.f32.mrf.mxu1 }
 0x476   : > { %1589 = vrot.lane.b32.xlu1 %v927_v49, %s2203_s27  ;;  %s2209_s27 = smov 56  }
 0x477   : > { %v923_v51 = vpop.f32.mrf.mxu1 }
 0x479   : > { %v1995_v52 = vpop.f32.mrf.mxu1 }
 0x47b   : > { %v1030_v57 = vpop.f32.mrf.mxu1 }
 0x47c   : > { %v1037_v58 = vmul.f32 %v2155_v54, %v1030_v57 }
 0x47d   : > { %v2006_v59 = vpop.f32.mrf.mxu1 }
 0x47e   : > { %1593 = vrot.lane.b32.xlu0 %v1037_v58, %s2204_s28  ;;  %v2165_v29 = vpop.eup %2164 }
 0x47f   : > { %v1033_v61 = vpop.f32.mrf.mxu1  ;;  %v2167_v38 = vpop.eup %2166 }
 0x480   : > { %v814_v40 = vmul.f32 %v2167_v38, %v2477_v30  ;;  %v1874_v30 = vld [vmem:[%s2590_s9] ss:$0 sm:$0xff] }
 0x481   : > { %v2007_v62 = vpop.f32.mrf.mxu1 }
 0x483   : > { %v1140_v60 = vpop.f32.mrf.mxu1 }
 0x484   : > { %v1147_v0 = vmul.f32 %v2157_v63, %v1140_v60 }
 0x485   : > { %v2018_v3 = vpop.f32.mrf.mxu1 }
 0x486   : > { %1597 = vrot.lane.b32.xlu1 %v1147_v0, %s2205_s29 }
 0x487   : > { %v1143_v4 = vpop.f32.mrf.mxu1 }
 0x489   : > { %v2019_v5 = vpop.f32.mrf.mxu1 }
 0x48b   : > { %v1250_v7 = vpop.f32.mrf.mxu1 }
 0x48c   : > { %v1257_v9 = vmul.f32 %v2159_v6, %v1250_v7 }
 0x48d   : > { %v2030_v55 = vpop.f32.mrf.mxu1 }
 0x48e   : > { %1601 = vrot.lane.b32.xlu1 %v1257_v9, %s2206_s30  ;;  %v1881_v55 = vld [vmem:[%s2592_s11] ss:$0 sm:$0xff] }
 0x48f   : > { %v1253_v10 = vpop.f32.mrf.mxu1 }
 0x491   : > { %v2031_v11 = vpop.f32.mrf.mxu1 }
 0x49c   : > { %v1360_v18 = vpop.f32.mrf.mxu1 }
 0x49d   : > { %v1367_v19 = vmul.f32 %v2161_v15, %v1360_v18 }
 0x49e   : > { %v2042_v20 = vpop.f32.mrf.mxu1 }
 0x49f   : > { %1605 = vrot.lane.b32.xlu0 %v1367_v19, %s2207_s19  ;;  %s456_s19 = scalar_lea.vmem %s2593_s12, %s1839_s16 }
 0x4a0   : > { %v1363_v21 = vpop.f32.mrf.mxu1 }
 0x4a2   : > { %v2043_v23 = vpop.f32.mrf.mxu1 }
 0x4a4   : > { %v1470_v17 = vpop.f32.mrf.mxu1 }
 0x4a5   : > { %v1477_v25 = vmul.f32 %v2163_v24, %v1470_v17 }
 0x4a6   : > { %v2054_v26 = vpop.f32.mrf.mxu1 }
 0x4a7   : > { %1609 = vrot.lane.b32.xlu1 %v1477_v25, %s2208_s26 }
 0x4a8   : > { %v1473_v27 = vpop.f32.mrf.mxu1 }
 0x4aa   : > { %v2055_v28 = vpop.f32.mrf.mxu1 }
 0x4ac   : > { %v1580_v31 = vpop.f32.mrf.mxu1 }
 0x4ad   : > { %v1587_v32 = vmul.f32 %v2165_v29, %v1580_v31 }
 0x4ae   : > { %v2066_v33 = vpop.f32.mrf.mxu1 }
 0x4af   : > { %1613 = vrot.lane.b32.xlu0 %v1587_v32, %s2209_s27 }
 0x4b0   : > { %v1583_v1 = vpop.f32.mrf.mxu1 }
 0x4b2   : > { %v2067_v34 = vpop.f32.mrf.mxu1 }
 0x4e8   : > { %v1590_v36 = vpop.permute.xlu1 %1589 }
 0x4e9   : > { %v1616_v42 = vsel %vm709_vm2, %v814_v40, %v1590_v36 }
 0x4f0   : > { %v1594_v39 = vpop.permute.xlu0 %1593 }
 0x4f1   : > { %v1618_v43 = vsel %vm1617_vm4, %v1616_v42, %v1594_v39 }
 0x4f8   : > { %v1598_v37 = vpop.permute.xlu1 %1597 }
 0x4f9   : > { %v1620_v45 = vsel %vm1619_vm5, %v1618_v43, %v1598_v37 }
 0x500   : > { %v1602_v41 = vpop.permute.xlu1 %1601 }
 0x501   : > { %v1622_v47 = vsel %vm1621_vm6, %v1620_v45, %v1602_v41 }
 0x511   : > { %v1606_v44 = vpop.permute.xlu0 %1605 }
 0x512   : > { %v1624_v48 = vsel %vm1623_vm7, %v1622_v47, %v1606_v44 }
 0x519   : > { %v1610_v46 = vpop.permute.xlu1 %1609 }
 0x51a   : > { %v1626_v49 = vsel %vm1625_vm8, %v1624_v48, %v1610_v46 }
 0x521   : > { %v1614_v50 = vpop.permute.xlu0 %1613 }
 0x522   : > { %v1628_v51 = vsel %vm1627_vm9, %v1626_v49, %v1614_v50 }
 0x523   : > { %v1629_v52 = vpack.c.bf16 %v1628_v51, %v1628_v51 }
 0x525   : > { %2077 = vmatmul.mubr.msk.bf16.vlgmr.msra.gmra.mxu0 %vm501_vm1, %v1629_v52 }
 0x5e5   : > { %v1706_v54 = vpop.f32.mrf.mxu0 }
 0x5e6   : > { %v1707_v56 = vadd.f32 %v1874_v30, %v1706_v54 }
 0x5e7   : > { %v2078_v57 = vpop.f32.mrf.mxu0 }
 0x5e8   : > { %v1712_v58 = vadd.f32 %v1707_v56, %v2330_v8  ;;  %v1880_v8 = vld [vmem:[%s2591_s10] ss:$0 sm:$0xff] }
 0x5e9   : > { %v1709_v59 = vpop.f32.mrf.mxu0 }
 0x5ea   : > { %v1713_v61 = vsel %vm501_vm1, %v1712_v58, 0.0 }
 0x5eb   : > { %1714 = vadd.xlane.f32.xlu1 %v1713_v61  ;;  %v2079_v62 = vpop.f32.mrf.mxu0 }
 0x674   : > { %v1715_v63 = vpop.xlane.xlu1 %1714 }
 0x675   : > { %v1717_v60 = vmul.f32 0.015625, %v1715_v63 }
 0x677   : > { %v1718_v0 = vsub.f32 %v1712_v58, %v1717_v60 }
 0x679   : > { %v1719_v3 = vmul.f32 %v1718_v0, %v1718_v0 }
 0x67b   : > { %v1720_v4 = vsel %vm501_vm1, %v1719_v3, 0.0 }
 0x67c   : > { %1721 = vadd.xlane.f32.xlu0 %v1720_v4 }
 0x705   : > { %v1722_v5 = vpop.xlane.xlu0 %1721 }
 0x706   : > { %v1723_v6 = vmul.f32 0.015625, %v1722_v5 }
 0x708   : > { %v1724_v7 = vadd.f32 1e-05, %v1723_v6 }
 0x70a   : > { %2168 = vrsqrt.f32 %v1724_v7 }
 0x717   : > { %v2169_v53 = vpop.eup %2168 }
 0x718   : > { %v1726_v9 = vmul.f32 %v2169_v53, %v1718_v0 }
 0x71a   : > { %v1734_v10 = vmul.f32 %v1880_v8, %v1726_v9 }
 0x71c   : > { %v1742_v11 = vadd.f32 %v1881_v55, %v1734_v10 }
 0x71e   : > { %v1743_v2 = vpack.c.bf16 %v1742_v11, %v1742_v11 }
 0x720   : > { %1745 = vst.msk [vmem:[%s456_s19] sm:$0xf] %vm1744_vm10, %v1743_v2 }
 0x721 PF: > { %s22_s23 = sadd.s32 1, %s2192_s23   ;;  %s2594_s21 = smov %s2188_s22 }
 0x722   : > { %p19_p5 = scmp.ge.s32.totalorder %s22_s23, 4   ;;  %s2595_s22 = smov %s2597_s24 }
 0x724   :  { %21 = sbr.rel (!%p19_p5) target bundleno = 2 (0x2), region = 101 }

// kernel: co_attention_forward.7
= control target key start
LH: loop header
LB: loop body
LE: loop exit
PB: predicated region body
PF: predicated region fallthrough
CT: control target
= control target key end

     0   :  { %17 = vsyncpa [#allocation3], 0  ;;  %s3140_s0 = inlined_call_operand.vmem [shape: f32[2,16,64], index: 0, kind: input, shape index: {}, may-alias: {0,1}]   ;;  %s3141_s1 = inlined_call_operand.vmem [shape: f32[2,16,64], index: 1, kind: input, shape index: {}, may-alias: {0,1}]   ;;  %s3142_s2 = inlined_call_operand.vmem [shape: bf16[64,64], index: 2, kind: input, shape index: {}]   ;;  %s3143_s3 = inlined_call_operand.hbm [shape: bf16[64,64], index: 3, kind: input, shape index: {}]   ;;  %s3144_s4 = inlined_call_operand.hbm [shape: bf16[64,64], index: 4, kind: input, shape index: {}]   ;;  %s3145_s5 = inlined_call_operand.hbm [shape: bf16[64,64], index: 5, kind: input, shape index: {}]   ;;  %s3146_s6 = inlined_call_operand.vmem [shape: f32[1,64], index: 6, kind: input, shape index: {}]   ;;  %s3147_s7 = inlined_call_operand.vmem [shape: f32[1,64], index: 7, kind: input, shape index: {}]   ;;  %s3148_s8 = inlined_call_operand.vmem [shape: f32[1,64], index: 8, kind: input, shape index: {}]   ;;  %s3149_s9 = inlined_call_operand.vmem [shape: f32[1,64], index: 9, kind: input, shape index: {}]   ;;  %s3150_s10 = inlined_call_operand.vmem [shape: f32[1,64], index: 10, kind: input, shape index: {}]   ;;  %s3151_s11 = inlined_call_operand.vmem [shape: f32[1,64], index: 11, kind: input, shape index: {}]   ;;  %s3152_s12 = inlined_call_operand.vmem [shape: bf16[2,16,64], index: 12, kind: output, shape index: {}]  }
   0x1   :  { %18 = vsyncpa [#allocation5], 0  ;;  %s2741_s21 = smov 0   ;;  %s2743_s22 = smov 0  }
   0x2   :  { %s2745_s23 = smov 0  }
   0x3 LB: > { %s2087_s24 = sadd.s32 4294967295, %s2653_s23   ;;  %p2089_p0 = scmp.ge.s32.totalorder %s2653_s23, 1  ;;  %s2653_s23 = sphi %s2745_s23, %s24_s23   ;;  %s2649_s22 = sphi %s2743_s22, %s3158_s22   ;;  %s2645_s21 = sphi %s2741_s21, %s3157_s21  }
   0x4   : > { %p333_p1 = scmp.lt.s32.totalorder %s2653_s23, 3  ;;  %p2759_p2 = scmp.eq.s32.totalorder %s2087_s24, 0 }
   0x5   : > { %s2655_s27 = smov [#allocation4]   ;;  %s36_s30 = sadd.s32 1, %s2649_s22 }
   0x6   : > { %p2763_p3 = pnand %p2089_p0, %p333_p1  ;;  %s361_s28 = sshll.u32 %s2655_s27, 4  ;;  %s362_s28 = int_to_ptr.vmem [resolvable:$true] %s361_s28 }
   0x7   : > { %p2776_p6 = scmp.ge.s32.totalorder %s36_s30, 2  ;;  %s2656_s14 = smov [#allocation2]  }
   0x8   : > { %p2363_p4 = pneg %p2763_p3  ;;  %s348_s15 = sshll.u32 %s2656_s14, 4  ;;  %s349_s15 = int_to_ptr.vmem [resolvable:$true] %s348_s15 }
   0x9   : > { %s2556_s16 = scalar_lea.vmem %s362_s28, 512  ;;  %p2564_p11 = scmp.lt.s32.totalorder %s362_s28, %s362_s28 }
   0xa   : > { %p2771_p5 = pnand %p2759_p2, %p2363_p4  ;;  %p2557_p8 = scmp.ne.s32.totalorder %s362_s28, %s2556_s16 }
   0xb   : > { %p2565_p12 = scmp.lt.s32.totalorder %s2556_s16, %s2556_s16 }
   0xc   : > { %p2547_p7 = pneg %p2771_p5 }
   0xd   : > { %p2566_p13 = por %p2565_p12, %p2564_p11 }
   0xe   : > { %p2559_p9 = pnand %p2557_p8, %p2547_p7 }
  0x10   : > { %p2560_p10 = pneg %p2559_p9 }
  0x12   : > { %p2567_p0 = pnand %p2566_p13, %p2560_p10 }
  0x14   : > { %2570 = shalt.err (!%p2567_p0)
}
  0x15   : > { %s2657_s17 = smov 64   ;;  %s2658_s18 = smov 4  }
  0x16   : > { %2369 = dma.hbm_to_vmem [thread:$0]  (!%p2771_p5), %s3144_s4, 512, %s362_s28, [#allocation5], %s2657_s17, %s2657_s17, %s2658_s18  }
  0x17   : > { %s3160_s30 = smov (%p2776_p6, %s36_s30), 0  ;;  %s2582_s24 = scalar_lea.vmem %s349_s15, 512 }
  0x18   : > { %p2583_p1 = scmp.ne.s32.totalorder %s349_s15, %s2582_s24  ;;  %p2590_p9 = scmp.lt.s32.totalorder %s349_s15, %s349_s15 }
  0x19   : > { %p2591_p10 = scmp.lt.s32.totalorder %s2582_s24, %s2582_s24 }
  0x1a   : > { %p2585_p4 = pnand %p2583_p1, %p2547_p7 }
  0x1b   : > { %p2592_p11 = por %p2591_p10, %p2590_p9 }
  0x1c   : > { %p2586_p8 = pneg %p2585_p4 }
  0x1e   : > { %p2593_p12 = pnand %p2592_p11, %p2586_p8 }
  0x20   : > { %2596 = shalt.err (!%p2593_p12)
}
  0x21   : > { %2366 = dma.hbm_to_vmem [thread:$0]  (!%p2771_p5), %s3143_s3, 512, %s349_s15, [#allocation3], %s2657_s17, %s2657_s17, %s2658_s18  }
  0x22   : > { %s2659_s13 = smov [#allocation6]  }
  0x23   : > { %s374_s14 = sshll.u32 %s2659_s13, 4  ;;  %s375_s14 = int_to_ptr.vmem [resolvable:$true] %s374_s14 }
  0x24   : > { %s2608_s16 = scalar_lea.vmem %s375_s14, 512  ;;  %p2616_p1 = scmp.lt.s32.totalorder %s375_s14, %s375_s14 }
  0x25   : > { %p2609_p6 = scmp.ne.s32.totalorder %s375_s14, %s2608_s16  ;;  %p2617_p4 = scmp.lt.s32.totalorder %s2608_s16, %s2608_s16 }
  0x27   : > { %p2611_p13 = pnand %p2609_p6, %p2547_p7  ;;  %p2618_p8 = por %p2617_p4, %p2616_p1 }
  0x29   : > { %p2612_p0 = pneg %p2611_p13 }
  0x2b   : > { %p2619_p9 = pnand %p2618_p8, %p2612_p0 }
  0x2d   : > { %2622 = shalt.err (!%p2619_p9)
}
  0x2e   : > { %2372 = dma.hbm_to_vmem [thread:$0]  (!%p2771_p5), %s3145_s5, 512, %s375_s14, [#allocation5], %s2657_s17, %s2657_s17, %s2658_s18  }
  0x2f   : > { %429 = sbr.rel (%p2763_p3) target bundleno = 1919 (0x77f), region = 68 }
  0x34   : > { %2636 = dma.done.wait (%p2759_p2), [#allocation3], 512  }
  0x35   : > { %2638 = vsyncadd (%p2759_p2), [#allocation3], 4294966784 }
  0x36   : > { %2640 = dma.done.wait (%p2759_p2), [#allocation5], 1024  }
  0x37   : > { %2642 = vsyncadd (%p2759_p2), [#allocation5], 4294966272  ;;  %v2660_v0 = vmov 0.0   ;;  %p493_p3 = scmp.lt.s32.totalorder %s2645_s21, 1  ;;  %vm2661_vm0 = vmmov 0   ;;  %v2459_v1 = vld [vmem:[#allocation2 + $0x18] sm:$0xff]  }
  0x38   : > { %2219 = vmatprep.subr.bf16.mxu1 %v2660_v0  ;;  %2207 = vmatprep.subr.bf16.mxu0 %v2660_v0  ;;  %v2460_v2 = vld [vmem:[%s3142_s2 + $0x18] sm:$0xff]   ;;  %v2461_v3 = vld [vmem:[#allocation2 + $0x10] sm:$0xff]   ;;  %v2463_v5 = vld [vmem:[#allocation2 + $0x8] sm:$0xff]   ;;  %vm563_vm1 = vcmask 523264   ;;  %vm774_vm2 = vcmask 64512   ;;  %s2662_s20 = smov 120  }
  0x39   : > { %2227 = vmatprep.mubr.msk.bf16.mxu1 %vm2661_vm0, %v2660_v0  ;;  %2215 = vmatprep.mubr.msk.bf16.mxu0 %vm2661_vm0, %v2660_v0  ;;  %s3162_s21 = smov (!%p493_p3, %s2645_s21), 1  ;;  %v2462_v4 = vld [vmem:[%s3142_s2 + $0x10] sm:$0xff]   ;;  %v2464_v6 = vld [vmem:[%s3142_s2 + $0x8] sm:$0xff]   ;;  %v2465_v7 = vld [vmem:[#allocation2] sm:$0xff]   ;;  %s2663_s24 = smov 112   ;;  %vm822_vm3 = vcmask 130048  }
  0x3a   : > { %2220 = vmatpush3.bf16.msra.mxu1 %v2459_v1  ;;  %s2150_s29 = sshll.u32 %s3162_s21, 4  ;;  %2208 = vmatpush3.bf16.msra.mxu0 %v2460_v2  ;;  %v2466_v10 = vld [vmem:[%s3142_s2] sm:$0xff]   ;;  %v2467_v32 = vld [vmem:[#allocation4 + $0x18] sm:$0xff]   ;;  %v2468_v33 = vld [vmem:[#allocation4 + $0x10] sm:$0xff]   ;;  %s2665_s28 = smov 96   ;;  %vm1800_vm4 = vcmask 195584  }
  0x3b   : > { %2221 = vmatprep.subr.bf16.mxu1 %v2660_v0  ;;  %2209 = vmatprep.subr.bf16.mxu0 %v2660_v0  ;;  %s506_s27 = scalar_lea.vmem %s3141_s1, %s2150_s29  ;;  %s2854_s14 = scalar_lea.vmem %s3140_s0, %s2150_s29  ;;  %v2110_v17 = vld [vmem:[%s3147_s7] ss:$0 sm:$0xff]  ;;  %v2469_v34 = vld [vmem:[#allocation4 + $0x8] sm:$0xff]   ;;  %vm1803_vm5 = vcmask 261120   ;;  %vm1806_vm6 = vcmask 326656   ;;  %vm1809_vm7 = vcmask 392192  }
  0x3c   : > { %v520_v8 = vld [vmem:[%s506_s27] sm:$0xff]  ;;  %v521_v9 = vld [vmem:[%s506_s27 + $0x8] sm:$0xff]  ;;  %s2664_s27 = smov 104   ;;  %s2666_s13 = smov 88   ;;  %vm1812_vm8 = vcmask 457728   ;;  %vm1954_vm9 = vcmask 519168  }
  0x3d   : > { %v518_v11 = vld [vmem:[%s2854_s14] sm:$0xff]  ;;  %v519_v12 = vld [vmem:[%s2854_s14 + $0x8] sm:$0xff]  ;;  %v523_v13 = vpack.c.bf16 %v521_v9, %v520_v8  ;;  %s2667_s16 = smov 80   ;;  %s2668_s15 = smov 72  }
  0x3e   : > { %2222 = vmatpush3.bf16.msra.mxu1 %v2461_v3  ;;  %2210 = vmatpush3.bf16.msra.mxu0 %v2462_v4  ;;  %v522_v14 = vpack.c.bf16 %v519_v12, %v518_v11  ;;  %v2104_v18 = vld [vmem:[%s3146_s6] ss:$0 sm:$0xff]  ;;  %s2669_s26 = smov 8   ;;  %s2670_s29 = smov 16  }
  0x3f   : > { %2223 = vmatprep.subr.bf16.mxu1 %v2660_v0  ;;  %2211 = vmatprep.subr.bf16.mxu0 %v2660_v0  ;;  %v2470_v35 = vld [vmem:[#allocation4] sm:$0xff]   ;;  %s2671_s17 = smov 24   ;;  %s2672_s18 = smov 32  }
  0x40   : > { %v2116_v42 = vld [vmem:[%s3148_s8] ss:$0 sm:$0xff]  ;;  %s2152_s25 = sshll.u32 %s3162_s21, 3 }
  0x42   : > { %2224 = vmatpush3.bf16.msra.mxu1 %v2463_v5  ;;  %2212 = vmatpush3.bf16.msra.mxu0 %v2464_v6 }
  0x43   : > { %2225 = vmatprep.subr.bf16.mxu1 %v2660_v0  ;;  %2213 = vmatprep.subr.bf16.mxu0 %v2660_v0 }
  0x46   : > { %2226 = vmatpush3.bf16.msra.mxu1 %v2465_v7  ;;  %2214 = vmatpush3.bf16.msra.mxu0 %v2466_v10 }
  0x47   : > { %2243 = vmatprep.subr.bf16.mxu1 %v2660_v0  ;;  %2231 = vmatprep.subr.bf16.mxu0 %v2660_v0 }
  0x49   : > { %2228 = vmatmul.mubr.msk.bf16.vlgmr.msra.gmra.mxu1 %vm563_vm1, %v523_v13  ;;  %2216 = vmatmul.mubr.msk.bf16.vlgmr.msra.gmra.mxu0 %vm563_vm1, %v522_v14 }
  0x4a   : > { %2245 = vmatprep.mubr.msk.bf16.mxu1 %vm2661_vm0, %v2660_v0  ;;  %2239 = vmatprep.mubr.msk.bf16.mxu0 %vm2661_vm0, %v2660_v0 }
  0x4b   : > { %2232 = vmatpush3.bf16.msra.mxu0 %v2467_v32 }
  0x4c   : > { %2233 = vmatprep.subr.bf16.mxu0 %v2660_v0 }
  0x4f   : > { %2234 = vmatpush3.bf16.msra.mxu0 %v2468_v33 }
  0x50   : > { %2235 = vmatprep.subr.bf16.mxu0 %v2660_v0 }
  0x53   : > { %2236 = vmatpush3.bf16.msra.mxu0 %v2469_v34 }
  0x54   : > { %2237 = vmatprep.subr.bf16.mxu0 %v2660_v0 }
  0x57   : > { %2238 = vmatpush3.bf16.msra.mxu0 %v2470_v35 }
  0x58   : > { %2267 = vmatprep.subr.bf16.mxu0 %v2660_v0 }
  0x5a   : > { %2240 = vmatmul.mubr.msk.bf16.vlgmr.msra.gmra.mxu0 %vm563_vm1, %v523_v13 }
  0x5b   : > { %2269 = vmatprep.mubr.msk.bf16.mxu0 %vm2661_vm0, %v2660_v0 }
 0x109   : > { %v684_v15 = vpop.f32.mrf.mxu1  ;;  %v601_v16 = vpop.f32.mrf.mxu0 }
 0x10a   : > { %v685_v22 = vadd.f32 %v2110_v17, %v684_v15  ;;  %v602_v23 = vadd.f32 %v2104_v18, %v601_v16 }
 0x10b   : > { %v2229_v19 = vpop.f32.mrf.mxu1  ;;  %v2217_v20 = vpop.f32.mrf.mxu0 }
 0x10d   : > { %v687_v21 = vpop.f32.mrf.mxu1  ;;  %v604_v25 = vpop.f32.mrf.mxu0 }
 0x10e   : > { %v688_v24 = vadd.f32 %v2110_v17, %v687_v21  ;;  %v605_v26 = vadd.f32 %v2104_v18, %v604_v25 }
 0x10f   : > { %v2230_v27 = vpop.f32.mrf.mxu1  ;;  %v2218_v29 = vpop.f32.mrf.mxu0 }
 0x110   : > { %v772_v28 = vpack.c.bf16 %v688_v24, %v685_v22  ;;  %v771_v30 = vpack.c.bf16 %v605_v26, %v602_v23 }
 0x112   : > { %894 = vrot.lane.b32.xlu1 %v772_v28, %s2662_s20  ;;  %v779_v31 = vsel %vm774_vm2, %v772_v28, 0 }
 0x113   : > { %2244 = vmatpush3.bf16.xpose.msra.mxu1 %v779_v31 }
 0x114   : > { %2249 = vmatprep.subr.bf16.mxu1 %v2660_v0 }
 0x116   : > { %891 = vrot.lane.b32.xlu1 %v771_v30, %s2662_s20 }
 0x11a   : > { %1014 = vrot.lane.b32.xlu1 %v771_v30, %s2663_s24  ;;  %2246 = vmatmul.mubr.msk.bf16.vlgmr.msra.gmra.mxu1 %vm774_vm2, %v771_v30  ;;  %v764_v43 = vpop.f32.mrf.mxu0 }
 0x11b   : > { %2251 = vmatprep.mubr.msk.bf16.mxu1 %vm2661_vm0, %v2660_v0  ;;  %v765_v45 = vadd.f32 %v2116_v42, %v764_v43 }
 0x11c   : > { %v2241_v44 = vpop.f32.mrf.mxu0 }
 0x11e   : > { %1137 = vrot.lane.b32.xlu1 %v772_v28, %s2664_s27  ;;  %v767_v46 = vpop.f32.mrf.mxu0 }
 0x11f   : > { %v768_v47 = vadd.f32 %v2116_v42, %v767_v46 }
 0x120   : > { %v2242_v48 = vpop.f32.mrf.mxu0 }
 0x121   : > { %v2910_v49 = vpack.c.bf16 %v768_v47, %v765_v45 }
 0x122   : > { %1135 = vrot.lane.b32.xlu1 %v771_v30, %s2664_s27 }
 0x123   : > { %2250 = vmatpush3.bf16.msra.mxu1 %v2910_v49 }
 0x124   : > { %2255 = vmatprep.subr.bf16.mxu1 %v2660_v0 }
 0x126   : > { %1258 = vrot.lane.b32.xlu1 %v772_v28, %s2665_s28 }
 0x12a   : > { %1256 = vrot.lane.b32.xlu1 %v771_v30, %s2665_s28 }
 0x12e   : > { %1379 = vrot.lane.b32.xlu1 %v772_v28, %s2666_s13 }
 0x132   : > { %1500 = vrot.lane.b32.xlu1 %v772_v28, %s2667_s16 }
 0x136   : > { %1621 = vrot.lane.b32.xlu1 %v772_v28, %s2668_s15 }
 0x184   : > { %v895_v50 = vpop.permute.xlu1 %894 }
 0x185   : > { %v900_v6 = vsel %vm774_vm2, %v895_v50, 0 }
 0x188   : > { %v892_v51 = vpop.permute.xlu1 %891 }
 0x18c   : > { %v1015_v52 = vpop.permute.xlu1 %1014 }
 0x190   : > { %v1138_v58 = vpop.permute.xlu1 %1137 }
 0x191   : > { %v1143_v63 = vsel %vm774_vm2, %v1138_v58, 0 }
 0x194   : > { %v1136_v62 = vpop.permute.xlu1 %1135 }
 0x198   : > { %v1259_v1 = vpop.permute.xlu1 %1258 }
 0x199   : > { %v1264_v7 = vsel %vm774_vm2, %v1259_v1, 0 }
 0x19c   : > { %v1257_v5 = vpop.permute.xlu1 %1256 }
 0x1a0   : > { %v1380_v8 = vpop.permute.xlu1 %1379 }
 0x1a1   : > { %v1385_v9 = vsel %vm774_vm2, %v1380_v8, 0 }
 0x1a4   : > { %v1501_v10 = vpop.permute.xlu1 %1500 }
 0x1a5   : > { %v1506_v12 = vsel %vm774_vm2, %v1501_v10, 0 }
 0x1a8   : > { %v1622_v13 = vpop.permute.xlu1 %1621 }
 0x1a9   : > { %v1627_v15 = vsel %vm774_vm2, %v1622_v13, 0 }
 0x1da   : > { %v815_v36 = vpop.f32.mrf.mxu1 }
 0x1db   : > { %v823_v37 = vsel %vm822_vm3, %v815_v36, -inf }
 0x1dc   : > { %824 = vmax.xlane.f32.xlu0 %v823_v37  ;;  %v2247_v38 = vpop.f32.mrf.mxu1 }
 0x1de   : > { %v818_v39 = vpop.f32.mrf.mxu1 }
 0x1df   : > { %v826_v40 = vsel %vm822_vm3, %v818_v39, -inf }
 0x1e0   : > { %827 = vmax.xlane.f32.xlu0 %v826_v40  ;;  %v2248_v41 = vpop.f32.mrf.mxu1 }
 0x1f6   : > { %1016 = vrot.lane.b32.xlu0 %v772_v28, %s2663_s24 }
 0x1fa   : > { %1377 = vrot.lane.b32.xlu0 %v771_v30, %s2666_s13 }
 0x1fe   : > { %1498 = vrot.lane.b32.xlu0 %v771_v30, %s2667_s16 }
 0x202   : > { %1619 = vrot.lane.b32.xlu0 %v771_v30, %s2668_s15 }
 0x265   : > { %v825_v53 = vpop.xlane.xlu0 %824 }
 0x266   : > { %v829_v54 = vsub.f32 %v815_v36, %v825_v53 }
 0x268   : > { %v831_v55 = vmul.f32 1.442695, %v829_v54 }
 0x269   : > { %v828_v56 = vpop.xlane.xlu0 %827 }
 0x26a   : > { %v830_v57 = vsub.f32 %v818_v39, %v828_v56  ;;  %2475 = vpow2.f32 %v831_v55 }
 0x26c   : > { %v833_v59 = vmul.f32 1.442695, %v830_v57 }
 0x26d   : > { %v1017_v60 = vpop.permute.xlu0 %1016 }
 0x26e   : > { %2477 = vpow2.f32 %v833_v59  ;;  %v1022_v61 = vsel %vm774_vm2, %v1017_v60, 0 }
 0x26f   : > { %2268 = vmatpush3.bf16.xpose.msra.mxu0 %v1022_v61 }
 0x270   : > { %2279 = vmatprep.subr.bf16.mxu0 %v2660_v0 }
 0x271   : > { %v1378_v11 = vpop.permute.xlu0 %1377 }
 0x275   : > { %v1499_v14 = vpop.permute.xlu0 %1498 }
 0x276   : > { %2270 = vmatmul.mubr.msk.bf16.vlgmr.msra.gmra.mxu0 %vm774_vm2, %v1015_v52 }
 0x277   : > { %2280 = vmatpush3.bf16.xpose.msra.mxu0 %v1143_v63  ;;  %2281 = vmatprep.mubr.msk.bf16.mxu0 %vm2661_vm0, %v2660_v0  ;;  %v2924_v2 = vpop.eup %2475 }
 0x278   : > { %2291 = vmatprep.subr.bf16.mxu0 %v2660_v0 }
 0x279   : > { %v1620_v16 = vpop.permute.xlu0 %1619 }
 0x27b   : > { %v2926_v3 = vpop.eup %2477 }
 0x27c   : > { %v841_v4 = vpack.c.bf16 %v2926_v3, %v2924_v2 }
 0x27e   : > { %2252 = vmatmul.mubr.msk.bf16.vlgmr.msra.gmra.mxu1 %vm822_vm3, %v841_v4  ;;  %2282 = vmatmul.mubr.msk.bf16.vlgmr.msra.gmra.mxu0 %vm774_vm2, %v1136_v62 }
 0x27f   : > { %2256 = vmatpush3.bf16.xpose.msra.mxu1 %v900_v6  ;;  %2292 = vmatpush3.bf16.xpose.msra.mxu0 %v1264_v7 }
 0x280   : > { %2257 = vmatprep.mubr.msk.bf16.mxu1 %vm2661_vm0, %v2660_v0  ;;  %2293 = vmatprep.mubr.msk.bf16.mxu0 %vm2661_vm0, %v2660_v0 }
 0x281   : > { %2303 = vmatprep.subr.bf16.mxu0 %v2660_v0  ;;  %2261 = vmatprep.subr.bf16.mxu1 %v2660_v0 }
 0x286   : > { %2258 = vmatmul.mubr.msk.bf16.vlgmr.msra.gmra.mxu1 %vm774_vm2, %v892_v51  ;;  %2294 = vmatmul.mubr.msk.bf16.vlgmr.msra.gmra.mxu0 %vm774_vm2, %v1257_v5 }
 0x287   : > { %2304 = vmatpush3.bf16.xpose.msra.mxu0 %v1385_v9  ;;  %2305 = vmatprep.mubr.msk.bf16.mxu0 %vm2661_vm0, %v2660_v0 }
 0x288   : > { %2315 = vmatprep.subr.bf16.mxu0 %v2660_v0  ;;  %2263 = vmatprep.mubr.msk.bf16.mxu1 %vm2661_vm0, %v2660_v0 }
 0x28e   : > { %2306 = vmatmul.mubr.msk.bf16.vlgmr.msra.gmra.mxu0 %vm774_vm2, %v1378_v11 }
 0x28f   : > { %2316 = vmatpush3.bf16.xpose.msra.mxu0 %v1506_v12  ;;  %2317 = vmatprep.mubr.msk.bf16.mxu0 %vm2661_vm0, %v2660_v0 }
 0x290   : > { %2327 = vmatprep.subr.bf16.mxu0 %v2660_v0 }
 0x296   : > { %2318 = vmatmul.mubr.msk.bf16.vlgmr.msra.gmra.mxu0 %vm774_vm2, %v1499_v14 }
 0x297   : > { %2328 = vmatpush3.bf16.xpose.msra.mxu0 %v1627_v15  ;;  %2329 = vmatprep.mubr.msk.bf16.mxu0 %vm2661_vm0, %v2660_v0 }
 0x298   : > { %2339 = vmatprep.subr.bf16.mxu0 %v2660_v0 }
 0x29e   : > { %2330 = vmatmul.mubr.msk.bf16.vlgmr.msra.gmra.mxu0 %vm774_vm2, %v1620_v16 }
 0x29f   : > { %2347 = vmatprep.mubr.msk.bf16.mxu0 %vm2661_vm0, %v2660_v0 }
 0x336   : > { %v2961_v17 = vpop.f32.mrf.mxu0 }
 0x337   : > { %v1065_v18 = vsel %vm822_vm3, %v2961_v17, -inf }
 0x338   : > { %1066 = vmax.xlane.f32.xlu0 %v1065_v18  ;;  %v2271_v19 = vpop.f32.mrf.mxu0 }
 0x33a   : > { %v2965_v20 = vpop.f32.mrf.mxu0 }
 0x33b   : > { %v1068_v21 = vsel %vm822_vm3, %v2965_v20, -inf }
 0x33c   : > { %1069 = vmax.xlane.f32.xlu1 %v1068_v21  ;;  %v2272_v22 = vpop.f32.mrf.mxu0 }
 0x33e   : > { %v2969_v23 = vpop.f32.mrf.mxu1  ;;  %v2971_v24 = vpop.f32.mrf.mxu0 }
 0x33f   : > { %v1186_v25 = vsel %vm822_vm3, %v2971_v24, -inf }
 0x340   : > { %v2253_v26 = vpop.f32.mrf.mxu1  ;;  %1187 = vmax.xlane.f32.xlu0 %v1186_v25  ;;  %v2283_v27 = vpop.f32.mrf.mxu0 }
 0x342   : > { %v2975_v28 = vpop.f32.mrf.mxu1  ;;  %v2977_v29 = vpop.f32.mrf.mxu0 }
 0x343   : > { %v1189_v30 = vsel %vm822_vm3, %v2977_v29, -inf }
 0x344   : > { %v2254_v31 = vpop.f32.mrf.mxu1  ;;  %1190 = vmax.xlane.f32.xlu1 %v1189_v30  ;;  %v2284_v32 = vpop.f32.mrf.mxu0 }
 0x346   : > { %v2981_v33 = vpop.f32.mrf.mxu1  ;;  %v2983_v34 = vpop.f32.mrf.mxu0 }
 0x347   : > { %v1307_v35 = vsel %vm822_vm3, %v2983_v34, -inf  ;;  %v943_v45 = vsel %vm822_vm3, %v2981_v33, -inf }
 0x348   : > { %v2259_v36 = vpop.f32.mrf.mxu1  ;;  %1308 = vmax.xlane.f32.xlu0 %v1307_v35  ;;  %v2295_v37 = vpop.f32.mrf.mxu0 }
 0x34a   : > { %v2987_v38 = vpop.f32.mrf.mxu1  ;;  %v2989_v39 = vpop.f32.mrf.mxu0 }
 0x34b   : > { %v946_v40 = vsel %vm822_vm3, %v2987_v38, -inf  ;;  %v1310_v41 = vsel %vm822_vm3, %v2989_v39, -inf }
 0x34c   : > { %v2260_v42 = vpop.f32.mrf.mxu1  ;;  %947 = vmax.xlane.f32.xlu0 %v946_v40  ;;  %1311 = vmax.xlane.f32.xlu1 %v1310_v41  ;;  %v2296_v43 = vpop.f32.mrf.mxu0 }
 0x34e   : > { %v2995_v44 = vpop.f32.mrf.mxu0 }
 0x34f   : > { %v1428_v48 = vsel %vm822_vm3, %v2995_v44, -inf }
 0x350   : > { %944 = vmax.xlane.f32.xlu1 %v943_v45  ;;  %v2307_v46 = vpop.f32.mrf.mxu0 }
 0x352   : > { %v2999_v47 = vpop.f32.mrf.mxu0 }
 0x353   : > { %v1431_v52 = vsel %vm822_vm3, %v2999_v47, -inf }
 0x354   : > { %1429 = vmax.xlane.f32.xlu1 %v1428_v48  ;;  %v2308_v50 = vpop.f32.mrf.mxu0 }
 0x356   : > { %v3003_v51 = vpop.f32.mrf.mxu0 }
 0x357   : > { %v1549_v60 = vsel %vm822_vm3, %v3003_v51, -inf }
 0x358   : > { %1432 = vmax.xlane.f32.xlu1 %v1431_v52  ;;  %v2319_v53 = vpop.f32.mrf.mxu0 }
 0x35a   : > { %v3007_v54 = vpop.f32.mrf.mxu0 }
 0x35b   : > { %v1552_v61 = vsel %vm822_vm3, %v3007_v54, -inf }
 0x35c   : > { %v2320_v55 = vpop.f32.mrf.mxu0 }
 0x35e   : > { %v3009_v56 = vpop.f32.mrf.mxu0 }
 0x35f   : > { %v1670_v62 = vsel %vm822_vm3, %v3009_v56, -inf }
 0x360   : > { %v2331_v57 = vpop.f32.mrf.mxu0 }
 0x362   : > { %963 = vrot.lane.b32.xlu0 %v2910_v49, %s2662_s20  ;;  %v3013_v58 = vpop.f32.mrf.mxu0  ;;  %s2673_s20 = smov 40  }
 0x363   : > { %v1673_v63 = vsel %vm822_vm3, %v3013_v58, -inf }
 0x364   : > { %v2332_v59 = vpop.f32.mrf.mxu0 }
 0x369   : > { %1084 = vrot.lane.b32.xlu1 %v2910_v49, %s2663_s24  ;;  %s2674_s24 = smov 48  }
 0x381   : > { %1550 = vmax.xlane.f32.xlu0 %v1549_v60 }
 0x38d   : > { %1553 = vmax.xlane.f32.xlu1 %v1552_v61 }
 0x391   : > { %1671 = vmax.xlane.f32.xlu1 %v1670_v62 }
 0x395   : > { %1674 = vmax.xlane.f32.xlu1 %v1673_v63 }
 0x397   : > { %1205 = vrot.lane.b32.xlu0 %v2910_v49, %s2664_s27  ;;  %s2675_s27 = smov 56  }
 0x39b   : > { %1447 = vrot.lane.b32.xlu0 %v2910_v49, %s2666_s13 }
 0x39f   : > { %1568 = vrot.lane.b32.xlu0 %v2910_v49, %s2667_s16 }
 0x3a3   : > { %1689 = vrot.lane.b32.xlu0 %v2910_v49, %s2668_s15 }
 0x3a6   : > { %1326 = vrot.lane.b32.xlu1 %v2910_v49, %s2665_s28 }
 0x3c1   : > { %v1067_v1 = vpop.xlane.xlu0 %1066 }
 0x3c2   : > { %v1071_v4 = vsub.f32 %v2961_v17, %v1067_v1 }
 0x3c4   : > { %v1073_v5 = vmul.f32 1.442695, %v1071_v4 }
 0x3c5   : > { %v1070_v6 = vpop.xlane.xlu1 %1069 }
 0x3c6   : > { %2479 = vpow2.f32 %v1073_v5  ;;  %v1072_v7 = vsub.f32 %v2965_v20, %v1070_v6 }
 0x3c8   : > { %v1075_v8 = vmul.f32 1.442695, %v1072_v7 }
 0x3c9   : > { %v1188_v9 = vpop.xlane.xlu0 %1187 }
 0x3ca   : > { %2481 = vpow2.f32 %v1075_v8  ;;  %v1192_v10 = vsub.f32 %v2971_v24, %v1188_v9 }
 0x3cc   : > { %v1194_v11 = vmul.f32 1.442695, %v1192_v10 }
 0x3cd   : > { %v1191_v12 = vpop.xlane.xlu1 %1190 }
 0x3ce   : > { %2483 = vpow2.f32 %v1194_v11  ;;  %v1193_v13 = vsub.f32 %v2977_v29, %v1191_v12 }
 0x3d0   : > { %v1196_v14 = vmul.f32 1.442695, %v1193_v13 }
 0x3d1   : > { %v1309_v49 = vpop.xlane.xlu0 %1308 }
 0x3d2   : > { %2485 = vpow2.f32 %v1196_v14  ;;  %v1313_v15 = vsub.f32 %v2983_v34, %v1309_v49 }
 0x3d3   : > { %v3040_v16 = vpop.eup %2479 }
 0x3d4   : > { %v1315_v17 = vmul.f32 1.442695, %v1313_v15  ;;  %v1077_v18 = vsel %vm822_vm3, %v3040_v16, 0.0 }
 0x3d5   : > { %v948_v19 = vpop.xlane.xlu0 %947  ;;  %v1312_v20 = vpop.xlane.xlu1 %1311  ;;  %1078 = vadd.xlane.f32.xlu0 %v1077_v18 }
 0x3d6   : > { %2487 = vpow2.f32 %v1315_v17  ;;  %v950_v21 = vsub.f32 %v2987_v38, %v948_v19  ;;  %v1314_v22 = vsub.f32 %v2989_v39, %v1312_v20 }
 0x3d7   : > { %v2482_v24 = vpop.eup %2481 }
 0x3d8   : > { %v1317_v25 = vmul.f32 1.442695, %v1314_v22  ;;  %v1080_v26 = vsel %vm822_vm3, %v2482_v24, 0.0  ;;  %v953_v27 = vmul.f32 1.442695, %v950_v21  ;;  %v1083_v62 = vpack.c.bf16 %v2482_v24, %v3040_v16 }
 0x3d9   : > { %v964_v29 = vpop.permute.xlu0 %963  ;;  %v945_v30 = vpop.xlane.xlu1 %944  ;;  %1081 = vadd.xlane.f32.xlu0 %v1080_v26  ;;  %v835_v24 = vsel %vm822_vm3, %v2924_v2, 0.0 }
 0x3da   : > { %v949_v31 = vsub.f32 %v2981_v33, %v945_v30  ;;  %2262 = vmatpush3.bf16.msra.mxu1 %v964_v29  ;;  %2489 = vpow2.f32 %v1317_v25 }
 0x3db   : > { %v2484_v32 = vpop.eup %2483  ;;  %2273 = vmatprep.subr.bf16.mxu1 %v2660_v0  ;;  %2491 = vpow2.f32 %v953_v27  ;;  %v838_v27 = vsel %vm822_vm3, %v2926_v3, 0.0 }
 0x3dc   : > { %v951_v34 = vmul.f32 1.442695, %v949_v31  ;;  %v1198_v35 = vsel %vm822_vm3, %v2484_v32, 0.0 }
 0x3dd   : > { %v1430_v36 = vpop.xlane.xlu1 %1429  ;;  %1199 = vadd.xlane.f32.xlu1 %v1198_v35 }
 0x3de   : > { %2493 = vpow2.f32 %v951_v34  ;;  %v1434_v37 = vsub.f32 %v2995_v44, %v1430_v36 }
 0x3df   : > { %v2486_v38 = vpop.eup %2485 }
 0x3e0   : > { %v1436_v39 = vmul.f32 1.442695, %v1434_v37  ;;  %v1201_v40 = vsel %vm822_vm3, %v2486_v38, 0.0  ;;  %v1204_v8 = vpack.c.bf16 %v2486_v38, %v2484_v32 }
 0x3e1   : > { %v1433_v41 = vpop.xlane.xlu1 %1432  ;;  %1202 = vadd.xlane.f32.xlu0 %v1201_v40 }
 0x3e2   : > { %2495 = vpow2.f32 %v1436_v39  ;;  %v1435_v33 = vsub.f32 %v2999_v47, %v1433_v41 }
 0x3e3   : > { %v2488_v42 = vpop.eup %2487 }
 0x3e4   : > { %v1438_v43 = vmul.f32 1.442695, %v1435_v33  ;;  %v1319_v45 = vsel %vm822_vm3, %v2488_v42, 0.0 }
 0x3e5   : > { %1320 = vadd.xlane.f32.xlu1 %v1319_v45  ;;  %v1085_v55 = vpop.permute.xlu1 %1084 }
 0x3e6   : > { %2497 = vpow2.f32 %v1438_v43 }
 0x3e7   : > { %v2490_v46 = vpop.eup %2489 }
 0x3e8   : > { %v1322_v48 = vsel %vm822_vm3, %v2490_v46, 0.0  ;;  %v1325_v50 = vpack.c.bf16 %v2490_v46, %v2488_v42  ;;  %v2492_v44 = vpop.eup %2491 }
 0x3e9   : > { %1323 = vadd.xlane.f32.xlu0 %v1322_v48  ;;  %v958_v61 = vsel %vm822_vm3, %v2492_v44, 0.0 }
 0x3eb   : > { %v2494_v52 = vpop.eup %2493 }
 0x3ec   : > { %v961_v53 = vpack.c.bf16 %v2492_v44, %v2494_v52  ;;  %v955_v1 = vsel %vm822_vm3, %v2494_v52, 0.0 }
 0x3ee   : > { %2264 = vmatmul.mubr.msk.bf16.vlgmr.msra.gmra.mxu1 %vm822_vm3, %v961_v53 }
 0x3ef   : > { %v2496_v57 = vpop.eup %2495  ;;  %2274 = vmatpush3.bf16.msra.mxu1 %v1085_v55  ;;  %2275 = vmatprep.mubr.msk.bf16.mxu1 %vm2661_vm0, %v2660_v0 }
 0x3f0   : > { %v1440_v47 = vsel %vm822_vm3, %v2496_v57, 0.0  ;;  %2285 = vmatprep.subr.bf16.mxu1 %v2660_v0 }
 0x3f1   : > { %1441 = vadd.xlane.f32.xlu1 %v1440_v47 }
 0x3f3   : > { %v2498_v59 = vpop.eup %2497 }
 0x3f4   : > { %v1443_v60 = vsel %vm822_vm3, %v2498_v59, 0.0  ;;  %v1446_v63 = vpack.c.bf16 %v2498_v59, %v2496_v57 }
 0x3f5   : > { %1444 = vadd.xlane.f32.xlu0 %v1443_v60  ;;  %959 = vadd.xlane.f32.xlu1 %v958_v61 }
 0x3f6   : > { %2276 = vmatmul.mubr.msk.bf16.vlgmr.msra.gmra.mxu1 %vm822_vm3, %v1083_v62 }
 0x3f7   : > { %2287 = vmatprep.mubr.msk.bf16.mxu1 %vm2661_vm0, %v2660_v0 }
 0x3f9   : > { %956 = vadd.xlane.f32.xlu0 %v955_v1 }
 0x40a   : > { %v1551_v4 = vpop.xlane.xlu0 %1550 }
 0x40b   : > { %v1555_v5 = vsub.f32 %v3003_v51, %v1551_v4 }
 0x40d   : > { %v1557_v6 = vmul.f32 1.442695, %v1555_v5 }
 0x40e   : > { %v1206_v7 = vpop.permute.xlu0 %1205 }
 0x40f   : > { %2499 = vpow2.f32 %v1557_v6  ;;  %2286 = vmatpush3.bf16.msra.mxu1 %v1206_v7 }
 0x410   : > { %2297 = vmatprep.subr.bf16.mxu1 %v2660_v0 }
 0x412   : > { %2288 = vmatmul.mubr.msk.bf16.vlgmr.msra.gmra.mxu1 %vm822_vm3, %v1204_v8 }
 0x413   : > { %2299 = vmatprep.mubr.msk.bf16.mxu1 %vm2661_vm0, %v2660_v0 }
 0x416   : > { %v1554_v9 = vpop.xlane.xlu1 %1553 }
 0x417   : > { %v1556_v10 = vsub.f32 %v3007_v54, %v1554_v9  ;;  %v1448_v54 = vpop.permute.xlu0 %1447 }
 0x419   : > { %v1559_v11 = vmul.f32 1.442695, %v1556_v10 }
 0x41a   : > { %v1672_v12 = vpop.xlane.xlu1 %1671 }
 0x41b   : > { %2501 = vpow2.f32 %v1559_v11  ;;  %v1676_v51 = vsub.f32 %v3009_v56, %v1672_v12  ;;  %v1569_v21 = vpop.permute.xlu0 %1568 }
 0x41c   : > { %v2500_v13 = vpop.eup %2499 }
 0x41d   : > { %v1678_v14 = vmul.f32 1.442695, %v1676_v51  ;;  %v1561_v49 = vsel %vm822_vm3, %v2500_v13, 0.0 }
 0x41e   : > { %1562 = vadd.xlane.f32.xlu1 %v1561_v49  ;;  %v1675_v15 = vpop.xlane.xlu1 %1674 }
 0x41f   : > { %2503 = vpow2.f32 %v1678_v14  ;;  %v1677_v16 = vsub.f32 %v3013_v58, %v1675_v15  ;;  %v1690_v29 = vpop.permute.xlu0 %1689 }
 0x421   : > { %v1680_v17 = vmul.f32 1.442695, %v1677_v16 }
 0x422   : > { %v1327_v18 = vpop.permute.xlu1 %1326 }
 0x423   : > { %2505 = vpow2.f32 %v1680_v17  ;;  %2298 = vmatpush3.bf16.msra.mxu1 %v1327_v18  ;;  %v2471_v18 = vld [vmem:[#allocation6 + $0x18] sm:$0xff]  }
 0x424   : > { %2309 = vmatprep.subr.bf16.mxu1 %v2660_v0  ;;  %2340 = vmatpush3.bf16.msra.mxu0 %v2471_v18 }
 0x425   : > { %2341 = vmatprep.subr.bf16.mxu0 %v2660_v0 }
 0x426   : > { %2300 = vmatmul.mubr.msk.bf16.vlgmr.msra.gmra.mxu1 %vm822_vm3, %v1325_v50 }
 0x427   : > { %2310 = vmatpush3.bf16.msra.mxu1 %v1448_v54  ;;  %2311 = vmatprep.mubr.msk.bf16.mxu1 %vm2661_vm0, %v2660_v0 }
 0x428   : > { %v2502_v56 = vpop.eup %2501  ;;  %2321 = vmatprep.subr.bf16.mxu1 %v2660_v0 }
 0x429   : > { %v1564_v19 = vsel %vm822_vm3, %v2502_v56, 0.0  ;;  %v1567_v26 = vpack.c.bf16 %v2502_v56, %v2500_v13 }
 0x42a   : > { %1565 = vadd.xlane.f32.xlu0 %v1564_v19 }
 0x42c   : > { %v2504_v58 = vpop.eup %2503 }
 0x42d   : > { %v1682_v20 = vsel %vm822_vm3, %v2504_v58, 0.0 }
 0x42e   : > { %1683 = vadd.xlane.f32.xlu1 %v1682_v20  ;;  %2312 = vmatmul.mubr.msk.bf16.vlgmr.msra.gmra.mxu1 %vm822_vm3, %v1446_v63 }
 0x42f   : > { %2322 = vmatpush3.bf16.msra.mxu1 %v1569_v21  ;;  %2323 = vmatprep.mubr.msk.bf16.mxu1 %vm2661_vm0, %v2660_v0 }
 0x430   : > { %v2506_v22 = vpop.eup %2505  ;;  %2333 = vmatprep.subr.bf16.mxu1 %v2660_v0 }
 0x431   : > { %v1685_v25 = vsel %vm822_vm3, %v2506_v22, 0.0  ;;  %v1688_v30 = vpack.c.bf16 %v2506_v22, %v2504_v58 }
 0x432   : > { %836 = vadd.xlane.f32.xlu1 %v835_v24  ;;  %1686 = vadd.xlane.f32.xlu0 %v1685_v25 }
 0x436   : > { %839 = vadd.xlane.f32.xlu0 %v838_v27  ;;  %2324 = vmatmul.mubr.msk.bf16.vlgmr.msra.gmra.mxu1 %vm822_vm3, %v1567_v26  ;;  %v2472_v27 = vld [vmem:[#allocation6 + $0x10] sm:$0xff]  }
 0x437   : > { %2334 = vmatpush3.bf16.msra.mxu1 %v1690_v29  ;;  %2335 = vmatprep.mubr.msk.bf16.mxu1 %vm2661_vm0, %v2660_v0 }
 0x438   : > { %2342 = vmatpush3.bf16.msra.mxu0 %v2472_v27 }
 0x439   : > { %2343 = vmatprep.subr.bf16.mxu0 %v2660_v0 }
 0x43e   : > { %2336 = vmatmul.mubr.msk.bf16.vlgmr.msra.gmra.mxu1 %vm822_vm3, %v1688_v30 }
 0x45e   : > { %v1079_v2 = vpop.xlane.xlu0 %1078 }
 0x462   : > { %v1082_v31 = vpop.xlane.xlu0 %1081 }
 0x466   : > { %v1200_v32 = vpop.xlane.xlu1 %1199 }
 0x46a   : > { %v1203_v34 = vpop.xlane.xlu0 %1202 }
 0x46e   : > { %v1321_v35 = vpop.xlane.xlu1 %1320 }
 0x472   : > { %v1324_v36 = vpop.xlane.xlu0 %1323 }
 0x47a   : > { %v1442_v37 = vpop.xlane.xlu1 %1441 }
 0x47e   : > { %v1445_v38 = vpop.xlane.xlu0 %1444  ;;  %v960_v3 = vpop.xlane.xlu1 %959 }
 0x47f   : > { %2507 = vrcp.f32 %v960_v3  ;;  %v2474_v3 = vld [vmem:[#allocation6] sm:$0xff]  }
 0x482   : > { %v957_v39 = vpop.xlane.xlu0 %956 }
 0x483   : > { %2509 = vrcp.f32 %v957_v39 }
 0x484   : > { %2511 = vrcp.f32 %v1079_v2  ;;  %v2473_v2 = vld [vmem:[#allocation6 + $0x8] sm:$0xff]  }
 0x485   : > { %2513 = vrcp.f32 %v1082_v31  ;;  %2344 = vmatpush3.bf16.msra.mxu0 %v2473_v2 }
 0x486   : > { %2515 = vrcp.f32 %v1200_v32  ;;  %2345 = vmatprep.subr.bf16.mxu0 %v2660_v0 }
 0x487   : > { %2517 = vrcp.f32 %v1203_v34 }
 0x488   : > { %2519 = vrcp.f32 %v1321_v35 }
 0x489   : > { %2521 = vrcp.f32 %v1324_v36  ;;  %2346 = vmatpush3.bf16.msra.mxu0 %v2474_v3  ;;  %v2544_v3 = vld [vmem:[%s2854_s14 + $0x8] sm:$0xff] }
 0x48a   : > { %2523 = vrcp.f32 %v1442_v37 }
 0x48b   : > { %2525 = vrcp.f32 %v1445_v38 }
 0x48c   : > { %v2508_v33 = vpop.eup %2507 }
 0x490   : > { %v2510_v42 = vpop.eup %2509 }
 0x491   : > { %v2512_v53 = vpop.eup %2511 }
 0x492   : > { %v2514_v55 = vpop.eup %2513 }
 0x493   : > { %v2516_v1 = vpop.eup %2515 }
 0x494   : > { %v2518_v4 = vpop.eup %2517 }
 0x495   : > { %v2520_v12 = vpop.eup %2519 }
 0x496   : > { %v2522_v13 = vpop.eup %2521 }
 0x497   : > { %v2524_v58 = vpop.eup %2523 }
 0x498   : > { %v2526_v21 = vpop.eup %2525 }
 0x4a7   : > { %v1563_v51 = vpop.xlane.xlu1 %1562 }
 0x4a8   : > { %2527 = vrcp.f32 %v1563_v51 }
 0x4ae   : > { %v1003_v40 = vpop.f32.mrf.mxu1 }
 0x4af   : > { %v1012_v45 = vmul.f32 %v2510_v42, %v1003_v40 }
 0x4b0   : > { %v2265_v41 = vpop.f32.mrf.mxu1 }
 0x4b2   : > { %v1006_v43 = vpop.f32.mrf.mxu1 }
 0x4b3   : > { %v1013_v46 = vmul.f32 %v2508_v33, %v1006_v43  ;;  %v1566_v14 = vpop.xlane.xlu0 %1565 }
 0x4b4   : > { %v2266_v48 = vpop.f32.mrf.mxu1  ;;  %2529 = vrcp.f32 %v1566_v14 }
 0x4b5   : > { %v2424_v50 = vpack.i.bf16 %v1013_v46, %v1012_v45  ;;  %v2528_v34 = vpop.eup %2527 }
 0x4b6   : > { %v1124_v44 = vpop.f32.mrf.mxu1 }
 0x4b7   : > { %2425 = vrot.lane.b32.xlu1 %v2424_v50, %s2669_s26  ;;  %v1133_v47 = vmul.f32 %v2512_v53, %v1124_v44  ;;  %v1684_v20 = vpop.xlane.xlu1 %1683 }
 0x4b8   : > { %v2277_v52 = vpop.f32.mrf.mxu1  ;;  %2531 = vrcp.f32 %v1684_v20 }
 0x4ba   : > { %v1127_v57 = vpop.f32.mrf.mxu1 }
 0x4bb   : > { %v1134_v59 = vmul.f32 %v2514_v55, %v1127_v57  ;;  %v1687_v22 = vpop.xlane.xlu0 %1686  ;;  %v837_v0 = vpop.xlane.xlu1 %836 }
 0x4bc   : > { %v2278_v60 = vpop.f32.mrf.mxu1  ;;  %2533 = vrcp.f32 %v1687_v22 }
 0x4bd   : > { %v2429_v61 = vpack.i.bf16 %v1134_v59, %v1133_v47  ;;  %2535 = vrcp.f32 %v837_v0 }
 0x4bf   : > { %2430 = vrot.lane.b32.xlu0 %v2429_v61, %s2670_s29  ;;  %v840_v52 = vpop.xlane.xlu0 %839 }
 0x4c0   : > { %2537 = vrcp.f32 %v840_v52 }
 0x4c1   : > { %v2530_v35 = vpop.eup %2529 }
 0x4c5   : > { %v2532_v42 = vpop.eup %2531 }
 0x4c9   : > { %v2534_v43 = vpop.eup %2533 }
 0x4ca   : > { %v2536_v47 = vpop.eup %2535 }
 0x4cd   : > { %v2538_v60 = vpop.eup %2537 }
 0x4d2   : > { %v1245_v62 = vpop.f32.mrf.mxu1 }
 0x4d3   : > { %v1254_v6 = vmul.f32 %v2516_v1, %v1245_v62 }
 0x4d4   : > { %v2289_v63 = vpop.f32.mrf.mxu1 }
 0x4d6   : > { %v1248_v5 = vpop.f32.mrf.mxu1 }
 0x4d7   : > { %v1255_v7 = vmul.f32 %v2518_v4, %v1248_v5  ;;  %v888_v5 = vmul.f32 %v2536_v47, %v2969_v23 }
 0x4d8   : > { %v2290_v8 = vpop.f32.mrf.mxu1 }
 0x4d9   : > { %v2434_v9 = vpack.i.bf16 %v1255_v7, %v1254_v6  ;;  %v889_v6 = vmul.f32 %v2538_v60, %v2975_v28 }
 0x4db   : > { %2435 = vrot.lane.b32.xlu1 %v2434_v9, %s2671_s17  ;;  %s515_s17 = scalar_lea.vmem %s3152_s12, %s2152_s25 }
 0x4e6   : > { %v1366_v10 = vpop.f32.mrf.mxu1 }
 0x4e7   : > { %v1375_v15 = vmul.f32 %v2520_v12, %v1366_v10 }
 0x4e8   : > { %v2301_v11 = vpop.f32.mrf.mxu1 }
 0x4ea   : > { %v1369_v49 = vpop.f32.mrf.mxu1 }
 0x4eb   : > { %v1376_v16 = vmul.f32 %v2522_v13, %v1369_v49 }
 0x4ec   : > { %v2302_v17 = vpop.f32.mrf.mxu1 }
 0x4ed   : > { %v2439_v54 = vpack.i.bf16 %v1376_v16, %v1375_v15 }
 0x4ee   : > { %v1487_v56 = vpop.f32.mrf.mxu1 }
 0x4ef   : > { %2440 = vrot.lane.b32.xlu1 %v2439_v54, %s2672_s18  ;;  %v1496_v25 = vmul.f32 %v2524_v58, %v1487_v56 }
 0x4f0   : > { %v2313_v19 = vpop.f32.mrf.mxu1 }
 0x4f2   : > { %v1490_v24 = vpop.f32.mrf.mxu1 }
 0x4f3   : > { %v1497_v26 = vmul.f32 %v2526_v21, %v1490_v24 }
 0x4f4   : > { %v2314_v29 = vpop.f32.mrf.mxu1 }
 0x4f5   : > { %v2444_v30 = vpack.i.bf16 %v1497_v26, %v1496_v25  ;;  %v2138_v29 = vld [vmem:[%s3149_s9] ss:$0 sm:$0xff] }
 0x4f6   : > { %v1608_v31 = vpop.f32.mrf.mxu1 }
 0x4f7   : > { %2445 = vrot.lane.b32.xlu0 %v2444_v30, %s2673_s20  ;;  %v1617_v37 = vmul.f32 %v2528_v34, %v1608_v31 }
 0x4f8   : > { %v2325_v32 = vpop.f32.mrf.mxu1 }
 0x4f9   : > { %v2543_v32 = vld [vmem:[%s2854_s14] sm:$0xff] }
 0x4fa   : > { %v1611_v36 = vpop.f32.mrf.mxu1 }
 0x4fb   : > { %v1618_v38 = vmul.f32 %v2530_v35, %v1611_v36 }
 0x4fc   : > { %v2326_v39 = vpop.f32.mrf.mxu1 }
 0x4fd   : > { %v2449_v40 = vpack.i.bf16 %v1618_v38, %v1617_v37 }
 0x4fe   : > { %v1729_v41 = vpop.f32.mrf.mxu1 }
 0x4ff   : > { %2450 = vrot.lane.b32.xlu1 %v2449_v40, %s2674_s24  ;;  %v1738_v46 = vmul.f32 %v2532_v42, %v1729_v41 }
 0x500   : > { %v2337_v33 = vpop.f32.mrf.mxu1 }
 0x502   : > { %v1732_v45 = vpop.f32.mrf.mxu1 }
 0x503   : > { %v1739_v48 = vmul.f32 %v2534_v43, %v1732_v45 }
 0x504   : > { %v2338_v50 = vpop.f32.mrf.mxu1 }
 0x505   : > { %v2454_v44 = vpack.i.bf16 %v1739_v48, %v1738_v46 }
 0x507   : > { %2455 = vrot.lane.b32.xlu0 %v2454_v44, %s2675_s27 }
 0x529   : > { %v2426_v53 = vpop.permute.xlu1 %2425 }
 0x52a   : > { %v2428_v61 = vunpack.i.h.bf16 %v2426_v53  ;;  %v2427_v62 = vunpack.i.l.bf16 %v2426_v53 }
 0x52c   : > { %v1797_v12 = vsel %vm774_vm2, %v889_v6, %v2428_v61  ;;  %v1796_v51 = vsel %vm774_vm2, %v888_v5, %v2427_v62  ;;  %v2144_v61 = vld [vmem:[%s3150_s10] ss:$0 sm:$0xff] }
 0x531   : > { %v2431_v57 = vpop.permute.xlu0 %2430 }
 0x532   : > { %v2433_v63 = vunpack.i.h.bf16 %v2431_v57  ;;  %v2432_v1 = vunpack.i.l.bf16 %v2431_v57 }
 0x534   : > { %v1798_v49 = vsel %vm822_vm3, %v1796_v51, %v2432_v1  ;;  %v1799_v15 = vsel %vm822_vm3, %v1797_v12, %v2433_v63  ;;  %v2145_v63 = vld [vmem:[%s3151_s11] ss:$0 sm:$0xff] }
 0x54d   : > { %v2436_v55 = vpop.permute.xlu1 %2435 }
 0x54e   : > { %v2438_v7 = vunpack.i.h.bf16 %v2436_v55  ;;  %v2437_v8 = vunpack.i.l.bf16 %v2436_v55 }
 0x550   : > { %v1801_v28 = vsel %vm1800_vm4, %v1798_v49, %v2437_v8  ;;  %v1802_v17 = vsel %vm1800_vm4, %v1799_v15, %v2438_v7 }
 0x561   : > { %v2441_v59 = vpop.permute.xlu1 %2440 }
 0x562   : > { %v2443_v10 = vunpack.i.h.bf16 %v2441_v59  ;;  %v2442_v11 = vunpack.i.l.bf16 %v2441_v59 }
 0x564   : > { %v1804_v18 = vsel %vm1803_vm5, %v1801_v28, %v2442_v11  ;;  %v1805_v54 = vsel %vm1803_vm5, %v1802_v17, %v2443_v10 }
 0x569   : > { %v2446_v4 = vpop.permute.xlu0 %2445 }
 0x56a   : > { %v2448_v13 = vunpack.i.h.bf16 %v2446_v4  ;;  %v2447_v14 = vunpack.i.l.bf16 %v2446_v4 }
 0x56c   : > { %v1807_v19 = vsel %vm1806_vm6, %v1804_v18, %v2447_v14  ;;  %v1808_v58 = vsel %vm1806_vm6, %v1805_v54, %v2448_v13 }
 0x571   : > { %v2451_v9 = vpop.permute.xlu1 %2450 }
 0x572   : > { %v2453_v23 = vunpack.i.h.bf16 %v2451_v9  ;;  %v2452_v16 = vunpack.i.l.bf16 %v2451_v9 }
 0x574   : > { %v1810_v22 = vsel %vm1809_vm7, %v1807_v19, %v2452_v16  ;;  %v1811_v24 = vsel %vm1809_vm7, %v1808_v58, %v2453_v23 }
 0x579   : > { %v2456_v56 = vpop.permute.xlu0 %2455 }
 0x57a   : > { %v2458_v20 = vunpack.i.h.bf16 %v2456_v56  ;;  %v2457_v21 = vunpack.i.l.bf16 %v2456_v56 }
 0x57c   : > { %v1813_v25 = vsel %vm1812_vm8, %v1810_v22, %v2457_v21  ;;  %v1814_v26 = vsel %vm1812_vm8, %v1811_v24, %v2458_v20 }
 0x57d   : > { %v1815_v27 = vpack.c.bf16 %v1814_v26, %v1813_v25 }
 0x57f   : > { %2348 = vmatmul.mubr.msk.bf16.vlgmr.msra.gmra.mxu0 %vm563_vm1, %v1815_v27 }
 0x63f   : > { %v1892_v30 = vpop.f32.mrf.mxu0 }
 0x640   : > { %v1893_v2 = vadd.f32 %v2138_v29, %v1892_v30 }
 0x641   : > { %v2349_v31 = vpop.f32.mrf.mxu0 }
 0x642   : > { %v1899_v34 = vadd.f32 %v2543_v32, %v1893_v2 }
 0x643   : > { %v1895_v35 = vpop.f32.mrf.mxu0 }
 0x644   : > { %v1896_v36 = vadd.f32 %v2138_v29, %v1895_v35  ;;  %v1901_v37 = vsel %vm563_vm1, %v1899_v34, 0.0 }
 0x645   : > { %1902 = vadd.xlane.f32.xlu1 %v1901_v37  ;;  %v2350_v38 = vpop.f32.mrf.mxu0 }
 0x646   : > { %v1900_v39 = vadd.f32 %v2544_v3, %v1896_v36 }
 0x648   : > { %v1904_v40 = vsel %vm563_vm1, %v1900_v39, 0.0 }
 0x649   : > { %1905 = vadd.xlane.f32.xlu0 %v1904_v40 }
 0x6ce   : > { %v1903_v41 = vpop.xlane.xlu1 %1902 }
 0x6cf   : > { %v1908_v33 = vmul.f32 0.015625, %v1903_v41 }
 0x6d1   : > { %v1910_v42 = vsub.f32 %v1899_v34, %v1908_v33 }
 0x6d2   : > { %v1906_v43 = vpop.xlane.xlu0 %1905 }
 0x6d3   : > { %v1909_v45 = vmul.f32 0.015625, %v1906_v43  ;;  %v1912_v46 = vmul.f32 %v1910_v42, %v1910_v42 }
 0x6d5   : > { %v1911_v48 = vsub.f32 %v1900_v39, %v1909_v45  ;;  %v1914_v50 = vsel %vm563_vm1, %v1912_v46, 0.0 }
 0x6d6   : > { %1915 = vadd.xlane.f32.xlu0 %v1914_v50 }
 0x6d7   : > { %v1913_v44 = vmul.f32 %v1911_v48, %v1911_v48 }
 0x6d9   : > { %v1917_v0 = vsel %vm563_vm1, %v1913_v44, 0.0 }
 0x6da   : > { %1918 = vadd.xlane.f32.xlu1 %v1917_v0 }
 0x75f   : > { %v1916_v52 = vpop.xlane.xlu0 %1915 }
 0x760   : > { %v1920_v53 = vmul.f32 0.015625, %v1916_v52 }
 0x762   : > { %v1922_v55 = vadd.f32 1e-05, %v1920_v53 }
 0x763   : > { %v1919_v57 = vpop.xlane.xlu1 %1918 }
 0x764   : > { %2539 = vrsqrt.f32 %v1922_v55  ;;  %v1921_v47 = vmul.f32 0.015625, %v1919_v57 }
 0x766   : > { %v1923_v59 = vadd.f32 1e-05, %v1921_v47 }
 0x768   : > { %2541 = vrsqrt.f32 %v1923_v59 }
 0x771   : > { %v2540_v60 = vpop.eup %2539 }
 0x772   : > { %v1926_v62 = vmul.f32 %v2540_v60, %v1910_v42 }
 0x774   : > { %v1935_v1 = vmul.f32 %v2144_v61, %v1926_v62 }
 0x775   : > { %v2542_v4 = vpop.eup %2541 }
 0x776   : > { %v1944_v5 = vadd.f32 %v2145_v63, %v1935_v1  ;;  %v1927_v6 = vmul.f32 %v2542_v4, %v1911_v48 }
 0x778   : > { %v2153_v7 = vpack.c.bf16 %v1944_v5, %v1944_v5  ;;  %v1936_v8 = vmul.f32 %v2144_v61, %v1927_v6 }
 0x77a   : > { %1955 = vst.msk [vmem:[%s515_s17] sm:$0xf] %vm1954_vm9, %v2153_v7  ;;  %v1945_v9 = vadd.f32 %v2145_v63, %v1936_v8 }
 0x77c   : > { %v2154_v10 = vpack.c.bf16 %v1945_v9, %v1945_v9 }
 0x77e   : > { %1956 = vst.msk [vmem:[%s515_s17 + $0x4] sm:$0xf] %vm1954_vm9, %v2154_v10 }
 0x77f PF: > { %s24_s23 = sadd.s32 1, %s2653_s23   ;;  %s3157_s21 = smov %s2649_s22 }
 0x780   : > { %p21_p2 = scmp.ge.s32.totalorder %s24_s23, 4   ;;  %s3158_s22 = smov %s3160_s30 }
 0x782   :  { %23 = sbr.rel (!%p21_p2) target bundleno = 3 (0x3), region = 114 }
 0x787   :  { %1987 = vsyncpa [#allocation3], 1 }
 0x788   :  { %1989 = vsyncpa [#allocation3 + $0x1], 1 }
 0x789   :  { %1990 = vsyncpa [#allocation5], 1 }

// kernel: co_attention_forward.10
= control target key start
LH: loop header
LB: loop body
LE: loop exit
PB: predicated region body
PF: predicated region fallthrough
CT: control target
= control target key end

     0   :  { %12 = vsyncpa [#allocation4], 0  ;;  %s1271_s0 = inlined_call_operand.vmem [shape: bf16[2,8,64], index: 0, kind: input, shape index: {}]   ;;  %s1272_s1 = inlined_call_operand.vmem [shape: bf16[64,256], index: 1, kind: input, shape index: {}]   ;;  %s1273_s2 = inlined_call_operand.vmem [shape: f32[1,256], index: 2, kind: input, shape index: {}]   ;;  %s1274_s3 = inlined_call_operand.vmem [shape: bf16[256,64], index: 3, kind: input, shape index: {}]   ;;  %s1275_s4 = inlined_call_operand.vmem [shape: f32[1,64], index: 4, kind: input, shape index: {}]   ;;  %s1276_s5 = inlined_call_operand.vmem [shape: f32[1,64], index: 5, kind: input, shape index: {}]   ;;  %s1277_s6 = inlined_call_operand.vmem [shape: f32[1,64], index: 6, kind: input, shape index: {}]   ;;  %s1278_s7 = inlined_call_operand.hbm [shape: f32[2,8,64], index: 7, kind: output, shape index: {}]  }
   0x1   :  { %14 = vsyncpa [#allocation4 + $0x1], 0  ;;  %s1078_s24 = smov 0   ;;  %s1080_s25 = smov 0  }
   0x2   :  { %s1082_s26 = smov 0   ;;  %s1084_s27 = smov 0  }
   0x3   :  { %s1086_s28 = smov 0   ;;  %s1088_s29 = smov 0  }
   0x4 LB: > { %s806_s30 = sadd.s32 4294967295, %s1033_s29   ;;  %s807_s8 = sadd.s32 4294967294, %s1033_s29   ;;  %s1033_s29 = sphi %s1088_s29, %s20_s29   ;;  %s1029_s28 = sphi %s1086_s28, %s1285_s28   ;;  %s1025_s27 = sphi %s1084_s27, %s1284_s27   ;;  %s1021_s26 = sphi %s1082_s26, %s1283_s26   ;;  %s1017_s25 = sphi %s1080_s25, %s1282_s25   ;;  %s1013_s24 = sphi %s1078_s24, %s1281_s24  }
   0x5   : > { %s32_s9 = sadd.s32 1, %s1029_s28  ;;  %s206_s10 = sadd.s32 1, %s1021_s26 }
   0x6   : > { %p34_p0 = scmp.ge.s32.totalorder %s32_s9, 2  ;;  %p216_p1 = scmp.ne.s32.totalorder %s1021_s26, %s1017_s25 }
   0x7   : > { %p217_p2 = scmp.eq.s32.totalorder %s806_s30, 1  ;;  %p222_p3 = scmp.ne.s32.totalorder %s1017_s25, %s1013_s24 }
   0x8   : > { %s1287_s9 = smov (%p34_p0, %s32_s9), 0  ;;  %p223_p5 = scmp.eq.s32.totalorder %s807_s8, 1 }
   0x9   : > { %p1118_p4 = por %p217_p2, %p216_p1  ;;  %s203_s12 = ssub.s32 %s1029_s28, %s1287_s9 }
   0xa   : > { %p813_p6 = scmp.ge.s32.totalorder %s1033_s29, 1  ;;  %p204_p7 = scmp.eq.s32.totalorder %s203_s12, 0 }
   0xb   : > { %p1125_p8 = por %p223_p5, %p222_p3  ;;  %p283_p9 = scmp.lt.s32.totalorder %s1033_s29, 3 }
   0xc   : > { %s1131_s14 = scalar_select %p204_p7, %s1021_s26, %s206_s10  }
   0xd   : > { %p284_p10 = pnand %p813_p6, %p283_p9 }
   0xe   : > { %p328_p11 = scmp.lt.s32.totalorder (!%p284_p10), %s1025_s27, 1  ;;  %s845_s15 = sshll.u32 (!%p284_p10), %s1025_s27, 7 }
   0xf   : > { %287 = sbr.rel (%p284_p10) target bundleno = 771 (0x303), region = 48  ;;  %s695_s20 = scalar_lea.hbm (!%p284_p10), %s1278_s7, %s845_s15 }
  0x10   : > { %s1037_s10 = smov (!%p284_p10), [#allocation3]  }
  0x11   : > { %s961_s12 = sshll.u32 (!%p284_p10), %s1037_s10, 4  ;;  %s962_s12 = int_to_ptr.vmem [resolvable:$false] %s961_s12 }
  0x14   : > { %v927_v0 = vld [vmem:[%s1272_s1 + $0x34] ss:$8 sps:$4 sm:$0xff]   ;;  %v929_v1 = vld [vmem:[%s1272_s1 + $0x30] ss:$8 sps:$4 sm:$0xff]   ;;  %v1035_v2 = vmov 0   ;;  %s329_s8 = scalar_select %p328_p11, %s1025_s27, 1  ;;  %v367_v26 = vlaneseq }
  0x15   : > { %453 = vmatprep.mubr.bf16.mxu0 %v1035_v2  ;;  %429 = vmatprep.subr.bf16.mxu0 %v927_v0  ;;  %v930_v3 = vld [vmem:[%s1272_s1 + $0x24] ss:$8 sps:$4 sm:$0xff]   ;;  %v932_v4 = vld [vmem:[%s1272_s1 + $0x20] ss:$8 sps:$4 sm:$0xff]   ;;  %v933_v5 = vld [vmem:[%s1272_s1 + $0x14] ss:$8 sps:$4 sm:$0xff]  }
  0x16   : > { %430 = vmatpush1.bf16.msra.mxu0 %v929_v1  ;;  %v935_v6 = vld [vmem:[%s1272_s1 + $0x10] ss:$8 sps:$4 sm:$0xff]   ;;  %v936_v7 = vld [vmem:[%s1272_s1 + $0x4] ss:$8 sps:$4 sm:$0xff]   ;;  %s815_s23 = sshll.u32 %s329_s8, 2  ;;  %vm354_vm0 = vcmask 523264  }
  0x17   : > { %431 = vmatprep.subr.bf16.mxu0 %v930_v3  ;;  %v939_v8 = vld [vmem:[%s1274_s3 + $0x78] sm:$0xff]   ;;  %v941_v10 = vld [vmem:[%s1274_s3 + $0x70] sm:$0xff]   ;;  %v943_v12 = vld [vmem:[%s1274_s3 + $0x68] sm:$0xff]   ;;  %s1177_s8 = scalar_lea.vmem %s1271_s0, %s815_s23  ;;  %v368_v27 = vshrl.u32 %v367_v26, 7  ;;  %v1036_v43 = vmov 0.0   ;;  %s963_s27 = scalar_lea.vmem %s962_s12, 256 }
  0x18   : > { %v940_v9 = vld [vmem:[%s1274_s3 + $0x38] sm:$0xff]   ;;  %848 = vmatprep.subr.bf16.mxu1 %v939_v8  ;;  %v942_v11 = vld [vmem:[%s1274_s3 + $0x30] sm:$0xff]   ;;  %v938_v13 = vld [vmem:[%s1272_s1] ss:$8 sps:$4 sm:$0xff]   ;;  %355 = vst.msk [vmem:[#allocation2] sm:$0xff] %vm354_vm0, %v1036_v43 }
  0x19   : > { %849 = vmatpush3.bf16.msra.mxu1 %v940_v9  ;;  %v944_v14 = vld [vmem:[%s1274_s3 + $0x28] sm:$0xff]   ;;  %v945_v15 = vld [vmem:[%s1274_s3 + $0x60] sm:$0xff]   ;;  %v947_v18 = vld [vmem:[%s1274_s3 + $0x58] sm:$0xff]   ;;  %v369_v28 = vsub.s32 0, %v368_v27  ;;  %v373_v30 = vsub.s32 1, %v368_v27 }
  0x1a   : > { %432 = vmatpush1.bf16.msra.mxu0 %v932_v4  ;;  %850 = vmatprep.subr.bf16.mxu1 %v941_v10  ;;  %v356_v16 = vld [vmem:[%s1177_s8] sm:$0xf]  ;;  %v948_v19 = vld [vmem:[%s1274_s3 + $0x18] sm:$0xff]   ;;  %v949_v20 = vld [vmem:[%s1274_s3 + $0x50] sm:$0xff]  }
  0x1b   : > { %433 = vmatprep.subr.bf16.mxu0 %v933_v5  ;;  %v946_v17 = vld [vmem:[%s1274_s3 + $0x20] sm:$0xff]   ;;  %v950_v21 = vld [vmem:[%s1274_s3 + $0x10] sm:$0xff]   ;;  %v951_v22 = vld [vmem:[%s1274_s3 + $0x48] sm:$0xff]  }
  0x1c   : > { %v952_v23 = vld [vmem:[%s1274_s3 + $0x8] sm:$0xff]   ;;  %v953_v24 = vld [vmem:[%s1274_s3 + $0x40] sm:$0xff]  }
  0x1d   : > { %851 = vmatpush3.bf16.msra.mxu1 %v942_v11  ;;  %v954_v25 = vld [vmem:[%s1274_s3] sm:$0xff]  }
  0x1e   : > { %434 = vmatpush1.bf16.msra.mxu0 %v935_v6  ;;  %852 = vmatprep.subr.bf16.mxu1 %v943_v12  ;;  %v365_v29 = vld [vmem:[%s1273_s2] sm:$0x3] }
  0x1f   : > { %435 = vmatprep.subr.bf16.mxu0 %v936_v7  ;;  %v370_v31 = vrot.slane %v365_v29, %v369_v28  ;;  %v374_v32 = vrot.slane %v365_v29, %v373_v30  ;;  %v466_v45 = vld [vmem:[#allocation2] sm:$0xff] }
  0x20   : > { %v640_v51 = vld [vmem:[%s1177_s8] sm:$0xf]  ;;  %s325_s8 = sand.u32 1, %s1017_s25  }
  0x21   : > { %853 = vmatpush3.bf16.msra.mxu1 %v944_v14  ;;  %v641_v52 = vunpack.c.l.bf16 %v640_v51  ;;  %v841_v54 = vld [vmem:[%s1275_s4] ss:$0 sm:$0xff]  ;;  %s814_s22 = sshll.u32 %s325_s8, 3  ;;  %s684_s21 = scalar_lea.sflag [#allocation4], %s325_s8 }
  0x22   : > { %436 = vmatpush1.bf16.msra.mxu0 %v938_v13  ;;  %854 = vmatprep.subr.bf16.mxu1 %v945_v15  ;;  %v842_v3 = vld [vmem:[%s1276_s5] ss:$0 sm:$0xff]  ;;  %s327_s16 = scalar_lea.vmem [#allocation3], %s814_s22 }
  0x23   : > { %v843_v5 = vld [vmem:[%s1277_s6] ss:$0 sm:$0xff]  ;;  %s697_s17 = sshll.u32 %s327_s16, 4  ;;  %s698_s17 = int_to_ptr.vmem [resolvable:$true] %s697_s17 }
  0x24   : > { %s957_s30 = scalar_lea.vmem %s698_s17, 128  ;;  %p964_p1 = scmp.lt.s32.totalorder %s698_s17, %s962_s12 }
  0x25   : > { %824 = vmatmul.mubr.msk.bf16.vlgmr.msra.gmra.mxu0 %vm354_vm0, %v356_v16  ;;  %855 = vmatpush3.bf16.msra.mxu1 %v946_v17  ;;  %p958_p12 = scmp.ne.s32.totalorder %s698_s17, %s957_s30  ;;  %p965_p2 = scmp.lt.s32.totalorder %s963_s27, %s957_s30 }
  0x26   : > { %856 = vmatprep.subr.bf16.mxu1 %v947_v18 }
  0x27   : > { %p959_p13 = pnand %p958_p12, %p1118_p4  ;;  %p966_p3 = por %p965_p2, %p964_p1 }
  0x29   : > { %857 = vmatpush3.bf16.msra.mxu1 %v948_v19  ;;  %p960_p0 = pneg %p959_p13 }
  0x2a   : > { %858 = vmatprep.subr.bf16.mxu1 %v949_v20 }
  0x2b   : > { %p967_p5 = pnand %p966_p3, %p960_p0 }
  0x2d   : > { %859 = vmatpush3.bf16.msra.mxu1 %v950_v21 }
  0x2e   : > { %860 = vmatprep.subr.bf16.mxu1 %v951_v22 }
  0x31   : > { %861 = vmatpush3.bf16.msra.mxu1 %v952_v23 }
  0x32   : > { %862 = vmatprep.subr.bf16.mxu1 %v953_v24 }
  0x35   : > { %863 = vmatpush3.bf16.msra.mxu1 %v954_v25 }
  0xe5   : > { %v455_v33 = vpop.f32.mrf.mxu0 }
  0xe6   : > { %v456_v34 = vadd.f32 %v455_v33, %v370_v31 }
  0xe7   : > { %v457_v35 = vpop.f32.mrf.mxu0 }
  0xe8   : > { %v458_v36 = vadd.f32 %v457_v35, %v374_v32  ;;  %v462_v37 = vmax.f32 %v456_v34, 0.0 }
  0xe9   : > { %v459_v38 = vpop.f32.mrf.mxu0 }
  0xea   : > { %v463_v39 = vmax.f32 %v458_v36, 0.0  ;;  %v464_v42 = vpack.c.bf16 %v462_v37, %v462_v37 }
  0xeb   : > { %v460_v40 = vpop.f32.mrf.mxu0 }
  0xec   : > { %v465_v41 = vpack.c.bf16 %v463_v39, %v463_v39 }
  0xee   : > { %627 = vmatprep.mubr.bf16.mxu1 %v465_v41 }
  0xef   : > { %628 = vmatmul.mubr.bf16.vlgmr.msra.gmra.mxu1 %v464_v42 }
 0x1af   : > { %v864_v44 = vpop.f32.mrf.mxu1 }
 0x1b1   : > { %v865_v46 = vpop.f32.mrf.mxu1 }
 0x1b2   : > { %v866_v47 = vadd.f32 %v865_v46, %v864_v44 }
 0x1b3   : > { %v867_v48 = vpop.f32.mrf.mxu1 }
 0x1b4   : > { %v635_v49 = vadd.f32 %v866_v47, %v466_v45 }
 0x1b5   : > { %v868_v50 = vpop.f32.mrf.mxu1 }
 0x1b6   : > { %636 = vst.msk [vmem:[#allocation2] sm:$0xff] %vm354_vm0, %v635_v49 }
 0x1bd   : > { %v642_v53 = vld [vmem:[#allocation2] sm:$0xff] }
 0x1be   : > { %v643_v55 = vadd.f32 %v642_v53, %v641_v52 }
 0x1c0   : > { %v651_v56 = vadd.f32 %v841_v54, %v643_v55 }
 0x1c2   : > { %v652_v57 = vsel %vm354_vm0, %v651_v56, 0.0 }
 0x1c3   : > { %653 = vadd.xlane.f32.xlu0 %v652_v57 }
 0x24c   : > { %v654_v58 = vpop.xlane.xlu0 %653 }
 0x24d   : > { %v656_v59 = vmul.f32 0.015625, %v654_v58 }
 0x24f   : > { %v657_v60 = vsub.f32 %v651_v56, %v656_v59 }
 0x251   : > { %v658_v61 = vmul.f32 %v657_v60, %v657_v60 }
 0x253   : > { %v659_v62 = vsel %vm354_vm0, %v658_v61, 0.0 }
 0x254   : > { %660 = vadd.xlane.f32.xlu0 %v659_v62 }
 0x2dd   : > { %v661_v63 = vpop.xlane.xlu0 %660 }
 0x2de   : > { %v662_v0 = vmul.f32 0.015625, %v661_v63 }
 0x2e0   : > { %v663_v1 = vadd.f32 1e-05, %v662_v0 }
 0x2e2   : > { %955 = vrsqrt.f32 %v663_v1 }
 0x2ef   : > { %v956_v2 = vpop.eup %955 }
 0x2f0   : > { %v665_v4 = vmul.f32 %v956_v2, %v657_v60 }
 0x2f2   : > { %v673_v6 = vmul.f32 %v842_v3, %v665_v4 }
 0x2f4   : > { %v681_v7 = vadd.f32 %v843_v5, %v673_v6 }
 0x2f6   : > { %682 = vst.msk [vmem:[%s327_s16] sm:$0xff] %vm354_vm0, %v681_v7 }
 0x2f7   : > { %970 = shalt.err (!%p967_p5)
}
 0x2f8   : > { %s971_s22 = scalar_lea.hbm %s695_s20, 128  ;;  %s975_s15 = scalar_lea.hbm %s1278_s7, 256 }
 0x2f9   : > { %p972_p6 = scmp.ne.s32.totalorder %s695_s20, %s971_s22  ;;  %p976_p10 = scmp.lt.s32.totalorder %s695_s20, %s1278_s7 }
 0x2fa   : > { %p977_p11 = scmp.lt.s32.totalorder %s975_s15, %s971_s22 }
 0x2fb   : > { %p973_p7 = pnand %p972_p6, %p1118_p4 }
 0x2fc   : > { %p978_p12 = por %p977_p11, %p976_p10 }
 0x2fd   : > { %p974_p9 = pneg %p973_p7 }
 0x2ff   : > { %p979_p13 = pnand %p978_p12, %p974_p9 }
 0x301   : > { %982 = shalt.err (!%p979_p13)
}
 0x302   : > { %870 = dma.vmem_to_hbm [thread:$0]  (%p1118_p4), %s698_s17, 128, %s695_s20, %s684_s21  }
 0x303 PF: > { %p876_p0 = scmp.ge.s32.totalorder %s1033_s29, 2  ;;  %s709_s19 = sand.u32 1, %s1013_s24  }
 0x304   : > { %s710_s30 = scalar_lea.sflag [#allocation4], %s709_s19 }
 0x305   : > { %p873_p1 = pnand %p876_p0, %p1125_p8 }
 0x307   : > { %p874_p2 = pneg %p873_p1 }
 0x309   : > { %1008 = dma.done.wait (%p874_p2), %s710_s30, 128  }
 0x30a   : > { %1010 = vsyncadd (%p874_p2), %s710_s30, 4294967168  ;;  %s20_s29 = sadd.s32 1, %s1033_s29   ;;  %s1281_s24 = smov %s1017_s25 }
 0x30b   : > { %p17_p3 = scmp.ge.s32.totalorder %s20_s29, 4   ;;  %s1282_s25 = smov %s1021_s26 }
 0x30c   : > { %s1283_s26 = smov %s1131_s14  ;;  %s1284_s27 = smov %s1029_s28 }
 0x30d   : > { %s1285_s28 = smov %s1287_s9  ;;  %19 = sbr.rel (!%p17_p3) target bundleno = 4 (0x4), region = 100 }
 0x312   :  { %715 = vsyncpa [#allocation4], 1 }
 0x313   :  { %717 = vsyncpa [#allocation4 + $0x1], 1 }

// kernel: co_attention_forward.11
= control target key start
LH: loop header
LB: loop body
LE: loop exit
PB: predicated region body
PF: predicated region fallthrough
CT: control target
= control target key end

     0   :  { %12 = vsyncpa [#allocation4], 0  ;;  %s1349_s0 = inlined_call_operand.vmem [shape: bf16[2,16,64], index: 0, kind: input, shape index: {}]   ;;  %s1350_s1 = inlined_call_operand.vmem [shape: bf16[64,256], index: 1, kind: input, shape index: {}]   ;;  %s1351_s2 = inlined_call_operand.vmem [shape: f32[1,256], index: 2, kind: input, shape index: {}]   ;;  %s1352_s3 = inlined_call_operand.vmem [shape: bf16[256,64], index: 3, kind: input, shape index: {}]   ;;  %s1353_s4 = inlined_call_operand.vmem [shape: f32[1,64], index: 4, kind: input, shape index: {}]   ;;  %s1354_s5 = inlined_call_operand.vmem [shape: f32[1,64], index: 5, kind: input, shape index: {}]   ;;  %s1355_s6 = inlined_call_operand.vmem [shape: f32[1,64], index: 6, kind: input, shape index: {}]   ;;  %s1356_s7 = inlined_call_operand.hbm [shape: f32[2,16,64], index: 7, kind: output, shape index: {}]  }
   0x1   :  { %14 = vsyncpa [#allocation4 + $0x1], 0  ;;  %s1136_s24 = smov 0   ;;  %s1138_s25 = smov 0  }
   0x2   :  { %s1140_s26 = smov 0   ;;  %s1142_s27 = smov 0  }
   0x3   :  { %s1144_s28 = smov 0   ;;  %s1146_s29 = smov 0  }
   0x4 LB: > { %s848_s30 = sadd.s32 4294967295, %s1089_s29   ;;  %s849_s8 = sadd.s32 4294967294, %s1089_s29   ;;  %s1089_s29 = sphi %s1146_s29, %s20_s29   ;;  %s1085_s28 = sphi %s1144_s28, %s1363_s28   ;;  %s1081_s27 = sphi %s1142_s27, %s1362_s27   ;;  %s1077_s26 = sphi %s1140_s26, %s1361_s26   ;;  %s1073_s25 = sphi %s1138_s25, %s1360_s25   ;;  %s1069_s24 = sphi %s1136_s24, %s1359_s24  }
   0x5   : > { %s32_s9 = sadd.s32 1, %s1085_s28  ;;  %s206_s10 = sadd.s32 1, %s1077_s26 }
   0x6   : > { %p34_p0 = scmp.ge.s32.totalorder %s32_s9, 2  ;;  %p216_p1 = scmp.ne.s32.totalorder %s1077_s26, %s1073_s25 }
   0x7   : > { %p217_p2 = scmp.eq.s32.totalorder %s848_s30, 1  ;;  %p222_p3 = scmp.ne.s32.totalorder %s1073_s25, %s1069_s24 }
   0x8   : > { %s1365_s9 = smov (%p34_p0, %s32_s9), 0  ;;  %p223_p5 = scmp.eq.s32.totalorder %s849_s8, 1 }
   0x9   : > { %p1176_p4 = por %p217_p2, %p216_p1  ;;  %s203_s12 = ssub.s32 %s1085_s28, %s1365_s9 }
   0xa   : > { %p855_p6 = scmp.ge.s32.totalorder %s1089_s29, 1  ;;  %p204_p7 = scmp.eq.s32.totalorder %s203_s12, 0 }
   0xb   : > { %p1183_p8 = por %p223_p5, %p222_p3  ;;  %p284_p9 = scmp.lt.s32.totalorder %s1089_s29, 3 }
   0xc   : > { %s1189_s14 = scalar_select %p204_p7, %s1077_s26, %s206_s10  }
   0xd   : > { %p285_p10 = pnand %p855_p6, %p284_p9 }
   0xe   : > { %p330_p11 = scmp.lt.s32.totalorder (!%p285_p10), %s1081_s27, 1  ;;  %s894_s15 = sshll.u32 (!%p285_p10), %s1081_s27, 8 }
   0xf   : > { %288 = sbr.rel (%p285_p10) target bundleno = 780 (0x30c), region = 48  ;;  %s1299_s22 = scalar_lea.hbm (!%p285_p10), %s1356_s7, %s894_s15 }
  0x14   : > { %v980_v0 = vld [vmem:[%s1350_s1 + $0x34] ss:$8 sps:$4 sm:$0xff]   ;;  %v982_v1 = vld [vmem:[%s1350_s1 + $0x30] ss:$8 sps:$4 sm:$0xff]   ;;  %v1091_v2 = vmov 0   ;;  %s331_s21 = scalar_select %p330_p11, %s1081_s27, 1  ;;  %v372_v26 = vlaneseq }
  0x15   : > { %463 = vmatprep.mubr.bf16.mxu0 %v1091_v2  ;;  %439 = vmatprep.subr.bf16.mxu0 %v980_v0  ;;  %v983_v3 = vld [vmem:[%s1350_s1 + $0x24] ss:$8 sps:$4 sm:$0xff]   ;;  %v985_v4 = vld [vmem:[%s1350_s1 + $0x20] ss:$8 sps:$4 sm:$0xff]   ;;  %v986_v5 = vld [vmem:[%s1350_s1 + $0x14] ss:$8 sps:$4 sm:$0xff]  }
  0x16   : > { %440 = vmatpush1.bf16.msra.mxu0 %v982_v1  ;;  %s893_s10 = sshll.u32 %s331_s21, 3  ;;  %v988_v6 = vld [vmem:[%s1350_s1 + $0x10] ss:$8 sps:$4 sm:$0xff]   ;;  %v989_v7 = vld [vmem:[%s1350_s1 + $0x4] ss:$8 sps:$4 sm:$0xff]   ;;  %vm357_vm0 = vcmask 523264  }
  0x17   : > { %441 = vmatprep.subr.bf16.mxu0 %v983_v3  ;;  %s1214_s18 = scalar_lea.vmem %s1349_s0, %s893_s10  ;;  %v993_v8 = vld [vmem:[%s1352_s3 + $0x78] sm:$0xff]   ;;  %v991_v10 = vld [vmem:[%s1350_s1] ss:$8 sps:$4 sm:$0xff]   ;;  %v995_v11 = vld [vmem:[%s1352_s3 + $0x70] sm:$0xff]   ;;  %v373_v27 = vshrl.u32 %v372_v26, 7  ;;  %v1092_v47 = vmov 0.0  }
  0x18   : > { %v994_v9 = vld [vmem:[%s1352_s3 + $0x38] sm:$0xff]   ;;  %899 = vmatprep.subr.bf16.mxu1 %v993_v8  ;;  %v996_v12 = vld [vmem:[%s1352_s3 + $0x30] sm:$0xff]   ;;  %v997_v13 = vld [vmem:[%s1352_s3 + $0x68] sm:$0xff]   ;;  %358 = vst.msk [vmem:[#allocation2] sm:$0xff] %vm357_vm0, %v1092_v47  ;;  %s1093_s21 = smov [#allocation3]  }
  0x19   : > { %900 = vmatpush3.bf16.msra.mxu1 %v994_v9  ;;  %v992_v14 = vld [vmem:[%s1214_s18] sm:$0xff]   ;;  %v998_v15 = vld [vmem:[%s1352_s3 + $0x28] sm:$0xff]   ;;  %v1001_v18 = vld [vmem:[%s1352_s3 + $0x58] sm:$0xff]   ;;  %v378_v28 = vsub.s32 1, %v373_v27  ;;  %v374_v29 = vsub.s32 0, %v373_v27  ;;  %359 = vst.msk [vmem:[#allocation2 + $0x8] sm:$0xff] %vm357_vm0, %v1092_v47 }
  0x1a   : > { %442 = vmatpush1.bf16.msra.mxu0 %v985_v4  ;;  %901 = vmatprep.subr.bf16.mxu1 %v995_v11  ;;  %v999_v16 = vld [vmem:[%s1352_s3 + $0x60] sm:$0xff]   ;;  %v1002_v19 = vld [vmem:[%s1352_s3 + $0x18] sm:$0xff]   ;;  %v1003_v20 = vld [vmem:[%s1352_s3 + $0x50] sm:$0xff]   ;;  %s1017_s30 = sshll.u32 %s1093_s21, 4  ;;  %s1018_s30 = int_to_ptr.vmem [resolvable:$false] %s1017_s30 }
  0x1b   : > { %443 = vmatprep.subr.bf16.mxu0 %v986_v5  ;;  %v1000_v17 = vld [vmem:[%s1352_s3 + $0x20] sm:$0xff]   ;;  %v1004_v21 = vld [vmem:[%s1352_s3 + $0x10] sm:$0xff]   ;;  %v1005_v22 = vld [vmem:[%s1352_s3 + $0x48] sm:$0xff]  }
  0x1c   : > { %v1006_v23 = vld [vmem:[%s1352_s3 + $0x8] sm:$0xff]   ;;  %v1007_v24 = vld [vmem:[%s1352_s3 + $0x40] sm:$0xff]  }
  0x1d   : > { %902 = vmatpush3.bf16.msra.mxu1 %v996_v12  ;;  %v1008_v25 = vld [vmem:[%s1352_s3] sm:$0xff]  }
  0x1e   : > { %444 = vmatpush1.bf16.msra.mxu0 %v988_v6  ;;  %903 = vmatprep.subr.bf16.mxu1 %v997_v13  ;;  %v370_v30 = vld [vmem:[%s1351_s2] sm:$0x3] }
  0x1f   : > { %445 = vmatprep.subr.bf16.mxu0 %v989_v7  ;;  %v379_v32 = vrot.slane %v370_v30, %v378_v28  ;;  %v375_v33 = vrot.slane %v370_v30, %v374_v29  ;;  %v480_v49 = vld [vmem:[#allocation2] sm:$0xff] }
  0x20   : > { %v481_v54 = vld [vmem:[#allocation2 + $0x8] sm:$0xff]  ;;  %v896_v57 = vld [vmem:[%s1214_s18] sm:$0xff]   ;;  %s327_s18 = sand.u32 1, %s1073_s25  }
  0x21   : > { %904 = vmatpush3.bf16.msra.mxu1 %v998_v15  ;;  %v897_v59 = vunpack.c.l.bf16 %v896_v57  ;;  %v885_v61 = vld [vmem:[%s1353_s4] ss:$0 sm:$0xff]  ;;  %v898_v63 = vunpack.c.h.bf16 %v896_v57  ;;  %s856_s8 = sshll.u32 %s327_s18, 4  ;;  %s1304_s23 = scalar_lea.sflag [#allocation4], %s327_s18 }
  0x22   : > { %446 = vmatpush1.bf16.msra.mxu0 %v991_v10  ;;  %905 = vmatprep.subr.bf16.mxu1 %v999_v16  ;;  %s329_s16 = scalar_lea.vmem [#allocation3], %s856_s8  ;;  %s1019_s8 = scalar_lea.vmem %s1018_s30, 512 }
  0x23   : > { %s736_s17 = sshll.u32 %s329_s16, 4  ;;  %s1301_s17 = int_to_ptr.vmem [resolvable:$true] %s736_s17 }
  0x24   : > { %s1013_s27 = scalar_lea.vmem %s1301_s17, 256  ;;  %p1020_p1 = scmp.lt.s32.totalorder %s1301_s17, %s1018_s30 }
  0x25   : > { %868 = vmatmul.mubr.msk.bf16.vlgmr.msra.gmra.mxu0 %vm357_vm0, %v992_v14  ;;  %906 = vmatpush3.bf16.msra.mxu1 %v1000_v17  ;;  %p1014_p12 = scmp.ne.s32.totalorder %s1301_s17, %s1013_s27  ;;  %p1021_p2 = scmp.lt.s32.totalorder %s1019_s8, %s1013_s27 }
  0x26   : > { %907 = vmatprep.subr.bf16.mxu1 %v1001_v18 }
  0x27   : > { %p1015_p13 = pnand %p1014_p12, %p1176_p4  ;;  %p1022_p3 = por %p1021_p2, %p1020_p1 }
  0x29   : > { %908 = vmatpush3.bf16.msra.mxu1 %v1002_v19  ;;  %p1016_p0 = pneg %p1015_p13 }
  0x2a   : > { %909 = vmatprep.subr.bf16.mxu1 %v1003_v20 }
  0x2b   : > { %p1023_p5 = pnand %p1022_p3, %p1016_p0 }
  0x2d   : > { %910 = vmatpush3.bf16.msra.mxu1 %v1004_v21 }
  0x2e   : > { %911 = vmatprep.subr.bf16.mxu1 %v1005_v22 }
  0x31   : > { %912 = vmatpush3.bf16.msra.mxu1 %v1006_v23  ;;  %v886_v23 = vld [vmem:[%s1354_s5] ss:$0 sm:$0xff] }
  0x32   : > { %913 = vmatprep.subr.bf16.mxu1 %v1007_v24 }
  0x35   : > { %914 = vmatpush3.bf16.msra.mxu1 %v1008_v25  ;;  %v887_v25 = vld [vmem:[%s1355_s6] ss:$0 sm:$0xff] }
  0xe5   : > { %v465_v31 = vpop.f32.mrf.mxu0 }
  0xe6   : > { %v466_v38 = vadd.f32 %v465_v31, %v375_v33 }
  0xe7   : > { %v467_v34 = vpop.f32.mrf.mxu0 }
  0xe8   : > { %v468_v36 = vadd.f32 %v467_v34, %v379_v32  ;;  %v474_v44 = vmax.f32 %v466_v38, 0.0 }
  0xe9   : > { %v469_v35 = vpop.f32.mrf.mxu0 }
  0xea   : > { %v470_v37 = vadd.f32 %v469_v35, %v375_v33  ;;  %v475_v42 = vmax.f32 %v468_v36, 0.0 }
  0xeb   : > { %v471_v39 = vpop.f32.mrf.mxu0 }
  0xec   : > { %v472_v40 = vadd.f32 %v471_v39, %v379_v32  ;;  %v476_v41 = vmax.f32 %v470_v37, 0.0 }
  0xee   : > { %v477_v43 = vmax.f32 %v472_v40, 0.0  ;;  %v478_v46 = vpack.c.bf16 %v476_v41, %v474_v44 }
  0xf0   : > { %v479_v45 = vpack.c.bf16 %v477_v43, %v475_v42 }
  0xf2   : > { %642 = vmatprep.mubr.bf16.mxu1 %v479_v45 }
  0xf3   : > { %643 = vmatmul.mubr.bf16.vlgmr.msra.gmra.mxu1 %v478_v46 }
 0x1b3   : > { %v915_v48 = vpop.f32.mrf.mxu1 }
 0x1b5   : > { %v916_v50 = vpop.f32.mrf.mxu1 }
 0x1b6   : > { %v917_v51 = vadd.f32 %v916_v50, %v915_v48 }
 0x1b7   : > { %v918_v52 = vpop.f32.mrf.mxu1 }
 0x1b8   : > { %v651_v53 = vadd.f32 %v917_v51, %v480_v49 }
 0x1b9   : > { %v919_v55 = vpop.f32.mrf.mxu1 }
 0x1ba   : > { %653 = vst.msk [vmem:[#allocation2] sm:$0xff] %vm357_vm0, %v651_v53  ;;  %v920_v56 = vadd.f32 %v919_v55, %v918_v52 }
 0x1bc   : > { %v652_v58 = vadd.f32 %v920_v56, %v481_v54 }
 0x1be   : > { %654 = vst.msk [vmem:[#allocation2 + $0x8] sm:$0xff] %vm357_vm0, %v652_v58 }
 0x1c1   : > { %v662_v60 = vld [vmem:[#allocation2] sm:$0xff] }
 0x1c2   : > { %v664_v62 = vadd.f32 %v897_v59, %v662_v60 }
 0x1c4   : > { %v673_v0 = vadd.f32 %v885_v61, %v664_v62 }
 0x1c5   : > { %v663_v1 = vld [vmem:[#allocation2 + $0x8] sm:$0xff] }
 0x1c6   : > { %v675_v2 = vsel %vm357_vm0, %v673_v0, 0.0  ;;  %v665_v3 = vadd.f32 %v898_v63, %v663_v1 }
 0x1c7   : > { %676 = vadd.xlane.f32.xlu0 %v675_v2 }
 0x1c8   : > { %v674_v4 = vadd.f32 %v885_v61, %v665_v3 }
 0x1ca   : > { %v678_v5 = vsel %vm357_vm0, %v674_v4, 0.0 }
 0x1cb   : > { %679 = vadd.xlane.f32.xlu0 %v678_v5 }
 0x250   : > { %v677_v6 = vpop.xlane.xlu0 %676 }
 0x251   : > { %v682_v7 = vmul.f32 0.015625, %v677_v6 }
 0x253   : > { %v684_v8 = vsub.f32 %v673_v0, %v682_v7 }
 0x254   : > { %v680_v9 = vpop.xlane.xlu0 %679 }
 0x255   : > { %v683_v10 = vmul.f32 0.015625, %v680_v9  ;;  %v686_v11 = vmul.f32 %v684_v8, %v684_v8 }
 0x257   : > { %v685_v12 = vsub.f32 %v674_v4, %v683_v10  ;;  %v688_v13 = vsel %vm357_vm0, %v686_v11, 0.0 }
 0x258   : > { %689 = vadd.xlane.f32.xlu1 %v688_v13 }
 0x259   : > { %v687_v14 = vmul.f32 %v685_v12, %v685_v12 }
 0x25b   : > { %v691_v15 = vsel %vm357_vm0, %v687_v14, 0.0 }
 0x25c   : > { %692 = vadd.xlane.f32.xlu1 %v691_v15 }
 0x2e1   : > { %v690_v16 = vpop.xlane.xlu1 %689 }
 0x2e2   : > { %v694_v17 = vmul.f32 0.015625, %v690_v16 }
 0x2e4   : > { %v696_v18 = vadd.f32 1e-05, %v694_v17 }
 0x2e5   : > { %v693_v19 = vpop.xlane.xlu1 %692 }
 0x2e6   : > { %1009 = vrsqrt.f32 %v696_v18  ;;  %v695_v20 = vmul.f32 0.015625, %v693_v19 }
 0x2e8   : > { %v697_v21 = vadd.f32 1e-05, %v695_v20 }
 0x2ea   : > { %1011 = vrsqrt.f32 %v697_v21 }
 0x2f3   : > { %v1010_v22 = vpop.eup %1009 }
 0x2f4   : > { %v700_v24 = vmul.f32 %v1010_v22, %v684_v8 }
 0x2f6   : > { %v709_v26 = vmul.f32 %v886_v23, %v700_v24 }
 0x2f7   : > { %v1012_v27 = vpop.eup %1011 }
 0x2f8   : > { %v701_v28 = vmul.f32 %v1012_v27, %v685_v12  ;;  %v718_v29 = vadd.f32 %v887_v25, %v709_v26 }
 0x2fa   : > { %v710_v30 = vmul.f32 %v886_v23, %v701_v28  ;;  %720 = vst.msk [vmem:[%s329_s16] sm:$0xff] %vm357_vm0, %v718_v29 }
 0x2fc   : > { %v719_v31 = vadd.f32 %v887_v25, %v710_v30 }
 0x2fe   : > { %721 = vst.msk [vmem:[%s329_s16 + $0x8] sm:$0xff] %vm357_vm0, %v719_v31 }
 0x2ff   : > { %1026 = shalt.err (!%p1023_p5)
}
 0x300   : > { %s1027_s18 = scalar_lea.hbm %s1299_s22, 256  ;;  %s1031_s15 = scalar_lea.hbm %s1356_s7, 512 }
 0x301   : > { %p1028_p6 = scmp.ne.s32.totalorder %s1299_s22, %s1027_s18  ;;  %p1032_p10 = scmp.lt.s32.totalorder %s1299_s22, %s1356_s7 }
 0x302   : > { %p1033_p11 = scmp.lt.s32.totalorder %s1031_s15, %s1027_s18 }
 0x303   : > { %p1029_p7 = pnand %p1028_p6, %p1176_p4 }
 0x304   : > { %p1034_p12 = por %p1033_p11, %p1032_p10 }
 0x305   : > { %p1030_p9 = pneg %p1029_p7 }
 0x307   : > { %p1035_p13 = pnand %p1034_p12, %p1030_p9 }
 0x309   : > { %1038 = shalt.err (!%p1035_p13)
}
 0x30a   : > { %s1094_s20 = smov 128   ;;  %s1095_s27 = smov 8  }
 0x30b   : > { %921 = dma.vmem_to_hbm [thread:$0]  (%p1176_p4), %s1301_s17, 256, %s1299_s22, %s1304_s23, %s1094_s20, %s1094_s20, %s1095_s27  }
 0x30c PF: > { %p927_p0 = scmp.ge.s32.totalorder %s1089_s29, 2  ;;  %s751_s21 = sand.u32 1, %s1069_s24  }
 0x30d   : > { %s752_s30 = scalar_lea.sflag [#allocation4], %s751_s21 }
 0x30e   : > { %p924_p1 = pnand %p927_p0, %p1183_p8 }
 0x310   : > { %p925_p2 = pneg %p924_p1 }
 0x312   : > { %1064 = dma.done.wait (%p925_p2), %s752_s30, 256  }
 0x313   : > { %1066 = vsyncadd (%p925_p2), %s752_s30, 4294967040  ;;  %s20_s29 = sadd.s32 1, %s1089_s29   ;;  %s1359_s24 = smov %s1073_s25 }
 0x314   : > { %p17_p3 = scmp.ge.s32.totalorder %s20_s29, 4   ;;  %s1360_s25 = smov %s1077_s26 }
 0x315   : > { %s1361_s26 = smov %s1189_s14  ;;  %s1362_s27 = smov %s1085_s28 }
 0x316   : > { %s1363_s28 = smov %s1365_s9  ;;  %19 = sbr.rel (!%p17_p3) target bundleno = 4 (0x4), region = 100 }
 0x31b   :  { %757 = vsyncpa [#allocation4], 1 }
 0x31c   :  { %759 = vsyncpa [#allocation4 + $0x1], 1 }

</bundles_post_ra>
